<compile_context>
chip_gen: v5e
topology: v5e:2x2
jax: 0.10.0
libtpu: 0.0.40
codegen_flags: <defaults>
</compile_context>

<pallas_src>
import jax
import jax.numpy as jnp
from jax.experimental import pallas as pl
from jax.experimental.pallas import tpu as pltpu


# (inp, oup, stride) for the 11 conv_dw blocks of this (truncated) MobileNetV1.
_DW_CFG = [
    (32, 64, 1), (64, 128, 2), (128, 128, 1), (128, 256, 2), (256, 256, 1),
    (256, 512, 2), (512, 512, 1), (512, 512, 1), (512, 512, 1), (512, 512, 1),
    (512, 512, 1),
]


def _cpad(c):
    """Round a channel count up to a multiple of 128 (lane-dense layout)."""
    return ((c + 127) // 128) * 128


# ---------------------------------------------------------------------------
# Pallas kernels
# ---------------------------------------------------------------------------
def _matmul_bias_relu_kernel(x_ref, w_ref, b_ref, o_ref):
    # x_ref: (tm, K) bf16, w_ref: (K, tn) bf16 (BN scale folded), b_ref: (1, tn) f32
    acc = jnp.dot(x_ref[...], w_ref[...], preferred_element_type=jnp.float32)
    o_ref[...] = jnp.maximum(acc + b_ref[...], 0.0).astype(o_ref.dtype)


def _make_fused_dw_pw_kernel(Ho, Wo, stride):
    """Fused depthwise-3x3(+BN+ReLU) -> pointwise-1x1(+BN+ReLU) kernel.

    ph_ref : (P, 1, Hp, Wp, Cin) bf16   padded input (P=1) / 4 phases (P=4, s=2)
    dww_ref: (9, Cin) f32               depthwise weights, BN scale folded
    dwb_ref: (1, Cin) f32               depthwise folded BN bias
    pww_ref: (Cin, tn) bf16             pointwise weights, BN scale folded
    pwb_ref: (1, tn) f32                pointwise folded BN bias
    o_ref  : (1, Ms, tn) bf16           flattened-spatial output tile
    act_ref: (Ms, Cin) f32 VMEM scratch depthwise activation (reused over tn tiles)
    """
    M = Ho * Wo

    def kernel(ph_ref, dww_ref, dwb_ref, pww_ref, pwb_ref, o_ref, act_ref):
        j = pl.program_id(1)  # Cout tile index (innermost, "arbitrary")
        Ms = act_ref.shape[0]

        @pl.when(j == 0)
        def _():
            # ---- depthwise 3x3 MAC (f32), taps are contiguous static slices ----
            prods = []
            for dh in range(3):
                for dw in range(3):
                    if stride == 1:
                        p, r0, c0 = 0, dh, dw
                    else:  # stride 2: phase (dh%2, dw%2), offset (dh//2, dw//2)
                        p, r0, c0 = (dh % 2) * 2 + (dw % 2), dh // 2, dw // 2
                    tap = ph_ref[p, 0, r0:r0 + Ho, c0:c0 + Wo, :].astype(jnp.float32)
                    k = dh * 3 + dw
                    prods.append(tap * dww_ref[k:k + 1, :])          # (Ho, Wo, C)
            # Pairwise (tree) sum: shorter dependency chain (helps v5e's VALUs).
            while len(prods) > 1:
                nxt = [prods[a] + prods[a + 1] for a in range(0, len(prods) - 1, 2)]
                if len(prods) % 2:
                    nxt.append(prods[-1])
                prods = nxt
            act = jnp.maximum(prods[0] + dwb_ref[...], 0.0)          # (Ho, Wo, C)

            # Flatten spatial into the (Ms, Cin) scratch row-by-row (no reshape).
            for h in range(Ho):
                act_ref[pl.ds(h * Wo, Wo), :] = act[h]
            if Ms > M:  # zero the alignment tail so the matmul stays finite
                act_ref[pl.ds(M, Ms - M), :] = jnp.zeros(
                    (Ms - M, act_ref.shape[1]), jnp.float32)

        # ---- pointwise 1x1 on the MXU + bias + ReLU ----
        lhs = act_ref[...].astype(jnp.bfloat16)
        res = jnp.dot(lhs, pww_ref[...], preferred_element_type=jnp.float32)
        out = jnp.maximum(res + pwb_ref[...], 0.0)
        o_ref[...] = out[None].astype(o_ref.dtype)

    return kernel


# ---------------------------------------------------------------------------
# Pallas wrappers
# ---------------------------------------------------------------------------
def matmul_bias_relu(x2d, w, b):
    """relu((M,K)@(K,Cout) + b); BN scale pre-folded into w."""
    M, K = x2d.shape
    Cout = w.shape[1]
    tm = 256 if M >= 256 else 128
    Mp = pl.cdiv(M, tm) * tm
    if Mp != M:
        x2d = jnp.pad(x2d, ((0, Mp - M), (0, 0)))
    tn = 256 if Cout % 256 == 0 else 128
    out = pl.pallas_call(
        _matmul_bias_relu_kernel,
        out_shape=jax.ShapeDtypeStruct((Mp, Cout), jnp.bfloat16),
        grid=(Mp // tm, Cout // tn),
        in_specs=[
            pl.BlockSpec((tm, K), lambda i, j: (i, 0)),
            pl.BlockSpec((K, tn), lambda i, j: (0, j)),
            pl.BlockSpec((1, tn), lambda i, j: (0, j)),
        ],
        out_specs=pl.BlockSpec((tm, tn), lambda i, j: (i, j)),
        compiler_params=pltpu.CompilerParams(
            dimension_semantics=("parallel", "parallel")),
    )(x2d, w, b)
    return out[:M] if Mp != M else out


def _make_phases(x, stride):
    """Zero-pad by 1; for stride 2 split into the 4 even/odd row/col phases so
    every 3x3 tap is a contiguous static slice inside the kernel."""
    N, H, W, C = x.shape
    xp = jnp.pad(x, ((0, 0), (1, 1), (1, 1), (0, 0)))
    if stride == 1:
        return xp[None], H, W                          # (1, N, H+2, W+2, C)
    assert stride == 2 and H % 2 == 0 and W % 2 == 0
    phases = jnp.stack(
        [xp[:, pr::2, pc::2, :] for pr in (0, 1) for pc in (0, 1)], axis=0)
    return phases, H // 2, W // 2                      # (4, N, H/2+1, W/2+1, C)


def fused_dw_pw(x, dw_w, dw_b, pw_w, pw_b, stride):
    """One conv_dw block: dw 3x3 (stride, pad 1) + BN + ReLU + pw 1x1 + BN + ReLU."""
    N, H, W, Cin = x.shape
    Cout = pw_w.shape[1]
    phases, Ho, Wo = _make_phases(x, stride)
    P, _, Hp, Wp, _ = phases.shape
    M = Ho * Wo
    Ms = max(8, ((M + 7) // 8) * 8)                    # sublane-aligned matmul M
    tn = 256 if Cout % 256 == 0 else 128
    kernel = _make_fused_dw_pw_kernel(Ho, Wo, stride)
    out = pl.pallas_call(
        kernel,
        out_shape=jax.ShapeDtypeStruct((N, Ms, Cout), jnp.bfloat16),
        grid=(N, Cout // tn),
        in_specs=[
            pl.BlockSpec((P, 1, Hp, Wp, Cin), lambda n, j: (0, n, 0, 0, 0)),
            pl.BlockSpec((9, Cin), lambda n, j: (0, 0)),
            pl.BlockSpec((1, Cin), lambda n, j: (0, 0)),
            pl.BlockSpec((Cin, tn), lambda n, j: (0, j)),
            pl.BlockSpec((1, tn), lambda n, j: (0, j)),
        ],
        out_specs=pl.BlockSpec((1, Ms, tn), lambda n, j: (n, 0, j)),
        scratch_shapes=[pltpu.VMEM((Ms, Cin), jnp.float32)],
        compiler_params=pltpu.CompilerParams(
            dimension_semantics=("parallel", "arbitrary")),
    )(phases, dw_w, dw_b, pw_w, pw_b)
    return out[:, :M, :].reshape(N, Ho, Wo, Cout)


def conv0_bn_relu(x, w, b, stride=2):
    """Standard 3x3 conv (pad 1) + folded BN + ReLU via im2col + Pallas matmul."""
    N, H, W, C = x.shape
    Ho = (H + 2 - 3) // stride + 1
    Wo = (W + 2 - 3) // stride + 1
    xp = jnp.pad(x, ((0, 0), (1, 1), (1, 1), (0, 0)))
    cols = [xp[:, dh::stride, dw::stride, :][:, :Ho, :Wo, :]
            for dh in range(3) for dw in range(3)]
    x2d = jnp.concatenate(cols, axis=-1).reshape(N * Ho * Wo, 9 * C)
    K = w.shape[0]                       # K was padded (27 -> 32) at init time
    if K > 9 * C:
        x2d = jnp.pad(x2d, ((0, 0), (0, K - 9 * C)))
    out = matmul_bias_relu(x2d, w, b)
    return out.reshape(N, Ho, Wo, w.shape[1])


# ---------------------------------------------------------------------------
# Parameter initialization (deterministic, synthetic; BN folded & pre-scaled)
# ---------------------------------------------------------------------------
def _bn_fold(gamma, beta, mean, var, eps=1e-5):
    scale = gamma * jax.lax.rsqrt(var + eps)
    return scale, beta - mean * scale


def _init_bn(key, c):
    k1, k2, k3, k4 = jax.random.split(key, 4)
    gamma = 1.0 + 0.1 * jax.random.normal(k1, (c,), jnp.float32)
    beta = 0.1 * jax.random.normal(k2, (c,), jnp.float32)
    mean = 0.1 * jax.random.normal(k3, (c,), jnp.float32)
    var = 1.0 + 0.1 * jax.random.uniform(k4, (c,), jnp.float32)
    return _bn_fold(gamma, beta, mean, var)


def init_params(key):
    params = {}
    key, k_w, k_bn = jax.random.split(key, 3)

    # conv0: standard 3x3 conv 3 -> 32, stride 2 (HWIO flattened to (27, 32)).
    cout, cout_p = 32, _cpad(32)
    w = jax.random.normal(k_w, (3, 3, 3, cout), jnp.float32) / jnp.sqrt(27.0)
    scale, bias = _init_bn(k_bn, cout)
    w = (w * scale).reshape(27, cout)
    w = jnp.pad(w, ((0, 5), (0, cout_p - cout)))          # K 27->32, Cout 32->128
    params["conv0_w"] = w.astype(jnp.bfloat16)
    params["conv0_b"] = jnp.pad(bias, (0, cout_p - cout)).reshape(1, cout_p)

    for i, (inp, oup, _stride) in enumerate(_DW_CFG):
        key, k1, k2, k3, k4 = jax.random.split(key, 5)
        cin_p, cout_p = _cpad(inp), _cpad(oup)

        dscale, dbias = _init_bn(k2, inp)
        dw = jax.random.normal(k1, (3, 3, inp), jnp.float32) / 3.0
        dw = (dw * dscale).reshape(9, inp)                # BN scale folded
        params[f"dw{i}_w"] = jnp.pad(dw, ((0, 0), (0, cin_p - inp)))        # f32
        params[f"dw{i}_b"] = jnp.pad(dbias, (0, cin_p - inp)).reshape(1, cin_p)

        pscale, pbias = _init_bn(k4, oup)
        pw = jax.random.normal(k3, (inp, oup), jnp.float32) / jnp.sqrt(float(inp))
        pw = pw * pscale[None, :]                         # BN scale folded
        pw = jnp.pad(pw, ((0, cin_p - inp), (0, cout_p - oup)))
        params[f"pw{i}_w"] = pw.astype(jnp.bfloat16)
        params[f"pw{i}_b"] = jnp.pad(pbias, (0, cout_p - oup)).reshape(1, cout_p)
    return params


# ---------------------------------------------------------------------------
# Forward pass (MobileNetV1.forward)
# ---------------------------------------------------------------------------
@jax.jit
def mobilenet_v1(params, x_nhwc):
    x = x_nhwc.astype(jnp.bfloat16)
    x = conv0_bn_relu(x, params["conv0_w"], params["conv0_b"], stride=2)
    for i, (_inp, _oup, stride) in enumerate(_DW_CFG):
        x = fused_dw_pw(x, params[f"dw{i}_w"], params[f"dw{i}_b"],
                        params[f"pw{i}_w"], params[f"pw{i}_b"], stride)
    return x.astype(jnp.float32)


if __name__ == "__main__":
    key = jax.random.PRNGKey(0)
    k_x, k_p = jax.random.split(key)
    # PyTorch-style NCHW input: (batch=2, channels=3, H=32, W=32)
    x_nchw = jax.random.normal(k_x, (2, 3, 32, 32), jnp.float32)
    x_nhwc = jnp.transpose(x_nchw, (0, 2, 3, 1))          # kernel layout

    params = init_params(k_p)
    y = mobilenet_v1(params, x_nhwc)   # (2, 2, 2, 512) NHWC == (2, 512, 2, 2) NCHW
    jax.block_until_ready(y)
    assert y.shape == (2, 2, 2, 512), y.shape
    assert bool(jnp.all(jnp.isfinite(y)))
    print("KERNEL_OK")
</pallas_src>

<mosaic_0001>
module attributes {stable_mosaic.version = 11 : i64} {
  func.func @_matmul_bias_relu_kernel(%arg0: i32, %arg1: i32, %arg2: memref<256x32xbf16, #tpu.memory_space<vmem>>, %arg3: memref<32x128xbf16, #tpu.memory_space<vmem>>, %arg4: memref<1x128xf32, #tpu.memory_space<vmem>>, %arg5: memref<256x128xbf16, #tpu.memory_space<vmem>>) attributes {dimension_semantics = [#tpu.dimension_semantics<parallel>, #tpu.dimension_semantics<parallel>], iteration_bounds = array<i64: 2, 1>, scalar_prefetch = 0 : i64, scratch_operands = 0 : i64, tpu.core_type = #tpu.core_type<tc>, window_params = [{transform_indices = @transform_0, window_bounds = array<i64: 256, 32>}, {transform_indices = @transform_1, window_bounds = array<i64: 32, 128>}, {transform_indices = @transform_2, window_bounds = array<i64: 1, 128>}, {transform_indices = @transform_3, window_bounds = array<i64: 256, 128>}]} {
    %c0 = arith.constant 0 : index
    %c0_0 = arith.constant 0 : index
    %0 = vector.load %arg2[%c0, %c0_0] : memref<256x32xbf16, #tpu.memory_space<vmem>>, vector<256x32xbf16>
    %c0_1 = arith.constant 0 : index
    %c0_2 = arith.constant 0 : index
    %1 = vector.load %arg3[%c0_1, %c0_2] : memref<32x128xbf16, #tpu.memory_space<vmem>>, vector<32x128xbf16>
    %cst = arith.constant dense<0.000000e+00> : vector<256x128xf32>
    %2 = tpu.matmul %0, %1, %cst {dimension_numbers = #tpu.dot_dimension_numbers<[1], [0], [0], [1], [0, 0, 1, 1], [], []>} : vector<256x32xbf16>, vector<32x128xbf16>, vector<256x128xf32> -> vector<256x128xf32>
    %c0_3 = arith.constant 0 : index
    %c0_4 = arith.constant 0 : index
    %3 = vector.load %arg4[%c0_3, %c0_4] : memref<1x128xf32, #tpu.memory_space<vmem>>, vector<1x128xf32>
    %4 = vector.broadcast %3 : vector<1x128xf32> to vector<256x128xf32>
    %5 = arith.addf %2, %4 : vector<256x128xf32>
    %cst_5 = arith.constant 0.000000e+00 : f32
    %6 = vector.broadcast %cst_5 : f32 to vector<256x128xf32>
    %7 = arith.maximumf %5, %6 : vector<256x128xf32>
    %8 = arith.truncf %7 : vector<256x128xf32> to vector<256x128xbf16>
    %c0_6 = arith.constant 0 : index
    %c0_7 = arith.constant 0 : index
    %9 = vector.load %arg5[%c0_6, %c0_7] : memref<256x128xbf16, #tpu.memory_space<vmem>>, vector<256x128xbf16>
    tpu.vector_store %arg5[%c0_6, %c0_7], %8 {strides = array<i32>} : memref<256x128xbf16, #tpu.memory_space<vmem>>, vector<256x128xbf16>,
    return
  }
  func.func @transform_0(%arg0: i32, %arg1: i32) -> (i32, i32) {
    %c0_i32 = arith.constant 0 : i32
    %c0_i32_0 = arith.constant 0 : i32
    return %arg0, %c0_i32 : i32, i32
  }
  func.func @transform_1(%arg0: i32, %arg1: i32) -> (i32, i32) {
    %c0_i32 = arith.constant 0 : i32
    %c0_i32_0 = arith.constant 0 : i32
    return %c0_i32, %arg1 : i32, i32
  }
  func.func @transform_2(%arg0: i32, %arg1: i32) -> (i32, i32) {
    %c0_i32 = arith.constant 0 : i32
    %c0_i32_0 = arith.constant 0 : i32
    return %c0_i32, %arg1 : i32, i32
  }
  func.func @transform_3(%arg0: i32, %arg1: i32) -> (i32, i32) {
    %c0_i32 = arith.constant 0 : i32
    return %arg0, %arg1 : i32, i32
  }
}

module attributes {stable_mosaic.version = 11 : i64} {
  func.func @kernel(%arg0: i32, %arg1: i32, %arg2: memref<1x1x18x18x128xbf16, #tpu.memory_space<vmem>>, %arg3: memref<9x128xf32, #tpu.memory_space<vmem>>, %arg4: memref<1x128xf32, #tpu.memory_space<vmem>>, %arg5: memref<128x128xbf16, #tpu.memory_space<vmem>>, %arg6: memref<1x128xf32, #tpu.memory_space<vmem>>, %arg7: memref<1x256x128xbf16, #tpu.memory_space<vmem>>, %arg8: memref<256x128xf32, #tpu.memory_space<vmem>>) attributes {dimension_semantics = [#tpu.dimension_semantics<parallel>, #tpu.dimension_semantics<arbitrary>], iteration_bounds = array<i64: 2, 1>, scalar_prefetch = 0 : i64, scratch_operands = 1 : i64, tpu.core_type = #tpu.core_type<tc>, window_params = [{transform_indices = @transform_0, window_bounds = array<i64: 1, 1, 18, 18, 128>}, {pipeline_mode = #tpu.pipeline_mode<synchronous>, transform_indices = @transform_1, window_bounds = array<i64: 9, 128>}, {pipeline_mode = #tpu.pipeline_mode<synchronous>, transform_indices = @transform_2, window_bounds = array<i64: 1, 128>}, {transform_indices = @transform_3, window_bounds = array<i64: 128, 128>}, {transform_indices = @transform_4, window_bounds = array<i64: 1, 128>}, {transform_indices = @transform_5, window_bounds = array<i64: 1, 256, 128>}]} {
    %c0_i32 = arith.constant 0 : i32
    %0 = arith.cmpi eq, %arg1, %c0_i32 : i32
    %1 = arith.extui %0 : i1 to i32
    %c0_i32_0 = arith.constant 0 : i32
    %2 = arith.cmpi ne, %1, %c0_i32_0 : i32
    scf.if %2 {
      %c0_10 = arith.constant 0 : index
      %c0_11 = arith.constant 0 : index
      %c0_12 = arith.constant 0 : index
      %c0_13 = arith.constant 0 : index
      %c0_14 = arith.constant 0 : index
      %15 = vector.load %arg2[%c0_10, %c0_11, %c0_12, %c0_13, %c0_14] : memref<1x1x18x18x128xbf16, #tpu.memory_space<vmem>>, vector<1x1x16x16x128xbf16>
      %16 = vector.shape_cast %15 : vector<1x1x16x16x128xbf16> to vector<16x16x128xbf16>
      %17 = arith.extf %16 : vector<16x16x128xbf16> to vector<16x16x128xf32>
      %c0_15 = arith.constant 0 : index
      %c0_16 = arith.constant 0 : index
      %18 = vector.load %arg3[%c0_15, %c0_16] : memref<9x128xf32, #tpu.memory_space<vmem>>, vector<1x128xf32>
      %19 = vector.shape_cast %18 : vector<1x128xf32> to vector<1x1x128xf32>
      %20 = vector.broadcast %19 : vector<1x1x128xf32> to vector<16x16x128xf32>
      %21 = arith.mulf %17, %20 : vector<16x16x128xf32>
      %c0_17 = arith.constant 0 : index
      %c0_18 = arith.constant 0 : index
      %c0_19 = arith.constant 0 : index
      %c1 = arith.constant 1 : index
      %c0_20 = arith.constant 0 : index
      %22 = vector.load %arg2[%c0_17, %c0_18, %c0_19, %c1, %c0_20] : memref<1x1x18x18x128xbf16, #tpu.memory_space<vmem>>, vector<1x1x16x16x128xbf16>
      %23 = vector.shape_cast %22 : vector<1x1x16x16x128xbf16> to vector<16x16x128xbf16>
      %24 = arith.extf %23 : vector<16x16x128xbf16> to vector<16x16x128xf32>
      %c1_21 = arith.constant 1 : index
      %c0_22 = arith.constant 0 : index
      %25 = vector.load %arg3[%c1_21, %c0_22] : memref<9x128xf32, #tpu.memory_space<vmem>>, vector<1x128xf32>
      %26 = vector.shape_cast %25 : vector<1x128xf32> to vector<1x1x128xf32>
      %27 = vector.broadcast %26 : vector<1x1x128xf32> to vector<16x16x128xf32>
      %28 = arith.mulf %24, %27 : vector<16x16x128xf32>
      %c0_23 = arith.constant 0 : index
      %c0_24 = arith.constant 0 : index
      %c0_25 = arith.constant 0 : index
      %c2 = arith.constant 2 : index
      %c0_26 = arith.constant 0 : index
      %29 = vector.load %arg2[%c0_23, %c0_24, %c0_25, %c2, %c0_26] : memref<1x1x18x18x128xbf16, #tpu.memory_space<vmem>>, vector<1x1x16x16x128xbf16>
      %30 = vector.shape_cast %29 : vector<1x1x16x16x128xbf16> to vector<16x16x128xbf16>
      %31 = arith.extf %30 : vector<16x16x128xbf16> to vector<16x16x128xf32>
      %c2_27 = arith.constant 2 : index
      %c0_28 = arith.constant 0 : index
      %32 = vector.load %arg3[%c2_27, %c0_28] : memref<9x128xf32, #tpu.memory_space<vmem>>, vector<1x128xf32>
      %33 = vector.shape_cast %32 : vector<1x128xf32> to vector<1x1x128xf32>
      %34 = vector.broadcast %33 : vector<1x1x128xf32> to vector<16x16x128xf32>
      %35 = arith.mulf %31, %34 : vector<16x16x128xf32>
      %c0_29 = arith.constant 0 : index
      %c0_30 = arith.constant 0 : index
      %c1_31 = arith.constant 1 : index
      %c0_32 = arith.constant 0 : index
      %c0_33 = arith.constant 0 : index
      %36 = vector.load %arg2[%c0_29, %c0_30, %c1_31, %c0_32, %c0_33] : memref<1x1x18x18x128xbf16, #tpu.memory_space<vmem>>, vector<1x1x16x16x128xbf16>
      %37 = vector.shape_cast %36 : vector<1x1x16x16x128xbf16> to vector<16x16x128xbf16>
      %38 = arith.extf %37 : vector<16x16x128xbf16> to vector<16x16x128xf32>
      %c3 = arith.constant 3 : index
      %c0_34 = arith.constant 0 : index
      %39 = vector.load %arg3[%c3, %c0_34] : memref<9x128xf32, #tpu.memory_space<vmem>>, vector<1x128xf32>
      %40 = vector.shape_cast %39 : vector<1x128xf32> to vector<1x1x128xf32>
      %41 = vector.broadcast %40 : vector<1x1x128xf32> to vector<16x16x128xf32>
      %42 = arith.mulf %38, %41 : vector<16x16x128xf32>
      %c0_35 = arith.constant 0 : index
      %c0_36 = arith.constant 0 : index
      %c1_37 = arith.constant 1 : index
      %c1_38 = arith.constant 1 : index
      %c0_39 = arith.constant 0 : index
      %43 = vector.load %arg2[%c0_35, %c0_36, %c1_37, %c1_38, %c0_39] : memref<1x1x18x18x128xbf16, #tpu.memory_space<vmem>>, vector<1x1x16x16x128xbf16>
      %44 = vector.shape_cast %43 : vector<1x1x16x16x128xbf16> to vector<16x16x128xbf16>
      %45 = arith.extf %44 : vector<16x16x128xbf16> to vector<16x16x128xf32>
      %c4 = arith.constant 4 : index
      %c0_40 = arith.constant 0 : index
      %46 = vector.load %arg3[%c4, %c0_40] : memref<9x128xf32, #tpu.memory_space<vmem>>, vector<1x128xf32>
      %47 = vector.shape_cast %46 : vector<1x128xf32> to vector<1x1x128xf32>
      %48 = vector.broadcast %47 : vector<1x1x128xf32> to vector<16x16x128xf32>
      %49 = arith.mulf %45, %48 : vector<16x16x128xf32>
      %c0_41 = arith.constant 0 : index
      %c0_42 = arith.constant 0 : index
      %c1_43 = arith.constant 1 : index
      %c2_44 = arith.constant 2 : index
      %c0_45 = arith.constant 0 : index
      %50 = vector.load %arg2[%c0_41, %c0_42, %c1_43, %c2_44, %c0_45] : memref<1x1x18x18x128xbf16, #tpu.memory_space<vmem>>, vector<1x1x16x16x128xbf16>
      %51 = vector.shape_cast %50 : vector<1x1x16x16x128xbf16> to vector<16x16x128xbf16>
      %52 = arith.extf %51 : vector<16x16x128xbf16> to vector<16x16x128xf32>
      %c5 = arith.constant 5 : index
      %c0_46 = arith.constant 0 : index
      %53 = vector.load %arg3[%c5, %c0_46] : memref<9x128xf32, #tpu.memory_space<vmem>>, vector<1x128xf32>
      %54 = vector.shape_cast %53 : vector<1x128xf32> to vector<1x1x128xf32>
      %55 = vector.broadcast %54 : vector<1x1x128xf32> to vector<16x16x128xf32>
      %56 = arith.mulf %52, %55 : vector<16x16x128xf32>
      %c0_47 = arith.constant 0 : index
      %c0_48 = arith.constant 0 : index
      %c2_49 = arith.constant 2 : index
      %c0_50 = arith.constant 0 : index
      %c0_51 = arith.constant 0 : index
      %57 = vector.load %arg2[%c0_47, %c0_48, %c2_49, %c0_50, %c0_51] : memref<1x1x18x18x128xbf16, #tpu.memory_space<vmem>>, vector<1x1x16x16x128xbf16>
      %58 = vector.shape_cast %57 : vector<1x1x16x16x128xbf16> to vector<16x16x128xbf16>
      %59 = arith.extf %58 : vector<16x16x128xbf16> to vector<16x16x128xf32>
      %c6 = arith.constant 6 : index
      %c0_52 = arith.constant 0 : index
      %60 = vector.load %arg3[%c6, %c0_52] : memref<9x128xf32, #tpu.memory_space<vmem>>, vector<1x128xf32>
      %61 = vector.shape_cast %60 : vector<1x128xf32> to vector<1x1x128xf32>
      %62 = vector.broadcast %61 : vector<1x1x128xf32> to vector<16x16x128xf32>
      %63 = arith.mulf %59, %62 : vector<16x16x128xf32>
      %c0_53 = arith.constant 0 : index
      %c0_54 = arith.constant 0 : index
      %c2_55 = arith.constant 2 : index
      %c1_56 = arith.constant 1 : index
      %c0_57 = arith.constant 0 : index
      %64 = vector.load %arg2[%c0_53, %c0_54, %c2_55, %c1_56, %c0_57] : memref<1x1x18x18x128xbf16, #tpu.memory_space<vmem>>, vector<1x1x16x16x128xbf16>
      %65 = vector.shape_cast %64 : vector<1x1x16x16x128xbf16> to vector<16x16x128xbf16>
      %66 = arith.extf %65 : vector<16x16x128xbf16> to vector<16x16x128xf32>
      %c7 = arith.constant 7 : index
      %c0_58 = arith.constant 0 : index
      %67 = vector.load %arg3[%c7, %c0_58] : memref<9x128xf32, #tpu.memory_space<vmem>>, vector<1x128xf32>
      %68 = vector.shape_cast %67 : vector<1x128xf32> to vector<1x1x128xf32>
      %69 = vector.broadcast %68 : vector<1x1x128xf32> to vector<16x16x128xf32>
      %70 = arith.mulf %66, %69 : vector<16x16x128xf32>
      %c0_59 = arith.constant 0 : index
      %c0_60 = arith.constant 0 : index
      %c2_61 = arith.constant 2 : index
      %c2_62 = arith.constant 2 : index
      %c0_63 = arith.constant 0 : index
      %71 = vector.load %arg2[%c0_59, %c0_60, %c2_61, %c2_62, %c0_63] : memref<1x1x18x18x128xbf16, #tpu.memory_space<vmem>>, vector<1x1x16x16x128xbf16>
      %72 = vector.shape_cast %71 : vector<1x1x16x16x128xbf16> to vector<16x16x128xbf16>
      %73 = arith.extf %72 : vector<16x16x128xbf16> to vector<16x16x128xf32>
      %c8 = arith.constant 8 : index
      %c0_64 = arith.constant 0 : index
      %74 = vector.load %arg3[%c8, %c0_64] : memref<9x128xf32, #tpu.memory_space<vmem>>, vector<1x128xf32>
      %75 = vector.shape_cast %74 : vector<1x128xf32> to vector<1x1x128xf32>
      %76 = vector.broadcast %75 : vector<1x1x128xf32> to vector<16x16x128xf32>
      %77 = arith.mulf %73, %76 : vector<16x16x128xf32>
      %78 = arith.addf %21, %28 : vector<16x16x128xf32>
      %79 = arith.addf %35, %42 : vector<16x16x128xf32>
      %80 = arith.addf %49, %56 : vector<16x16x128xf32>
      %81 = arith.addf %63, %70 : vector<16x16x128xf32>
      %82 = arith.addf %78, %79 : vector<16x16x128xf32>
      %83 = arith.addf %80, %81 : vector<16x16x128xf32>
      %84 = arith.addf %82, %83 : vector<16x16x128xf32>
      %85 = arith.addf %84, %77 : vector<16x16x128xf32>
      %c0_65 = arith.constant 0 : index
      %c0_66 = arith.constant 0 : index
      %86 = vector.load %arg4[%c0_65, %c0_66] : memref<1x128xf32, #tpu.memory_space<vmem>>, vector<1x128xf32>
      %87 = vector.shape_cast %86 : vector<1x128xf32> to vector<1x1x128xf32>
      %88 = vector.broadcast %87 : vector<1x1x128xf32> to vector<16x16x128xf32>
      %89 = arith.addf %85, %88 : vector<16x16x128xf32>
      %cst_67 = arith.constant 0.000000e+00 : f32
      %90 = vector.broadcast %cst_67 : f32 to vector<16x16x128xf32>
      %91 = arith.maximumf %89, %90 : vector<16x16x128xf32>
      %92 = vector.extract_strided_slice %91 {offsets = [0, 0, 0], sizes = [1, 16, 128], strides = [1, 1, 1]} : vector<16x16x128xf32> to vector<1x16x128xf32>
      %93 = vector.shape_cast %92 : vector<1x16x128xf32> to vector<16x128xf32>
      %c0_68 = arith.constant 0 : index
      %c0_69 = arith.constant 0 : index
      %94 = vector.load %arg8[%c0_68, %c0_69] : memref<256x128xf32, #tpu.memory_space<vmem>>, vector<16x128xf32>
      tpu.vector_store %arg8[%c0_68, %c0_69], %93 {strides = array<i32>} : memref<256x128xf32, #tpu.memory_space<vmem>>, vector<16x128xf32>,
      %95 = vector.extract_strided_slice %91 {offsets = [1, 0, 0], sizes = [1, 16, 128], strides = [1, 1, 1]} : vector<16x16x128xf32> to vector<1x16x128xf32>
      %96 = vector.shape_cast %95 : vector<1x16x128xf32> to vector<16x128xf32>
      %c16 = arith.constant 16 : index
      %c0_70 = arith.constant 0 : index
      %97 = vector.load %arg8[%c16, %c0_70] : memref<256x128xf32, #tpu.memory_space<vmem>>, vector<16x128xf32>
      tpu.vector_store %arg8[%c16, %c0_70], %96 {strides = array<i32>} : memref<256x128xf32, #tpu.memory_space<vmem>>, vector<16x128xf32>,
      %98 = vector.extract_strided_slice %91 {offsets = [2, 0, 0], sizes = [1, 16, 128], strides = [1, 1, 1]} : vector<16x16x128xf32> to vector<1x16x128xf32>
      %99 = vector.shape_cast %98 : vector<1x16x128xf32> to vector<16x128xf32>
      %c32 = arith.constant 32 : index
      %c0_71 = arith.constant 0 : index
      %100 = vector.load %arg8[%c32, %c0_71] : memref<256x128xf32, #tpu.memory_space<vmem>>, vector<16x128xf32>
      tpu.vector_store %arg8[%c32, %c0_71], %99 {strides = array<i32>} : memref<256x128xf32, #tpu.memory_space<vmem>>, vector<16x128xf32>,
      %101 = vector.extract_strided_slice %91 {offsets = [3, 0, 0], sizes = [1, 16, 128], strides = [1, 1, 1]} : vector<16x16x128xf32> to vector<1x16x128xf32>
      %102 = vector.shape_cast %101 : vector<1x16x128xf32> to vector<16x128xf32>
      %c48 = arith.constant 48 : index
      %c0_72 = arith.constant 0 : index
      %103 = vector.load %arg8[%c48, %c0_72] : memref<256x128xf32, #tpu.memory_space<vmem>>, vector<16x128xf32>
      tpu.vector_store %arg8[%c48, %c0_72], %102 {strides = array<i32>} : memref<256x128xf32, #tpu.memory_space<vmem>>, vector<16x128xf32>,
      %104 = vector.extract_strided_slice %91 {offsets = [4, 0, 0], sizes = [1, 16, 128], strides = [1, 1, 1]} : vector<16x16x128xf32> to vector<1x16x128xf32>
      %105 = vector.shape_cast %104 : vector<1x16x128xf32> to vector<16x128xf32>
      %c64 = arith.constant 64 : index
      %c0_73 = arith.constant 0 : index
      %106 = vector.load %arg8[%c64, %c0_73] : memref<256x128xf32, #tpu.memory_space<vmem>>, vector<16x128xf32>
      tpu.vector_store %arg8[%c64, %c0_73], %105 {strides = array<i32>} : memref<256x128xf32, #tpu.memory_space<vmem>>, vector<16x128xf32>,
      %107 = vector.extract_strided_slice %91 {offsets = [5, 0, 0], sizes = [1, 16, 128], strides = [1, 1, 1]} : vector<16x16x128xf32> to vector<1x16x128xf32>
      %108 = vector.shape_cast %107 : vector<1x16x128xf32> to vector<16x128xf32>
      %c80 = arith.constant 80 : index
      %c0_74 = arith.constant 0 : index
      %109 = vector.load %arg8[%c80, %c0_74] : memref<256x128xf32, #tpu.memory_space<vmem>>, vector<16x128xf32>
      tpu.vector_store %arg8[%c80, %c0_74], %108 {strides = array<i32>} : memref<256x128xf32, #tpu.memory_space<vmem>>, vector<16x128xf32>,
      %110 = vector.extract_strided_slice %91 {offsets = [6, 0, 0], sizes = [1, 16, 128], strides = [1, 1, 1]} : vector<16x16x128xf32> to vector<1x16x128xf32>
      %111 = vector.shape_cast %110 : vector<1x16x128xf32> to vector<16x128xf32>
      %c96 = arith.constant 96 : index
      %c0_75 = arith.constant 0 : index
      %112 = vector.load %arg8[%c96, %c0_75] : memref<256x128xf32, #tpu.memory_space<vmem>>, vector<16x128xf32>
      tpu.vector_store %arg8[%c96, %c0_75], %111 {strides = array<i32>} : memref<256x128xf32, #tpu.memory_space<vmem>>, vector<16x128xf32>,
      %113 = vector.extract_strided_slice %91 {offsets = [7, 0, 0], sizes = [1, 16, 128], strides = [1, 1, 1]} : vector<16x16x128xf32> to vector<1x16x128xf32>
      %114 = vector.shape_cast %113 : vector<1x16x128xf32> to vector<16x128xf32>
      %c112 = arith.constant 112 : index
      %c0_76 = arith.constant 0 : index
      %115 = vector.load %arg8[%c112, %c0_76] : memref<256x128xf32, #tpu.memory_space<vmem>>, vector<16x128xf32>
      tpu.vector_store %arg8[%c112, %c0_76], %114 {strides = array<i32>} : memref<256x128xf32, #tpu.memory_space<vmem>>, vector<16x128xf32>,
      %116 = vector.extract_strided_slice %91 {offsets = [8, 0, 0], sizes = [1, 16, 128], strides = [1, 1, 1]} : vector<16x16x128xf32> to vector<1x16x128xf32>
      %117 = vector.shape_cast %116 : vector<1x16x128xf32> to vector<16x128xf32>
      %c128 = arith.constant 128 : index
      %c0_77 = arith.constant 0 : index
      %118 = vector.load %arg8[%c128, %c0_77] : memref<256x128xf32, #tpu.memory_space<vmem>>, vector<16x128xf32>
      tpu.vector_store %arg8[%c128, %c0_77], %117 {strides = array<i32>} : memref<256x128xf32, #tpu.memory_space<vmem>>, vector<16x128xf32>,
      %119 = vector.extract_strided_slice %91 {offsets = [9, 0, 0], sizes = [1, 16, 128], strides = [1, 1, 1]} : vector<16x16x128xf32> to vector<1x16x128xf32>
      %120 = vector.shape_cast %119 : vector<1x16x128xf32> to vector<16x128xf32>
      %c144 = arith.constant 144 : index
      %c0_78 = arith.constant 0 : index
      %121 = vector.load %arg8[%c144, %c0_78] : memref<256x128xf32, #tpu.memory_space<vmem>>, vector<16x128xf32>
      tpu.vector_store %arg8[%c144, %c0_78], %120 {strides = array<i32>} : memref<256x128xf32, #tpu.memory_space<vmem>>, vector<16x128xf32>,
      %122 = vector.extract_strided_slice %91 {offsets = [10, 0, 0], sizes = [1, 16, 128], strides = [1, 1, 1]} : vector<16x16x128xf32> to vector<1x16x128xf32>
      %123 = vector.shape_cast %122 : vector<1x16x128xf32> to vector<16x128xf32>
      %c160 = arith.constant 160 : index
      %c0_79 = arith.constant 0 : index
      %124 = vector.load %arg8[%c160, %c0_79] : memref<256x128xf32, #tpu.memory_space<vmem>>, vector<16x128xf32>
      tpu.vector_store %arg8[%c160, %c0_79], %123 {strides = array<i32>} : memref<256x128xf32, #tpu.memory_space<vmem>>, vector<16x128xf32>,
      %125 = vector.extract_strided_slice %91 {offsets = [11, 0, 0], sizes = [1, 16, 128], strides = [1, 1, 1]} : vector<16x16x128xf32> to vector<1x16x128xf32>
      %126 = vector.shape_cast %125 : vector<1x16x128xf32> to vector<16x128xf32>
      %c176 = arith.constant 176 : index
      %c0_80 = arith.constant 0 : index
      %127 = vector.load %arg8[%c176, %c0_80] : memref<256x128xf32, #tpu.memory_space<vmem>>, vector<16x128xf32>
      tpu.vector_store %arg8[%c176, %c0_80], %126 {strides = array<i32>} : memref<256x128xf32, #tpu.memory_space<vmem>>, vector<16x128xf32>,
      %128 = vector.extract_strided_slice %91 {offsets = [12, 0, 0], sizes = [1, 16, 128], strides = [1, 1, 1]} : vector<16x16x128xf32> to vector<1x16x128xf32>
      %129 = vector.shape_cast %128 : vector<1x16x128xf32> to vector<16x128xf32>
      %c192 = arith.constant 192 : index
      %c0_81 = arith.constant 0 : index
      %130 = vector.load %arg8[%c192, %c0_81] : memref<256x128xf32, #tpu.memory_space<vmem>>, vector<16x128xf32>
      tpu.vector_store %arg8[%c192, %c0_81], %129 {strides = array<i32>} : memref<256x128xf32, #tpu.memory_space<vmem>>, vector<16x128xf32>,
      %131 = vector.extract_strided_slice %91 {offsets = [13, 0, 0], sizes = [1, 16, 128], strides = [1, 1, 1]} : vector<16x16x128xf32> to vector<1x16x128xf32>
      %132 = vector.shape_cast %131 : vector<1x16x128xf32> to vector<16x128xf32>
      %c208 = arith.constant 208 : index
      %c0_82 = arith.constant 0 : index
      %133 = vector.load %arg8[%c208, %c0_82] : memref<256x128xf32, #tpu.memory_space<vmem>>, vector<16x128xf32>
      tpu.vector_store %arg8[%c208, %c0_82], %132 {strides = array<i32>} : memref<256x128xf32, #tpu.memory_space<vmem>>, vector<16x128xf32>,
      %134 = vector.extract_strided_slice %91 {offsets = [14, 0, 0], sizes = [1, 16, 128], strides = [1, 1, 1]} : vector<16x16x128xf32> to vector<1x16x128xf32>
      %135 = vector.shape_cast %134 : vector<1x16x128xf32> to vector<16x128xf32>
      %c224 = arith.constant 224 : index
      %c0_83 = arith.constant 0 : index
      %136 = vector.load %arg8[%c224, %c0_83] : memref<256x128xf32, #tpu.memory_space<vmem>>, vector<16x128xf32>
      tpu.vector_store %arg8[%c224, %c0_83], %135 {strides = array<i32>} : memref<256x128xf32, #tpu.memory_space<vmem>>, vector<16x128xf32>,
      %137 = vector.extract_strided_slice %91 {offsets = [15, 0, 0], sizes = [1, 16, 128], strides = [1, 1, 1]} : vector<16x16x128xf32> to vector<1x16x128xf32>
      %138 = vector.shape_cast %137 : vector<1x16x128xf32> to vector<16x128xf32>
      %c240 = arith.constant 240 : index
      %c0_84 = arith.constant 0 : index
      %139 = vector.load %arg8[%c240, %c0_84] : memref<256x128xf32, #tpu.memory_space<vmem>>, vector<16x128xf32>
      tpu.vector_store %arg8[%c240, %c0_84], %138 {strides = array<i32>} : memref<256x128xf32, #tpu.memory_space<vmem>>, vector<16x128xf32>,
    } else {
    }
    %c0 = arith.constant 0 : index
    %c0_1 = arith.constant 0 : index
    %3 = vector.load %arg8[%c0, %c0_1] : memref<256x128xf32, #tpu.memory_space<vmem>>, vector<256x128xf32>
    %4 = arith.truncf %3 : vector<256x128xf32> to vector<256x128xbf16>
    %c0_2 = arith.constant 0 : index
    %c0_3 = arith.constant 0 : index
    %5 = vector.load %arg5[%c0_2, %c0_3] : memref<128x128xbf16, #tpu.memory_space<vmem>>, vector<128x128xbf16>
    %cst = arith.constant dense<0.000000e+00> : vector<256x128xf32>
    %6 = tpu.matmul %4, %5, %cst {dimension_numbers = #tpu.dot_dimension_numbers<[1], [0], [0], [1], [0, 0, 1, 1], [], []>} : vector<256x128xbf16>, vector<128x128xbf16>, vector<256x128xf32> -> vector<256x128xf32>
    %c0_4 = arith.constant 0 : index
    %c0_5 = arith.constant 0 : index
    %7 = vector.load %arg6[%c0_4, %c0_5] : memref<1x128xf32, #tpu.memory_space<vmem>>, vector<1x128xf32>
    %8 = vector.broadcast %7 : vector<1x128xf32> to vector<256x128xf32>
    %9 = arith.addf %6, %8 : vector<256x128xf32>
    %cst_6 = arith.constant 0.000000e+00 : f32
    %10 = vector.broadcast %cst_6 : f32 to vector<256x128xf32>
    %11 = arith.maximumf %9, %10 : vector<256x128xf32>
    %12 = vector.shape_cast %11 : vector<256x128xf32> to vector<1x256x128xf32>
    %13 = arith.truncf %12 : vector<1x256x128xf32> to vector<1x256x128xbf16>
    %c0_7 = arith.constant 0 : index
    %c0_8 = arith.constant 0 : index
    %c0_9 = arith.constant 0 : index
    %14 = vector.load %arg7[%c0_7, %c0_8, %c0_9] : memref<1x256x128xbf16, #tpu.memory_space<vmem>>, vector<1x256x128xbf16>
    tpu.vector_store %arg7[%c0_7, %c0_8, %c0_9], %13 {strides = array<i32>} : memref<1x256x128xbf16, #tpu.memory_space<vmem>>, vector<1x256x128xbf16>,
    return
  }
  func.func @transform_0(%arg0: i32, %arg1: i32) -> (i32, i32, i32, i32, i32) {
    %c0_i32 = arith.constant 0 : i32
    %c0_i32_0 = arith.constant 0 : i32
    %c0_i32_1 = arith.constant 0 : i32
    %c0_i32_2 = arith.constant 0 : i32
    %c0_i32_3 = arith.constant 0 : i32
    return %c0_i32, %arg0, %c0_i32_0, %c0_i32_1, %c0_i32_2 : i32, i32, i32, i32, i32
  }
  func.func @transform_1(%arg0: i32, %arg1: i32) -> (i32, i32) {
    %c0_i32 = arith.constant 0 : i32
    %c0_i32_0 = arith.constant 0 : i32
    %c0_i32_1 = arith.constant 0 : i32
    return %c0_i32, %c0_i32_0 : i32, i32
  }
  func.func @transform_2(%arg0: i32, %arg1: i32) -> (i32, i32) {
    %c0_i32 = arith.constant 0 : i32
    %c0_i32_0 = arith.constant 0 : i32
    %c0_i32_1 = arith.constant 0 : i32
    return %c0_i32, %c0_i32_0 : i32, i32
  }
  func.func @transform_3(%arg0: i32, %arg1: i32) -> (i32, i32) {
    %c0_i32 = arith.constant 0 : i32
    %c0_i32_0 = arith.constant 0 : i32
    return %c0_i32, %arg1 : i32, i32
  }
  func.func @transform_4(%arg0: i32, %arg1: i32) -> (i32, i32) {
    %c0_i32 = arith.constant 0 : i32
    %c0_i32_0 = arith.constant 0 : i32
    return %c0_i32, %arg1 : i32, i32
  }
  func.func @transform_5(%arg0: i32, %arg1: i32) -> (i32, i32, i32) {
    %c0_i32 = arith.constant 0 : i32
    %c0_i32_0 = arith.constant 0 : i32
    return %arg0, %c0_i32, %arg1 : i32, i32, i32
  }
}

module attributes {stable_mosaic.version = 11 : i64} {
  func.func @kernel(%arg0: i32, %arg1: i32, %arg2: memref<4x1x9x9x128xbf16, #tpu.memory_space<vmem>>, %arg3: memref<9x128xf32, #tpu.memory_space<vmem>>, %arg4: memref<1x128xf32, #tpu.memory_space<vmem>>, %arg5: memref<128x128xbf16, #tpu.memory_space<vmem>>, %arg6: memref<1x128xf32, #tpu.memory_space<vmem>>, %arg7: memref<1x64x128xbf16, #tpu.memory_space<vmem>>, %arg8: memref<64x128xf32, #tpu.memory_space<vmem>>) attributes {dimension_semantics = [#tpu.dimension_semantics<parallel>, #tpu.dimension_semantics<arbitrary>], iteration_bounds = array<i64: 2, 1>, scalar_prefetch = 0 : i64, scratch_operands = 1 : i64, tpu.core_type = #tpu.core_type<tc>, window_params = [{transform_indices = @transform_0, window_bounds = array<i64: 4, 1, 9, 9, 128>}, {pipeline_mode = #tpu.pipeline_mode<synchronous>, transform_indices = @transform_1, window_bounds = array<i64: 9, 128>}, {pipeline_mode = #tpu.pipeline_mode<synchronous>, transform_indices = @transform_2, window_bounds = array<i64: 1, 128>}, {transform_indices = @transform_3, window_bounds = array<i64: 128, 128>}, {transform_indices = @transform_4, window_bounds = array<i64: 1, 128>}, {transform_indices = @transform_5, window_bounds = array<i64: 1, 64, 128>}]} {
    %c0_i32 = arith.constant 0 : i32
    %0 = arith.cmpi eq, %arg1, %c0_i32 : i32
    %1 = arith.extui %0 : i1 to i32
    %c0_i32_0 = arith.constant 0 : i32
    %2 = arith.cmpi ne, %1, %c0_i32_0 : i32
    scf.if %2 {
      %c0_10 = arith.constant 0 : index
      %c0_11 = arith.constant 0 : index
      %c0_12 = arith.constant 0 : index
      %c0_13 = arith.constant 0 : index
      %c0_14 = arith.constant 0 : index
      %15 = vector.load %arg2[%c0_10, %c0_11, %c0_12, %c0_13, %c0_14] : memref<4x1x9x9x128xbf16, #tpu.memory_space<vmem>>, vector<1x1x8x8x128xbf16>
      %16 = vector.shape_cast %15 : vector<1x1x8x8x128xbf16> to vector<8x8x128xbf16>
      %17 = arith.extf %16 : vector<8x8x128xbf16> to vector<8x8x128xf32>
      %c0_15 = arith.constant 0 : index
      %c0_16 = arith.constant 0 : index
      %18 = vector.load %arg3[%c0_15, %c0_16] : memref<9x128xf32, #tpu.memory_space<vmem>>, vector<1x128xf32>
      %19 = vector.shape_cast %18 : vector<1x128xf32> to vector<1x1x128xf32>
      %20 = vector.broadcast %19 : vector<1x1x128xf32> to vector<8x8x128xf32>
      %21 = arith.mulf %17, %20 : vector<8x8x128xf32>
      %c1 = arith.constant 1 : index
      %c0_17 = arith.constant 0 : index
      %c0_18 = arith.constant 0 : index
      %c0_19 = arith.constant 0 : index
      %c0_20 = arith.constant 0 : index
      %22 = vector.load %arg2[%c1, %c0_17, %c0_18, %c0_19, %c0_20] : memref<4x1x9x9x128xbf16, #tpu.memory_space<vmem>>, vector<1x1x8x8x128xbf16>
      %23 = vector.shape_cast %22 : vector<1x1x8x8x128xbf16> to vector<8x8x128xbf16>
      %24 = arith.extf %23 : vector<8x8x128xbf16> to vector<8x8x128xf32>
      %c1_21 = arith.constant 1 : index
      %c0_22 = arith.constant 0 : index
      %25 = vector.load %arg3[%c1_21, %c0_22] : memref<9x128xf32, #tpu.memory_space<vmem>>, vector<1x128xf32>
      %26 = vector.shape_cast %25 : vector<1x128xf32> to vector<1x1x128xf32>
      %27 = vector.broadcast %26 : vector<1x1x128xf32> to vector<8x8x128xf32>
      %28 = arith.mulf %24, %27 : vector<8x8x128xf32>
      %c0_23 = arith.constant 0 : index
      %c0_24 = arith.constant 0 : index
      %c0_25 = arith.constant 0 : index
      %c1_26 = arith.constant 1 : index
      %c0_27 = arith.constant 0 : index
      %29 = vector.load %arg2[%c0_23, %c0_24, %c0_25, %c1_26, %c0_27] : memref<4x1x9x9x128xbf16, #tpu.memory_space<vmem>>, vector<1x1x8x8x128xbf16>
      %30 = vector.shape_cast %29 : vector<1x1x8x8x128xbf16> to vector<8x8x128xbf16>
      %31 = arith.extf %30 : vector<8x8x128xbf16> to vector<8x8x128xf32>
      %c2 = arith.constant 2 : index
      %c0_28 = arith.constant 0 : index
      %32 = vector.load %arg3[%c2, %c0_28] : memref<9x128xf32, #tpu.memory_space<vmem>>, vector<1x128xf32>
      %33 = vector.shape_cast %32 : vector<1x128xf32> to vector<1x1x128xf32>
      %34 = vector.broadcast %33 : vector<1x1x128xf32> to vector<8x8x128xf32>
      %35 = arith.mulf %31, %34 : vector<8x8x128xf32>
      %c2_29 = arith.constant 2 : index
      %c0_30 = arith.constant 0 : index
      %c0_31 = arith.constant 0 : index
      %c0_32 = arith.constant 0 : index
      %c0_33 = arith.constant 0 : index
      %36 = vector.load %arg2[%c2_29, %c0_30, %c0_31, %c0_32, %c0_33] : memref<4x1x9x9x128xbf16, #tpu.memory_space<vmem>>, vector<1x1x8x8x128xbf16>
      %37 = vector.shape_cast %36 : vector<1x1x8x8x128xbf16> to vector<8x8x128xbf16>
      %38 = arith.extf %37 : vector<8x8x128xbf16> to vector<8x8x128xf32>
      %c3 = arith.constant 3 : index
      %c0_34 = arith.constant 0 : index
      %39 = vector.load %arg3[%c3, %c0_34] : memref<9x128xf32, #tpu.memory_space<vmem>>, vector<1x128xf32>
      %40 = vector.shape_cast %39 : vector<1x128xf32> to vector<1x1x128xf32>
      %41 = vector.broadcast %40 : vector<1x1x128xf32> to vector<8x8x128xf32>
      %42 = arith.mulf %38, %41 : vector<8x8x128xf32>
      %c3_35 = arith.constant 3 : index
      %c0_36 = arith.constant 0 : index
      %c0_37 = arith.constant 0 : index
      %c0_38 = arith.constant 0 : index
      %c0_39 = arith.constant 0 : index
      %43 = vector.load %arg2[%c3_35, %c0_36, %c0_37, %c0_38, %c0_39] : memref<4x1x9x9x128xbf16, #tpu.memory_space<vmem>>, vector<1x1x8x8x128xbf16>
      %44 = vector.shape_cast %43 : vector<1x1x8x8x128xbf16> to vector<8x8x128xbf16>
      %45 = arith.extf %44 : vector<8x8x128xbf16> to vector<8x8x128xf32>
      %c4 = arith.constant 4 : index
      %c0_40 = arith.constant 0 : index
      %46 = vector.load %arg3[%c4, %c0_40] : memref<9x128xf32, #tpu.memory_space<vmem>>, vector<1x128xf32>
      %47 = vector.shape_cast %46 : vector<1x128xf32> to vector<1x1x128xf32>
      %48 = vector.broadcast %47 : vector<1x1x128xf32> to vector<8x8x128xf32>
      %49 = arith.mulf %45, %48 : vector<8x8x128xf32>
      %c2_41 = arith.constant 2 : index
      %c0_42 = arith.constant 0 : index
      %c0_43 = arith.constant 0 : index
      %c1_44 = arith.constant 1 : index
      %c0_45 = arith.constant 0 : index
      %50 = vector.load %arg2[%c2_41, %c0_42, %c0_43, %c1_44, %c0_45] : memref<4x1x9x9x128xbf16, #tpu.memory_space<vmem>>, vector<1x1x8x8x128xbf16>
      %51 = vector.shape_cast %50 : vector<1x1x8x8x128xbf16> to vector<8x8x128xbf16>
      %52 = arith.extf %51 : vector<8x8x128xbf16> to vector<8x8x128xf32>
      %c5 = arith.constant 5 : index
      %c0_46 = arith.constant 0 : index
      %53 = vector.load %arg3[%c5, %c0_46] : memref<9x128xf32, #tpu.memory_space<vmem>>, vector<1x128xf32>
      %54 = vector.shape_cast %53 : vector<1x128xf32> to vector<1x1x128xf32>
      %55 = vector.broadcast %54 : vector<1x1x128xf32> to vector<8x8x128xf32>
      %56 = arith.mulf %52, %55 : vector<8x8x128xf32>
      %c0_47 = arith.constant 0 : index
      %c0_48 = arith.constant 0 : index
      %c1_49 = arith.constant 1 : index
      %c0_50 = arith.constant 0 : index
      %c0_51 = arith.constant 0 : index
      %57 = vector.load %arg2[%c0_47, %c0_48, %c1_49, %c0_50, %c0_51] : memref<4x1x9x9x128xbf16, #tpu.memory_space<vmem>>, vector<1x1x8x8x128xbf16>
      %58 = vector.shape_cast %57 : vector<1x1x8x8x128xbf16> to vector<8x8x128xbf16>
      %59 = arith.extf %58 : vector<8x8x128xbf16> to vector<8x8x128xf32>
      %c6 = arith.constant 6 : index
      %c0_52 = arith.constant 0 : index
      %60 = vector.load %arg3[%c6, %c0_52] : memref<9x128xf32, #tpu.memory_space<vmem>>, vector<1x128xf32>
      %61 = vector.shape_cast %60 : vector<1x128xf32> to vector<1x1x128xf32>
      %62 = vector.broadcast %61 : vector<1x1x128xf32> to vector<8x8x128xf32>
      %63 = arith.mulf %59, %62 : vector<8x8x128xf32>
      %c1_53 = arith.constant 1 : index
      %c0_54 = arith.constant 0 : index
      %c1_55 = arith.constant 1 : index
      %c0_56 = arith.constant 0 : index
      %c0_57 = arith.constant 0 : index
      %64 = vector.load %arg2[%c1_53, %c0_54, %c1_55, %c0_56, %c0_57] : memref<4x1x9x9x128xbf16, #tpu.memory_space<vmem>>, vector<1x1x8x8x128xbf16>
      %65 = vector.shape_cast %64 : vector<1x1x8x8x128xbf16> to vector<8x8x128xbf16>
      %66 = arith.extf %65 : vector<8x8x128xbf16> to vector<8x8x128xf32>
      %c7 = arith.constant 7 : index
      %c0_58 = arith.constant 0 : index
      %67 = vector.load %arg3[%c7, %c0_58] : memref<9x128xf32, #tpu.memory_space<vmem>>, vector<1x128xf32>
      %68 = vector.shape_cast %67 : vector<1x128xf32> to vector<1x1x128xf32>
      %69 = vector.broadcast %68 : vector<1x1x128xf32> to vector<8x8x128xf32>
      %70 = arith.mulf %66, %69 : vector<8x8x128xf32>
      %c0_59 = arith.constant 0 : index
      %c0_60 = arith.constant 0 : index
      %c1_61 = arith.constant 1 : index
      %c1_62 = arith.constant 1 : index
      %c0_63 = arith.constant 0 : index
      %71 = vector.load %arg2[%c0_59, %c0_60, %c1_61, %c1_62, %c0_63] : memref<4x1x9x9x128xbf16, #tpu.memory_space<vmem>>, vector<1x1x8x8x128xbf16>
      %72 = vector.shape_cast %71 : vector<1x1x8x8x128xbf16> to vector<8x8x128xbf16>
      %73 = arith.extf %72 : vector<8x8x128xbf16> to vector<8x8x128xf32>
      %c8 = arith.constant 8 : index
      %c0_64 = arith.constant 0 : index
      %74 = vector.load %arg3[%c8, %c0_64] : memref<9x128xf32, #tpu.memory_space<vmem>>, vector<1x128xf32>
      %75 = vector.shape_cast %74 : vector<1x128xf32> to vector<1x1x128xf32>
      %76 = vector.broadcast %75 : vector<1x1x128xf32> to vector<8x8x128xf32>
      %77 = arith.mulf %73, %76 : vector<8x8x128xf32>
      %78 = arith.addf %21, %28 : vector<8x8x128xf32>
      %79 = arith.addf %35, %42 : vector<8x8x128xf32>
      %80 = arith.addf %49, %56 : vector<8x8x128xf32>
      %81 = arith.addf %63, %70 : vector<8x8x128xf32>
      %82 = arith.addf %78, %79 : vector<8x8x128xf32>
      %83 = arith.addf %80, %81 : vector<8x8x128xf32>
      %84 = arith.addf %82, %83 : vector<8x8x128xf32>
      %85 = arith.addf %84, %77 : vector<8x8x128xf32>
      %c0_65 = arith.constant 0 : index
      %c0_66 = arith.constant 0 : index
      %86 = vector.load %arg4[%c0_65, %c0_66] : memref<1x128xf32, #tpu.memory_space<vmem>>, vector<1x128xf32>
      %87 = vector.shape_cast %86 : vector<1x128xf32> to vector<1x1x128xf32>
      %88 = vector.broadcast %87 : vector<1x1x128xf32> to vector<8x8x128xf32>
      %89 = arith.addf %85, %88 : vector<8x8x128xf32>
      %cst_67 = arith.constant 0.000000e+00 : f32
      %90 = vector.broadcast %cst_67 : f32 to vector<8x8x128xf32>
      %91 = arith.maximumf %89, %90 : vector<8x8x128xf32>
      %92 = vector.extract_strided_slice %91 {offsets = [0, 0, 0], sizes = [1, 8, 128], strides = [1, 1, 1]} : vector<8x8x128xf32> to vector<1x8x128xf32>
      %93 = vector.shape_cast %92 : vector<1x8x128xf32> to vector<8x128xf32>
      %c0_68 = arith.constant 0 : index
      %c0_69 = arith.constant 0 : index
      %94 = vector.load %arg8[%c0_68, %c0_69] : memref<64x128xf32, #tpu.memory_space<vmem>>, vector<8x128xf32>
      tpu.vector_store %arg8[%c0_68, %c0_69], %93 {strides = array<i32>} : memref<64x128xf32, #tpu.memory_space<vmem>>, vector<8x128xf32>,
      %95 = vector.extract_strided_slice %91 {offsets = [1, 0, 0], sizes = [1, 8, 128], strides = [1, 1, 1]} : vector<8x8x128xf32> to vector<1x8x128xf32>
      %96 = vector.shape_cast %95 : vector<1x8x128xf32> to vector<8x128xf32>
      %c8_70 = arith.constant 8 : index
      %c0_71 = arith.constant 0 : index
      %97 = vector.load %arg8[%c8_70, %c0_71] : memref<64x128xf32, #tpu.memory_space<vmem>>, vector<8x128xf32>
      tpu.vector_store %arg8[%c8_70, %c0_71], %96 {strides = array<i32>} : memref<64x128xf32, #tpu.memory_space<vmem>>, vector<8x128xf32>,
      %98 = vector.extract_strided_slice %91 {offsets = [2, 0, 0], sizes = [1, 8, 128], strides = [1, 1, 1]} : vector<8x8x128xf32> to vector<1x8x128xf32>
      %99 = vector.shape_cast %98 : vector<1x8x128xf32> to vector<8x128xf32>
      %c16 = arith.constant 16 : index
      %c0_72 = arith.constant 0 : index
      %100 = vector.load %arg8[%c16, %c0_72] : memref<64x128xf32, #tpu.memory_space<vmem>>, vector<8x128xf32>
      tpu.vector_store %arg8[%c16, %c0_72], %99 {strides = array<i32>} : memref<64x128xf32, #tpu.memory_space<vmem>>, vector<8x128xf32>,
      %101 = vector.extract_strided_slice %91 {offsets = [3, 0, 0], sizes = [1, 8, 128], strides = [1, 1, 1]} : vector<8x8x128xf32> to vector<1x8x128xf32>
      %102 = vector.shape_cast %101 : vector<1x8x128xf32> to vector<8x128xf32>
      %c24 = arith.constant 24 : index
      %c0_73 = arith.constant 0 : index
      %103 = vector.load %arg8[%c24, %c0_73] : memref<64x128xf32, #tpu.memory_space<vmem>>, vector<8x128xf32>
      tpu.vector_store %arg8[%c24, %c0_73], %102 {strides = array<i32>} : memref<64x128xf32, #tpu.memory_space<vmem>>, vector<8x128xf32>,
      %104 = vector.extract_strided_slice %91 {offsets = [4, 0, 0], sizes = [1, 8, 128], strides = [1, 1, 1]} : vector<8x8x128xf32> to vector<1x8x128xf32>
      %105 = vector.shape_cast %104 : vector<1x8x128xf32> to vector<8x128xf32>
      %c32 = arith.constant 32 : index
      %c0_74 = arith.constant 0 : index
      %106 = vector.load %arg8[%c32, %c0_74] : memref<64x128xf32, #tpu.memory_space<vmem>>, vector<8x128xf32>
      tpu.vector_store %arg8[%c32, %c0_74], %105 {strides = array<i32>} : memref<64x128xf32, #tpu.memory_space<vmem>>, vector<8x128xf32>,
      %107 = vector.extract_strided_slice %91 {offsets = [5, 0, 0], sizes = [1, 8, 128], strides = [1, 1, 1]} : vector<8x8x128xf32> to vector<1x8x128xf32>
      %108 = vector.shape_cast %107 : vector<1x8x128xf32> to vector<8x128xf32>
      %c40 = arith.constant 40 : index
      %c0_75 = arith.constant 0 : index
      %109 = vector.load %arg8[%c40, %c0_75] : memref<64x128xf32, #tpu.memory_space<vmem>>, vector<8x128xf32>
      tpu.vector_store %arg8[%c40, %c0_75], %108 {strides = array<i32>} : memref<64x128xf32, #tpu.memory_space<vmem>>, vector<8x128xf32>,
      %110 = vector.extract_strided_slice %91 {offsets = [6, 0, 0], sizes = [1, 8, 128], strides = [1, 1, 1]} : vector<8x8x128xf32> to vector<1x8x128xf32>
      %111 = vector.shape_cast %110 : vector<1x8x128xf32> to vector<8x128xf32>
      %c48 = arith.constant 48 : index
      %c0_76 = arith.constant 0 : index
      %112 = vector.load %arg8[%c48, %c0_76] : memref<64x128xf32, #tpu.memory_space<vmem>>, vector<8x128xf32>
      tpu.vector_store %arg8[%c48, %c0_76], %111 {strides = array<i32>} : memref<64x128xf32, #tpu.memory_space<vmem>>, vector<8x128xf32>,
      %113 = vector.extract_strided_slice %91 {offsets = [7, 0, 0], sizes = [1, 8, 128], strides = [1, 1, 1]} : vector<8x8x128xf32> to vector<1x8x128xf32>
      %114 = vector.shape_cast %113 : vector<1x8x128xf32> to vector<8x128xf32>
      %c56 = arith.constant 56 : index
      %c0_77 = arith.constant 0 : index
      %115 = vector.load %arg8[%c56, %c0_77] : memref<64x128xf32, #tpu.memory_space<vmem>>, vector<8x128xf32>
      tpu.vector_store %arg8[%c56, %c0_77], %114 {strides = array<i32>} : memref<64x128xf32, #tpu.memory_space<vmem>>, vector<8x128xf32>,
    } else {
    }
    %c0 = arith.constant 0 : index
    %c0_1 = arith.constant 0 : index
    %3 = vector.load %arg8[%c0, %c0_1] : memref<64x128xf32, #tpu.memory_space<vmem>>, vector<64x128xf32>
    %4 = arith.truncf %3 : vector<64x128xf32> to vector<64x128xbf16>
    %c0_2 = arith.constant 0 : index
    %c0_3 = arith.constant 0 : index
    %5 = vector.load %arg5[%c0_2, %c0_3] : memref<128x128xbf16, #tpu.memory_space<vmem>>, vector<128x128xbf16>
    %cst = arith.constant dense<0.000000e+00> : vector<64x128xf32>
    %6 = tpu.matmul %4, %5, %cst {dimension_numbers = #tpu.dot_dimension_numbers<[1], [0], [0], [1], [0, 0, 1, 1], [], []>} : vector<64x128xbf16>, vector<128x128xbf16>, vector<64x128xf32> -> vector<64x128xf32>
    %c0_4 = arith.constant 0 : index
    %c0_5 = arith.constant 0 : index
    %7 = vector.load %arg6[%c0_4, %c0_5] : memref<1x128xf32, #tpu.memory_space<vmem>>, vector<1x128xf32>
    %8 = vector.broadcast %7 : vector<1x128xf32> to vector<64x128xf32>
    %9 = arith.addf %6, %8 : vector<64x128xf32>
    %cst_6 = arith.constant 0.000000e+00 : f32
    %10 = vector.broadcast %cst_6 : f32 to vector<64x128xf32>
    %11 = arith.maximumf %9, %10 : vector<64x128xf32>
    %12 = vector.shape_cast %11 : vector<64x128xf32> to vector<1x64x128xf32>
    %13 = arith.truncf %12 : vector<1x64x128xf32> to vector<1x64x128xbf16>
    %c0_7 = arith.constant 0 : index
    %c0_8 = arith.constant 0 : index
    %c0_9 = arith.constant 0 : index
    %14 = vector.load %arg7[%c0_7, %c0_8, %c0_9] : memref<1x64x128xbf16, #tpu.memory_space<vmem>>, vector<1x64x128xbf16>
    tpu.vector_store %arg7[%c0_7, %c0_8, %c0_9], %13 {strides = array<i32>} : memref<1x64x128xbf16, #tpu.memory_space<vmem>>, vector<1x64x128xbf16>,
    return
  }
  func.func @transform_0(%arg0: i32, %arg1: i32) -> (i32, i32, i32, i32, i32) {
    %c0_i32 = arith.constant 0 : i32
    %c0_i32_0 = arith.constant 0 : i32
    %c0_i32_1 = arith.constant 0 : i32
    %c0_i32_2 = arith.constant 0 : i32
    %c0_i32_3 = arith.constant 0 : i32
    return %c0_i32, %arg0, %c0_i32_0, %c0_i32_1, %c0_i32_2 : i32, i32, i32, i32, i32
  }
  func.func @transform_1(%arg0: i32, %arg1: i32) -> (i32, i32) {
    %c0_i32 = arith.constant 0 : i32
    %c0_i32_0 = arith.constant 0 : i32
    %c0_i32_1 = arith.constant 0 : i32
    return %c0_i32, %c0_i32_0 : i32, i32
  }
  func.func @transform_2(%arg0: i32, %arg1: i32) -> (i32, i32) {
    %c0_i32 = arith.constant 0 : i32
    %c0_i32_0 = arith.constant 0 : i32
    %c0_i32_1 = arith.constant 0 : i32
    return %c0_i32, %c0_i32_0 : i32, i32
  }
  func.func @transform_3(%arg0: i32, %arg1: i32) -> (i32, i32) {
    %c0_i32 = arith.constant 0 : i32
    %c0_i32_0 = arith.constant 0 : i32
    return %c0_i32, %arg1 : i32, i32
  }
  func.func @transform_4(%arg0: i32, %arg1: i32) -> (i32, i32) {
    %c0_i32 = arith.constant 0 : i32
    %c0_i32_0 = arith.constant 0 : i32
    return %c0_i32, %arg1 : i32, i32
  }
  func.func @transform_5(%arg0: i32, %arg1: i32) -> (i32, i32, i32) {
    %c0_i32 = arith.constant 0 : i32
    %c0_i32_0 = arith.constant 0 : i32
    return %arg0, %c0_i32, %arg1 : i32, i32, i32
  }
}

module attributes {stable_mosaic.version = 11 : i64} {
  func.func @kernel(%arg0: i32, %arg1: i32, %arg2: memref<1x1x10x10x128xbf16, #tpu.memory_space<vmem>>, %arg3: memref<9x128xf32, #tpu.memory_space<vmem>>, %arg4: memref<1x128xf32, #tpu.memory_space<vmem>>, %arg5: memref<128x128xbf16, #tpu.memory_space<vmem>>, %arg6: memref<1x128xf32, #tpu.memory_space<vmem>>, %arg7: memref<1x64x128xbf16, #tpu.memory_space<vmem>>, %arg8: memref<64x128xf32, #tpu.memory_space<vmem>>) attributes {dimension_semantics = [#tpu.dimension_semantics<parallel>, #tpu.dimension_semantics<arbitrary>], iteration_bounds = array<i64: 2, 1>, scalar_prefetch = 0 : i64, scratch_operands = 1 : i64, tpu.core_type = #tpu.core_type<tc>, window_params = [{transform_indices = @transform_0, window_bounds = array<i64: 1, 1, 10, 10, 128>}, {pipeline_mode = #tpu.pipeline_mode<synchronous>, transform_indices = @transform_1, window_bounds = array<i64: 9, 128>}, {pipeline_mode = #tpu.pipeline_mode<synchronous>, transform_indices = @transform_2, window_bounds = array<i64: 1, 128>}, {transform_indices = @transform_3, window_bounds = array<i64: 128, 128>}, {transform_indices = @transform_4, window_bounds = array<i64: 1, 128>}, {transform_indices = @transform_5, window_bounds = array<i64: 1, 64, 128>}]} {
    %c0_i32 = arith.constant 0 : i32
    %0 = arith.cmpi eq, %arg1, %c0_i32 : i32
    %1 = arith.extui %0 : i1 to i32
    %c0_i32_0 = arith.constant 0 : i32
    %2 = arith.cmpi ne, %1, %c0_i32_0 : i32
    scf.if %2 {
      %c0_10 = arith.constant 0 : index
      %c0_11 = arith.constant 0 : index
      %c0_12 = arith.constant 0 : index
      %c0_13 = arith.constant 0 : index
      %c0_14 = arith.constant 0 : index
      %15 = vector.load %arg2[%c0_10, %c0_11, %c0_12, %c0_13, %c0_14] : memref<1x1x10x10x128xbf16, #tpu.memory_space<vmem>>, vector<1x1x8x8x128xbf16>
      %16 = vector.shape_cast %15 : vector<1x1x8x8x128xbf16> to vector<8x8x128xbf16>
      %17 = arith.extf %16 : vector<8x8x128xbf16> to vector<8x8x128xf32>
      %c0_15 = arith.constant 0 : index
      %c0_16 = arith.constant 0 : index
      %18 = vector.load %arg3[%c0_15, %c0_16] : memref<9x128xf32, #tpu.memory_space<vmem>>, vector<1x128xf32>
      %19 = vector.shape_cast %18 : vector<1x128xf32> to vector<1x1x128xf32>
      %20 = vector.broadcast %19 : vector<1x1x128xf32> to vector<8x8x128xf32>
      %21 = arith.mulf %17, %20 : vector<8x8x128xf32>
      %c0_17 = arith.constant 0 : index
      %c0_18 = arith.constant 0 : index
      %c0_19 = arith.constant 0 : index
      %c1 = arith.constant 1 : index
      %c0_20 = arith.constant 0 : index
      %22 = vector.load %arg2[%c0_17, %c0_18, %c0_19, %c1, %c0_20] : memref<1x1x10x10x128xbf16, #tpu.memory_space<vmem>>, vector<1x1x8x8x128xbf16>
      %23 = vector.shape_cast %22 : vector<1x1x8x8x128xbf16> to vector<8x8x128xbf16>
      %24 = arith.extf %23 : vector<8x8x128xbf16> to vector<8x8x128xf32>
      %c1_21 = arith.constant 1 : index
      %c0_22 = arith.constant 0 : index
      %25 = vector.load %arg3[%c1_21, %c0_22] : memref<9x128xf32, #tpu.memory_space<vmem>>, vector<1x128xf32>
      %26 = vector.shape_cast %25 : vector<1x128xf32> to vector<1x1x128xf32>
      %27 = vector.broadcast %26 : vector<1x1x128xf32> to vector<8x8x128xf32>
      %28 = arith.mulf %24, %27 : vector<8x8x128xf32>
      %c0_23 = arith.constant 0 : index
      %c0_24 = arith.constant 0 : index
      %c0_25 = arith.constant 0 : index
      %c2 = arith.constant 2 : index
      %c0_26 = arith.constant 0 : index
      %29 = vector.load %arg2[%c0_23, %c0_24, %c0_25, %c2, %c0_26] : memref<1x1x10x10x128xbf16, #tpu.memory_space<vmem>>, vector<1x1x8x8x128xbf16>
      %30 = vector.shape_cast %29 : vector<1x1x8x8x128xbf16> to vector<8x8x128xbf16>
      %31 = arith.extf %30 : vector<8x8x128xbf16> to vector<8x8x128xf32>
      %c2_27 = arith.constant 2 : index
      %c0_28 = arith.constant 0 : index
      %32 = vector.load %arg3[%c2_27, %c0_28] : memref<9x128xf32, #tpu.memory_space<vmem>>, vector<1x128xf32>
      %33 = vector.shape_cast %32 : vector<1x128xf32> to vector<1x1x128xf32>
      %34 = vector.broadcast %33 : vector<1x1x128xf32> to vector<8x8x128xf32>
      %35 = arith.mulf %31, %34 : vector<8x8x128xf32>
      %c0_29 = arith.constant 0 : index
      %c0_30 = arith.constant 0 : index
      %c1_31 = arith.constant 1 : index
      %c0_32 = arith.constant 0 : index
      %c0_33 = arith.constant 0 : index
      %36 = vector.load %arg2[%c0_29, %c0_30, %c1_31, %c0_32, %c0_33] : memref<1x1x10x10x128xbf16, #tpu.memory_space<vmem>>, vector<1x1x8x8x128xbf16>
      %37 = vector.shape_cast %36 : vector<1x1x8x8x128xbf16> to vector<8x8x128xbf16>
      %38 = arith.extf %37 : vector<8x8x128xbf16> to vector<8x8x128xf32>
      %c3 = arith.constant 3 : index
      %c0_34 = arith.constant 0 : index
      %39 = vector.load %arg3[%c3, %c0_34] : memref<9x128xf32, #tpu.memory_space<vmem>>, vector<1x128xf32>
      %40 = vector.shape_cast %39 : vector<1x128xf32> to vector<1x1x128xf32>
      %41 = vector.broadcast %40 : vector<1x1x128xf32> to vector<8x8x128xf32>
      %42 = arith.mulf %38, %41 : vector<8x8x128xf32>
      %c0_35 = arith.constant 0 : index
      %c0_36 = arith.constant 0 : index
      %c1_37 = arith.constant 1 : index
      %c1_38 = arith.constant 1 : index
      %c0_39 = arith.constant 0 : index
      %43 = vector.load %arg2[%c0_35, %c0_36, %c1_37, %c1_38, %c0_39] : memref<1x1x10x10x128xbf16, #tpu.memory_space<vmem>>, vector<1x1x8x8x128xbf16>
      %44 = vector.shape_cast %43 : vector<1x1x8x8x128xbf16> to vector<8x8x128xbf16>
      %45 = arith.extf %44 : vector<8x8x128xbf16> to vector<8x8x128xf32>
      %c4 = arith.constant 4 : index
      %c0_40 = arith.constant 0 : index
      %46 = vector.load %arg3[%c4, %c0_40] : memref<9x128xf32, #tpu.memory_space<vmem>>, vector<1x128xf32>
      %47 = vector.shape_cast %46 : vector<1x128xf32> to vector<1x1x128xf32>
      %48 = vector.broadcast %47 : vector<1x1x128xf32> to vector<8x8x128xf32>
      %49 = arith.mulf %45, %48 : vector<8x8x128xf32>
      %c0_41 = arith.constant 0 : index
      %c0_42 = arith.constant 0 : index
      %c1_43 = arith.constant 1 : index
      %c2_44 = arith.constant 2 : index
      %c0_45 = arith.constant 0 : index
      %50 = vector.load %arg2[%c0_41, %c0_42, %c1_43, %c2_44, %c0_45] : memref<1x1x10x10x128xbf16, #tpu.memory_space<vmem>>, vector<1x1x8x8x128xbf16>
      %51 = vector.shape_cast %50 : vector<1x1x8x8x128xbf16> to vector<8x8x128xbf16>
      %52 = arith.extf %51 : vector<8x8x128xbf16> to vector<8x8x128xf32>
      %c5 = arith.constant 5 : index
      %c0_46 = arith.constant 0 : index
      %53 = vector.load %arg3[%c5, %c0_46] : memref<9x128xf32, #tpu.memory_space<vmem>>, vector<1x128xf32>
      %54 = vector.shape_cast %53 : vector<1x128xf32> to vector<1x1x128xf32>
      %55 = vector.broadcast %54 : vector<1x1x128xf32> to vector<8x8x128xf32>
      %56 = arith.mulf %52, %55 : vector<8x8x128xf32>
      %c0_47 = arith.constant 0 : index
      %c0_48 = arith.constant 0 : index
      %c2_49 = arith.constant 2 : index
      %c0_50 = arith.constant 0 : index
      %c0_51 = arith.constant 0 : index
      %57 = vector.load %arg2[%c0_47, %c0_48, %c2_49, %c0_50, %c0_51] : memref<1x1x10x10x128xbf16, #tpu.memory_space<vmem>>, vector<1x1x8x8x128xbf16>
      %58 = vector.shape_cast %57 : vector<1x1x8x8x128xbf16> to vector<8x8x128xbf16>
      %59 = arith.extf %58 : vector<8x8x128xbf16> to vector<8x8x128xf32>
      %c6 = arith.constant 6 : index
      %c0_52 = arith.constant 0 : index
      %60 = vector.load %arg3[%c6, %c0_52] : memref<9x128xf32, #tpu.memory_space<vmem>>, vector<1x128xf32>
      %61 = vector.shape_cast %60 : vector<1x128xf32> to vector<1x1x128xf32>
      %62 = vector.broadcast %61 : vector<1x1x128xf32> to vector<8x8x128xf32>
      %63 = arith.mulf %59, %62 : vector<8x8x128xf32>
      %c0_53 = arith.constant 0 : index
      %c0_54 = arith.constant 0 : index
      %c2_55 = arith.constant 2 : index
      %c1_56 = arith.constant 1 : index
      %c0_57 = arith.constant 0 : index
      %64 = vector.load %arg2[%c0_53, %c0_54, %c2_55, %c1_56, %c0_57] : memref<1x1x10x10x128xbf16, #tpu.memory_space<vmem>>, vector<1x1x8x8x128xbf16>
      %65 = vector.shape_cast %64 : vector<1x1x8x8x128xbf16> to vector<8x8x128xbf16>
      %66 = arith.extf %65 : vector<8x8x128xbf16> to vector<8x8x128xf32>
      %c7 = arith.constant 7 : index
      %c0_58 = arith.constant 0 : index
      %67 = vector.load %arg3[%c7, %c0_58] : memref<9x128xf32, #tpu.memory_space<vmem>>, vector<1x128xf32>
      %68 = vector.shape_cast %67 : vector<1x128xf32> to vector<1x1x128xf32>
      %69 = vector.broadcast %68 : vector<1x1x128xf32> to vector<8x8x128xf32>
      %70 = arith.mulf %66, %69 : vector<8x8x128xf32>
      %c0_59 = arith.constant 0 : index
      %c0_60 = arith.constant 0 : index
      %c2_61 = arith.constant 2 : index
      %c2_62 = arith.constant 2 : index
      %c0_63 = arith.constant 0 : index
      %71 = vector.load %arg2[%c0_59, %c0_60, %c2_61, %c2_62, %c0_63] : memref<1x1x10x10x128xbf16, #tpu.memory_space<vmem>>, vector<1x1x8x8x128xbf16>
      %72 = vector.shape_cast %71 : vector<1x1x8x8x128xbf16> to vector<8x8x128xbf16>
      %73 = arith.extf %72 : vector<8x8x128xbf16> to vector<8x8x128xf32>
      %c8 = arith.constant 8 : index
      %c0_64 = arith.constant 0 : index
      %74 = vector.load %arg3[%c8, %c0_64] : memref<9x128xf32, #tpu.memory_space<vmem>>, vector<1x128xf32>
      %75 = vector.shape_cast %74 : vector<1x128xf32> to vector<1x1x128xf32>
      %76 = vector.broadcast %75 : vector<1x1x128xf32> to vector<8x8x128xf32>
      %77 = arith.mulf %73, %76 : vector<8x8x128xf32>
      %78 = arith.addf %21, %28 : vector<8x8x128xf32>
      %79 = arith.addf %35, %42 : vector<8x8x128xf32>
      %80 = arith.addf %49, %56 : vector<8x8x128xf32>
      %81 = arith.addf %63, %70 : vector<8x8x128xf32>
      %82 = arith.addf %78, %79 : vector<8x8x128xf32>
      %83 = arith.addf %80, %81 : vector<8x8x128xf32>
      %84 = arith.addf %82, %83 : vector<8x8x128xf32>
      %85 = arith.addf %84, %77 : vector<8x8x128xf32>
      %c0_65 = arith.constant 0 : index
      %c0_66 = arith.constant 0 : index
      %86 = vector.load %arg4[%c0_65, %c0_66] : memref<1x128xf32, #tpu.memory_space<vmem>>, vector<1x128xf32>
      %87 = vector.shape_cast %86 : vector<1x128xf32> to vector<1x1x128xf32>
      %88 = vector.broadcast %87 : vector<1x1x128xf32> to vector<8x8x128xf32>
      %89 = arith.addf %85, %88 : vector<8x8x128xf32>
      %cst_67 = arith.constant 0.000000e+00 : f32
      %90 = vector.broadcast %cst_67 : f32 to vector<8x8x128xf32>
      %91 = arith.maximumf %89, %90 : vector<8x8x128xf32>
      %92 = vector.extract_strided_slice %91 {offsets = [0, 0, 0], sizes = [1, 8, 128], strides = [1, 1, 1]} : vector<8x8x128xf32> to vector<1x8x128xf32>
      %93 = vector.shape_cast %92 : vector<1x8x128xf32> to vector<8x128xf32>
      %c0_68 = arith.constant 0 : index
      %c0_69 = arith.constant 0 : index
      %94 = vector.load %arg8[%c0_68, %c0_69] : memref<64x128xf32, #tpu.memory_space<vmem>>, vector<8x128xf32>
      tpu.vector_store %arg8[%c0_68, %c0_69], %93 {strides = array<i32>} : memref<64x128xf32, #tpu.memory_space<vmem>>, vector<8x128xf32>,
      %95 = vector.extract_strided_slice %91 {offsets = [1, 0, 0], sizes = [1, 8, 128], strides = [1, 1, 1]} : vector<8x8x128xf32> to vector<1x8x128xf32>
      %96 = vector.shape_cast %95 : vector<1x8x128xf32> to vector<8x128xf32>
      %c8_70 = arith.constant 8 : index
      %c0_71 = arith.constant 0 : index
      %97 = vector.load %arg8[%c8_70, %c0_71] : memref<64x128xf32, #tpu.memory_space<vmem>>, vector<8x128xf32>
      tpu.vector_store %arg8[%c8_70, %c0_71], %96 {strides = array<i32>} : memref<64x128xf32, #tpu.memory_space<vmem>>, vector<8x128xf32>,
      %98 = vector.extract_strided_slice %91 {offsets = [2, 0, 0], sizes = [1, 8, 128], strides = [1, 1, 1]} : vector<8x8x128xf32> to vector<1x8x128xf32>
      %99 = vector.shape_cast %98 : vector<1x8x128xf32> to vector<8x128xf32>
      %c16 = arith.constant 16 : index
      %c0_72 = arith.constant 0 : index
      %100 = vector.load %arg8[%c16, %c0_72] : memref<64x128xf32, #tpu.memory_space<vmem>>, vector<8x128xf32>
      tpu.vector_store %arg8[%c16, %c0_72], %99 {strides = array<i32>} : memref<64x128xf32, #tpu.memory_space<vmem>>, vector<8x128xf32>,
      %101 = vector.extract_strided_slice %91 {offsets = [3, 0, 0], sizes = [1, 8, 128], strides = [1, 1, 1]} : vector<8x8x128xf32> to vector<1x8x128xf32>
      %102 = vector.shape_cast %101 : vector<1x8x128xf32> to vector<8x128xf32>
      %c24 = arith.constant 24 : index
      %c0_73 = arith.constant 0 : index
      %103 = vector.load %arg8[%c24, %c0_73] : memref<64x128xf32, #tpu.memory_space<vmem>>, vector<8x128xf32>
      tpu.vector_store %arg8[%c24, %c0_73], %102 {strides = array<i32>} : memref<64x128xf32, #tpu.memory_space<vmem>>, vector<8x128xf32>,
      %104 = vector.extract_strided_slice %91 {offsets = [4, 0, 0], sizes = [1, 8, 128], strides = [1, 1, 1]} : vector<8x8x128xf32> to vector<1x8x128xf32>
      %105 = vector.shape_cast %104 : vector<1x8x128xf32> to vector<8x128xf32>
      %c32 = arith.constant 32 : index
      %c0_74 = arith.constant 0 : index
      %106 = vector.load %arg8[%c32, %c0_74] : memref<64x128xf32, #tpu.memory_space<vmem>>, vector<8x128xf32>
      tpu.vector_store %arg8[%c32, %c0_74], %105 {strides = array<i32>} : memref<64x128xf32, #tpu.memory_space<vmem>>, vector<8x128xf32>,
      %107 = vector.extract_strided_slice %91 {offsets = [5, 0, 0], sizes = [1, 8, 128], strides = [1, 1, 1]} : vector<8x8x128xf32> to vector<1x8x128xf32>
      %108 = vector.shape_cast %107 : vector<1x8x128xf32> to vector<8x128xf32>
      %c40 = arith.constant 40 : index
      %c0_75 = arith.constant 0 : index
      %109 = vector.load %arg8[%c40, %c0_75] : memref<64x128xf32, #tpu.memory_space<vmem>>, vector<8x128xf32>
      tpu.vector_store %arg8[%c40, %c0_75], %108 {strides = array<i32>} : memref<64x128xf32, #tpu.memory_space<vmem>>, vector<8x128xf32>,
      %110 = vector.extract_strided_slice %91 {offsets = [6, 0, 0], sizes = [1, 8, 128], strides = [1, 1, 1]} : vector<8x8x128xf32> to vector<1x8x128xf32>
      %111 = vector.shape_cast %110 : vector<1x8x128xf32> to vector<8x128xf32>
      %c48 = arith.constant 48 : index
      %c0_76 = arith.constant 0 : index
      %112 = vector.load %arg8[%c48, %c0_76] : memref<64x128xf32, #tpu.memory_space<vmem>>, vector<8x128xf32>
      tpu.vector_store %arg8[%c48, %c0_76], %111 {strides = array<i32>} : memref<64x128xf32, #tpu.memory_space<vmem>>, vector<8x128xf32>,
      %113 = vector.extract_strided_slice %91 {offsets = [7, 0, 0], sizes = [1, 8, 128], strides = [1, 1, 1]} : vector<8x8x128xf32> to vector<1x8x128xf32>
      %114 = vector.shape_cast %113 : vector<1x8x128xf32> to vector<8x128xf32>
      %c56 = arith.constant 56 : index
      %c0_77 = arith.constant 0 : index
      %115 = vector.load %arg8[%c56, %c0_77] : memref<64x128xf32, #tpu.memory_space<vmem>>, vector<8x128xf32>
      tpu.vector_store %arg8[%c56, %c0_77], %114 {strides = array<i32>} : memref<64x128xf32, #tpu.memory_space<vmem>>, vector<8x128xf32>,
    } else {
    }
    %c0 = arith.constant 0 : index
    %c0_1 = arith.constant 0 : index
    %3 = vector.load %arg8[%c0, %c0_1] : memref<64x128xf32, #tpu.memory_space<vmem>>, vector<64x128xf32>
    %4 = arith.truncf %3 : vector<64x128xf32> to vector<64x128xbf16>
    %c0_2 = arith.constant 0 : index
    %c0_3 = arith.constant 0 : index
    %5 = vector.load %arg5[%c0_2, %c0_3] : memref<128x128xbf16, #tpu.memory_space<vmem>>, vector<128x128xbf16>
    %cst = arith.constant dense<0.000000e+00> : vector<64x128xf32>
    %6 = tpu.matmul %4, %5, %cst {dimension_numbers = #tpu.dot_dimension_numbers<[1], [0], [0], [1], [0, 0, 1, 1], [], []>} : vector<64x128xbf16>, vector<128x128xbf16>, vector<64x128xf32> -> vector<64x128xf32>
    %c0_4 = arith.constant 0 : index
    %c0_5 = arith.constant 0 : index
    %7 = vector.load %arg6[%c0_4, %c0_5] : memref<1x128xf32, #tpu.memory_space<vmem>>, vector<1x128xf32>
    %8 = vector.broadcast %7 : vector<1x128xf32> to vector<64x128xf32>
    %9 = arith.addf %6, %8 : vector<64x128xf32>
    %cst_6 = arith.constant 0.000000e+00 : f32
    %10 = vector.broadcast %cst_6 : f32 to vector<64x128xf32>
    %11 = arith.maximumf %9, %10 : vector<64x128xf32>
    %12 = vector.shape_cast %11 : vector<64x128xf32> to vector<1x64x128xf32>
    %13 = arith.truncf %12 : vector<1x64x128xf32> to vector<1x64x128xbf16>
    %c0_7 = arith.constant 0 : index
    %c0_8 = arith.constant 0 : index
    %c0_9 = arith.constant 0 : index
    %14 = vector.load %arg7[%c0_7, %c0_8, %c0_9] : memref<1x64x128xbf16, #tpu.memory_space<vmem>>, vector<1x64x128xbf16>
    tpu.vector_store %arg7[%c0_7, %c0_8, %c0_9], %13 {strides = array<i32>} : memref<1x64x128xbf16, #tpu.memory_space<vmem>>, vector<1x64x128xbf16>,
    return
  }
  func.func @transform_0(%arg0: i32, %arg1: i32) -> (i32, i32, i32, i32, i32) {
    %c0_i32 = arith.constant 0 : i32
    %c0_i32_0 = arith.constant 0 : i32
    %c0_i32_1 = arith.constant 0 : i32
    %c0_i32_2 = arith.constant 0 : i32
    %c0_i32_3 = arith.constant 0 : i32
    return %c0_i32, %arg0, %c0_i32_0, %c0_i32_1, %c0_i32_2 : i32, i32, i32, i32, i32
  }
  func.func @transform_1(%arg0: i32, %arg1: i32) -> (i32, i32) {
    %c0_i32 = arith.constant 0 : i32
    %c0_i32_0 = arith.constant 0 : i32
    %c0_i32_1 = arith.constant 0 : i32
    return %c0_i32, %c0_i32_0 : i32, i32
  }
  func.func @transform_2(%arg0: i32, %arg1: i32) -> (i32, i32) {
    %c0_i32 = arith.constant 0 : i32
    %c0_i32_0 = arith.constant 0 : i32
    %c0_i32_1 = arith.constant 0 : i32
    return %c0_i32, %c0_i32_0 : i32, i32
  }
  func.func @transform_3(%arg0: i32, %arg1: i32) -> (i32, i32) {
    %c0_i32 = arith.constant 0 : i32
    %c0_i32_0 = arith.constant 0 : i32
    return %c0_i32, %arg1 : i32, i32
  }
  func.func @transform_4(%arg0: i32, %arg1: i32) -> (i32, i32) {
    %c0_i32 = arith.constant 0 : i32
    %c0_i32_0 = arith.constant 0 : i32
    return %c0_i32, %arg1 : i32, i32
  }
  func.func @transform_5(%arg0: i32, %arg1: i32) -> (i32, i32, i32) {
    %c0_i32 = arith.constant 0 : i32
    %c0_i32_0 = arith.constant 0 : i32
    return %arg0, %c0_i32, %arg1 : i32, i32, i32
  }
}

module attributes {stable_mosaic.version = 11 : i64} {
  func.func @kernel(%arg0: i32, %arg1: i32, %arg2: memref<1x1x6x6x256xbf16, #tpu.memory_space<vmem>>, %arg3: memref<9x256xf32, #tpu.memory_space<vmem>>, %arg4: memref<1x256xf32, #tpu.memory_space<vmem>>, %arg5: memref<256x256xbf16, #tpu.memory_space<vmem>>, %arg6: memref<1x256xf32, #tpu.memory_space<vmem>>, %arg7: memref<1x16x256xbf16, #tpu.memory_space<vmem>>, %arg8: memref<16x256xf32, #tpu.memory_space<vmem>>) attributes {dimension_semantics = [#tpu.dimension_semantics<parallel>, #tpu.dimension_semantics<arbitrary>], iteration_bounds = array<i64: 2, 1>, scalar_prefetch = 0 : i64, scratch_operands = 1 : i64, tpu.core_type = #tpu.core_type<tc>, window_params = [{transform_indices = @transform_0, window_bounds = array<i64: 1, 1, 6, 6, 256>}, {pipeline_mode = #tpu.pipeline_mode<synchronous>, transform_indices = @transform_1, window_bounds = array<i64: 9, 256>}, {pipeline_mode = #tpu.pipeline_mode<synchronous>, transform_indices = @transform_2, window_bounds = array<i64: 1, 256>}, {transform_indices = @transform_3, window_bounds = array<i64: 256, 256>}, {transform_indices = @transform_4, window_bounds = array<i64: 1, 256>}, {transform_indices = @transform_5, window_bounds = array<i64: 1, 16, 256>}]} {
    %c0_i32 = arith.constant 0 : i32
    %0 = arith.cmpi eq, %arg1, %c0_i32 : i32
    %1 = arith.extui %0 : i1 to i32
    %c0_i32_0 = arith.constant 0 : i32
    %2 = arith.cmpi ne, %1, %c0_i32_0 : i32
    scf.if %2 {
      %c0_10 = arith.constant 0 : index
      %c0_11 = arith.constant 0 : index
      %c0_12 = arith.constant 0 : index
      %c0_13 = arith.constant 0 : index
      %c0_14 = arith.constant 0 : index
      %15 = vector.load %arg2[%c0_10, %c0_11, %c0_12, %c0_13, %c0_14] : memref<1x1x6x6x256xbf16, #tpu.memory_space<vmem>>, vector<1x1x4x4x256xbf16>
      %16 = vector.shape_cast %15 : vector<1x1x4x4x256xbf16> to vector<4x4x256xbf16>
      %17 = arith.extf %16 : vector<4x4x256xbf16> to vector<4x4x256xf32>
      %c0_15 = arith.constant 0 : index
      %c0_16 = arith.constant 0 : index
      %18 = vector.load %arg3[%c0_15, %c0_16] : memref<9x256xf32, #tpu.memory_space<vmem>>, vector<1x256xf32>
      %19 = vector.shape_cast %18 : vector<1x256xf32> to vector<1x1x256xf32>
      %20 = vector.broadcast %19 : vector<1x1x256xf32> to vector<4x4x256xf32>
      %21 = arith.mulf %17, %20 : vector<4x4x256xf32>
      %c0_17 = arith.constant 0 : index
      %c0_18 = arith.constant 0 : index
      %c0_19 = arith.constant 0 : index
      %c1 = arith.constant 1 : index
      %c0_20 = arith.constant 0 : index
      %22 = vector.load %arg2[%c0_17, %c0_18, %c0_19, %c1, %c0_20] : memref<1x1x6x6x256xbf16, #tpu.memory_space<vmem>>, vector<1x1x4x4x256xbf16>
      %23 = vector.shape_cast %22 : vector<1x1x4x4x256xbf16> to vector<4x4x256xbf16>
      %24 = arith.extf %23 : vector<4x4x256xbf16> to vector<4x4x256xf32>
      %c1_21 = arith.constant 1 : index
      %c0_22 = arith.constant 0 : index
      %25 = vector.load %arg3[%c1_21, %c0_22] : memref<9x256xf32, #tpu.memory_space<vmem>>, vector<1x256xf32>
      %26 = vector.shape_cast %25 : vector<1x256xf32> to vector<1x1x256xf32>
      %27 = vector.broadcast %26 : vector<1x1x256xf32> to vector<4x4x256xf32>
      %28 = arith.mulf %24, %27 : vector<4x4x256xf32>
      %c0_23 = arith.constant 0 : index
      %c0_24 = arith.constant 0 : index
      %c0_25 = arith.constant 0 : index
      %c2 = arith.constant 2 : index
      %c0_26 = arith.constant 0 : index
      %29 = vector.load %arg2[%c0_23, %c0_24, %c0_25, %c2, %c0_26] : memref<1x1x6x6x256xbf16, #tpu.memory_space<vmem>>, vector<1x1x4x4x256xbf16>
      %30 = vector.shape_cast %29 : vector<1x1x4x4x256xbf16> to vector<4x4x256xbf16>
      %31 = arith.extf %30 : vector<4x4x256xbf16> to vector<4x4x256xf32>
      %c2_27 = arith.constant 2 : index
      %c0_28 = arith.constant 0 : index
      %32 = vector.load %arg3[%c2_27, %c0_28] : memref<9x256xf32, #tpu.memory_space<vmem>>, vector<1x256xf32>
      %33 = vector.shape_cast %32 : vector<1x256xf32> to vector<1x1x256xf32>
      %34 = vector.broadcast %33 : vector<1x1x256xf32> to vector<4x4x256xf32>
      %35 = arith.mulf %31, %34 : vector<4x4x256xf32>
      %c0_29 = arith.constant 0 : index
      %c0_30 = arith.constant 0 : index
      %c1_31 = arith.constant 1 : index
      %c0_32 = arith.constant 0 : index
      %c0_33 = arith.constant 0 : index
      %36 = vector.load %arg2[%c0_29, %c0_30, %c1_31, %c0_32, %c0_33] : memref<1x1x6x6x256xbf16, #tpu.memory_space<vmem>>, vector<1x1x4x4x256xbf16>
      %37 = vector.shape_cast %36 : vector<1x1x4x4x256xbf16> to vector<4x4x256xbf16>
      %38 = arith.extf %37 : vector<4x4x256xbf16> to vector<4x4x256xf32>
      %c3 = arith.constant 3 : index
      %c0_34 = arith.constant 0 : index
      %39 = vector.load %arg3[%c3, %c0_34] : memref<9x256xf32, #tpu.memory_space<vmem>>, vector<1x256xf32>
      %40 = vector.shape_cast %39 : vector<1x256xf32> to vector<1x1x256xf32>
      %41 = vector.broadcast %40 : vector<1x1x256xf32> to vector<4x4x256xf32>
      %42 = arith.mulf %38, %41 : vector<4x4x256xf32>
      %c0_35 = arith.constant 0 : index
      %c0_36 = arith.constant 0 : index
      %c1_37 = arith.constant 1 : index
      %c1_38 = arith.constant 1 : index
      %c0_39 = arith.constant 0 : index
      %43 = vector.load %arg2[%c0_35, %c0_36, %c1_37, %c1_38, %c0_39] : memref<1x1x6x6x256xbf16, #tpu.memory_space<vmem>>, vector<1x1x4x4x256xbf16>
      %44 = vector.shape_cast %43 : vector<1x1x4x4x256xbf16> to vector<4x4x256xbf16>
      %45 = arith.extf %44 : vector<4x4x256xbf16> to vector<4x4x256xf32>
      %c4 = arith.constant 4 : index
      %c0_40 = arith.constant 0 : index
      %46 = vector.load %arg3[%c4, %c0_40] : memref<9x256xf32, #tpu.memory_space<vmem>>, vector<1x256xf32>
      %47 = vector.shape_cast %46 : vector<1x256xf32> to vector<1x1x256xf32>
      %48 = vector.broadcast %47 : vector<1x1x256xf32> to vector<4x4x256xf32>
      %49 = arith.mulf %45, %48 : vector<4x4x256xf32>
      %c0_41 = arith.constant 0 : index
      %c0_42 = arith.constant 0 : index
      %c1_43 = arith.constant 1 : index
      %c2_44 = arith.constant 2 : index
      %c0_45 = arith.constant 0 : index
      %50 = vector.load %arg2[%c0_41, %c0_42, %c1_43, %c2_44, %c0_45] : memref<1x1x6x6x256xbf16, #tpu.memory_space<vmem>>, vector<1x1x4x4x256xbf16>
      %51 = vector.shape_cast %50 : vector<1x1x4x4x256xbf16> to vector<4x4x256xbf16>
      %52 = arith.extf %51 : vector<4x4x256xbf16> to vector<4x4x256xf32>
      %c5 = arith.constant 5 : index
      %c0_46 = arith.constant 0 : index
      %53 = vector.load %arg3[%c5, %c0_46] : memref<9x256xf32, #tpu.memory_space<vmem>>, vector<1x256xf32>
      %54 = vector.shape_cast %53 : vector<1x256xf32> to vector<1x1x256xf32>
      %55 = vector.broadcast %54 : vector<1x1x256xf32> to vector<4x4x256xf32>
      %56 = arith.mulf %52, %55 : vector<4x4x256xf32>
      %c0_47 = arith.constant 0 : index
      %c0_48 = arith.constant 0 : index
      %c2_49 = arith.constant 2 : index
      %c0_50 = arith.constant 0 : index
      %c0_51 = arith.constant 0 : index
      %57 = vector.load %arg2[%c0_47, %c0_48, %c2_49, %c0_50, %c0_51] : memref<1x1x6x6x256xbf16, #tpu.memory_space<vmem>>, vector<1x1x4x4x256xbf16>
      %58 = vector.shape_cast %57 : vector<1x1x4x4x256xbf16> to vector<4x4x256xbf16>
      %59 = arith.extf %58 : vector<4x4x256xbf16> to vector<4x4x256xf32>
      %c6 = arith.constant 6 : index
      %c0_52 = arith.constant 0 : index
      %60 = vector.load %arg3[%c6, %c0_52] : memref<9x256xf32, #tpu.memory_space<vmem>>, vector<1x256xf32>
      %61 = vector.shape_cast %60 : vector<1x256xf32> to vector<1x1x256xf32>
      %62 = vector.broadcast %61 : vector<1x1x256xf32> to vector<4x4x256xf32>
      %63 = arith.mulf %59, %62 : vector<4x4x256xf32>
      %c0_53 = arith.constant 0 : index
      %c0_54 = arith.constant 0 : index
      %c2_55 = arith.constant 2 : index
      %c1_56 = arith.constant 1 : index
      %c0_57 = arith.constant 0 : index
      %64 = vector.load %arg2[%c0_53, %c0_54, %c2_55, %c1_56, %c0_57] : memref<1x1x6x6x256xbf16, #tpu.memory_space<vmem>>, vector<1x1x4x4x256xbf16>
      %65 = vector.shape_cast %64 : vector<1x1x4x4x256xbf16> to vector<4x4x256xbf16>
      %66 = arith.extf %65 : vector<4x4x256xbf16> to vector<4x4x256xf32>
      %c7 = arith.constant 7 : index
      %c0_58 = arith.constant 0 : index
      %67 = vector.load %arg3[%c7, %c0_58] : memref<9x256xf32, #tpu.memory_space<vmem>>, vector<1x256xf32>
      %68 = vector.shape_cast %67 : vector<1x256xf32> to vector<1x1x256xf32>
      %69 = vector.broadcast %68 : vector<1x1x256xf32> to vector<4x4x256xf32>
      %70 = arith.mulf %66, %69 : vector<4x4x256xf32>
      %c0_59 = arith.constant 0 : index
      %c0_60 = arith.constant 0 : index
      %c2_61 = arith.constant 2 : index
      %c2_62 = arith.constant 2 : index
      %c0_63 = arith.constant 0 : index
      %71 = vector.load %arg2[%c0_59, %c0_60, %c2_61, %c2_62, %c0_63] : memref<1x1x6x6x256xbf16, #tpu.memory_space<vmem>>, vector<1x1x4x4x256xbf16>
      %72 = vector.shape_cast %71 : vector<1x1x4x4x256xbf16> to vector<4x4x256xbf16>
      %73 = arith.extf %72 : vector<4x4x256xbf16> to vector<4x4x256xf32>
      %c8 = arith.constant 8 : index
      %c0_64 = arith.constant 0 : index
      %74 = vector.load %arg3[%c8, %c0_64] : memref<9x256xf32, #tpu.memory_space<vmem>>, vector<1x256xf32>
      %75 = vector.shape_cast %74 : vector<1x256xf32> to vector<1x1x256xf32>
      %76 = vector.broadcast %75 : vector<1x1x256xf32> to vector<4x4x256xf32>
      %77 = arith.mulf %73, %76 : vector<4x4x256xf32>
      %78 = arith.addf %21, %28 : vector<4x4x256xf32>
      %79 = arith.addf %35, %42 : vector<4x4x256xf32>
      %80 = arith.addf %49, %56 : vector<4x4x256xf32>
      %81 = arith.addf %63, %70 : vector<4x4x256xf32>
      %82 = arith.addf %78, %79 : vector<4x4x256xf32>
      %83 = arith.addf %80, %81 : vector<4x4x256xf32>
      %84 = arith.addf %82, %83 : vector<4x4x256xf32>
      %85 = arith.addf %84, %77 : vector<4x4x256xf32>
      %c0_65 = arith.constant 0 : index
      %c0_66 = arith.constant 0 : index
      %86 = vector.load %arg4[%c0_65, %c0_66] : memref<1x256xf32, #tpu.memory_space<vmem>>, vector<1x256xf32>
      %87 = vector.shape_cast %86 : vector<1x256xf32> to vector<1x1x256xf32>
      %88 = vector.broadcast %87 : vector<1x1x256xf32> to vector<4x4x256xf32>
      %89 = arith.addf %85, %88 : vector<4x4x256xf32>
      %cst_67 = arith.constant 0.000000e+00 : f32
      %90 = vector.broadcast %cst_67 : f32 to vector<4x4x256xf32>
      %91 = arith.maximumf %89, %90 : vector<4x4x256xf32>
      %92 = vector.extract_strided_slice %91 {offsets = [0, 0, 0], sizes = [1, 4, 256], strides = [1, 1, 1]} : vector<4x4x256xf32> to vector<1x4x256xf32>
      %93 = vector.shape_cast %92 : vector<1x4x256xf32> to vector<4x256xf32>
      %c0_68 = arith.constant 0 : index
      %c0_69 = arith.constant 0 : index
      %94 = vector.load %arg8[%c0_68, %c0_69] : memref<16x256xf32, #tpu.memory_space<vmem>>, vector<4x256xf32>
      tpu.vector_store %arg8[%c0_68, %c0_69], %93 {strides = array<i32>} : memref<16x256xf32, #tpu.memory_space<vmem>>, vector<4x256xf32>,
      %95 = vector.extract_strided_slice %91 {offsets = [1, 0, 0], sizes = [1, 4, 256], strides = [1, 1, 1]} : vector<4x4x256xf32> to vector<1x4x256xf32>
      %96 = vector.shape_cast %95 : vector<1x4x256xf32> to vector<4x256xf32>
      %c4_70 = arith.constant 4 : index
      %c0_71 = arith.constant 0 : index
      %97 = vector.load %arg8[%c4_70, %c0_71] : memref<16x256xf32, #tpu.memory_space<vmem>>, vector<4x256xf32>
      tpu.vector_store %arg8[%c4_70, %c0_71], %96 {strides = array<i32>} : memref<16x256xf32, #tpu.memory_space<vmem>>, vector<4x256xf32>,
      %98 = vector.extract_strided_slice %91 {offsets = [2, 0, 0], sizes = [1, 4, 256], strides = [1, 1, 1]} : vector<4x4x256xf32> to vector<1x4x256xf32>
      %99 = vector.shape_cast %98 : vector<1x4x256xf32> to vector<4x256xf32>
      %c8_72 = arith.constant 8 : index
      %c0_73 = arith.constant 0 : index
      %100 = vector.load %arg8[%c8_72, %c0_73] : memref<16x256xf32, #tpu.memory_space<vmem>>, vector<4x256xf32>
      tpu.vector_store %arg8[%c8_72, %c0_73], %99 {strides = array<i32>} : memref<16x256xf32, #tpu.memory_space<vmem>>, vector<4x256xf32>,
      %101 = vector.extract_strided_slice %91 {offsets = [3, 0, 0], sizes = [1, 4, 256], strides = [1, 1, 1]} : vector<4x4x256xf32> to vector<1x4x256xf32>
      %102 = vector.shape_cast %101 : vector<1x4x256xf32> to vector<4x256xf32>
      %c12 = arith.constant 12 : index
      %c0_74 = arith.constant 0 : index
      %103 = vector.load %arg8[%c12, %c0_74] : memref<16x256xf32, #tpu.memory_space<vmem>>, vector<4x256xf32>
      tpu.vector_store %arg8[%c12, %c0_74], %102 {strides = array<i32>} : memref<16x256xf32, #tpu.memory_space<vmem>>, vector<4x256xf32>,
    } else {
    }
    %c0 = arith.constant 0 : index
    %c0_1 = arith.constant 0 : index
    %3 = vector.load %arg8[%c0, %c0_1] : memref<16x256xf32, #tpu.memory_space<vmem>>, vector<16x256xf32>
    %4 = arith.truncf %3 : vector<16x256xf32> to vector<16x256xbf16>
    %c0_2 = arith.constant 0 : index
    %c0_3 = arith.constant 0 : index
    %5 = vector.load %arg5[%c0_2, %c0_3] : memref<256x256xbf16, #tpu.memory_space<vmem>>, vector<256x256xbf16>
    %cst = arith.constant dense<0.000000e+00> : vector<16x256xf32>
    %6 = tpu.matmul %4, %5, %cst {dimension_numbers = #tpu.dot_dimension_numbers<[1], [0], [0], [1], [0, 0, 1, 1], [], []>} : vector<16x256xbf16>, vector<256x256xbf16>, vector<16x256xf32> -> vector<16x256xf32>
    %c0_4 = arith.constant 0 : index
    %c0_5 = arith.constant 0 : index
    %7 = vector.load %arg6[%c0_4, %c0_5] : memref<1x256xf32, #tpu.memory_space<vmem>>, vector<1x256xf32>
    %8 = vector.broadcast %7 : vector<1x256xf32> to vector<16x256xf32>
    %9 = arith.addf %6, %8 : vector<16x256xf32>
    %cst_6 = arith.constant 0.000000e+00 : f32
    %10 = vector.broadcast %cst_6 : f32 to vector<16x256xf32>
    %11 = arith.maximumf %9, %10 : vector<16x256xf32>
    %12 = vector.shape_cast %11 : vector<16x256xf32> to vector<1x16x256xf32>
    %13 = arith.truncf %12 : vector<1x16x256xf32> to vector<1x16x256xbf16>
    %c0_7 = arith.constant 0 : index
    %c0_8 = arith.constant 0 : index
    %c0_9 = arith.constant 0 : index
    %14 = vector.load %arg7[%c0_7, %c0_8, %c0_9] : memref<1x16x256xbf16, #tpu.memory_space<vmem>>, vector<1x16x256xbf16>
    tpu.vector_store %arg7[%c0_7, %c0_8, %c0_9], %13 {strides = array<i32>} : memref<1x16x256xbf16, #tpu.memory_space<vmem>>, vector<1x16x256xbf16>,
    return
  }
  func.func @transform_0(%arg0: i32, %arg1: i32) -> (i32, i32, i32, i32, i32) {
    %c0_i32 = arith.constant 0 : i32
    %c0_i32_0 = arith.constant 0 : i32
    %c0_i32_1 = arith.constant 0 : i32
    %c0_i32_2 = arith.constant 0 : i32
    %c0_i32_3 = arith.constant 0 : i32
    return %c0_i32, %arg0, %c0_i32_0, %c0_i32_1, %c0_i32_2 : i32, i32, i32, i32, i32
  }
  func.func @transform_1(%arg0: i32, %arg1: i32) -> (i32, i32) {
    %c0_i32 = arith.constant 0 : i32
    %c0_i32_0 = arith.constant 0 : i32
    %c0_i32_1 = arith.constant 0 : i32
    return %c0_i32, %c0_i32_0 : i32, i32
  }
  func.func @transform_2(%arg0: i32, %arg1: i32) -> (i32, i32) {
    %c0_i32 = arith.constant 0 : i32
    %c0_i32_0 = arith.constant 0 : i32
    %c0_i32_1 = arith.constant 0 : i32
    return %c0_i32, %c0_i32_0 : i32, i32
  }
  func.func @transform_3(%arg0: i32, %arg1: i32) -> (i32, i32) {
    %c0_i32 = arith.constant 0 : i32
    %c0_i32_0 = arith.constant 0 : i32
    return %c0_i32, %arg1 : i32, i32
  }
  func.func @transform_4(%arg0: i32, %arg1: i32) -> (i32, i32) {
    %c0_i32 = arith.constant 0 : i32
    %c0_i32_0 = arith.constant 0 : i32
    return %c0_i32, %arg1 : i32, i32
  }
  func.func @transform_5(%arg0: i32, %arg1: i32) -> (i32, i32, i32) {
    %c0_i32 = arith.constant 0 : i32
    %c0_i32_0 = arith.constant 0 : i32
    return %arg0, %c0_i32, %arg1 : i32, i32, i32
  }
}

module attributes {stable_mosaic.version = 11 : i64} {
  func.func @kernel(%arg0: i32, %arg1: i32, %arg2: memref<4x1x5x5x128xbf16, #tpu.memory_space<vmem>>, %arg3: memref<9x128xf32, #tpu.memory_space<vmem>>, %arg4: memref<1x128xf32, #tpu.memory_space<vmem>>, %arg5: memref<128x256xbf16, #tpu.memory_space<vmem>>, %arg6: memref<1x256xf32, #tpu.memory_space<vmem>>, %arg7: memref<1x16x256xbf16, #tpu.memory_space<vmem>>, %arg8: memref<16x128xf32, #tpu.memory_space<vmem>>) attributes {dimension_semantics = [#tpu.dimension_semantics<parallel>, #tpu.dimension_semantics<arbitrary>], iteration_bounds = array<i64: 2, 1>, scalar_prefetch = 0 : i64, scratch_operands = 1 : i64, tpu.core_type = #tpu.core_type<tc>, window_params = [{transform_indices = @transform_0, window_bounds = array<i64: 4, 1, 5, 5, 128>}, {pipeline_mode = #tpu.pipeline_mode<synchronous>, transform_indices = @transform_1, window_bounds = array<i64: 9, 128>}, {pipeline_mode = #tpu.pipeline_mode<synchronous>, transform_indices = @transform_2, window_bounds = array<i64: 1, 128>}, {transform_indices = @transform_3, window_bounds = array<i64: 128, 256>}, {transform_indices = @transform_4, window_bounds = array<i64: 1, 256>}, {transform_indices = @transform_5, window_bounds = array<i64: 1, 16, 256>}]} {
    %c0_i32 = arith.constant 0 : i32
    %0 = arith.cmpi eq, %arg1, %c0_i32 : i32
    %1 = arith.extui %0 : i1 to i32
    %c0_i32_0 = arith.constant 0 : i32
    %2 = arith.cmpi ne, %1, %c0_i32_0 : i32
    scf.if %2 {
      %c0_10 = arith.constant 0 : index
      %c0_11 = arith.constant 0 : index
      %c0_12 = arith.constant 0 : index
      %c0_13 = arith.constant 0 : index
      %c0_14 = arith.constant 0 : index
      %15 = vector.load %arg2[%c0_10, %c0_11, %c0_12, %c0_13, %c0_14] : memref<4x1x5x5x128xbf16, #tpu.memory_space<vmem>>, vector<1x1x4x4x128xbf16>
      %16 = vector.shape_cast %15 : vector<1x1x4x4x128xbf16> to vector<4x4x128xbf16>
      %17 = arith.extf %16 : vector<4x4x128xbf16> to vector<4x4x128xf32>
      %c0_15 = arith.constant 0 : index
      %c0_16 = arith.constant 0 : index
      %18 = vector.load %arg3[%c0_15, %c0_16] : memref<9x128xf32, #tpu.memory_space<vmem>>, vector<1x128xf32>
      %19 = vector.shape_cast %18 : vector<1x128xf32> to vector<1x1x128xf32>
      %20 = vector.broadcast %19 : vector<1x1x128xf32> to vector<4x4x128xf32>
      %21 = arith.mulf %17, %20 : vector<4x4x128xf32>
      %c1 = arith.constant 1 : index
      %c0_17 = arith.constant 0 : index
      %c0_18 = arith.constant 0 : index
      %c0_19 = arith.constant 0 : index
      %c0_20 = arith.constant 0 : index
      %22 = vector.load %arg2[%c1, %c0_17, %c0_18, %c0_19, %c0_20] : memref<4x1x5x5x128xbf16, #tpu.memory_space<vmem>>, vector<1x1x4x4x128xbf16>
      %23 = vector.shape_cast %22 : vector<1x1x4x4x128xbf16> to vector<4x4x128xbf16>
      %24 = arith.extf %23 : vector<4x4x128xbf16> to vector<4x4x128xf32>
      %c1_21 = arith.constant 1 : index
      %c0_22 = arith.constant 0 : index
      %25 = vector.load %arg3[%c1_21, %c0_22] : memref<9x128xf32, #tpu.memory_space<vmem>>, vector<1x128xf32>
      %26 = vector.shape_cast %25 : vector<1x128xf32> to vector<1x1x128xf32>
      %27 = vector.broadcast %26 : vector<1x1x128xf32> to vector<4x4x128xf32>
      %28 = arith.mulf %24, %27 : vector<4x4x128xf32>
      %c0_23 = arith.constant 0 : index
      %c0_24 = arith.constant 0 : index
      %c0_25 = arith.constant 0 : index
      %c1_26 = arith.constant 1 : index
      %c0_27 = arith.constant 0 : index
      %29 = vector.load %arg2[%c0_23, %c0_24, %c0_25, %c1_26, %c0_27] : memref<4x1x5x5x128xbf16, #tpu.memory_space<vmem>>, vector<1x1x4x4x128xbf16>
      %30 = vector.shape_cast %29 : vector<1x1x4x4x128xbf16> to vector<4x4x128xbf16>
      %31 = arith.extf %30 : vector<4x4x128xbf16> to vector<4x4x128xf32>
      %c2 = arith.constant 2 : index
      %c0_28 = arith.constant 0 : index
      %32 = vector.load %arg3[%c2, %c0_28] : memref<9x128xf32, #tpu.memory_space<vmem>>, vector<1x128xf32>
      %33 = vector.shape_cast %32 : vector<1x128xf32> to vector<1x1x128xf32>
      %34 = vector.broadcast %33 : vector<1x1x128xf32> to vector<4x4x128xf32>
      %35 = arith.mulf %31, %34 : vector<4x4x128xf32>
      %c2_29 = arith.constant 2 : index
      %c0_30 = arith.constant 0 : index
      %c0_31 = arith.constant 0 : index
      %c0_32 = arith.constant 0 : index
      %c0_33 = arith.constant 0 : index
      %36 = vector.load %arg2[%c2_29, %c0_30, %c0_31, %c0_32, %c0_33] : memref<4x1x5x5x128xbf16, #tpu.memory_space<vmem>>, vector<1x1x4x4x128xbf16>
      %37 = vector.shape_cast %36 : vector<1x1x4x4x128xbf16> to vector<4x4x128xbf16>
      %38 = arith.extf %37 : vector<4x4x128xbf16> to vector<4x4x128xf32>
      %c3 = arith.constant 3 : index
      %c0_34 = arith.constant 0 : index
      %39 = vector.load %arg3[%c3, %c0_34] : memref<9x128xf32, #tpu.memory_space<vmem>>, vector<1x128xf32>
      %40 = vector.shape_cast %39 : vector<1x128xf32> to vector<1x1x128xf32>
      %41 = vector.broadcast %40 : vector<1x1x128xf32> to vector<4x4x128xf32>
      %42 = arith.mulf %38, %41 : vector<4x4x128xf32>
      %c3_35 = arith.constant 3 : index
      %c0_36 = arith.constant 0 : index
      %c0_37 = arith.constant 0 : index
      %c0_38 = arith.constant 0 : index
      %c0_39 = arith.constant 0 : index
      %43 = vector.load %arg2[%c3_35, %c0_36, %c0_37, %c0_38, %c0_39] : memref<4x1x5x5x128xbf16, #tpu.memory_space<vmem>>, vector<1x1x4x4x128xbf16>
      %44 = vector.shape_cast %43 : vector<1x1x4x4x128xbf16> to vector<4x4x128xbf16>
      %45 = arith.extf %44 : vector<4x4x128xbf16> to vector<4x4x128xf32>
      %c4 = arith.constant 4 : index
      %c0_40 = arith.constant 0 : index
      %46 = vector.load %arg3[%c4, %c0_40] : memref<9x128xf32, #tpu.memory_space<vmem>>, vector<1x128xf32>
      %47 = vector.shape_cast %46 : vector<1x128xf32> to vector<1x1x128xf32>
      %48 = vector.broadcast %47 : vector<1x1x128xf32> to vector<4x4x128xf32>
      %49 = arith.mulf %45, %48 : vector<4x4x128xf32>
      %c2_41 = arith.constant 2 : index
      %c0_42 = arith.constant 0 : index
      %c0_43 = arith.constant 0 : index
      %c1_44 = arith.constant 1 : index
      %c0_45 = arith.constant 0 : index
      %50 = vector.load %arg2[%c2_41, %c0_42, %c0_43, %c1_44, %c0_45] : memref<4x1x5x5x128xbf16, #tpu.memory_space<vmem>>, vector<1x1x4x4x128xbf16>
      %51 = vector.shape_cast %50 : vector<1x1x4x4x128xbf16> to vector<4x4x128xbf16>
      %52 = arith.extf %51 : vector<4x4x128xbf16> to vector<4x4x128xf32>
      %c5 = arith.constant 5 : index
      %c0_46 = arith.constant 0 : index
      %53 = vector.load %arg3[%c5, %c0_46] : memref<9x128xf32, #tpu.memory_space<vmem>>, vector<1x128xf32>
      %54 = vector.shape_cast %53 : vector<1x128xf32> to vector<1x1x128xf32>
      %55 = vector.broadcast %54 : vector<1x1x128xf32> to vector<4x4x128xf32>
      %56 = arith.mulf %52, %55 : vector<4x4x128xf32>
      %c0_47 = arith.constant 0 : index
      %c0_48 = arith.constant 0 : index
      %c1_49 = arith.constant 1 : index
      %c0_50 = arith.constant 0 : index
      %c0_51 = arith.constant 0 : index
      %57 = vector.load %arg2[%c0_47, %c0_48, %c1_49, %c0_50, %c0_51] : memref<4x1x5x5x128xbf16, #tpu.memory_space<vmem>>, vector<1x1x4x4x128xbf16>
      %58 = vector.shape_cast %57 : vector<1x1x4x4x128xbf16> to vector<4x4x128xbf16>
      %59 = arith.extf %58 : vector<4x4x128xbf16> to vector<4x4x128xf32>
      %c6 = arith.constant 6 : index
      %c0_52 = arith.constant 0 : index
      %60 = vector.load %arg3[%c6, %c0_52] : memref<9x128xf32, #tpu.memory_space<vmem>>, vector<1x128xf32>
      %61 = vector.shape_cast %60 : vector<1x128xf32> to vector<1x1x128xf32>
      %62 = vector.broadcast %61 : vector<1x1x128xf32> to vector<4x4x128xf32>
      %63 = arith.mulf %59, %62 : vector<4x4x128xf32>
      %c1_53 = arith.constant 1 : index
      %c0_54 = arith.constant 0 : index
      %c1_55 = arith.constant 1 : index
      %c0_56 = arith.constant 0 : index
      %c0_57 = arith.constant 0 : index
      %64 = vector.load %arg2[%c1_53, %c0_54, %c1_55, %c0_56, %c0_57] : memref<4x1x5x5x128xbf16, #tpu.memory_space<vmem>>, vector<1x1x4x4x128xbf16>
      %65 = vector.shape_cast %64 : vector<1x1x4x4x128xbf16> to vector<4x4x128xbf16>
      %66 = arith.extf %65 : vector<4x4x128xbf16> to vector<4x4x128xf32>
      %c7 = arith.constant 7 : index
      %c0_58 = arith.constant 0 : index
      %67 = vector.load %arg3[%c7, %c0_58] : memref<9x128xf32, #tpu.memory_space<vmem>>, vector<1x128xf32>
      %68 = vector.shape_cast %67 : vector<1x128xf32> to vector<1x1x128xf32>
      %69 = vector.broadcast %68 : vector<1x1x128xf32> to vector<4x4x128xf32>
      %70 = arith.mulf %66, %69 : vector<4x4x128xf32>
      %c0_59 = arith.constant 0 : index
      %c0_60 = arith.constant 0 : index
      %c1_61 = arith.constant 1 : index
      %c1_62 = arith.constant 1 : index
      %c0_63 = arith.constant 0 : index
      %71 = vector.load %arg2[%c0_59, %c0_60, %c1_61, %c1_62, %c0_63] : memref<4x1x5x5x128xbf16, #tpu.memory_space<vmem>>, vector<1x1x4x4x128xbf16>
      %72 = vector.shape_cast %71 : vector<1x1x4x4x128xbf16> to vector<4x4x128xbf16>
      %73 = arith.extf %72 : vector<4x4x128xbf16> to vector<4x4x128xf32>
      %c8 = arith.constant 8 : index
      %c0_64 = arith.constant 0 : index
      %74 = vector.load %arg3[%c8, %c0_64] : memref<9x128xf32, #tpu.memory_space<vmem>>, vector<1x128xf32>
      %75 = vector.shape_cast %74 : vector<1x128xf32> to vector<1x1x128xf32>
      %76 = vector.broadcast %75 : vector<1x1x128xf32> to vector<4x4x128xf32>
      %77 = arith.mulf %73, %76 : vector<4x4x128xf32>
      %78 = arith.addf %21, %28 : vector<4x4x128xf32>
      %79 = arith.addf %35, %42 : vector<4x4x128xf32>
      %80 = arith.addf %49, %56 : vector<4x4x128xf32>
      %81 = arith.addf %63, %70 : vector<4x4x128xf32>
      %82 = arith.addf %78, %79 : vector<4x4x128xf32>
      %83 = arith.addf %80, %81 : vector<4x4x128xf32>
      %84 = arith.addf %82, %83 : vector<4x4x128xf32>
      %85 = arith.addf %84, %77 : vector<4x4x128xf32>
      %c0_65 = arith.constant 0 : index
      %c0_66 = arith.constant 0 : index
      %86 = vector.load %arg4[%c0_65, %c0_66] : memref<1x128xf32, #tpu.memory_space<vmem>>, vector<1x128xf32>
      %87 = vector.shape_cast %86 : vector<1x128xf32> to vector<1x1x128xf32>
      %88 = vector.broadcast %87 : vector<1x1x128xf32> to vector<4x4x128xf32>
      %89 = arith.addf %85, %88 : vector<4x4x128xf32>
      %cst_67 = arith.constant 0.000000e+00 : f32
      %90 = vector.broadcast %cst_67 : f32 to vector<4x4x128xf32>
      %91 = arith.maximumf %89, %90 : vector<4x4x128xf32>
      %92 = vector.extract_strided_slice %91 {offsets = [0, 0, 0], sizes = [1, 4, 128], strides = [1, 1, 1]} : vector<4x4x128xf32> to vector<1x4x128xf32>
      %93 = vector.shape_cast %92 : vector<1x4x128xf32> to vector<4x128xf32>
      %c0_68 = arith.constant 0 : index
      %c0_69 = arith.constant 0 : index
      %94 = vector.load %arg8[%c0_68, %c0_69] : memref<16x128xf32, #tpu.memory_space<vmem>>, vector<4x128xf32>
      tpu.vector_store %arg8[%c0_68, %c0_69], %93 {strides = array<i32>} : memref<16x128xf32, #tpu.memory_space<vmem>>, vector<4x128xf32>,
      %95 = vector.extract_strided_slice %91 {offsets = [1, 0, 0], sizes = [1, 4, 128], strides = [1, 1, 1]} : vector<4x4x128xf32> to vector<1x4x128xf32>
      %96 = vector.shape_cast %95 : vector<1x4x128xf32> to vector<4x128xf32>
      %c4_70 = arith.constant 4 : index
      %c0_71 = arith.constant 0 : index
      %97 = vector.load %arg8[%c4_70, %c0_71] : memref<16x128xf32, #tpu.memory_space<vmem>>, vector<4x128xf32>
      tpu.vector_store %arg8[%c4_70, %c0_71], %96 {strides = array<i32>} : memref<16x128xf32, #tpu.memory_space<vmem>>, vector<4x128xf32>,
      %98 = vector.extract_strided_slice %91 {offsets = [2, 0, 0], sizes = [1, 4, 128], strides = [1, 1, 1]} : vector<4x4x128xf32> to vector<1x4x128xf32>
      %99 = vector.shape_cast %98 : vector<1x4x128xf32> to vector<4x128xf32>
      %c8_72 = arith.constant 8 : index
      %c0_73 = arith.constant 0 : index
      %100 = vector.load %arg8[%c8_72, %c0_73] : memref<16x128xf32, #tpu.memory_space<vmem>>, vector<4x128xf32>
      tpu.vector_store %arg8[%c8_72, %c0_73], %99 {strides = array<i32>} : memref<16x128xf32, #tpu.memory_space<vmem>>, vector<4x128xf32>,
      %101 = vector.extract_strided_slice %91 {offsets = [3, 0, 0], sizes = [1, 4, 128], strides = [1, 1, 1]} : vector<4x4x128xf32> to vector<1x4x128xf32>
      %102 = vector.shape_cast %101 : vector<1x4x128xf32> to vector<4x128xf32>
      %c12 = arith.constant 12 : index
      %c0_74 = arith.constant 0 : index
      %103 = vector.load %arg8[%c12, %c0_74] : memref<16x128xf32, #tpu.memory_space<vmem>>, vector<4x128xf32>
      tpu.vector_store %arg8[%c12, %c0_74], %102 {strides = array<i32>} : memref<16x128xf32, #tpu.memory_space<vmem>>, vector<4x128xf32>,
    } else {
    }
    %c0 = arith.constant 0 : index
    %c0_1 = arith.constant 0 : index
    %3 = vector.load %arg8[%c0, %c0_1] : memref<16x128xf32, #tpu.memory_space<vmem>>, vector<16x128xf32>
    %4 = arith.truncf %3 : vector<16x128xf32> to vector<16x128xbf16>
    %c0_2 = arith.constant 0 : index
    %c0_3 = arith.constant 0 : index
    %5 = vector.load %arg5[%c0_2, %c0_3] : memref<128x256xbf16, #tpu.memory_space<vmem>>, vector<128x256xbf16>
    %cst = arith.constant dense<0.000000e+00> : vector<16x256xf32>
    %6 = tpu.matmul %4, %5, %cst {dimension_numbers = #tpu.dot_dimension_numbers<[1], [0], [0], [1], [0, 0, 1, 1], [], []>} : vector<16x128xbf16>, vector<128x256xbf16>, vector<16x256xf32> -> vector<16x256xf32>
    %c0_4 = arith.constant 0 : index
    %c0_5 = arith.constant 0 : index
    %7 = vector.load %arg6[%c0_4, %c0_5] : memref<1x256xf32, #tpu.memory_space<vmem>>, vector<1x256xf32>
    %8 = vector.broadcast %7 : vector<1x256xf32> to vector<16x256xf32>
    %9 = arith.addf %6, %8 : vector<16x256xf32>
    %cst_6 = arith.constant 0.000000e+00 : f32
    %10 = vector.broadcast %cst_6 : f32 to vector<16x256xf32>
    %11 = arith.maximumf %9, %10 : vector<16x256xf32>
    %12 = vector.shape_cast %11 : vector<16x256xf32> to vector<1x16x256xf32>
    %13 = arith.truncf %12 : vector<1x16x256xf32> to vector<1x16x256xbf16>
    %c0_7 = arith.constant 0 : index
    %c0_8 = arith.constant 0 : index
    %c0_9 = arith.constant 0 : index
    %14 = vector.load %arg7[%c0_7, %c0_8, %c0_9] : memref<1x16x256xbf16, #tpu.memory_space<vmem>>, vector<1x16x256xbf16>
    tpu.vector_store %arg7[%c0_7, %c0_8, %c0_9], %13 {strides = array<i32>} : memref<1x16x256xbf16, #tpu.memory_space<vmem>>, vector<1x16x256xbf16>,
    return
  }
  func.func @transform_0(%arg0: i32, %arg1: i32) -> (i32, i32, i32, i32, i32) {
    %c0_i32 = arith.constant 0 : i32
    %c0_i32_0 = arith.constant 0 : i32
    %c0_i32_1 = arith.constant 0 : i32
    %c0_i32_2 = arith.constant 0 : i32
    %c0_i32_3 = arith.constant 0 : i32
    return %c0_i32, %arg0, %c0_i32_0, %c0_i32_1, %c0_i32_2 : i32, i32, i32, i32, i32
  }
  func.func @transform_1(%arg0: i32, %arg1: i32) -> (i32, i32) {
    %c0_i32 = arith.constant 0 : i32
    %c0_i32_0 = arith.constant 0 : i32
    %c0_i32_1 = arith.constant 0 : i32
    return %c0_i32, %c0_i32_0 : i32, i32
  }
  func.func @transform_2(%arg0: i32, %arg1: i32) -> (i32, i32) {
    %c0_i32 = arith.constant 0 : i32
    %c0_i32_0 = arith.constant 0 : i32
    %c0_i32_1 = arith.constant 0 : i32
    return %c0_i32, %c0_i32_0 : i32, i32
  }
  func.func @transform_3(%arg0: i32, %arg1: i32) -> (i32, i32) {
    %c0_i32 = arith.constant 0 : i32
    %c0_i32_0 = arith.constant 0 : i32
    return %c0_i32, %arg1 : i32, i32
  }
  func.func @transform_4(%arg0: i32, %arg1: i32) -> (i32, i32) {
    %c0_i32 = arith.constant 0 : i32
    %c0_i32_0 = arith.constant 0 : i32
    return %c0_i32, %arg1 : i32, i32
  }
  func.func @transform_5(%arg0: i32, %arg1: i32) -> (i32, i32, i32) {
    %c0_i32 = arith.constant 0 : i32
    %c0_i32_0 = arith.constant 0 : i32
    return %arg0, %c0_i32, %arg1 : i32, i32, i32
  }
}

module attributes {stable_mosaic.version = 11 : i64} {
  func.func @kernel(%arg0: i32, %arg1: i32, %arg2: memref<4x1x3x3x256xbf16, #tpu.memory_space<vmem>>, %arg3: memref<9x256xf32, #tpu.memory_space<vmem>>, %arg4: memref<1x256xf32, #tpu.memory_space<vmem>>, %arg5: memref<256x256xbf16, #tpu.memory_space<vmem>>, %arg6: memref<1x256xf32, #tpu.memory_space<vmem>>, %arg7: memref<1x8x256xbf16, #tpu.memory_space<vmem>>, %arg8: memref<8x256xf32, #tpu.memory_space<vmem>>) attributes {dimension_semantics = [#tpu.dimension_semantics<parallel>, #tpu.dimension_semantics<arbitrary>], iteration_bounds = array<i64: 2, 2>, scalar_prefetch = 0 : i64, scratch_operands = 1 : i64, tpu.core_type = #tpu.core_type<tc>, window_params = [{transform_indices = @transform_0, window_bounds = array<i64: 4, 1, 3, 3, 256>}, {pipeline_mode = #tpu.pipeline_mode<synchronous>, transform_indices = @transform_1, window_bounds = array<i64: 9, 256>}, {pipeline_mode = #tpu.pipeline_mode<synchronous>, transform_indices = @transform_2, window_bounds = array<i64: 1, 256>}, {transform_indices = @transform_3, window_bounds = array<i64: 256, 256>}, {transform_indices = @transform_4, window_bounds = array<i64: 1, 256>}, {transform_indices = @transform_5, window_bounds = array<i64: 1, 8, 256>}]} {
    %c0_i32 = arith.constant 0 : i32
    %0 = arith.cmpi eq, %arg1, %c0_i32 : i32
    %1 = arith.extui %0 : i1 to i32
    %c0_i32_0 = arith.constant 0 : i32
    %2 = arith.cmpi ne, %1, %c0_i32_0 : i32
    scf.if %2 {
      %c0_10 = arith.constant 0 : index
      %c0_11 = arith.constant 0 : index
      %c0_12 = arith.constant 0 : index
      %c0_13 = arith.constant 0 : index
      %c0_14 = arith.constant 0 : index
      %15 = vector.load %arg2[%c0_10, %c0_11, %c0_12, %c0_13, %c0_14] : memref<4x1x3x3x256xbf16, #tpu.memory_space<vmem>>, vector<1x1x2x2x256xbf16>
      %16 = vector.shape_cast %15 : vector<1x1x2x2x256xbf16> to vector<2x2x256xbf16>
      %17 = arith.extf %16 : vector<2x2x256xbf16> to vector<2x2x256xf32>
      %c0_15 = arith.constant 0 : index
      %c0_16 = arith.constant 0 : index
      %18 = vector.load %arg3[%c0_15, %c0_16] : memref<9x256xf32, #tpu.memory_space<vmem>>, vector<1x256xf32>
      %19 = vector.shape_cast %18 : vector<1x256xf32> to vector<1x1x256xf32>
      %20 = vector.broadcast %19 : vector<1x1x256xf32> to vector<2x2x256xf32>
      %21 = arith.mulf %17, %20 : vector<2x2x256xf32>
      %c1 = arith.constant 1 : index
      %c0_17 = arith.constant 0 : index
      %c0_18 = arith.constant 0 : index
      %c0_19 = arith.constant 0 : index
      %c0_20 = arith.constant 0 : index
      %22 = vector.load %arg2[%c1, %c0_17, %c0_18, %c0_19, %c0_20] : memref<4x1x3x3x256xbf16, #tpu.memory_space<vmem>>, vector<1x1x2x2x256xbf16>
      %23 = vector.shape_cast %22 : vector<1x1x2x2x256xbf16> to vector<2x2x256xbf16>
      %24 = arith.extf %23 : vector<2x2x256xbf16> to vector<2x2x256xf32>
      %c1_21 = arith.constant 1 : index
      %c0_22 = arith.constant 0 : index
      %25 = vector.load %arg3[%c1_21, %c0_22] : memref<9x256xf32, #tpu.memory_space<vmem>>, vector<1x256xf32>
      %26 = vector.shape_cast %25 : vector<1x256xf32> to vector<1x1x256xf32>
      %27 = vector.broadcast %26 : vector<1x1x256xf32> to vector<2x2x256xf32>
      %28 = arith.mulf %24, %27 : vector<2x2x256xf32>
      %c0_23 = arith.constant 0 : index
      %c0_24 = arith.constant 0 : index
      %c0_25 = arith.constant 0 : index
      %c1_26 = arith.constant 1 : index
      %c0_27 = arith.constant 0 : index
      %29 = vector.load %arg2[%c0_23, %c0_24, %c0_25, %c1_26, %c0_27] : memref<4x1x3x3x256xbf16, #tpu.memory_space<vmem>>, vector<1x1x2x2x256xbf16>
      %30 = vector.shape_cast %29 : vector<1x1x2x2x256xbf16> to vector<2x2x256xbf16>
      %31 = arith.extf %30 : vector<2x2x256xbf16> to vector<2x2x256xf32>
      %c2 = arith.constant 2 : index
      %c0_28 = arith.constant 0 : index
      %32 = vector.load %arg3[%c2, %c0_28] : memref<9x256xf32, #tpu.memory_space<vmem>>, vector<1x256xf32>
      %33 = vector.shape_cast %32 : vector<1x256xf32> to vector<1x1x256xf32>
      %34 = vector.broadcast %33 : vector<1x1x256xf32> to vector<2x2x256xf32>
      %35 = arith.mulf %31, %34 : vector<2x2x256xf32>
      %c2_29 = arith.constant 2 : index
      %c0_30 = arith.constant 0 : index
      %c0_31 = arith.constant 0 : index
      %c0_32 = arith.constant 0 : index
      %c0_33 = arith.constant 0 : index
      %36 = vector.load %arg2[%c2_29, %c0_30, %c0_31, %c0_32, %c0_33] : memref<4x1x3x3x256xbf16, #tpu.memory_space<vmem>>, vector<1x1x2x2x256xbf16>
      %37 = vector.shape_cast %36 : vector<1x1x2x2x256xbf16> to vector<2x2x256xbf16>
      %38 = arith.extf %37 : vector<2x2x256xbf16> to vector<2x2x256xf32>
      %c3 = arith.constant 3 : index
      %c0_34 = arith.constant 0 : index
      %39 = vector.load %arg3[%c3, %c0_34] : memref<9x256xf32, #tpu.memory_space<vmem>>, vector<1x256xf32>
      %40 = vector.shape_cast %39 : vector<1x256xf32> to vector<1x1x256xf32>
      %41 = vector.broadcast %40 : vector<1x1x256xf32> to vector<2x2x256xf32>
      %42 = arith.mulf %38, %41 : vector<2x2x256xf32>
      %c3_35 = arith.constant 3 : index
      %c0_36 = arith.constant 0 : index
      %c0_37 = arith.constant 0 : index
      %c0_38 = arith.constant 0 : index
      %c0_39 = arith.constant 0 : index
      %43 = vector.load %arg2[%c3_35, %c0_36, %c0_37, %c0_38, %c0_39] : memref<4x1x3x3x256xbf16, #tpu.memory_space<vmem>>, vector<1x1x2x2x256xbf16>
      %44 = vector.shape_cast %43 : vector<1x1x2x2x256xbf16> to vector<2x2x256xbf16>
      %45 = arith.extf %44 : vector<2x2x256xbf16> to vector<2x2x256xf32>
      %c4 = arith.constant 4 : index
      %c0_40 = arith.constant 0 : index
      %46 = vector.load %arg3[%c4, %c0_40] : memref<9x256xf32, #tpu.memory_space<vmem>>, vector<1x256xf32>
      %47 = vector.shape_cast %46 : vector<1x256xf32> to vector<1x1x256xf32>
      %48 = vector.broadcast %47 : vector<1x1x256xf32> to vector<2x2x256xf32>
      %49 = arith.mulf %45, %48 : vector<2x2x256xf32>
      %c2_41 = arith.constant 2 : index
      %c0_42 = arith.constant 0 : index
      %c0_43 = arith.constant 0 : index
      %c1_44 = arith.constant 1 : index
      %c0_45 = arith.constant 0 : index
      %50 = vector.load %arg2[%c2_41, %c0_42, %c0_43, %c1_44, %c0_45] : memref<4x1x3x3x256xbf16, #tpu.memory_space<vmem>>, vector<1x1x2x2x256xbf16>
      %51 = vector.shape_cast %50 : vector<1x1x2x2x256xbf16> to vector<2x2x256xbf16>
      %52 = arith.extf %51 : vector<2x2x256xbf16> to vector<2x2x256xf32>
      %c5 = arith.constant 5 : index
      %c0_46 = arith.constant 0 : index
      %53 = vector.load %arg3[%c5, %c0_46] : memref<9x256xf32, #tpu.memory_space<vmem>>, vector<1x256xf32>
      %54 = vector.shape_cast %53 : vector<1x256xf32> to vector<1x1x256xf32>
      %55 = vector.broadcast %54 : vector<1x1x256xf32> to vector<2x2x256xf32>
      %56 = arith.mulf %52, %55 : vector<2x2x256xf32>
      %c0_47 = arith.constant 0 : index
      %c0_48 = arith.constant 0 : index
      %c1_49 = arith.constant 1 : index
      %c0_50 = arith.constant 0 : index
      %c0_51 = arith.constant 0 : index
      %57 = vector.load %arg2[%c0_47, %c0_48, %c1_49, %c0_50, %c0_51] : memref<4x1x3x3x256xbf16, #tpu.memory_space<vmem>>, vector<1x1x2x2x256xbf16>
      %58 = vector.shape_cast %57 : vector<1x1x2x2x256xbf16> to vector<2x2x256xbf16>
      %59 = arith.extf %58 : vector<2x2x256xbf16> to vector<2x2x256xf32>
      %c6 = arith.constant 6 : index
      %c0_52 = arith.constant 0 : index
      %60 = vector.load %arg3[%c6, %c0_52] : memref<9x256xf32, #tpu.memory_space<vmem>>, vector<1x256xf32>
      %61 = vector.shape_cast %60 : vector<1x256xf32> to vector<1x1x256xf32>
      %62 = vector.broadcast %61 : vector<1x1x256xf32> to vector<2x2x256xf32>
      %63 = arith.mulf %59, %62 : vector<2x2x256xf32>
      %c1_53 = arith.constant 1 : index
      %c0_54 = arith.constant 0 : index
      %c1_55 = arith.constant 1 : index
      %c0_56 = arith.constant 0 : index
      %c0_57 = arith.constant 0 : index
      %64 = vector.load %arg2[%c1_53, %c0_54, %c1_55, %c0_56, %c0_57] : memref<4x1x3x3x256xbf16, #tpu.memory_space<vmem>>, vector<1x1x2x2x256xbf16>
      %65 = vector.shape_cast %64 : vector<1x1x2x2x256xbf16> to vector<2x2x256xbf16>
      %66 = arith.extf %65 : vector<2x2x256xbf16> to vector<2x2x256xf32>
      %c7 = arith.constant 7 : index
      %c0_58 = arith.constant 0 : index
      %67 = vector.load %arg3[%c7, %c0_58] : memref<9x256xf32, #tpu.memory_space<vmem>>, vector<1x256xf32>
      %68 = vector.shape_cast %67 : vector<1x256xf32> to vector<1x1x256xf32>
      %69 = vector.broadcast %68 : vector<1x1x256xf32> to vector<2x2x256xf32>
      %70 = arith.mulf %66, %69 : vector<2x2x256xf32>
      %c0_59 = arith.constant 0 : index
      %c0_60 = arith.constant 0 : index
      %c1_61 = arith.constant 1 : index
      %c1_62 = arith.constant 1 : index
      %c0_63 = arith.constant 0 : index
      %71 = vector.load %arg2[%c0_59, %c0_60, %c1_61, %c1_62, %c0_63] : memref<4x1x3x3x256xbf16, #tpu.memory_space<vmem>>, vector<1x1x2x2x256xbf16>
      %72 = vector.shape_cast %71 : vector<1x1x2x2x256xbf16> to vector<2x2x256xbf16>
      %73 = arith.extf %72 : vector<2x2x256xbf16> to vector<2x2x256xf32>
      %c8 = arith.constant 8 : index
      %c0_64 = arith.constant 0 : index
      %74 = vector.load %arg3[%c8, %c0_64] : memref<9x256xf32, #tpu.memory_space<vmem>>, vector<1x256xf32>
      %75 = vector.shape_cast %74 : vector<1x256xf32> to vector<1x1x256xf32>
      %76 = vector.broadcast %75 : vector<1x1x256xf32> to vector<2x2x256xf32>
      %77 = arith.mulf %73, %76 : vector<2x2x256xf32>
      %78 = arith.addf %21, %28 : vector<2x2x256xf32>
      %79 = arith.addf %35, %42 : vector<2x2x256xf32>
      %80 = arith.addf %49, %56 : vector<2x2x256xf32>
      %81 = arith.addf %63, %70 : vector<2x2x256xf32>
      %82 = arith.addf %78, %79 : vector<2x2x256xf32>
      %83 = arith.addf %80, %81 : vector<2x2x256xf32>
      %84 = arith.addf %82, %83 : vector<2x2x256xf32>
      %85 = arith.addf %84, %77 : vector<2x2x256xf32>
      %c0_65 = arith.constant 0 : index
      %c0_66 = arith.constant 0 : index
      %86 = vector.load %arg4[%c0_65, %c0_66] : memref<1x256xf32, #tpu.memory_space<vmem>>, vector<1x256xf32>
      %87 = vector.shape_cast %86 : vector<1x256xf32> to vector<1x1x256xf32>
      %88 = vector.broadcast %87 : vector<1x1x256xf32> to vector<2x2x256xf32>
      %89 = arith.addf %85, %88 : vector<2x2x256xf32>
      %cst_67 = arith.constant 0.000000e+00 : f32
      %90 = vector.broadcast %cst_67 : f32 to vector<2x2x256xf32>
      %91 = arith.maximumf %89, %90 : vector<2x2x256xf32>
      %92 = vector.extract_strided_slice %91 {offsets = [0, 0, 0], sizes = [1, 2, 256], strides = [1, 1, 1]} : vector<2x2x256xf32> to vector<1x2x256xf32>
      %93 = vector.shape_cast %92 : vector<1x2x256xf32> to vector<2x256xf32>
      %c0_68 = arith.constant 0 : index
      %c0_69 = arith.constant 0 : index
      %94 = vector.load %arg8[%c0_68, %c0_69] : memref<8x256xf32, #tpu.memory_space<vmem>>, vector<2x256xf32>
      tpu.vector_store %arg8[%c0_68, %c0_69], %93 {strides = array<i32>} : memref<8x256xf32, #tpu.memory_space<vmem>>, vector<2x256xf32>,
      %95 = vector.extract_strided_slice %91 {offsets = [1, 0, 0], sizes = [1, 2, 256], strides = [1, 1, 1]} : vector<2x2x256xf32> to vector<1x2x256xf32>
      %96 = vector.shape_cast %95 : vector<1x2x256xf32> to vector<2x256xf32>
      %c2_70 = arith.constant 2 : index
      %c0_71 = arith.constant 0 : index
      %97 = vector.load %arg8[%c2_70, %c0_71] : memref<8x256xf32, #tpu.memory_space<vmem>>, vector<2x256xf32>
      tpu.vector_store %arg8[%c2_70, %c0_71], %96 {strides = array<i32>} : memref<8x256xf32, #tpu.memory_space<vmem>>, vector<2x256xf32>,
      %cst_72 = arith.constant 0.000000e+00 : f32
      %98 = vector.broadcast %cst_72 : f32 to vector<4x256xf32>
      %c4_73 = arith.constant 4 : index
      %c0_74 = arith.constant 0 : index
      %99 = vector.load %arg8[%c4_73, %c0_74] : memref<8x256xf32, #tpu.memory_space<vmem>>, vector<4x256xf32>
      tpu.vector_store %arg8[%c4_73, %c0_74], %98 {strides = array<i32>} : memref<8x256xf32, #tpu.memory_space<vmem>>, vector<4x256xf32>,
    } else {
    }
    %c0 = arith.constant 0 : index
    %c0_1 = arith.constant 0 : index
    %3 = vector.load %arg8[%c0, %c0_1] : memref<8x256xf32, #tpu.memory_space<vmem>>, vector<8x256xf32>
    %4 = arith.truncf %3 : vector<8x256xf32> to vector<8x256xbf16>
    %c0_2 = arith.constant 0 : index
    %c0_3 = arith.constant 0 : index
    %5 = vector.load %arg5[%c0_2, %c0_3] : memref<256x256xbf16, #tpu.memory_space<vmem>>, vector<256x256xbf16>
    %cst = arith.constant dense<0.000000e+00> : vector<8x256xf32>
    %6 = tpu.matmul %4, %5, %cst {dimension_numbers = #tpu.dot_dimension_numbers<[1], [0], [0], [1], [0, 0, 1, 1], [], []>} : vector<8x256xbf16>, vector<256x256xbf16>, vector<8x256xf32> -> vector<8x256xf32>
    %c0_4 = arith.constant 0 : index
    %c0_5 = arith.constant 0 : index
    %7 = vector.load %arg6[%c0_4, %c0_5] : memref<1x256xf32, #tpu.memory_space<vmem>>, vector<1x256xf32>
    %8 = vector.broadcast %7 : vector<1x256xf32> to vector<8x256xf32>
    %9 = arith.addf %6, %8 : vector<8x256xf32>
    %cst_6 = arith.constant 0.000000e+00 : f32
    %10 = vector.broadcast %cst_6 : f32 to vector<8x256xf32>
    %11 = arith.maximumf %9, %10 : vector<8x256xf32>
    %12 = vector.shape_cast %11 : vector<8x256xf32> to vector<1x8x256xf32>
    %13 = arith.truncf %12 : vector<1x8x256xf32> to vector<1x8x256xbf16>
    %c0_7 = arith.constant 0 : index
    %c0_8 = arith.constant 0 : index
    %c0_9 = arith.constant 0 : index
    %14 = vector.load %arg7[%c0_7, %c0_8, %c0_9] : memref<1x8x256xbf16, #tpu.memory_space<vmem>>, vector<1x8x256xbf16>
    tpu.vector_store %arg7[%c0_7, %c0_8, %c0_9], %13 {strides = array<i32>} : memref<1x8x256xbf16, #tpu.memory_space<vmem>>, vector<1x8x256xbf16>,
    return
  }
  func.func @transform_0(%arg0: i32, %arg1: i32) -> (i32, i32, i32, i32, i32) {
    %c0_i32 = arith.constant 0 : i32
    %c0_i32_0 = arith.constant 0 : i32
    %c0_i32_1 = arith.constant 0 : i32
    %c0_i32_2 = arith.constant 0 : i32
    %c0_i32_3 = arith.constant 0 : i32
    return %c0_i32, %arg0, %c0_i32_0, %c0_i32_1, %c0_i32_2 : i32, i32, i32, i32, i32
  }
  func.func @transform_1(%arg0: i32, %arg1: i32) -> (i32, i32) {
    %c0_i32 = arith.constant 0 : i32
    %c0_i32_0 = arith.constant 0 : i32
    %c0_i32_1 = arith.constant 0 : i32
    return %c0_i32, %c0_i32_0 : i32, i32
  }
  func.func @transform_2(%arg0: i32, %arg1: i32) -> (i32, i32) {
    %c0_i32 = arith.constant 0 : i32
    %c0_i32_0 = arith.constant 0 : i32
    %c0_i32_1 = arith.constant 0 : i32
    return %c0_i32, %c0_i32_0 : i32, i32
  }
  func.func @transform_3(%arg0: i32, %arg1: i32) -> (i32, i32) {
    %c0_i32 = arith.constant 0 : i32
    %c0_i32_0 = arith.constant 0 : i32
    return %c0_i32, %arg1 : i32, i32
  }
  func.func @transform_4(%arg0: i32, %arg1: i32) -> (i32, i32) {
    %c0_i32 = arith.constant 0 : i32
    %c0_i32_0 = arith.constant 0 : i32
    return %c0_i32, %arg1 : i32, i32
  }
  func.func @transform_5(%arg0: i32, %arg1: i32) -> (i32, i32, i32) {
    %c0_i32 = arith.constant 0 : i32
    %c0_i32_0 = arith.constant 0 : i32
    return %arg0, %c0_i32, %arg1 : i32, i32, i32
  }
}

module attributes {stable_mosaic.version = 11 : i64} {
  func.func @kernel(%arg0: i32, %arg1: i32, %arg2: memref<1x1x4x4x512xbf16, #tpu.memory_space<vmem>>, %arg3: memref<9x512xf32, #tpu.memory_space<vmem>>, %arg4: memref<1x512xf32, #tpu.memory_space<vmem>>, %arg5: memref<512x256xbf16, #tpu.memory_space<vmem>>, %arg6: memref<1x256xf32, #tpu.memory_space<vmem>>, %arg7: memref<1x8x256xbf16, #tpu.memory_space<vmem>>, %arg8: memref<8x512xf32, #tpu.memory_space<vmem>>) attributes {dimension_semantics = [#tpu.dimension_semantics<parallel>, #tpu.dimension_semantics<arbitrary>], iteration_bounds = array<i64: 2, 2>, scalar_prefetch = 0 : i64, scratch_operands = 1 : i64, tpu.core_type = #tpu.core_type<tc>, window_params = [{transform_indices = @transform_0, window_bounds = array<i64: 1, 1, 4, 4, 512>}, {pipeline_mode = #tpu.pipeline_mode<synchronous>, transform_indices = @transform_1, window_bounds = array<i64: 9, 512>}, {pipeline_mode = #tpu.pipeline_mode<synchronous>, transform_indices = @transform_2, window_bounds = array<i64: 1, 512>}, {transform_indices = @transform_3, window_bounds = array<i64: 512, 256>}, {transform_indices = @transform_4, window_bounds = array<i64: 1, 256>}, {transform_indices = @transform_5, window_bounds = array<i64: 1, 8, 256>}]} {
    %c0_i32 = arith.constant 0 : i32
    %0 = arith.cmpi eq, %arg1, %c0_i32 : i32
    %1 = arith.extui %0 : i1 to i32
    %c0_i32_0 = arith.constant 0 : i32
    %2 = arith.cmpi ne, %1, %c0_i32_0 : i32
    scf.if %2 {
      %c0_10 = arith.constant 0 : index
      %c0_11 = arith.constant 0 : index
      %c0_12 = arith.constant 0 : index
      %c0_13 = arith.constant 0 : index
      %c0_14 = arith.constant 0 : index
      %15 = vector.load %arg2[%c0_10, %c0_11, %c0_12, %c0_13, %c0_14] : memref<1x1x4x4x512xbf16, #tpu.memory_space<vmem>>, vector<1x1x2x2x512xbf16>
      %16 = vector.shape_cast %15 : vector<1x1x2x2x512xbf16> to vector<2x2x512xbf16>
      %17 = arith.extf %16 : vector<2x2x512xbf16> to vector<2x2x512xf32>
      %c0_15 = arith.constant 0 : index
      %c0_16 = arith.constant 0 : index
      %18 = vector.load %arg3[%c0_15, %c0_16] : memref<9x512xf32, #tpu.memory_space<vmem>>, vector<1x512xf32>
      %19 = vector.shape_cast %18 : vector<1x512xf32> to vector<1x1x512xf32>
      %20 = vector.broadcast %19 : vector<1x1x512xf32> to vector<2x2x512xf32>
      %21 = arith.mulf %17, %20 : vector<2x2x512xf32>
      %c0_17 = arith.constant 0 : index
      %c0_18 = arith.constant 0 : index
      %c0_19 = arith.constant 0 : index
      %c1 = arith.constant 1 : index
      %c0_20 = arith.constant 0 : index
      %22 = vector.load %arg2[%c0_17, %c0_18, %c0_19, %c1, %c0_20] : memref<1x1x4x4x512xbf16, #tpu.memory_space<vmem>>, vector<1x1x2x2x512xbf16>
      %23 = vector.shape_cast %22 : vector<1x1x2x2x512xbf16> to vector<2x2x512xbf16>
      %24 = arith.extf %23 : vector<2x2x512xbf16> to vector<2x2x512xf32>
      %c1_21 = arith.constant 1 : index
      %c0_22 = arith.constant 0 : index
      %25 = vector.load %arg3[%c1_21, %c0_22] : memref<9x512xf32, #tpu.memory_space<vmem>>, vector<1x512xf32>
      %26 = vector.shape_cast %25 : vector<1x512xf32> to vector<1x1x512xf32>
      %27 = vector.broadcast %26 : vector<1x1x512xf32> to vector<2x2x512xf32>
      %28 = arith.mulf %24, %27 : vector<2x2x512xf32>
      %c0_23 = arith.constant 0 : index
      %c0_24 = arith.constant 0 : index
      %c0_25 = arith.constant 0 : index
      %c2 = arith.constant 2 : index
      %c0_26 = arith.constant 0 : index
      %29 = vector.load %arg2[%c0_23, %c0_24, %c0_25, %c2, %c0_26] : memref<1x1x4x4x512xbf16, #tpu.memory_space<vmem>>, vector<1x1x2x2x512xbf16>
      %30 = vector.shape_cast %29 : vector<1x1x2x2x512xbf16> to vector<2x2x512xbf16>
      %31 = arith.extf %30 : vector<2x2x512xbf16> to vector<2x2x512xf32>
      %c2_27 = arith.constant 2 : index
      %c0_28 = arith.constant 0 : index
      %32 = vector.load %arg3[%c2_27, %c0_28] : memref<9x512xf32, #tpu.memory_space<vmem>>, vector<1x512xf32>
      %33 = vector.shape_cast %32 : vector<1x512xf32> to vector<1x1x512xf32>
      %34 = vector.broadcast %33 : vector<1x1x512xf32> to vector<2x2x512xf32>
      %35 = arith.mulf %31, %34 : vector<2x2x512xf32>
      %c0_29 = arith.constant 0 : index
      %c0_30 = arith.constant 0 : index
      %c1_31 = arith.constant 1 : index
      %c0_32 = arith.constant 0 : index
      %c0_33 = arith.constant 0 : index
      %36 = vector.load %arg2[%c0_29, %c0_30, %c1_31, %c0_32, %c0_33] : memref<1x1x4x4x512xbf16, #tpu.memory_space<vmem>>, vector<1x1x2x2x512xbf16>
      %37 = vector.shape_cast %36 : vector<1x1x2x2x512xbf16> to vector<2x2x512xbf16>
      %38 = arith.extf %37 : vector<2x2x512xbf16> to vector<2x2x512xf32>
      %c3 = arith.constant 3 : index
      %c0_34 = arith.constant 0 : index
      %39 = vector.load %arg3[%c3, %c0_34] : memref<9x512xf32, #tpu.memory_space<vmem>>, vector<1x512xf32>
      %40 = vector.shape_cast %39 : vector<1x512xf32> to vector<1x1x512xf32>
      %41 = vector.broadcast %40 : vector<1x1x512xf32> to vector<2x2x512xf32>
      %42 = arith.mulf %38, %41 : vector<2x2x512xf32>
      %c0_35 = arith.constant 0 : index
      %c0_36 = arith.constant 0 : index
      %c1_37 = arith.constant 1 : index
      %c1_38 = arith.constant 1 : index
      %c0_39 = arith.constant 0 : index
      %43 = vector.load %arg2[%c0_35, %c0_36, %c1_37, %c1_38, %c0_39] : memref<1x1x4x4x512xbf16, #tpu.memory_space<vmem>>, vector<1x1x2x2x512xbf16>
      %44 = vector.shape_cast %43 : vector<1x1x2x2x512xbf16> to vector<2x2x512xbf16>
      %45 = arith.extf %44 : vector<2x2x512xbf16> to vector<2x2x512xf32>
      %c4 = arith.constant 4 : index
      %c0_40 = arith.constant 0 : index
      %46 = vector.load %arg3[%c4, %c0_40] : memref<9x512xf32, #tpu.memory_space<vmem>>, vector<1x512xf32>
      %47 = vector.shape_cast %46 : vector<1x512xf32> to vector<1x1x512xf32>
      %48 = vector.broadcast %47 : vector<1x1x512xf32> to vector<2x2x512xf32>
      %49 = arith.mulf %45, %48 : vector<2x2x512xf32>
      %c0_41 = arith.constant 0 : index
      %c0_42 = arith.constant 0 : index
      %c1_43 = arith.constant 1 : index
      %c2_44 = arith.constant 2 : index
      %c0_45 = arith.constant 0 : index
      %50 = vector.load %arg2[%c0_41, %c0_42, %c1_43, %c2_44, %c0_45] : memref<1x1x4x4x512xbf16, #tpu.memory_space<vmem>>, vector<1x1x2x2x512xbf16>
      %51 = vector.shape_cast %50 : vector<1x1x2x2x512xbf16> to vector<2x2x512xbf16>
      %52 = arith.extf %51 : vector<2x2x512xbf16> to vector<2x2x512xf32>
      %c5 = arith.constant 5 : index
      %c0_46 = arith.constant 0 : index
      %53 = vector.load %arg3[%c5, %c0_46] : memref<9x512xf32, #tpu.memory_space<vmem>>, vector<1x512xf32>
      %54 = vector.shape_cast %53 : vector<1x512xf32> to vector<1x1x512xf32>
      %55 = vector.broadcast %54 : vector<1x1x512xf32> to vector<2x2x512xf32>
      %56 = arith.mulf %52, %55 : vector<2x2x512xf32>
      %c0_47 = arith.constant 0 : index
      %c0_48 = arith.constant 0 : index
      %c2_49 = arith.constant 2 : index
      %c0_50 = arith.constant 0 : index
      %c0_51 = arith.constant 0 : index
      %57 = vector.load %arg2[%c0_47, %c0_48, %c2_49, %c0_50, %c0_51] : memref<1x1x4x4x512xbf16, #tpu.memory_space<vmem>>, vector<1x1x2x2x512xbf16>
      %58 = vector.shape_cast %57 : vector<1x1x2x2x512xbf16> to vector<2x2x512xbf16>
      %59 = arith.extf %58 : vector<2x2x512xbf16> to vector<2x2x512xf32>
      %c6 = arith.constant 6 : index
      %c0_52 = arith.constant 0 : index
      %60 = vector.load %arg3[%c6, %c0_52] : memref<9x512xf32, #tpu.memory_space<vmem>>, vector<1x512xf32>
      %61 = vector.shape_cast %60 : vector<1x512xf32> to vector<1x1x512xf32>
      %62 = vector.broadcast %61 : vector<1x1x512xf32> to vector<2x2x512xf32>
      %63 = arith.mulf %59, %62 : vector<2x2x512xf32>
      %c0_53 = arith.constant 0 : index
      %c0_54 = arith.constant 0 : index
      %c2_55 = arith.constant 2 : index
      %c1_56 = arith.constant 1 : index
      %c0_57 = arith.constant 0 : index
      %64 = vector.load %arg2[%c0_53, %c0_54, %c2_55, %c1_56, %c0_57] : memref<1x1x4x4x512xbf16, #tpu.memory_space<vmem>>, vector<1x1x2x2x512xbf16>
      %65 = vector.shape_cast %64 : vector<1x1x2x2x512xbf16> to vector<2x2x512xbf16>
      %66 = arith.extf %65 : vector<2x2x512xbf16> to vector<2x2x512xf32>
      %c7 = arith.constant 7 : index
      %c0_58 = arith.constant 0 : index
      %67 = vector.load %arg3[%c7, %c0_58] : memref<9x512xf32, #tpu.memory_space<vmem>>, vector<1x512xf32>
      %68 = vector.shape_cast %67 : vector<1x512xf32> to vector<1x1x512xf32>
      %69 = vector.broadcast %68 : vector<1x1x512xf32> to vector<2x2x512xf32>
      %70 = arith.mulf %66, %69 : vector<2x2x512xf32>
      %c0_59 = arith.constant 0 : index
      %c0_60 = arith.constant 0 : index
      %c2_61 = arith.constant 2 : index
      %c2_62 = arith.constant 2 : index
      %c0_63 = arith.constant 0 : index
      %71 = vector.load %arg2[%c0_59, %c0_60, %c2_61, %c2_62, %c0_63] : memref<1x1x4x4x512xbf16, #tpu.memory_space<vmem>>, vector<1x1x2x2x512xbf16>
      %72 = vector.shape_cast %71 : vector<1x1x2x2x512xbf16> to vector<2x2x512xbf16>
      %73 = arith.extf %72 : vector<2x2x512xbf16> to vector<2x2x512xf32>
      %c8 = arith.constant 8 : index
      %c0_64 = arith.constant 0 : index
      %74 = vector.load %arg3[%c8, %c0_64] : memref<9x512xf32, #tpu.memory_space<vmem>>, vector<1x512xf32>
      %75 = vector.shape_cast %74 : vector<1x512xf32> to vector<1x1x512xf32>
      %76 = vector.broadcast %75 : vector<1x1x512xf32> to vector<2x2x512xf32>
      %77 = arith.mulf %73, %76 : vector<2x2x512xf32>
      %78 = arith.addf %21, %28 : vector<2x2x512xf32>
      %79 = arith.addf %35, %42 : vector<2x2x512xf32>
      %80 = arith.addf %49, %56 : vector<2x2x512xf32>
      %81 = arith.addf %63, %70 : vector<2x2x512xf32>
      %82 = arith.addf %78, %79 : vector<2x2x512xf32>
      %83 = arith.addf %80, %81 : vector<2x2x512xf32>
      %84 = arith.addf %82, %83 : vector<2x2x512xf32>
      %85 = arith.addf %84, %77 : vector<2x2x512xf32>
      %c0_65 = arith.constant 0 : index
      %c0_66 = arith.constant 0 : index
      %86 = vector.load %arg4[%c0_65, %c0_66] : memref<1x512xf32, #tpu.memory_space<vmem>>, vector<1x512xf32>
      %87 = vector.shape_cast %86 : vector<1x512xf32> to vector<1x1x512xf32>
      %88 = vector.broadcast %87 : vector<1x1x512xf32> to vector<2x2x512xf32>
      %89 = arith.addf %85, %88 : vector<2x2x512xf32>
      %cst_67 = arith.constant 0.000000e+00 : f32
      %90 = vector.broadcast %cst_67 : f32 to vector<2x2x512xf32>
      %91 = arith.maximumf %89, %90 : vector<2x2x512xf32>
      %92 = vector.extract_strided_slice %91 {offsets = [0, 0, 0], sizes = [1, 2, 512], strides = [1, 1, 1]} : vector<2x2x512xf32> to vector<1x2x512xf32>
      %93 = vector.shape_cast %92 : vector<1x2x512xf32> to vector<2x512xf32>
      %c0_68 = arith.constant 0 : index
      %c0_69 = arith.constant 0 : index
      %94 = vector.load %arg8[%c0_68, %c0_69] : memref<8x512xf32, #tpu.memory_space<vmem>>, vector<2x512xf32>
      tpu.vector_store %arg8[%c0_68, %c0_69], %93 {strides = array<i32>} : memref<8x512xf32, #tpu.memory_space<vmem>>, vector<2x512xf32>,
      %95 = vector.extract_strided_slice %91 {offsets = [1, 0, 0], sizes = [1, 2, 512], strides = [1, 1, 1]} : vector<2x2x512xf32> to vector<1x2x512xf32>
      %96 = vector.shape_cast %95 : vector<1x2x512xf32> to vector<2x512xf32>
      %c2_70 = arith.constant 2 : index
      %c0_71 = arith.constant 0 : index
      %97 = vector.load %arg8[%c2_70, %c0_71] : memref<8x512xf32, #tpu.memory_space<vmem>>, vector<2x512xf32>
      tpu.vector_store %arg8[%c2_70, %c0_71], %96 {strides = array<i32>} : memref<8x512xf32, #tpu.memory_space<vmem>>, vector<2x512xf32>,
      %cst_72 = arith.constant 0.000000e+00 : f32
      %98 = vector.broadcast %cst_72 : f32 to vector<4x512xf32>
      %c4_73 = arith.constant 4 : index
      %c0_74 = arith.constant 0 : index
      %99 = vector.load %arg8[%c4_73, %c0_74] : memref<8x512xf32, #tpu.memory_space<vmem>>, vector<4x512xf32>
      tpu.vector_store %arg8[%c4_73, %c0_74], %98 {strides = array<i32>} : memref<8x512xf32, #tpu.memory_space<vmem>>, vector<4x512xf32>,
    } else {
    }
    %c0 = arith.constant 0 : index
    %c0_1 = arith.constant 0 : index
    %3 = vector.load %arg8[%c0, %c0_1] : memref<8x512xf32, #tpu.memory_space<vmem>>, vector<8x512xf32>
    %4 = arith.truncf %3 : vector<8x512xf32> to vector<8x512xbf16>
    %c0_2 = arith.constant 0 : index
    %c0_3 = arith.constant 0 : index
    %5 = vector.load %arg5[%c0_2, %c0_3] : memref<512x256xbf16, #tpu.memory_space<vmem>>, vector<512x256xbf16>
    %cst = arith.constant dense<0.000000e+00> : vector<8x256xf32>
    %6 = tpu.matmul %4, %5, %cst {dimension_numbers = #tpu.dot_dimension_numbers<[1], [0], [0], [1], [0, 0, 1, 1], [], []>} : vector<8x512xbf16>, vector<512x256xbf16>, vector<8x256xf32> -> vector<8x256xf32>
    %c0_4 = arith.constant 0 : index
    %c0_5 = arith.constant 0 : index
    %7 = vector.load %arg6[%c0_4, %c0_5] : memref<1x256xf32, #tpu.memory_space<vmem>>, vector<1x256xf32>
    %8 = vector.broadcast %7 : vector<1x256xf32> to vector<8x256xf32>
    %9 = arith.addf %6, %8 : vector<8x256xf32>
    %cst_6 = arith.constant 0.000000e+00 : f32
    %10 = vector.broadcast %cst_6 : f32 to vector<8x256xf32>
    %11 = arith.maximumf %9, %10 : vector<8x256xf32>
    %12 = vector.shape_cast %11 : vector<8x256xf32> to vector<1x8x256xf32>
    %13 = arith.truncf %12 : vector<1x8x256xf32> to vector<1x8x256xbf16>
    %c0_7 = arith.constant 0 : index
    %c0_8 = arith.constant 0 : index
    %c0_9 = arith.constant 0 : index
    %14 = vector.load %arg7[%c0_7, %c0_8, %c0_9] : memref<1x8x256xbf16, #tpu.memory_space<vmem>>, vector<1x8x256xbf16>
    tpu.vector_store %arg7[%c0_7, %c0_8, %c0_9], %13 {strides = array<i32>} : memref<1x8x256xbf16, #tpu.memory_space<vmem>>, vector<1x8x256xbf16>,
    return
  }
  func.func @transform_0(%arg0: i32, %arg1: i32) -> (i32, i32, i32, i32, i32) {
    %c0_i32 = arith.constant 0 : i32
    %c0_i32_0 = arith.constant 0 : i32
    %c0_i32_1 = arith.constant 0 : i32
    %c0_i32_2 = arith.constant 0 : i32
    %c0_i32_3 = arith.constant 0 : i32
    return %c0_i32, %arg0, %c0_i32_0, %c0_i32_1, %c0_i32_2 : i32, i32, i32, i32, i32
  }
  func.func @transform_1(%arg0: i32, %arg1: i32) -> (i32, i32) {
    %c0_i32 = arith.constant 0 : i32
    %c0_i32_0 = arith.constant 0 : i32
    %c0_i32_1 = arith.constant 0 : i32
    return %c0_i32, %c0_i32_0 : i32, i32
  }
  func.func @transform_2(%arg0: i32, %arg1: i32) -> (i32, i32) {
    %c0_i32 = arith.constant 0 : i32
    %c0_i32_0 = arith.constant 0 : i32
    %c0_i32_1 = arith.constant 0 : i32
    return %c0_i32, %c0_i32_0 : i32, i32
  }
  func.func @transform_3(%arg0: i32, %arg1: i32) -> (i32, i32) {
    %c0_i32 = arith.constant 0 : i32
    %c0_i32_0 = arith.constant 0 : i32
    return %c0_i32, %arg1 : i32, i32
  }
  func.func @transform_4(%arg0: i32, %arg1: i32) -> (i32, i32) {
    %c0_i32 = arith.constant 0 : i32
    %c0_i32_0 = arith.constant 0 : i32
    return %c0_i32, %arg1 : i32, i32
  }
  func.func @transform_5(%arg0: i32, %arg1: i32) -> (i32, i32, i32) {
    %c0_i32 = arith.constant 0 : i32
    %c0_i32_0 = arith.constant 0 : i32
    return %arg0, %c0_i32, %arg1 : i32, i32, i32
  }
}

</mosaic_0001>

<bundles_post_ra>
// kernel: mobilenet_v1.12
= control target key start
LH: loop header
LB: loop body
LE: loop exit
PB: predicated region body
PF: predicated region fallthrough
CT: control target
= control target key end

     0   :  { %s983_s12 = smov 0   ;;  %s985_s13 = smov 0   ;;  %s1118_s0 = inlined_call_operand.vmem [shape: bf16[512,32], index: 0, kind: input, shape index: {}]   ;;  %s1119_s1 = inlined_call_operand.vmem [shape: bf16[32,128], index: 1, kind: input, shape index: {}]   ;;  %s1120_s2 = inlined_call_operand.vmem [shape: f32[1,128], index: 2, kind: input, shape index: {}]   ;;  %s1121_s3 = inlined_call_operand.vmem [shape: bf16[512,128], index: 3, kind: output, shape index: {}]  }
   0x1   :  { %s987_s14 = smov 0  }
   0x2 LB: > { %s25_s15 = sadd.s32 1, %s957_s13  ;;  %p700_p0 = scmp.ge.s32.totalorder %s961_s14, 1  ;;  %s961_s14 = sphi %s987_s14, %s13_s14   ;;  %s957_s13 = sphi %s985_s13, %s1123_s13   ;;  %s953_s12 = sphi %s983_s12, %s1122_s12  }
   0x3   : > { %p27_p1 = scmp.ge.s32.totalorder %s25_s15, 2  ;;  %p169_p2 = scmp.lt.s32.totalorder %s961_s14, 3 }
   0x5   : > { %s1125_s15 = smov (%p27_p1, %s25_s15), 0  ;;  %p170_p3 = pnand %p700_p0, %p169_p2 }
   0x6   : > { %s701_s18 = sshll.u32 (!%p170_p3), %s953_s12, 5 }
   0x7   : > { %173 = sbr.rel (%p170_p3) target bundleno = 217 (0xd9), region = 32  ;;  %p204_p4 = scmp.lt.s32.totalorder (!%p170_p3), %s701_s18, 63 }
   0xc   : > { %v812_v0 = vld [vmem:[%s1119_s1 + $0x8] sm:$0xff]  ;;  %v811_v1 = vld [vmem:[%s1119_s1] sm:$0xff]  ;;  %s1127_s18 = smov (!%p204_p4, %s701_s18), 63  ;;  %vm358_vm0 = vcmask 261120  }
   0xd   : > { %413 = vmatpush.bf16.msra.mxu0 %v812_v0  ;;  %908 = vmatpush.bf16.msra.mxu1 %v812_v0  ;;  %s702_s21 = sshll.u32 %s1127_s18, 2  ;;  %v1052_v20 = vld [vmem:[%s1120_s2] ss:$0 sm:$0xff] }
   0xe   : > { %909 = vmatpush.bf16.msra.mxu2 %v812_v0  ;;  %910 = vmatpush.bf16.msra.mxu3 %v812_v0  ;;  %s1015_s24 = scalar_lea.vmem %s1118_s0, %s702_s21  ;;  %s1063_s29 = scalar_lea.vmem %s1121_s3, %s702_s21 }
   0xf   : > { %v795_v2 = vld [vmem:[%s1015_s24] sm:$0xff]  ;;  %v796_v6 = vld [vmem:[%s1015_s24 + $0x8] sm:$0xff]  ;;  %v797_v10 = vld [vmem:[%s1015_s24 + $0x10] sm:$0xff] }
  0x10   : > { %v799_v3 = vld [vmem:[%s1015_s24 + $0x20] sm:$0xff]  ;;  %v800_v7 = vld [vmem:[%s1015_s24 + $0x28] sm:$0xff]  ;;  %v801_v11 = vld [vmem:[%s1015_s24 + $0x30] sm:$0xff] }
  0x11   : > { %414 = vmatpush.bf16.msra.mxu0 %v811_v1  ;;  %911 = vmatpush.bf16.msra.mxu1 %v811_v1  ;;  %v803_v4 = vld [vmem:[%s1015_s24 + $0x40] sm:$0xff]  ;;  %v804_v8 = vld [vmem:[%s1015_s24 + $0x48] sm:$0xff]  ;;  %v805_v12 = vld [vmem:[%s1015_s24 + $0x50] sm:$0xff] }
  0x12   : > { %912 = vmatpush.bf16.msra.mxu2 %v811_v1  ;;  %913 = vmatpush.bf16.msra.mxu3 %v811_v1  ;;  %v807_v5 = vld [vmem:[%s1015_s24 + $0x60] sm:$0xff]  ;;  %v808_v9 = vld [vmem:[%s1015_s24 + $0x68] sm:$0xff]  ;;  %v809_v13 = vld [vmem:[%s1015_s24 + $0x70] sm:$0xff] }
  0x13   : > { %v798_v14 = vld [vmem:[%s1015_s24 + $0x18] sm:$0xff] }
  0x14   : > { %777 = vmatmul.msk.bf16.vlgmr.msra.gmra.mxu0 %vm358_vm0, %v795_v2  ;;  %781 = vmatmul.msk.bf16.vlgmr.msra.gmra.mxu1 %vm358_vm0, %v799_v3  ;;  %v802_v15 = vld [vmem:[%s1015_s24 + $0x38] sm:$0xff] }
  0x15   : > { %785 = vmatmul.msk.bf16.vlgmr.msra.gmra.mxu2 %vm358_vm0, %v803_v4  ;;  %789 = vmatmul.msk.bf16.vlgmr.msra.gmra.mxu3 %vm358_vm0, %v807_v5  ;;  %v806_v16 = vld [vmem:[%s1015_s24 + $0x58] sm:$0xff] }
  0x16   : > { %v810_v17 = vld [vmem:[%s1015_s24 + $0x78] sm:$0xff] }
  0x24   : > { %778 = vmatmul.msk.bf16.gmra.mxu0 %vm358_vm0, %v796_v6  ;;  %782 = vmatmul.msk.bf16.gmra.mxu1 %vm358_vm0, %v800_v7 }
  0x25   : > { %786 = vmatmul.msk.bf16.gmra.mxu2 %vm358_vm0, %v804_v8  ;;  %790 = vmatmul.msk.bf16.gmra.mxu3 %vm358_vm0, %v808_v9 }
  0x34   : > { %779 = vmatmul.msk.bf16.gmra.mxu0 %vm358_vm0, %v797_v10  ;;  %783 = vmatmul.msk.bf16.gmra.mxu1 %vm358_vm0, %v801_v11 }
  0x35   : > { %787 = vmatmul.msk.bf16.gmra.mxu2 %vm358_vm0, %v805_v12  ;;  %791 = vmatmul.msk.bf16.gmra.mxu3 %vm358_vm0, %v809_v13 }
  0x44   : > { %780 = vmatmul.msk.bf16.gmra.mxu0 %vm358_vm0, %v798_v14  ;;  %784 = vmatmul.msk.bf16.gmra.mxu1 %vm358_vm0, %v802_v15 }
  0x45   : > { %788 = vmatmul.msk.bf16.gmra.mxu2 %vm358_vm0, %v806_v16  ;;  %792 = vmatmul.msk.bf16.gmra.mxu3 %vm358_vm0, %v810_v17 }
  0x91   : > { %v416_v18 = vpop.f32.mrf.mxu0  ;;  %v436_v19 = vpop.f32.mrf.mxu1 }
  0x92   : > { %v417_v21 = vadd.f32 %v1052_v20, %v416_v18  ;;  %v437_v22 = vadd.f32 %v1052_v20, %v436_v19 }
  0x94   : > { %v496_v29 = vmax.f32 %v417_v21, 0.0  ;;  %v504_v30 = vmax.f32 %v437_v22, 0.0 }
  0x98   : > { %v456_v23 = vpop.f32.mrf.mxu2  ;;  %v476_v24 = vpop.f32.mrf.mxu3 }
  0x99   : > { %v418_v25 = vpop.f32.mrf.mxu0  ;;  %v438_v26 = vpop.f32.mrf.mxu1  ;;  %v457_v35 = vadd.f32 %v1052_v20, %v456_v23  ;;  %v477_v36 = vadd.f32 %v1052_v20, %v476_v24 }
  0x9a   : > { %v419_v27 = vadd.f32 %v1052_v20, %v418_v25  ;;  %v439_v28 = vadd.f32 %v1052_v20, %v438_v26 }
  0x9b   : > { %v512_v43 = vmax.f32 %v457_v35, 0.0  ;;  %v520_v44 = vmax.f32 %v477_v36, 0.0 }
  0x9c   : > { %v497_v31 = vmax.f32 %v419_v27, 0.0  ;;  %v505_v32 = vmax.f32 %v439_v28, 0.0 }
  0x9e   : > { %v816_v33 = vpack.c.bf16 %v497_v31, %v496_v29  ;;  %v836_v34 = vpack.c.bf16 %v505_v32, %v504_v30 }
  0xa0   : > { %817 = vst [vmem:[%s1063_s29] sm:$0xff] %v816_v33   ;;  %v458_v37 = vpop.f32.mrf.mxu2  ;;  %v478_v38 = vpop.f32.mrf.mxu3 }
  0xa1   : > { %896 = vst [vmem:[%s1063_s29 + $0x20] sm:$0xff] %v836_v34   ;;  %v459_v39 = vadd.f32 %v1052_v20, %v458_v37  ;;  %v479_v40 = vadd.f32 %v1052_v20, %v478_v38  ;;  %v421_v41 = vpop.f32.mrf.mxu0  ;;  %v441_v42 = vpop.f32.mrf.mxu1 }
  0xa2   : > { %v422_v49 = vadd.f32 %v1052_v20, %v421_v41  ;;  %v442_v50 = vadd.f32 %v1052_v20, %v441_v42 }
  0xa3   : > { %v513_v45 = vmax.f32 %v459_v39, 0.0  ;;  %v521_v46 = vmax.f32 %v479_v40, 0.0 }
  0xa4   : > { %v498_v57 = vmax.f32 %v422_v49, 0.0  ;;  %v506_v58 = vmax.f32 %v442_v50, 0.0 }
  0xa5   : > { %v856_v47 = vpack.c.bf16 %v513_v45, %v512_v43  ;;  %v876_v48 = vpack.c.bf16 %v521_v46, %v520_v44 }
  0xa7   : > { %900 = vst [vmem:[%s1063_s29 + $0x40] sm:$0xff] %v856_v47  }
  0xa8   : > { %904 = vst [vmem:[%s1063_s29 + $0x60] sm:$0xff] %v876_v48   ;;  %v461_v51 = vpop.f32.mrf.mxu2  ;;  %v481_v52 = vpop.f32.mrf.mxu3 }
  0xa9   : > { %v423_v53 = vpop.f32.mrf.mxu0  ;;  %v443_v54 = vpop.f32.mrf.mxu1  ;;  %v462_v63 = vadd.f32 %v1052_v20, %v461_v51  ;;  %v482_v0 = vadd.f32 %v1052_v20, %v481_v52 }
  0xaa   : > { %v424_v55 = vadd.f32 %v1052_v20, %v423_v53  ;;  %v444_v56 = vadd.f32 %v1052_v20, %v443_v54 }
  0xab   : > { %v514_v7 = vmax.f32 %v462_v63, 0.0  ;;  %v522_v8 = vmax.f32 %v482_v0, 0.0 }
  0xac   : > { %v499_v59 = vmax.f32 %v424_v55, 0.0  ;;  %v507_v60 = vmax.f32 %v444_v56, 0.0 }
  0xae   : > { %v821_v61 = vpack.c.bf16 %v499_v59, %v498_v57  ;;  %v841_v62 = vpack.c.bf16 %v507_v60, %v506_v58 }
  0xb0   : > { %893 = vst [vmem:[%s1063_s29 + $0x8] sm:$0xff] %v821_v61   ;;  %v463_v1 = vpop.f32.mrf.mxu2  ;;  %v483_v2 = vpop.f32.mrf.mxu3 }
  0xb1   : > { %897 = vst [vmem:[%s1063_s29 + $0x28] sm:$0xff] %v841_v62   ;;  %v464_v3 = vadd.f32 %v1052_v20, %v463_v1  ;;  %v484_v4 = vadd.f32 %v1052_v20, %v483_v2  ;;  %v426_v5 = vpop.f32.mrf.mxu0  ;;  %v446_v6 = vpop.f32.mrf.mxu1 }
  0xb2   : > { %v427_v13 = vadd.f32 %v1052_v20, %v426_v5  ;;  %v447_v14 = vadd.f32 %v1052_v20, %v446_v6 }
  0xb3   : > { %v515_v9 = vmax.f32 %v464_v3, 0.0  ;;  %v523_v10 = vmax.f32 %v484_v4, 0.0 }
  0xb4   : > { %v500_v22 = vmax.f32 %v427_v13, 0.0  ;;  %v508_v23 = vmax.f32 %v447_v14, 0.0 }
  0xb5   : > { %v861_v11 = vpack.c.bf16 %v515_v9, %v514_v7  ;;  %v881_v12 = vpack.c.bf16 %v523_v10, %v522_v8 }
  0xb7   : > { %901 = vst [vmem:[%s1063_s29 + $0x48] sm:$0xff] %v861_v11  }
  0xb8   : > { %905 = vst [vmem:[%s1063_s29 + $0x68] sm:$0xff] %v881_v12   ;;  %v466_v15 = vpop.f32.mrf.mxu2  ;;  %v486_v16 = vpop.f32.mrf.mxu3 }
  0xb9   : > { %v428_v17 = vpop.f32.mrf.mxu0  ;;  %v448_v18 = vpop.f32.mrf.mxu1  ;;  %v467_v28 = vadd.f32 %v1052_v20, %v466_v15  ;;  %v487_v29 = vadd.f32 %v1052_v20, %v486_v16 }
  0xba   : > { %v429_v19 = vadd.f32 %v1052_v20, %v428_v17  ;;  %v449_v21 = vadd.f32 %v1052_v20, %v448_v18 }
  0xbb   : > { %v516_v36 = vmax.f32 %v467_v28, 0.0  ;;  %v524_v37 = vmax.f32 %v487_v29, 0.0 }
  0xbc   : > { %v501_v24 = vmax.f32 %v429_v19, 0.0  ;;  %v509_v25 = vmax.f32 %v449_v21, 0.0 }
  0xbe   : > { %v826_v26 = vpack.c.bf16 %v501_v24, %v500_v22  ;;  %v846_v27 = vpack.c.bf16 %v509_v25, %v508_v23 }
  0xc0   : > { %894 = vst [vmem:[%s1063_s29 + $0x10] sm:$0xff] %v826_v26   ;;  %v468_v30 = vpop.f32.mrf.mxu2  ;;  %v488_v31 = vpop.f32.mrf.mxu3 }
  0xc1   : > { %898 = vst [vmem:[%s1063_s29 + $0x30] sm:$0xff] %v846_v27   ;;  %v469_v32 = vadd.f32 %v1052_v20, %v468_v30  ;;  %v489_v33 = vadd.f32 %v1052_v20, %v488_v31  ;;  %v431_v34 = vpop.f32.mrf.mxu0  ;;  %v451_v35 = vpop.f32.mrf.mxu1 }
  0xc2   : > { %v432_v42 = vadd.f32 %v1052_v20, %v431_v34  ;;  %v452_v43 = vadd.f32 %v1052_v20, %v451_v35 }
  0xc3   : > { %v517_v38 = vmax.f32 %v469_v32, 0.0  ;;  %v525_v39 = vmax.f32 %v489_v33, 0.0 }
  0xc4   : > { %v502_v50 = vmax.f32 %v432_v42, 0.0  ;;  %v510_v51 = vmax.f32 %v452_v43, 0.0 }
  0xc5   : > { %v866_v40 = vpack.c.bf16 %v517_v38, %v516_v36  ;;  %v886_v41 = vpack.c.bf16 %v525_v39, %v524_v37 }
  0xc7   : > { %902 = vst [vmem:[%s1063_s29 + $0x50] sm:$0xff] %v866_v40  }
  0xc8   : > { %906 = vst [vmem:[%s1063_s29 + $0x70] sm:$0xff] %v886_v41   ;;  %v471_v44 = vpop.f32.mrf.mxu2  ;;  %v491_v45 = vpop.f32.mrf.mxu3 }
  0xc9   : > { %v433_v46 = vpop.f32.mrf.mxu0  ;;  %v453_v47 = vpop.f32.mrf.mxu1  ;;  %v472_v56 = vadd.f32 %v1052_v20, %v471_v44  ;;  %v492_v57 = vadd.f32 %v1052_v20, %v491_v45 }
  0xca   : > { %v434_v48 = vadd.f32 %v1052_v20, %v433_v46  ;;  %v454_v49 = vadd.f32 %v1052_v20, %v453_v47 }
  0xcb   : > { %v518_v62 = vmax.f32 %v472_v56, 0.0  ;;  %v526_v63 = vmax.f32 %v492_v57, 0.0 }
  0xcc   : > { %v503_v52 = vmax.f32 %v434_v48, 0.0  ;;  %v511_v53 = vmax.f32 %v454_v49, 0.0 }
  0xce   : > { %v831_v54 = vpack.c.bf16 %v503_v52, %v502_v50  ;;  %v851_v55 = vpack.c.bf16 %v511_v53, %v510_v51 }
  0xd0   : > { %895 = vst [vmem:[%s1063_s29 + $0x18] sm:$0xff] %v831_v54   ;;  %v473_v58 = vpop.f32.mrf.mxu2  ;;  %v493_v59 = vpop.f32.mrf.mxu3 }
  0xd1   : > { %899 = vst [vmem:[%s1063_s29 + $0x38] sm:$0xff] %v851_v55   ;;  %v474_v60 = vadd.f32 %v1052_v20, %v473_v58  ;;  %v494_v61 = vadd.f32 %v1052_v20, %v493_v59 }
  0xd3   : > { %v519_v0 = vmax.f32 %v474_v60, 0.0  ;;  %v527_v1 = vmax.f32 %v494_v61, 0.0 }
  0xd5   : > { %v871_v2 = vpack.c.bf16 %v519_v0, %v518_v62  ;;  %v891_v3 = vpack.c.bf16 %v527_v1, %v526_v63 }
  0xd7   : > { %903 = vst [vmem:[%s1063_s29 + $0x58] sm:$0xff] %v871_v2  }
  0xd8   : > { %907 = vst [vmem:[%s1063_s29 + $0x78] sm:$0xff] %v891_v3  }
  0xd9 PF: > { %s13_s14 = sadd.s32 1, %s961_s14   ;;  %s1122_s12 = smov %s957_s13 }
  0xda   : > { %p10_p5 = scmp.ge.s32.totalorder %s13_s14, 4   ;;  %s1123_s13 = smov %s1125_s15 }
  0xdc   :  { %12 = sbr.rel (!%p10_p5) target bundleno = 2 (0x2), region = 68 }

// kernel: mobilenet_v1.14
= control target key start
LH: loop header
LB: loop body
LE: loop exit
PB: predicated region body
PF: predicated region fallthrough
CT: control target
= control target key end

     0   :  { %s1664_s18 = smov 0   ;;  %s1666_s19 = smov 0   ;;  %s2103_s0 = inlined_call_operand.vmem [shape: bf16[4,2,9,9,128], index: 0, kind: input, shape index: {}]   ;;  %s2104_s1 = inlined_call_operand.vmem [shape: f32[9,128], index: 1, kind: input, shape index: {}]   ;;  %s2105_s2 = inlined_call_operand.vmem [shape: f32[1,128], index: 2, kind: input, shape index: {}]   ;;  %s2106_s3 = inlined_call_operand.vmem [shape: bf16[128,128], index: 3, kind: input, shape index: {}]   ;;  %s2107_s4 = inlined_call_operand.vmem [shape: f32[1,128], index: 4, kind: input, shape index: {}]   ;;  %s2108_s5 = inlined_call_operand.vmem [shape: bf16[2,64,128], index: 5, kind: output, shape index: {}]  }
   0x1   :  { %s1668_s20 = smov 0   ;;  %s1670_s21 = smov 0  }
   0x2   :  { %s1672_s22 = smov 0  }
   0x3 LB: > { %s27_s23 = sadd.s32 1, %s1628_s21  ;;  %p41_p1 = scmp.ne.s32.totalorder %s1620_s19, %s1616_s18  ;;  %s1632_s22 = sphi %s1672_s22, %s15_s22   ;;  %s1628_s21 = sphi %s1670_s21, %s2112_s21   ;;  %s1624_s20 = sphi %s1668_s20, %s2111_s20   ;;  %s1620_s19 = sphi %s1666_s19, %s2110_s19   ;;  %s1616_s18 = sphi %s1664_s18, %s2109_s18  }
   0x4   : > { %p29_p0 = scmp.ge.s32.totalorder %s27_s23, 2  ;;  %p42_p2 = scmp.eq.s32.totalorder %s1632_s22, 0 }
   0x5   : > { %s34_s25 = sadd.s32 1, %s1620_s19  ;;  %p1389_p5 = scmp.ge.s32.totalorder %s1632_s22, 2 }
   0x6   : > { %s2114_s23 = smov (%p29_p0, %s27_s23), 0  ;;  %p43_p3 = por %p42_p2, %p41_p1 }
   0x7   : > { %s31_s24 = ssub.s32 %s1628_s21, %s2114_s23  ;;  %208 = sbr.rel (%p1389_p5) target bundleno = 53 (0x35), region = 32 }
   0x8   : > { %p32_p4 = scmp.eq.s32.totalorder %s31_s24, 0 }
   0xa   : > { %s1699_s26 = scalar_select %p32_p4, %s1620_s19, %s34_s25  }
   0xc   : > { %211 = sbr.rel (!%p43_p3) target bundleno = 53 (0x35), region = 36  ;;  %s213_s27 = sand.u32 (%p43_p3), 1, %s1620_s19  }
   0xd   : > { %s1541_s28 = smul.u32 (%p43_p3), 72, %s1628_s21 }
   0xe   : > { %s1540_s29 = smul.u32 (%p43_p3), 288, %s213_s27 }
   0xf   : > { %s1707_s7 = scalar_lea.vmem (%p43_p3), %s2103_s0, %s1541_s28 }
  0x10   : > { %v235_v0 = vld [vmem:[%s1707_s7] sm:$0xff] (%p43_p3)   ;;  %v239_v1 = vld [vmem:[%s1707_s7 + $0x8] sm:$0xff] (%p43_p3)   ;;  %v243_v2 = vld [vmem:[%s1707_s7 + $0x10] sm:$0xff] (%p43_p3)   ;;  %s1712_s8 = scalar_lea.vmem (%p43_p3), [#allocation3], %s1540_s29 }
  0x11   : > { %236 = vst [vmem:[%s1712_s8] sm:$0xff] %v235_v0   ;;  %v247_v3 = vld [vmem:[%s1707_s7 + $0x18] sm:$0xff]   ;;  %v251_v4 = vld [vmem:[%s1707_s7 + $0x20] sm:$0xff]   ;;  %v255_v5 = vld [vmem:[%s1707_s7 + $0x28] sm:$0xff]  }
  0x12   : > { %240 = vst [vmem:[%s1712_s8 + $0x8] sm:$0xff] %v239_v1   ;;  %v259_v6 = vld [vmem:[%s1707_s7 + $0x30] sm:$0xff]   ;;  %v263_v7 = vld [vmem:[%s1707_s7 + $0x38] sm:$0xff]   ;;  %v267_v8 = vld [vmem:[%s1707_s7 + $0x40] sm:$0xff]  }
  0x13   : > { %244 = vst [vmem:[%s1712_s8 + $0x10] sm:$0xff] %v243_v2   ;;  %v271_v9 = vld [vmem:[%s1707_s7 + $0x90] sm:$0xff]   ;;  %v275_v10 = vld [vmem:[%s1707_s7 + $0x98] sm:$0xff]   ;;  %v279_v11 = vld [vmem:[%s1707_s7 + $0xa0] sm:$0xff]  }
  0x14   : > { %248 = vst [vmem:[%s1712_s8 + $0x18] sm:$0xff] %v247_v3   ;;  %v283_v12 = vld [vmem:[%s1707_s7 + $0xa8] sm:$0xff]   ;;  %v287_v13 = vld [vmem:[%s1707_s7 + $0xb0] sm:$0xff]   ;;  %v291_v14 = vld [vmem:[%s1707_s7 + $0xb8] sm:$0xff]  }
  0x15   : > { %252 = vst [vmem:[%s1712_s8 + $0x20] sm:$0xff] %v251_v4   ;;  %v295_v15 = vld [vmem:[%s1707_s7 + $0xc0] sm:$0xff]   ;;  %v299_v16 = vld [vmem:[%s1707_s7 + $0xc8] sm:$0xff]   ;;  %v303_v17 = vld [vmem:[%s1707_s7 + $0xd0] sm:$0xff]  }
  0x16   : > { %256 = vst [vmem:[%s1712_s8 + $0x28] sm:$0xff] %v255_v5   ;;  %v307_v18 = vld [vmem:[%s1707_s7 + $0x120] sm:$0xff]   ;;  %v311_v19 = vld [vmem:[%s1707_s7 + $0x128] sm:$0xff]   ;;  %v315_v20 = vld [vmem:[%s1707_s7 + $0x130] sm:$0xff]  }
  0x17   : > { %260 = vst [vmem:[%s1712_s8 + $0x30] sm:$0xff] %v259_v6   ;;  %v319_v21 = vld [vmem:[%s1707_s7 + $0x138] sm:$0xff]   ;;  %v323_v22 = vld [vmem:[%s1707_s7 + $0x140] sm:$0xff]   ;;  %v327_v23 = vld [vmem:[%s1707_s7 + $0x148] sm:$0xff]  }
  0x18   : > { %264 = vst [vmem:[%s1712_s8 + $0x38] sm:$0xff] %v263_v7   ;;  %v331_v24 = vld [vmem:[%s1707_s7 + $0x150] sm:$0xff]   ;;  %v335_v25 = vld [vmem:[%s1707_s7 + $0x158] sm:$0xff]   ;;  %v339_v26 = vld [vmem:[%s1707_s7 + $0x160] sm:$0xff]  }
  0x19   : > { %268 = vst [vmem:[%s1712_s8 + $0x40] sm:$0xff] %v267_v8   ;;  %v343_v27 = vld [vmem:[%s1707_s7 + $0x1b0] sm:$0xff]   ;;  %v347_v28 = vld [vmem:[%s1707_s7 + $0x1b8] sm:$0xff]   ;;  %v351_v29 = vld [vmem:[%s1707_s7 + $0x1c0] sm:$0xff]  }
  0x1a   : > { %272 = vst [vmem:[%s1712_s8 + $0x48] sm:$0xff] %v271_v9   ;;  %v355_v30 = vld [vmem:[%s1707_s7 + $0x1c8] sm:$0xff]   ;;  %v359_v31 = vld [vmem:[%s1707_s7 + $0x1d0] sm:$0xff]   ;;  %v363_v32 = vld [vmem:[%s1707_s7 + $0x1d8] sm:$0xff]  }
  0x1b   : > { %276 = vst [vmem:[%s1712_s8 + $0x50] sm:$0xff] %v275_v10   ;;  %v367_v33 = vld [vmem:[%s1707_s7 + $0x1e0] sm:$0xff]   ;;  %v371_v34 = vld [vmem:[%s1707_s7 + $0x1e8] sm:$0xff]   ;;  %v375_v35 = vld [vmem:[%s1707_s7 + $0x1f0] sm:$0xff]  }
  0x1c   : > { %280 = vst [vmem:[%s1712_s8 + $0x58] sm:$0xff] %v279_v11  }
  0x1d   : > { %284 = vst [vmem:[%s1712_s8 + $0x60] sm:$0xff] %v283_v12  }
  0x1e   : > { %288 = vst [vmem:[%s1712_s8 + $0x68] sm:$0xff] %v287_v13  }
  0x1f   : > { %292 = vst [vmem:[%s1712_s8 + $0x70] sm:$0xff] %v291_v14  }
  0x20   : > { %296 = vst [vmem:[%s1712_s8 + $0x78] sm:$0xff] %v295_v15  }
  0x21   : > { %300 = vst [vmem:[%s1712_s8 + $0x80] sm:$0xff] %v299_v16  }
  0x22   : > { %304 = vst [vmem:[%s1712_s8 + $0x88] sm:$0xff] %v303_v17  }
  0x23   : > { %308 = vst [vmem:[%s1712_s8 + $0x90] sm:$0xff] %v307_v18  }
  0x24   : > { %312 = vst [vmem:[%s1712_s8 + $0x98] sm:$0xff] %v311_v19  }
  0x25   : > { %316 = vst [vmem:[%s1712_s8 + $0xa0] sm:$0xff] %v315_v20  }
  0x26   : > { %320 = vst [vmem:[%s1712_s8 + $0xa8] sm:$0xff] %v319_v21  }
  0x27   : > { %324 = vst [vmem:[%s1712_s8 + $0xb0] sm:$0xff] %v323_v22  }
  0x28   : > { %328 = vst [vmem:[%s1712_s8 + $0xb8] sm:$0xff] %v327_v23  }
  0x29   : > { %332 = vst [vmem:[%s1712_s8 + $0xc0] sm:$0xff] %v331_v24  }
  0x2a   : > { %336 = vst [vmem:[%s1712_s8 + $0xc8] sm:$0xff] %v335_v25  }
  0x2b   : > { %340 = vst [vmem:[%s1712_s8 + $0xd0] sm:$0xff] %v339_v26  }
  0x2c   : > { %344 = vst [vmem:[%s1712_s8 + $0xd8] sm:$0xff] %v343_v27  }
  0x2d   : > { %348 = vst [vmem:[%s1712_s8 + $0xe0] sm:$0xff] %v347_v28  }
  0x2e   : > { %352 = vst [vmem:[%s1712_s8 + $0xe8] sm:$0xff] %v351_v29  }
  0x2f   : > { %356 = vst [vmem:[%s1712_s8 + $0xf0] sm:$0xff] %v355_v30  }
  0x30   : > { %360 = vst [vmem:[%s1712_s8 + $0xf8] sm:$0xff] %v359_v31  }
  0x31   : > { %364 = vst [vmem:[%s1712_s8 + $0x100] sm:$0xff] %v363_v32  }
  0x32   : > { %368 = vst [vmem:[%s1712_s8 + $0x108] sm:$0xff] %v367_v33  }
  0x33   : > { %372 = vst [vmem:[%s1712_s8 + $0x110] sm:$0xff] %v371_v34  }
  0x34   : > { %376 = vst [vmem:[%s1712_s8 + $0x118] sm:$0xff] %v375_v35  }
  0x35 PF: > { %p1391_p6 = scmp.ge.s32.totalorder %s1632_s22, 1  ;;  %p545_p7 = scmp.lt.s32.totalorder %s1632_s22, 3 }
  0x37   : > { %p546_p8 = pnand %p1391_p6, %p545_p7 }
  0x38   : > { %s552_s11 = sand.u32 (!%p546_p8), 1, %s1616_s18   ;;  %p596_p9 = scmp.lt.s32.totalorder (!%p546_p8), %s1624_s20, 1 }
  0x39   : > { %549 = sbr.rel (%p546_p8) target bundleno = 307 (0x133), region = 77 }
  0x3a   : > { %s1542_s12 = smul.u32 (!%p546_p8), 288, %s552_s11 }
  0x3c   : > { %s1800_s25 = scalar_lea.vmem (!%p546_p8), [#allocation3], %s1542_s12 }
  0x3e   : > { %v1492_v36 = vld [vmem:[%s2106_s3 + $0x38] sm:$0xff]  ;;  %v1491_v37 = vld [vmem:[%s2106_s3 + $0x30] sm:$0xff]  ;;  %v1795_v38 = vld [vmem:[%s2104_s1] ss:$0 sm:$0xff]  ;;  %vm935_vm0 = vcmask 1046528   ;;  %s2116_s20 = smov (!%p596_p9, %s1624_s20), 1 }
  0x3f   : > { %1220 = vmatpush.bf16.msra.mxu0 %v1492_v36  ;;  %1516 = vmatpush.bf16.msra.mxu1 %v1492_v36  ;;  %v1490_v39 = vld [vmem:[%s2106_s3 + $0x28] sm:$0xff]  ;;  %v608_v40 = vld [vmem:[%s1800_s25] sm:$0xf]  ;;  %v1395_v45 = vld [vmem:[%s1800_s25 + $0x50] sm:$0xf]  ;;  %s1484_s12 = sshll.u32 %s2116_s20, 5 }
  0x40   : > { %1517 = vmatpush.bf16.msra.mxu2 %v1492_v36  ;;  %1518 = vmatpush.bf16.msra.mxu3 %v1492_v36  ;;  %v609_v41 = vld [vmem:[%s1800_s25 + $0x8] sm:$0xf]  ;;  %v616_v43 = vunpack.c.l.bf16 %v608_v40  ;;  %v1809_v47 = vld [vmem:[%s2104_s1 + $0x1] ss:$0 sm:$0xff]  ;;  %v661_v48 = vld [vmem:[%s1800_s25 + $0x4] sm:$0x1]  ;;  %v644_v49 = vunpack.c.l.bf16 %v1395_v45  ;;  %s603_s15 = scalar_lea.vmem %s2108_s5, %s1484_s12 }
  0x41   : > { %v1394_v42 = vld [vmem:[%s1800_s25 + $0x48] sm:$0xf]  ;;  %v617_v44 = vunpack.c.l.bf16 %v609_v41  ;;  %v662_v50 = vld [vmem:[%s1800_s25 + $0xc] sm:$0x1]  ;;  %v669_v51 = vunpack.c.l.bf16 %v661_v48  ;;  %v1816_v52 = vld [vmem:[%s2104_s1 + $0x2] ss:$0 sm:$0xff] }
  0x42   : > { %v643_v46 = vunpack.c.l.bf16 %v1394_v42  ;;  %v626_v53 = vmul.f32 %v1795_v38, %v616_v43  ;;  %v670_v56 = vunpack.c.l.bf16 %v662_v50  ;;  %v1402_v57 = vld [vmem:[%s1800_s25 + $0x90] sm:$0xf]  ;;  %v1403_v58 = vld [vmem:[%s1800_s25 + $0x98] sm:$0xf]  ;;  %v1489_v59 = vld [vmem:[%s2106_s3 + $0x20] sm:$0xff]  ;;  %v654_v60 = vmul.f32 %v1809_v47, %v644_v49 }
  0x43   : > { %1221 = vmatpush.bf16.msra.mxu0 %v1491_v37  ;;  %1519 = vmatpush.bf16.msra.mxu1 %v1491_v37  ;;  %v627_v54 = vmul.f32 %v1795_v38, %v617_v44  ;;  %v1828_v61 = vmul.f32 %v1816_v52, %v616_v43  ;;  %v1833_v62 = vld [vmem:[%s2104_s1 + $0x3] ss:$0 sm:$0xff]  ;;  %v1410_v63 = vld [vmem:[%s1800_s25 + $0xd8] sm:$0xf]  ;;  %v1838_v1 = vmul.f32 %v1816_v52, %v669_v51  ;;  %v704_v2 = vunpack.c.l.bf16 %v1402_v57  ;;  %v1843_v5 = vld [vmem:[%s2104_s1 + $0x4] ss:$0 sm:$0xff] }
  0x44   : > { %1520 = vmatpush.bf16.msra.mxu2 %v1491_v37  ;;  %1521 = vmatpush.bf16.msra.mxu3 %v1491_v37  ;;  %v653_v55 = vmul.f32 %v1809_v47, %v643_v46  ;;  %v1411_v0 = vld [vmem:[%s1800_s25 + $0xe0] sm:$0xf]  ;;  %v705_v3 = vunpack.c.l.bf16 %v1403_v58  ;;  %v731_v4 = vunpack.c.l.bf16 %v1410_v63  ;;  %v1418_v6 = vld [vmem:[%s1800_s25 + $0x94] sm:$0x1]  ;;  %v681_v7 = vmul.f32 %v1816_v52, %v617_v44  ;;  %v1419_v10 = vld [vmem:[%s1800_s25 + $0x9c] sm:$0x1] }
  0x45   : > { %v1848_v8 = vmul.f32 %v1816_v52, %v670_v56  ;;  %v732_v9 = vunpack.c.l.bf16 %v1411_v0  ;;  %v757_v11 = vunpack.c.l.bf16 %v1418_v6  ;;  %v1854_v12 = vld [vmem:[%s2104_s1 + $0x5] ss:$0 sm:$0xff]  ;;  %v714_v13 = vmul.f32 %v1833_v62, %v704_v2  ;;  %v1426_v15 = vld [vmem:[%s1800_s25 + $0x8] sm:$0xf]  ;;  %v1427_v16 = vld [vmem:[%s1800_s25 + $0x10] sm:$0xf] }
  0x46   : > { %v758_v14 = vunpack.c.l.bf16 %v1419_v10  ;;  %v1859_v17 = vadd.f32 %v653_v55, %v626_v53  ;;  %v1861_v18 = vadd.f32 %v654_v60, %v627_v54  ;;  %v1488_v19 = vld [vmem:[%s2106_s3 + $0x18] sm:$0xff]  ;;  %v715_v20 = vmul.f32 %v1833_v62, %v705_v3  ;;  %v1873_v24 = vld [vmem:[%s2104_s1 + $0x6] ss:$0 sm:$0xff]  ;;  %v1434_v25 = vld [vmem:[%s1800_s25 + $0x50] sm:$0xf] }
  0x47   : > { %1222 = vmatpush.bf16.msra.mxu0 %v1490_v39  ;;  %1522 = vmatpush.bf16.msra.mxu1 %v1490_v39  ;;  %v741_v21 = vmul.f32 %v1843_v5, %v731_v4  ;;  %v742_v22 = vmul.f32 %v1843_v5, %v732_v9  ;;  %v767_v23 = vmul.f32 %v1854_v12, %v704_v2  ;;  %v1435_v26 = vld [vmem:[%s1800_s25 + $0x58] sm:$0xf]  ;;  %v792_v28 = vunpack.c.l.bf16 %v1426_v15  ;;  %v1881_v31 = vld [vmem:[%s2104_s1 + $0x7] ss:$0 sm:$0xff]  ;;  %v1442_v32 = vld [vmem:[%s1800_s25 + $0xc] sm:$0x1] }
  0x48   : > { %1523 = vmatpush.bf16.msra.mxu2 %v1490_v39  ;;  %1524 = vmatpush.bf16.msra.mxu3 %v1490_v39  ;;  %v768_v27 = vmul.f32 %v1854_v12, %v757_v11  ;;  %v793_v29 = vunpack.c.l.bf16 %v1427_v16  ;;  %v819_v30 = vunpack.c.l.bf16 %v1434_v25  ;;  %v769_v33 = vmul.f32 %v1854_v12, %v705_v3  ;;  %v1443_v36 = vld [vmem:[%s1800_s25 + $0x14] sm:$0x1]  ;;  %v1890_v39 = vld [vmem:[%s2104_s1 + $0x8] ss:$0 sm:$0xff]  ;;  %v1397_v25 = vld [vmem:[%s1800_s25 + $0x60] sm:$0xf] }
  0x49   : > { %v770_v34 = vmul.f32 %v1854_v12, %v758_v14  ;;  %v820_v35 = vunpack.c.l.bf16 %v1435_v26  ;;  %v845_v37 = vunpack.c.l.bf16 %v1442_v32  ;;  %v802_v40 = vmul.f32 %v1873_v24, %v792_v28  ;;  %v1487_v54 = vld [vmem:[%s2106_s3 + $0x10] sm:$0xff]  ;;  %v1486_v2 = vld [vmem:[%s2106_s3 + $0x8] sm:$0xff]  ;;  %v664_v32 = vld [vmem:[%s1800_s25 + $0x1c] sm:$0x1] }
  0x4a   : > { %v803_v41 = vmul.f32 %v1873_v24, %v793_v29  ;;  %v829_v42 = vmul.f32 %v1881_v31, %v819_v30  ;;  %v846_v43 = vunpack.c.l.bf16 %v1443_v36  ;;  %v855_v45 = vmul.f32 %v1890_v39, %v792_v28  ;;  %v663_v26 = vld [vmem:[%s1800_s25 + $0x14] sm:$0x1] }
  0x4b   : > { %1223 = vmatpush.bf16.msra.mxu0 %v1489_v59  ;;  %1525 = vmatpush.bf16.msra.mxu1 %v1489_v59  ;;  %v830_v44 = vmul.f32 %v1881_v31, %v820_v35  ;;  %v856_v46 = vmul.f32 %v1890_v39, %v845_v37  ;;  %v857_v48 = vmul.f32 %v1890_v39, %v793_v29  ;;  %v887_v50 = vrot.slane %v714_v13, 7 }
  0x4c   : > { %1526 = vmatpush.bf16.msra.mxu2 %v1489_v59  ;;  %1527 = vmatpush.bf16.msra.mxu3 %v1489_v59  ;;  %v858_v49 = vmul.f32 %v1890_v39, %v846_v43  ;;  %v888_v51 = vrot.slane %v715_v20, 7  ;;  %v936_v53 = vrot.slane %v767_v23, 1  ;;  %v937_v55 = vrot.slane %v768_v27, 1  ;;  %v1404_v43 = vld [vmem:[%s1800_s25 + $0xa0] sm:$0xf] }
  0x4d   : > { %v939_v56 = vrot.slane %v769_v33, 1  ;;  %v940_v57 = vrot.slane %v770_v34, 1  ;;  %v976_v58 = vadd.f32 %v829_v42, %v802_v40  ;;  %v903_v59 = vadd.f32 %v887_v50, %v1828_v61  ;;  %v1929_v40 = vld [vmem:[%s2105_s2] ss:$0 sm:$0xff] }
  0x4e   : > { %v904_v60 = vadd.f32 %v887_v50, %v1838_v1  ;;  %v905_v63 = vadd.f32 %v888_v51, %v681_v7  ;;  %v1072_v0 = vrot.slane %v855_v45, 1  ;;  %v906_v3 = vadd.f32 %v888_v51, %v1848_v8  ;;  %v610_v1 = vld [vmem:[%s1800_s25 + $0x10] sm:$0xf]  ;;  %v611_v7 = vld [vmem:[%s1800_s25 + $0x18] sm:$0xf] }
  0x4f   : > { %1224 = vmatpush.bf16.msra.mxu0 %v1488_v19  ;;  %1528 = vmatpush.bf16.msra.mxu1 %v1488_v19  ;;  %v938_v4 = vsel %vm935_vm0, %v936_v53, %v937_v55  ;;  %v941_v6 = vsel %vm935_vm0, %v939_v56, %v940_v57  ;;  %v977_v9 = vadd.f32 %v830_v44, %v803_v41  ;;  %v1000_v13 = vrot.slane %v903_v59, 1  ;;  %v1412_v50 = vld [vmem:[%s1800_s25 + $0xe8] sm:$0xf]  ;;  %v1413_v51 = vld [vmem:[%s1800_s25 + $0xf0] sm:$0xf] }
  0x50   : > { %1529 = vmatpush.bf16.msra.mxu2 %v1488_v19  ;;  %1530 = vmatpush.bf16.msra.mxu3 %v1488_v19  ;;  %v968_v10 = vadd.f32 %v938_v4, %v741_v21  ;;  %v969_v11 = vadd.f32 %v941_v6, %v742_v22  ;;  %v1001_v61 = vrot.slane %v904_v60, 1  ;;  %v1003_v14 = vrot.slane %v905_v63, 1  ;;  %v1396_v19 = vld [vmem:[%s1800_s25 + $0x58] sm:$0xf]  ;;  %v1420_v57 = vld [vmem:[%s1800_s25 + $0xa4] sm:$0x1] }
  0x51   : > { %v1004_v15 = vrot.slane %v906_v3, 1  ;;  %v1073_v8 = vrot.slane %v856_v46, 1  ;;  %v1075_v16 = vrot.slane %v857_v48, 1  ;;  %v1076_v23 = vrot.slane %v858_v49, 1  ;;  %v1405_v49 = vld [vmem:[%s1800_s25 + $0xa8] sm:$0xf] }
  0x52   : > { %v1002_v20 = vsel %vm935_vm0, %v1000_v13, %v1001_v61  ;;  %v1040_v21 = vadd.f32 %v976_v58, %v968_v10  ;;  %v1041_v22 = vadd.f32 %v977_v9, %v969_v11  ;;  %v618_v30 = vunpack.c.l.bf16 %v610_v1  ;;  %v1421_v58 = vld [vmem:[%s1800_s25 + $0xac] sm:$0x1]  ;;  %v1428_v9 = vld [vmem:[%s1800_s25 + $0x18] sm:$0xf]  ;;  %v1429_v10 = vld [vmem:[%s1800_s25 + $0x20] sm:$0xf] }
  0x53   : > { %1225 = vmatpush.bf16.msra.mxu0 %v1487_v54  ;;  %1531 = vmatpush.bf16.msra.mxu1 %v1487_v54  ;;  %v1005_v27 = vsel %vm935_vm0, %v1003_v14, %v1004_v15  ;;  %v1032_v28 = vadd.f32 %v1002_v20, %v1859_v17  ;;  %v1074_v29 = vsel %vm935_vm0, %v1072_v0, %v1073_v8  ;;  %v619_v35 = vunpack.c.l.bf16 %v611_v7  ;;  %v1485_v17 = vld [vmem:[%s2106_s3] sm:$0xff]  ;;  %v1437_v14 = vld [vmem:[%s1800_s25 + $0x68] sm:$0xf]  ;;  %v1444_v20 = vld [vmem:[%s1800_s25 + $0x1c] sm:$0x1] }
  0x54   : > { %1532 = vmatpush.bf16.msra.mxu2 %v1487_v54  ;;  %1533 = vmatpush.bf16.msra.mxu3 %v1487_v54  ;;  %v1033_v33 = vadd.f32 %v1005_v27, %v1861_v18  ;;  %v1077_v34 = vsel %vm935_vm0, %v1075_v16, %v1076_v23  ;;  %v645_v36 = vunpack.c.l.bf16 %v1396_v19  ;;  %v1932_v18 = vmul.f32 %v1795_v38, %v618_v30  ;;  %v1436_v7 = vld [vmem:[%s1800_s25 + $0x60] sm:$0xf] }
  0x55   : > { %v1048_v37 = vadd.f32 %v1040_v21, %v1032_v28  ;;  %v646_v41 = vunpack.c.l.bf16 %v1397_v25  ;;  %v671_v42 = vunpack.c.l.bf16 %v663_v26  ;;  %v629_v45 = vmul.f32 %v1795_v38, %v619_v35  ;;  %v1445_v21 = vld [vmem:[%s1800_s25 + $0x24] sm:$0x1] }
  0x56   : > { %v1049_v44 = vadd.f32 %v1041_v22, %v1033_v33  ;;  %v655_v46 = vmul.f32 %v1809_v47, %v645_v36  ;;  %v672_v48 = vunpack.c.l.bf16 %v664_v32  ;;  %v683_v55 = vmul.f32 %v1816_v52, %v618_v30 }
  0x57   : > { %1226 = vmatpush.bf16.msra.mxu0 %v1486_v2  ;;  %1534 = vmatpush.bf16.msra.mxu1 %v1486_v2  ;;  %v1104_v53 = vadd.f32 %v1074_v29, %v1048_v37  ;;  %v656_v54 = vmul.f32 %v1809_v47, %v646_v41  ;;  %v684_v56 = vmul.f32 %v1816_v52, %v671_v42  ;;  %v706_v0 = vunpack.c.l.bf16 %v1404_v43 }
  0x58   : > { %1535 = vmatpush.bf16.msra.mxu2 %v1486_v2  ;;  %1536 = vmatpush.bf16.msra.mxu3 %v1486_v2  ;;  %v1105_v59 = vadd.f32 %v1077_v34, %v1049_v44  ;;  %v685_v60 = vmul.f32 %v1816_v52, %v619_v35  ;;  %v686_v63 = vmul.f32 %v1816_v52, %v672_v48  ;;  %v707_v3 = vunpack.c.l.bf16 %v1405_v49 }
  0x59   : > { %v1116_v2 = vadd.f32 %v1929_v40, %v1104_v53  ;;  %v733_v4 = vunpack.c.l.bf16 %v1412_v50  ;;  %v734_v6 = vunpack.c.l.bf16 %v1413_v51  ;;  %v716_v13 = vmul.f32 %v1833_v62, %v706_v0 }
  0x5a   : > { %v1117_v11 = vadd.f32 %v1929_v40, %v1105_v59  ;;  %v759_v61 = vunpack.c.l.bf16 %v1420_v57  ;;  %v760_v1 = vunpack.c.l.bf16 %v1421_v58  ;;  %v717_v8 = vmul.f32 %v1833_v62, %v707_v3 }
  0x5b   : > { %1227 = vmatpush.bf16.msra.mxu0 %v1485_v17  ;;  %1537 = vmatpush.bf16.msra.mxu1 %v1485_v17  ;;  %v1124_v15 = vmax.f32 %v1116_v2, 0.0  ;;  %v743_v16 = vmul.f32 %v1843_v5, %v733_v4  ;;  %v744_v19 = vmul.f32 %v1843_v5, %v734_v6  ;;  %v771_v23 = vmul.f32 %v1854_v12, %v706_v0 }
  0x5c   : > { %1538 = vmatpush.bf16.msra.mxu2 %v1485_v17  ;;  %1539 = vmatpush.bf16.msra.mxu3 %v1485_v17  ;;  %v1125_v22 = vmax.f32 %v1117_v11, 0.0  ;;  %v772_v25 = vmul.f32 %v1854_v12, %v759_v61  ;;  %v773_v26 = vmul.f32 %v1854_v12, %v707_v3  ;;  %v774_v27 = vmul.f32 %v1854_v12, %v760_v1  ;;  %v612_v61 = vld [vmem:[%s1800_s25 + $0x20] sm:$0xf]  ;;  %v613_v1 = vld [vmem:[%s1800_s25 + $0x28] sm:$0xf] }
  0x5d   : > { %v794_v28 = vunpack.c.l.bf16 %v1428_v9  ;;  %v795_v29 = vunpack.c.l.bf16 %v1429_v10  ;;  %v821_v30 = vunpack.c.l.bf16 %v1436_v7  ;;  %v822_v33 = vunpack.c.l.bf16 %v1437_v14 }
  0x5e   : > { %v1148_v32 = vpack.c.bf16 %v1125_v22, %v1124_v15  ;;  %v847_v34 = vunpack.c.l.bf16 %v1444_v20  ;;  %v848_v35 = vunpack.c.l.bf16 %v1445_v21  ;;  %v873_v49 = vadd.f32 %v655_v46, %v1932_v18  ;;  %v1399_v21 = vld [vmem:[%s1800_s25 + $0x70] sm:$0xf] }
  0x5f   : > { %v804_v36 = vmul.f32 %v1873_v24, %v794_v28  ;;  %v805_v17 = vmul.f32 %v1873_v24, %v795_v29  ;;  %v831_v37 = vmul.f32 %v1881_v31, %v821_v30  ;;  %v859_v41 = vmul.f32 %v1890_v39, %v794_v28  ;;  %v666_v30 = vld [vmem:[%s1800_s25 + $0x2c] sm:$0x1] }
  0x60   : > { %1228 = vmatmul.bf16.vlgmr.msra.gmra.mxu0 %v1148_v32  ;;  %v832_v42 = vmul.f32 %v1881_v31, %v822_v33  ;;  %v860_v43 = vmul.f32 %v1890_v39, %v847_v34  ;;  %v861_v44 = vmul.f32 %v1890_v39, %v795_v29  ;;  %v862_v48 = vmul.f32 %v1890_v39, %v848_v35 }
  0x61   : > { %v874_v50 = vadd.f32 %v656_v54, %v629_v45  ;;  %v889_v51 = vrot.slane %v716_v13, 7  ;;  %v890_v53 = vrot.slane %v717_v8, 7  ;;  %v942_v57 = vrot.slane %v771_v23, 1 }
  0x62   : > { %v943_v58 = vrot.slane %v772_v25, 1  ;;  %v945_v59 = vrot.slane %v773_v26, 1  ;;  %v946_v0 = vrot.slane %v774_v27, 1  ;;  %v978_v11 = vadd.f32 %v831_v37, %v804_v36  ;;  %v1406_v36 = vld [vmem:[%s1800_s25 + $0xb0] sm:$0xf] }
  0x63   : > { %v907_v2 = vadd.f32 %v889_v51, %v683_v55  ;;  %v908_v3 = vadd.f32 %v889_v51, %v684_v56  ;;  %v909_v4 = vadd.f32 %v890_v53, %v685_v60  ;;  %v910_v6 = vadd.f32 %v890_v53, %v686_v63  ;;  %v1398_v63 = vld [vmem:[%s1800_s25 + $0x68] sm:$0xf]  ;;  %v1415_v53 = vld [vmem:[%s1800_s25 + $0x100] sm:$0xf] }
  0x64   : > { %v944_v9 = vsel %vm935_vm0, %v942_v57, %v943_v58  ;;  %v947_v10 = vsel %vm935_vm0, %v945_v59, %v946_v0  ;;  %v979_v18 = vadd.f32 %v832_v42, %v805_v17  ;;  %v1078_v56 = vrot.slane %v859_v41, 1  ;;  %v1422_v57 = vld [vmem:[%s1800_s25 + $0xb4] sm:$0x1] }
  0x65   : > { %v970_v45 = vadd.f32 %v944_v9, %v743_v16  ;;  %v971_v46 = vadd.f32 %v947_v10, %v744_v19  ;;  %v1006_v54 = vrot.slane %v907_v2, 1  ;;  %v1007_v13 = vrot.slane %v908_v3, 1  ;;  %v665_v16 = vld [vmem:[%s1800_s25 + $0x24] sm:$0x1]  ;;  %v1423_v3 = vld [vmem:[%s1800_s25 + $0xbc] sm:$0x1] }
  0x66   : > { %v1009_v7 = vrot.slane %v909_v4, 1  ;;  %v1010_v55 = vrot.slane %v910_v6, 1  ;;  %v1079_v60 = vrot.slane %v860_v43, 1  ;;  %v1081_v20 = vrot.slane %v861_v44, 1  ;;  %v1407_v43 = vld [vmem:[%s1800_s25 + $0xb8] sm:$0xf] }
  0x67   : > { %v1008_v14 = vsel %vm935_vm0, %v1006_v54, %v1007_v13  ;;  %v1042_v15 = vadd.f32 %v978_v11, %v970_v45  ;;  %v1043_v8 = vadd.f32 %v979_v18, %v971_v46  ;;  %v1082_v25 = vrot.slane %v862_v48, 1  ;;  %v1414_v44 = vld [vmem:[%s1800_s25 + $0xf8] sm:$0xf]  ;;  %v1430_v54 = vld [vmem:[%s1800_s25 + $0x28] sm:$0xf] }
  0x68   : > { %v1011_v19 = vsel %vm935_vm0, %v1009_v7, %v1010_v55  ;;  %v1034_v22 = vadd.f32 %v1008_v14, %v873_v49  ;;  %v1080_v23 = vsel %vm935_vm0, %v1078_v56, %v1079_v60  ;;  %v620_v27 = vunpack.c.l.bf16 %v612_v61  ;;  %v1431_v13 = vld [vmem:[%s1800_s25 + $0x30] sm:$0xf]  ;;  %v1439_v60 = vld [vmem:[%s1800_s25 + $0x78] sm:$0xf] }
  0x69   : > { %v1035_v26 = vadd.f32 %v1011_v19, %v874_v50  ;;  %v621_v28 = vunpack.c.l.bf16 %v613_v1  ;;  %v647_v29 = vunpack.c.l.bf16 %v1398_v63  ;;  %v1083_v33 = vsel %vm935_vm0, %v1081_v20, %v1082_v25  ;;  %v1438_v61 = vld [vmem:[%s1800_s25 + $0x70] sm:$0xf]  ;;  %v1446_v63 = vld [vmem:[%s1800_s25 + $0x2c] sm:$0x1] }
  0x6a   : > { %v1050_v32 = vadd.f32 %v1042_v15, %v1034_v22  ;;  %v648_v34 = vunpack.c.l.bf16 %v1399_v21  ;;  %v673_v35 = vunpack.c.l.bf16 %v665_v16  ;;  %v630_v37 = vmul.f32 %v1795_v38, %v620_v27  ;;  %v1447_v21 = vld [vmem:[%s1800_s25 + $0x34] sm:$0x1] }
  0x6b   : > { %v1051_v17 = vadd.f32 %v1043_v8, %v1035_v26  ;;  %v631_v41 = vmul.f32 %v1795_v38, %v621_v28  ;;  %v657_v42 = vmul.f32 %v1809_v47, %v647_v29  ;;  %v674_v50 = vunpack.c.l.bf16 %v666_v30 }
  0x6c   : > { %v1106_v48 = vadd.f32 %v1080_v23, %v1050_v32  ;;  %v658_v49 = vmul.f32 %v1809_v47, %v648_v34  ;;  %v687_v51 = vmul.f32 %v1816_v52, %v620_v27  ;;  %v688_v59 = vmul.f32 %v1816_v52, %v673_v35 }
  0x6d   : > { %v1107_v58 = vadd.f32 %v1083_v33, %v1051_v17  ;;  %v689_v0 = vmul.f32 %v1816_v52, %v621_v28  ;;  %v708_v2 = vunpack.c.l.bf16 %v1406_v36  ;;  %v690_v6 = vmul.f32 %v1816_v52, %v674_v50 }
  0x6e   : > { %v1118_v4 = vadd.f32 %v1929_v40, %v1106_v48  ;;  %v709_v9 = vunpack.c.l.bf16 %v1407_v43  ;;  %v735_v10 = vunpack.c.l.bf16 %v1414_v44  ;;  %v736_v45 = vunpack.c.l.bf16 %v1415_v53 }
  0x6f   : > { %v1119_v11 = vadd.f32 %v1929_v40, %v1107_v58  ;;  %v718_v18 = vmul.f32 %v1833_v62, %v708_v2  ;;  %v761_v46 = vunpack.c.l.bf16 %v1422_v57  ;;  %v762_v56 = vunpack.c.l.bf16 %v1423_v3 }
  0x70   : > { %v1126_v1 = vmax.f32 %v1118_v4, 0.0  ;;  %v719_v7 = vmul.f32 %v1833_v62, %v709_v9  ;;  %v745_v55 = vmul.f32 %v1843_v5, %v735_v10  ;;  %v746_v15 = vmul.f32 %v1843_v5, %v736_v45 }
  0x71   : > { %v1127_v14 = vmax.f32 %v1119_v11, 0.0  ;;  %v775_v8 = vmul.f32 %v1854_v12, %v708_v2  ;;  %v776_v20 = vmul.f32 %v1854_v12, %v761_v46  ;;  %v777_v16 = vmul.f32 %v1854_v12, %v709_v9 }
  0x72   : > { %v778_v19 = vmul.f32 %v1854_v12, %v762_v56  ;;  %v796_v22 = vunpack.c.l.bf16 %v1430_v54  ;;  %v797_v23 = vunpack.c.l.bf16 %v1431_v13  ;;  %v823_v26 = vunpack.c.l.bf16 %v1438_v61 }
  0x73   : > { %v1149_v25 = vpack.c.bf16 %v1127_v14, %v1126_v1  ;;  %v824_v27 = vunpack.c.l.bf16 %v1439_v60  ;;  %v849_v28 = vunpack.c.l.bf16 %v1446_v63  ;;  %v850_v32 = vunpack.c.l.bf16 %v1447_v21  ;;  %v615_v1 = vld [vmem:[%s1800_s25 + $0x38] sm:$0xf]  ;;  %v1401_v63 = vld [vmem:[%s1800_s25 + $0x80] sm:$0xf] }
  0x74   : > { %v806_v29 = vmul.f32 %v1873_v24, %v796_v22  ;;  %v807_v30 = vmul.f32 %v1873_v24, %v797_v23  ;;  %v863_v33 = vmul.f32 %v1890_v39, %v796_v22  ;;  %v833_v34 = vmul.f32 %v1881_v31, %v823_v26  ;;  %v1400_v60 = vld [vmem:[%s1800_s25 + $0x78] sm:$0xf] }
  0x75   : > { %1233 = vmatmul.bf16.vlgmr.msra.gmra.mxu1 %v1149_v25  ;;  %v834_v35 = vmul.f32 %v1881_v31, %v824_v27  ;;  %v864_v36 = vmul.f32 %v1890_v39, %v849_v28  ;;  %v865_v17 = vmul.f32 %v1890_v39, %v797_v23  ;;  %v866_v43 = vmul.f32 %v1890_v39, %v850_v32  ;;  %v668_v23 = vld [vmem:[%s1800_s25 + $0x3c] sm:$0x1] }
  0x76   : > { %v875_v44 = vadd.f32 %v657_v42, %v630_v37  ;;  %v876_v48 = vadd.f32 %v658_v49, %v631_v41  ;;  %v891_v50 = vrot.slane %v718_v18, 7  ;;  %v892_v53 = vrot.slane %v719_v7, 7  ;;  %v614_v18 = vld [vmem:[%s1800_s25 + $0x30] sm:$0xf] }
  0x77   : > { %v948_v57 = vrot.slane %v775_v8, 1  ;;  %v949_v58 = vrot.slane %v776_v20, 1  ;;  %v951_v2 = vrot.slane %v777_v16, 1  ;;  %v952_v9 = vrot.slane %v778_v19, 1 }
  0x78   : > { %v911_v3 = vadd.f32 %v891_v50, %v687_v51  ;;  %v912_v4 = vadd.f32 %v891_v50, %v688_v59  ;;  %v980_v10 = vadd.f32 %v833_v34, %v806_v29  ;;  %v913_v11 = vadd.f32 %v892_v53, %v689_v0  ;;  %v1408_v34 = vld [vmem:[%s1800_s25 + $0xc0] sm:$0xf]  ;;  %v1417_v50 = vld [vmem:[%s1800_s25 + $0x110] sm:$0xf] }
  0x79   : > { %v914_v45 = vadd.f32 %v892_v53, %v690_v6  ;;  %v950_v46 = vsel %vm935_vm0, %v948_v57, %v949_v58  ;;  %v981_v54 = vadd.f32 %v834_v35, %v807_v30  ;;  %v953_v37 = vsel %vm935_vm0, %v951_v2, %v952_v9  ;;  %v1409_v35 = vld [vmem:[%s1800_s25 + $0xc8] sm:$0xf]  ;;  %v1424_v53 = vld [vmem:[%s1800_s25 + $0xc4] sm:$0x1] }
  0x7a   : > { %v972_v41 = vadd.f32 %v950_v46, %v745_v55  ;;  %v1012_v42 = vrot.slane %v911_v3, 1  ;;  %v1013_v49 = vrot.slane %v912_v4, 1  ;;  %v973_v13 = vadd.f32 %v953_v37, %v746_v15  ;;  %v667_v15 = vld [vmem:[%s1800_s25 + $0x34] sm:$0x1]  ;;  %v1425_v3 = vld [vmem:[%s1800_s25 + $0xcc] sm:$0x1] }
  0x7b   : > { %v1015_v51 = vrot.slane %v913_v11, 1  ;;  %v1016_v59 = vrot.slane %v914_v45, 1  ;;  %v1084_v61 = vrot.slane %v863_v33, 1  ;;  %v1085_v7 = vrot.slane %v864_v36, 1  ;;  %v1432_v37 = vld [vmem:[%s1800_s25 + $0x38] sm:$0xf] }
  0x7c   : > { %v1014_v0 = vsel %vm935_vm0, %v1012_v42, %v1013_v49  ;;  %v1044_v6 = vadd.f32 %v980_v10, %v972_v41  ;;  %v1087_v56 = vrot.slane %v865_v17, 1  ;;  %v1045_v8 = vadd.f32 %v981_v54, %v973_v13  ;;  %v1433_v41 = vld [vmem:[%s1800_s25 + $0x40] sm:$0xf] }
  0x7d   : > { %v1017_v14 = vsel %vm935_vm0, %v1015_v51, %v1016_v59  ;;  %v1036_v55 = vadd.f32 %v1014_v0, %v875_v44  ;;  %v1088_v20 = vrot.slane %v866_v43, 1  ;;  %v1086_v16 = vsel %vm935_vm0, %v1084_v61, %v1085_v7  ;;  %v1440_v51 = vld [vmem:[%s1800_s25 + $0x80] sm:$0xf]  ;;  %v1441_v59 = vld [vmem:[%s1800_s25 + $0x88] sm:$0xf] }
  0x7e   : > { %v1037_v21 = vadd.f32 %v1017_v14, %v876_v48  ;;  %v622_v19 = vunpack.c.l.bf16 %v614_v18  ;;  %v623_v22 = vunpack.c.l.bf16 %v615_v1  ;;  %v649_v27 = vunpack.c.l.bf16 %v1400_v60  ;;  %v1416_v48 = vld [vmem:[%s1800_s25 + $0x108] sm:$0xf]  ;;  %v1449_v7 = vld [vmem:[%s1800_s25 + $0x44] sm:$0x1] }
  0x7f   : > { %v1052_v25 = vadd.f32 %v1044_v6, %v1036_v55  ;;  %v1089_v26 = vsel %vm935_vm0, %v1087_v56, %v1088_v20  ;;  %v650_v28 = vunpack.c.l.bf16 %v1401_v63  ;;  %v675_v33 = vunpack.c.l.bf16 %v667_v15  ;;  %v1448_v6 = vld [vmem:[%s1800_s25 + $0x3c] sm:$0x1] }
  0x80   : > { %v1053_v29 = vadd.f32 %v1045_v8, %v1037_v21  ;;  %v632_v30 = vmul.f32 %v1795_v38, %v622_v19  ;;  %v633_v32 = vmul.f32 %v1795_v38, %v623_v22  ;;  %v659_v17 = vmul.f32 %v1809_v47, %v649_v27 }
  0x81   : > { %v1108_v36 = vadd.f32 %v1086_v16, %v1052_v25  ;;  %v660_v43 = vmul.f32 %v1809_v47, %v650_v28  ;;  %v676_v44 = vunpack.c.l.bf16 %v668_v23  ;;  %v691_v58 = vmul.f32 %v1816_v52, %v622_v19 }
  0x82   : > { %v1109_v57 = vadd.f32 %v1089_v26, %v1053_v29  ;;  %v692_v2 = vmul.f32 %v1816_v52, %v675_v33  ;;  %v693_v38 = vmul.f32 %v1816_v52, %v623_v22  ;;  %v710_v9 = vunpack.c.l.bf16 %v1408_v34 }
  0x83   : > { %v1120_v4 = vadd.f32 %v1929_v40, %v1108_v36  ;;  %v694_v47 = vmul.f32 %v1816_v52, %v676_v44  ;;  %v711_v10 = vunpack.c.l.bf16 %v1409_v35  ;;  %v737_v45 = vunpack.c.l.bf16 %v1416_v48 }
  0x84   : > { %v1121_v11 = vadd.f32 %v1929_v40, %v1109_v57  ;;  %v738_v46 = vunpack.c.l.bf16 %v1417_v50  ;;  %v763_v54 = vunpack.c.l.bf16 %v1424_v53  ;;  %v720_v49 = vmul.f32 %v1833_v62, %v710_v9 }
  0x85   : > { %v1128_v42 = vmax.f32 %v1120_v4, 0.0  ;;  %v721_v18 = vmul.f32 %v1833_v62, %v711_v10  ;;  %v764_v13 = vunpack.c.l.bf16 %v1425_v3  ;;  %v747_v61 = vmul.f32 %v1843_v5, %v737_v45 }
  0x86   : > { %v1129_v52 = vmax.f32 %v1121_v11, 0.0  ;;  %v748_v1 = vmul.f32 %v1843_v5, %v738_v46  ;;  %v779_v0 = vmul.f32 %v1854_v12, %v710_v9  ;;  %v780_v56 = vmul.f32 %v1854_v12, %v763_v54 }
  0x87   : > { %v781_v60 = vmul.f32 %v1854_v12, %v711_v10  ;;  %v782_v63 = vmul.f32 %v1854_v12, %v764_v13  ;;  %v798_v14 = vunpack.c.l.bf16 %v1432_v37  ;;  %v799_v55 = vunpack.c.l.bf16 %v1433_v41 }
  0x88   : > { %v1150_v62 = vpack.c.bf16 %v1129_v52, %v1128_v42  ;;  %v825_v8 = vunpack.c.l.bf16 %v1440_v51  ;;  %v826_v20 = vunpack.c.l.bf16 %v1441_v59  ;;  %v851_v21 = vunpack.c.l.bf16 %v1448_v6 }
  0x89   : > { %v808_v15 = vmul.f32 %v1873_v24, %v798_v14  ;;  %v852_v16 = vunpack.c.l.bf16 %v1449_v7  ;;  %v867_v5 = vmul.f32 %v1890_v39, %v798_v14  ;;  %v809_v19 = vmul.f32 %v1873_v24, %v799_v55 }
  0x8a   : > { %1238 = vmatmul.bf16.vlgmr.msra.gmra.mxu2 %v1150_v62  ;;  %v835_v22 = vmul.f32 %v1881_v31, %v825_v8  ;;  %v836_v23 = vmul.f32 %v1881_v31, %v826_v20  ;;  %v869_v12 = vmul.f32 %v1890_v39, %v799_v55  ;;  %v868_v25 = vmul.f32 %v1890_v39, %v851_v21 }
  0x8b   : > { %v870_v26 = vmul.f32 %v1890_v39, %v852_v16  ;;  %v877_v27 = vadd.f32 %v659_v17, %v632_v30  ;;  %v878_v28 = vadd.f32 %v660_v43, %v633_v32  ;;  %v893_v29 = vrot.slane %v720_v49, 7 }
  0x8c   : > { %v894_v33 = vrot.slane %v721_v18, 7  ;;  %v954_v34 = vrot.slane %v779_v0, 1  ;;  %v955_v35 = vrot.slane %v780_v56, 1  ;;  %v957_v36 = vrot.slane %v781_v60, 1  ;;  %v1593_v56 = vld [vmem:[%s2107_s4] ss:$0 sm:$0xff] }
  0x8d   : > { %v958_v44 = vrot.slane %v782_v63, 1  ;;  %v982_v48 = vadd.f32 %v835_v22, %v808_v15  ;;  %v983_v24 = vadd.f32 %v836_v23, %v809_v19  ;;  %v915_v50 = vadd.f32 %v893_v29, %v691_v58 }
  0x8e   : > { %v916_v53 = vadd.f32 %v893_v29, %v692_v2  ;;  %v917_v57 = vadd.f32 %v894_v33, %v693_v38  ;;  %v918_v31 = vadd.f32 %v894_v33, %v694_v47  ;;  %v956_v3 = vsel %vm935_vm0, %v954_v34, %v955_v35 }
  0x8f   : > { %v959_v4 = vsel %vm935_vm0, %v957_v36, %v958_v44  ;;  %v1090_v9 = vrot.slane %v867_v5, 1  ;;  %v1091_v39 = vrot.slane %v868_v25, 1  ;;  %v974_v30 = vadd.f32 %v956_v3, %v747_v61 }
  0x90   : > { %v975_v32 = vadd.f32 %v959_v4, %v748_v1  ;;  %v1018_v17 = vrot.slane %v915_v50, 1  ;;  %v1019_v43 = vrot.slane %v916_v53, 1  ;;  %v1021_v10 = vrot.slane %v917_v57, 1 }
  0x91   : > { %v1022_v11 = vrot.slane %v918_v31, 1  ;;  %v1092_v45 = vsel %vm935_vm0, %v1090_v9, %v1091_v39  ;;  %v1093_v46 = vrot.slane %v869_v12, 1  ;;  %v1046_v2 = vadd.f32 %v982_v48, %v974_v30 }
  0x92   : > { %v1020_v58 = vsel %vm935_vm0, %v1018_v17, %v1019_v43  ;;  %v1047_v38 = vadd.f32 %v983_v24, %v975_v32  ;;  %v1094_v47 = vrot.slane %v870_v26, 1 }
  0x93   : > { %v1023_v54 = vsel %vm935_vm0, %v1021_v10, %v1022_v11  ;;  %v1038_v37 = vadd.f32 %v1020_v58, %v877_v27 }
  0x94   : > { %v1039_v41 = vadd.f32 %v1023_v54, %v878_v28  ;;  %v1095_v42 = vsel %vm935_vm0, %v1093_v46, %v1094_v47 }
  0x95   : > { %v1054_v49 = vadd.f32 %v1046_v2, %v1038_v37 }
  0x96   : > { %v1055_v18 = vadd.f32 %v1047_v38, %v1039_v41 }
  0x97   : > { %v1110_v13 = vadd.f32 %v1092_v45, %v1054_v49 }
  0x98   : > { %v1111_v51 = vadd.f32 %v1095_v42, %v1055_v18 }
  0x99   : > { %v1122_v59 = vadd.f32 %v1929_v40, %v1110_v13 }
  0x9a   : > { %v1123_v52 = vadd.f32 %v1929_v40, %v1111_v51 }
  0x9b   : > { %v1130_v61 = vmax.f32 %v1122_v59, 0.0 }
  0x9c   : > { %v1131_v1 = vmax.f32 %v1123_v52, 0.0 }
  0x9e   : > { %v1151_v0 = vpack.c.bf16 %v1131_v1, %v1130_v61 }
  0xa0   : > { %1243 = vmatmul.bf16.vlgmr.msra.gmra.mxu3 %v1151_v0 }
  0xdd   : > { %v1229_v6 = vpop.f32.mrf.mxu0 }
  0xde   : > { %v1230_v60 = vadd.f32 %v1593_v56, %v1229_v6 }
  0xe0   : > { %v1249_v40 = vmax.f32 %v1230_v60, 0.0 }
  0xe5   : > { %v1231_v14 = vpop.f32.mrf.mxu0 }
  0xe6   : > { %v1232_v55 = vadd.f32 %v1593_v56, %v1231_v14 }
  0xe8   : > { %v1250_v15 = vmax.f32 %v1232_v55, 0.0 }
  0xea   : > { %v1496_v16 = vpack.c.bf16 %v1250_v15, %v1249_v40 }
  0xec   : > { %1497 = vst [vmem:[%s603_s15] sm:$0xff] %v1496_v16  }
  0xf2   : > { %v1234_v7 = vpop.f32.mrf.mxu1 }
  0xf3   : > { %v1235_v63 = vadd.f32 %v1593_v56, %v1234_v7 }
  0xf5   : > { %v1251_v20 = vmax.f32 %v1235_v63, 0.0 }
  0xfa   : > { %v1236_v62 = vpop.f32.mrf.mxu1 }
  0xfb   : > { %v1237_v8 = vadd.f32 %v1593_v56, %v1236_v62 }
  0xfd   : > { %v1252_v21 = vmax.f32 %v1237_v8, 0.0 }
  0xff   : > { %v1501_v5 = vpack.c.bf16 %v1252_v21, %v1251_v20 }
 0x101   : > { %1513 = vst [vmem:[%s603_s15 + $0x8] sm:$0xff] %v1501_v5  }
 0x10d   : > { %v1239_v19 = vpop.f32.mrf.mxu2 }
 0x10e   : > { %v1240_v22 = vadd.f32 %v1593_v56, %v1239_v19 }
 0x110   : > { %v1253_v25 = vmax.f32 %v1240_v22, 0.0 }
 0x115   : > { %v1241_v23 = vpop.f32.mrf.mxu2 }
 0x116   : > { %v1242_v12 = vadd.f32 %v1593_v56, %v1241_v23 }
 0x118   : > { %v1254_v26 = vmax.f32 %v1242_v12, 0.0 }
 0x11a   : > { %v1506_v27 = vpack.c.bf16 %v1254_v26, %v1253_v25 }
 0x11c   : > { %1514 = vst [vmem:[%s603_s15 + $0x10] sm:$0xff] %v1506_v27  }
 0x123   : > { %v1244_v28 = vpop.f32.mrf.mxu3 }
 0x124   : > { %v1245_v29 = vadd.f32 %v1593_v56, %v1244_v28 }
 0x126   : > { %v1255_v35 = vmax.f32 %v1245_v29, 0.0 }
 0x12b   : > { %v1246_v33 = vpop.f32.mrf.mxu3 }
 0x12c   : > { %v1247_v34 = vadd.f32 %v1593_v56, %v1246_v33 }
 0x12e   : > { %v1256_v36 = vmax.f32 %v1247_v34, 0.0 }
 0x130   : > { %v1511_v44 = vpack.c.bf16 %v1256_v36, %v1255_v35 }
 0x132   : > { %1515 = vst [vmem:[%s603_s15 + $0x18] sm:$0xff] %v1511_v44  }
 0x133 PF: > { %s15_s22 = sadd.s32 1, %s1632_s22   ;;  %s2109_s18 = smov %s1620_s19 }
 0x134   : > { %p12_p10 = scmp.ge.s32.totalorder %s15_s22, 4   ;;  %s2110_s19 = smov %s1699_s26 }
 0x135   : > { %s2111_s20 = smov %s1628_s21  ;;  %s2112_s21 = smov %s2114_s23 }
 0x136   :  { %14 = sbr.rel (!%p12_p10) target bundleno = 3 (0x3), region = 131 }

// kernel: mobilenet_v1.13
= control target key start
LH: loop header
LB: loop body
LE: loop exit
PB: predicated region body
PF: predicated region fallthrough
CT: control target
= control target key end

     0   :  { %s3653_s18 = smov 0   ;;  %s3655_s19 = smov 0   ;;  %s4954_s0 = inlined_call_operand.vmem [shape: bf16[1,2,18,18,128], index: 0, kind: input, shape index: {}]   ;;  %s4955_s1 = inlined_call_operand.vmem [shape: f32[9,128], index: 1, kind: input, shape index: {}]   ;;  %s4956_s2 = inlined_call_operand.vmem [shape: f32[1,128], index: 2, kind: input, shape index: {}]   ;;  %s4957_s3 = inlined_call_operand.vmem [shape: bf16[128,128], index: 3, kind: input, shape index: {}]   ;;  %s4958_s4 = inlined_call_operand.vmem [shape: f32[1,128], index: 4, kind: input, shape index: {}]   ;;  %s4959_s5 = inlined_call_operand.vmem [shape: bf16[2,256,128], index: 5, kind: output, shape index: {}]  }
   0x1   :  { %s3657_s20 = smov 0  }
   0x2 LB: > { %s27_s21 = sadd.s32 1, %s3617_s19  ;;  %p3120_p0 = scmp.ge.s32.totalorder %s3621_s20, 1  ;;  %s3621_s20 = sphi %s3657_s20, %s15_s20   ;;  %s3617_s19 = sphi %s3655_s19, %s4961_s19   ;;  %s3613_s18 = sphi %s3653_s18, %s4960_s18  }
   0x3   : > { %p29_p1 = scmp.ge.s32.totalorder %s27_s21, 2  ;;  %p218_p2 = scmp.lt.s32.totalorder %s3621_s20, 3 }
   0x5   : > { %s4963_s21 = smov (%p29_p1, %s27_s21), 0  ;;  %p219_p3 = pnand %p3120_p0, %p218_p2 }
   0x6   : > { %p256_p4 = scmp.lt.s32.totalorder (!%p219_p3), %s3613_s18, 1 }
   0x7   : > { %222 = sbr.rel (%p219_p3) target bundleno = 557 (0x22d), region = 40 }
   0xc   : > { %v3294_v0 = vld [vmem:[%s4957_s3 + $0x38] sm:$0xff]  ;;  %v3293_v1 = vld [vmem:[%s4957_s3 + $0x30] sm:$0xff]  ;;  %s4965_s18 = smov (!%p256_p4, %s3613_s18), 1  ;;  %v3292_v2 = vld [vmem:[%s4957_s3 + $0x28] sm:$0xff]  ;;  %vm1293_vm0 = vcmask 1041408   ;;  %vm1116_vm1 = vcmask 1046528  }
   0xd   : > { %2824 = vmatpush.bf16.msra.mxu0 %v3294_v0  ;;  %3509 = vmatpush.bf16.msra.mxu1 %v3294_v0  ;;  %s3533_s28 = smul.u32 216, %s4965_s18  ;;  %v3686_v3 = vld [vmem:[%s4955_s1] ss:$0 sm:$0xff]  ;;  %v3691_v4 = vld [vmem:[%s4955_s1 + $0x1] ss:$0 sm:$0xff]  ;;  %v3290_v46 = vld [vmem:[%s4957_s3 + $0x18] sm:$0xff] }
   0xe   : > { %3510 = vmatpush.bf16.msra.mxu2 %v3294_v0  ;;  %3511 = vmatpush.bf16.msra.mxu3 %v3294_v0  ;;  %v3701_v5 = vld [vmem:[%s4955_s1 + $0x2] ss:$0 sm:$0xff]  ;;  %v3706_v6 = vld [vmem:[%s4955_s1 + $0x3] ss:$0 sm:$0xff]  ;;  %v3714_v10 = vld [vmem:[%s4955_s1 + $0x4] ss:$0 sm:$0xff] }
   0xf   : > { %s3696_s10 = scalar_lea.vmem %s4954_s0, %s3533_s28  ;;  %v3722_v22 = vld [vmem:[%s4955_s1 + $0x5] ss:$0 sm:$0xff]  ;;  %v3736_v29 = vld [vmem:[%s4955_s1 + $0x6] ss:$0 sm:$0xff]  ;;  %v3747_v35 = vld [vmem:[%s4955_s1 + $0x7] ss:$0 sm:$0xff] }
  0x10   : > { %v3296_v7 = vld [vmem:[%s3696_s10] sm:$0xff]   ;;  %v378_v8 = vld [vmem:[%s3696_s10 + $0x8] sm:$0x1]  ;;  %v3124_v15 = vld [vmem:[%s3696_s10 + $0xc] sm:$0xff]   ;;  %vm1902_vm2 = vcmask 1045504   ;;  %vm2079_vm3 = vcmask 1040384  }
  0x11   : > { %2825 = vmatpush.bf16.msra.mxu0 %v3293_v1  ;;  %3512 = vmatpush.bf16.msra.mxu1 %v3293_v1  ;;  %v460_v9 = vld [vmem:[%s3696_s10] sm:$0xe]  ;;  %v3297_v11 = vunpack.c.l.bf16 %v3296_v7  ;;  %v3298_v12 = vunpack.c.h.bf16 %v3296_v7  ;;  %v394_v13 = vunpack.c.l.bf16 %v378_v8  ;;  %v3156_v16 = vld [vmem:[%s3696_s10 + $0x14] sm:$0x1]  ;;  %v3172_v17 = vld [vmem:[%s3696_s10 + $0xc] sm:$0xe]  ;;  %v575_v18 = vunpack.c.l.bf16 %v3124_v15 }
  0x12   : > { %3513 = vmatpush.bf16.msra.mxu2 %v3293_v1  ;;  %3514 = vmatpush.bf16.msra.mxu3 %v3293_v1  ;;  %v476_v14 = vunpack.c.l.bf16 %v460_v9  ;;  %v576_v19 = vunpack.c.h.bf16 %v3124_v15  ;;  %v657_v20 = vunpack.c.l.bf16 %v3156_v16  ;;  %v739_v21 = vunpack.c.l.bf16 %v3172_v17  ;;  %v3486_v23 = vld [vmem:[%s3696_s10 + $0x18] sm:$0xff]   ;;  %v3291_v24 = vld [vmem:[%s4957_s3 + $0x20] sm:$0xff]  ;;  %v3757_v41 = vld [vmem:[%s4955_s1 + $0x8] ss:$0 sm:$0xff]  ;;  %s3286_s16 = sshll.u32 %s4965_s18, 7 }
  0x13   : > { %v346_v25 = vmul.f32 %v3686_v3, %v3297_v11  ;;  %v347_v26 = vmul.f32 %v3686_v3, %v3298_v12  ;;  %v412_v27 = vmul.f32 %v3691_v4, %v3297_v11  ;;  %v3731_v28 = vunpack.c.l.bf16 %v3486_v23  ;;  %v3220_v34 = vld [vmem:[%s3696_s10 + $0x20] sm:$0x1]  ;;  %v3236_v40 = vld [vmem:[%s3696_s10 + $0x18] sm:$0xe]  ;;  %v3289_v63 = vld [vmem:[%s4957_s3 + $0x10] sm:$0xff]  ;;  %s4898_s23 = scalar_lea.vmem %s4959_s5, %s3286_s16 }
  0x14   : > { %v413_v30 = vmul.f32 %v3691_v4, %v3298_v12  ;;  %v414_v31 = vmul.f32 %v3691_v4, %v394_v13  ;;  %v494_v32 = vmul.f32 %v3701_v5, %v476_v14  ;;  %v3741_v33 = vunpack.c.h.bf16 %v3486_v23 }
  0x15   : > { %2826 = vmatpush.bf16.msra.mxu0 %v3292_v2  ;;  %3515 = vmatpush.bf16.msra.mxu1 %v3292_v2  ;;  %v495_v36 = vmul.f32 %v3701_v5, %v3298_v12  ;;  %v496_v37 = vmul.f32 %v3701_v5, %v394_v13  ;;  %v609_v38 = vmul.f32 %v3706_v6, %v575_v18  ;;  %v920_v50 = vunpack.c.l.bf16 %v3220_v34 }
  0x16   : > { %3516 = vmatpush.bf16.msra.mxu2 %v3292_v2  ;;  %3517 = vmatpush.bf16.msra.mxu3 %v3292_v2  ;;  %v610_v39 = vmul.f32 %v3706_v6, %v576_v19  ;;  %v675_v42 = vmul.f32 %v3714_v10, %v575_v18  ;;  %v3761_v43 = vmul.f32 %v3714_v10, %v576_v19  ;;  %v1002_v54 = vunpack.c.l.bf16 %v3236_v40 }
  0x17   : > { %v677_v44 = vmul.f32 %v3714_v10, %v657_v20  ;;  %v757_v45 = vmul.f32 %v3722_v22, %v739_v21  ;;  %v758_v47 = vmul.f32 %v3722_v22, %v576_v19  ;;  %v759_v48 = vmul.f32 %v3722_v22, %v657_v20  ;;  %v3288_v20 = vld [vmem:[%s4957_s3 + $0x8] sm:$0xff] }
  0x18   : > { %v872_v49 = vmul.f32 %v3736_v29, %v3731_v28  ;;  %v873_v51 = vmul.f32 %v3736_v29, %v3741_v33  ;;  %v938_v52 = vmul.f32 %v3747_v35, %v3731_v28  ;;  %v939_v53 = vmul.f32 %v3747_v35, %v3741_v33 }
  0x19   : > { %2827 = vmatpush.bf16.msra.mxu0 %v3291_v24  ;;  %3518 = vmatpush.bf16.msra.mxu1 %v3291_v24  ;;  %v940_v55 = vmul.f32 %v3747_v35, %v920_v50  ;;  %v3781_v56 = vmul.f32 %v3757_v41, %v3741_v33  ;;  %v3784_v57 = vmul.f32 %v3757_v41, %v920_v50  ;;  %v1117_v58 = vrot.slane %v412_v27, 1 }
  0x1a   : > { %3519 = vmatpush.bf16.msra.mxu2 %v3291_v24  ;;  %3520 = vmatpush.bf16.msra.mxu3 %v3291_v24  ;;  %v1020_v59 = vmul.f32 %v3757_v41, %v1002_v54  ;;  %v1118_v60 = vrot.slane %v413_v30, 1  ;;  %v1120_v61 = vrot.slane %v414_v31, 1  ;;  %v1294_v62 = vrot.slane %v609_v38, 6 }
  0x1b   : > { %v1295_v0 = vrot.slane %v610_v39, 6  ;;  %v1486_v1 = vrot.slane %v757_v45, 1  ;;  %v1487_v2 = vrot.slane %v758_v47, 1  ;;  %v1489_v7 = vrot.slane %v759_v48, 1  ;;  %v382_v45 = vld [vmem:[%s3696_s10 + $0x38] sm:$0x1] }
  0x1c   : > { %v1119_v8 = vsel %vm1116_vm1, %v1117_v58, %v1118_v60  ;;  %v1121_v9 = vsel %vm1116_vm1, %v1118_v60, %v1120_v61  ;;  %v1390_v11 = vadd.f32 %v1294_v62, %v494_v32  ;;  %v1710_v15 = vrot.slane %v938_v52, 1  ;;  %v3472_v32 = vld [vmem:[%s3696_s10 + $0x30] sm:$0xff]   ;;  %v3287_v47 = vld [vmem:[%s4957_s3] sm:$0xff] }
  0x1d   : > { %2828 = vmatpush.bf16.msra.mxu0 %v3290_v46  ;;  %3521 = vmatpush.bf16.msra.mxu1 %v3290_v46  ;;  %v1229_v12 = vadd.f32 %v1119_v8, %v346_v25  ;;  %v1296_v13 = vsel %vm1293_vm0, %v1294_v62, %v1295_v0  ;;  %v1392_v14 = vadd.f32 %v1295_v0, %v496_v37  ;;  %v1711_v24 = vrot.slane %v939_v53, 1  ;;  %v3160_v8 = vld [vmem:[%s3696_s10 + $0x44] sm:$0x1] }
  0x1e   : > { %3522 = vmatpush.bf16.msra.mxu2 %v3290_v46  ;;  %3523 = vmatpush.bf16.msra.mxu3 %v3290_v46  ;;  %v1230_v16 = vadd.f32 %v1121_v9, %v347_v26  ;;  %v1391_v17 = vadd.f32 %v1296_v13, %v495_v36  ;;  %v1488_v18 = vsel %vm1116_vm1, %v1486_v1, %v1487_v2  ;;  %v1713_v25 = vrot.slane %v940_v55, 1  ;;  %v464_v46 = vld [vmem:[%s3696_s10 + $0x30] sm:$0xe]  ;;  %v3176_v9 = vld [vmem:[%s3696_s10 + $0x3c] sm:$0xe] }
  0x1f   : > { %v1490_v19 = vsel %vm1116_vm1, %v1487_v2, %v1489_v7  ;;  %v1614_v21 = vadd.f32 %v1488_v18, %v675_v42  ;;  %v1616_v23 = vadd.f32 %v1489_v7, %v677_v44  ;;  %v1903_v26 = vrot.slane %v1390_v11, 2 }
  0x20   : > { %v1904_v27 = vrot.slane %v1391_v17, 2  ;;  %v1906_v30 = vrot.slane %v1392_v14, 2  ;;  %v2464_v31 = vrot.slane %v1020_v59, 2  ;;  %v1712_v34 = vsel %vm1116_vm1, %v1710_v15, %v1711_v24  ;;  %v3488_v15 = vld [vmem:[%s3696_s10 + $0x48] sm:$0xff]  }
  0x21   : > { %2829 = vmatpush.bf16.msra.mxu0 %v3289_v63  ;;  %3524 = vmatpush.bf16.msra.mxu1 %v3289_v63  ;;  %v1714_v36 = vsel %vm1116_vm1, %v1711_v24, %v1713_v25  ;;  %v2465_v37 = vrot.slane %v3781_v56, 2  ;;  %v2467_v38 = vrot.slane %v3784_v57, 2  ;;  %v1822_v39 = vadd.f32 %v1712_v34, %v872_v49  ;;  %v3132_v56 = vld [vmem:[%s3696_s10 + $0x3c] sm:$0xff]  }
  0x22   : > { %3525 = vmatpush.bf16.msra.mxu2 %v3289_v63  ;;  %3526 = vmatpush.bf16.msra.mxu3 %v3289_v63  ;;  %v1823_v40 = vadd.f32 %v1714_v36, %v873_v51  ;;  %v1905_v42 = vsel %vm1902_vm2, %v1903_v26, %v1904_v27  ;;  %v1907_v44 = vsel %vm1902_vm2, %v1904_v27, %v1906_v30  ;;  %v3305_v53 = vunpack.c.l.bf16 %v3472_v32  ;;  %v3841_v36 = vld [vmem:[%s4956_s2] ss:$0 sm:$0xff] }
  0x23   : > { %v1615_v48 = vadd.f32 %v1490_v19, %v3761_v43  ;;  %v2015_v50 = vadd.f32 %v1905_v42, %v1229_v12  ;;  %v2016_v52 = vadd.f32 %v1907_v44, %v1230_v16  ;;  %v2080_v49 = vrot.slane %v1822_v39, 7  ;;  %v3240_v39 = vld [vmem:[%s3696_s10 + $0x48] sm:$0xe] }
  0x24   : > { %v2081_v51 = vrot.slane %v1823_v40, 7  ;;  %v2466_v54 = vsel %vm1902_vm2, %v2464_v31, %v2465_v37  ;;  %v3306_v55 = vunpack.c.h.bf16 %v3472_v32  ;;  %v2468_v57 = vsel %vm1902_vm2, %v2465_v37, %v2467_v38  ;;  %v3224_v31 = vld [vmem:[%s3696_s10 + $0x50] sm:$0x1] }
  0x25   : > { %2830 = vmatpush.bf16.msra.mxu0 %v3288_v20  ;;  %3527 = vmatpush.bf16.msra.mxu1 %v3288_v20  ;;  %v3815_v58 = vmul.f32 %v3686_v3, %v3305_v53  ;;  %v398_v59 = vunpack.c.l.bf16 %v382_v45  ;;  %v480_v43 = vunpack.c.l.bf16 %v464_v46  ;;  %v2176_v61 = vadd.f32 %v2080_v49, %v1614_v21 }
  0x26   : > { %3528 = vmatpush.bf16.msra.mxu2 %v3288_v20  ;;  %3529 = vmatpush.bf16.msra.mxu3 %v3288_v20  ;;  %v2082_v60 = vsel %vm2079_vm3, %v2080_v49, %v2081_v51  ;;  %v2178_v62 = vadd.f32 %v2081_v51, %v1616_v23  ;;  %v424_v63 = vmul.f32 %v3691_v4, %v3305_v53  ;;  %v583_v7 = vunpack.c.l.bf16 %v3132_v56 }
  0x27   : > { %v2177_v0 = vadd.f32 %v2082_v60, %v1615_v48  ;;  %v3820_v1 = vmul.f32 %v3686_v3, %v3306_v55  ;;  %v425_v2 = vmul.f32 %v3691_v4, %v3306_v55  ;;  %v2272_v11 = vrot.slane %v2176_v61, 1 }
  0x28   : > { %v2275_v12 = vrot.slane %v2178_v62, 1  ;;  %v426_v13 = vmul.f32 %v3691_v4, %v398_v59  ;;  %v506_v14 = vmul.f32 %v3701_v5, %v480_v43  ;;  %v507_v17 = vmul.f32 %v3701_v5, %v3306_v55 }
  0x29   : > { %2831 = vmatpush.bf16.msra.mxu0 %v3287_v47  ;;  %3530 = vmatpush.bf16.msra.mxu1 %v3287_v47  ;;  %v2273_v16 = vrot.slane %v2177_v0, 1  ;;  %v508_v18 = vmul.f32 %v3701_v5, %v398_v59  ;;  %v584_v19 = vunpack.c.h.bf16 %v3132_v56  ;;  %v617_v20 = vmul.f32 %v3706_v6, %v583_v7 }
  0x2a   : > { %3531 = vmatpush.bf16.msra.mxu2 %v3287_v47  ;;  %3532 = vmatpush.bf16.msra.mxu3 %v3287_v47  ;;  %v661_v21 = vunpack.c.l.bf16 %v3160_v8  ;;  %v687_v23 = vmul.f32 %v3714_v10, %v583_v7  ;;  %v743_v24 = vunpack.c.l.bf16 %v3176_v9  ;;  %v3835_v30 = vunpack.c.l.bf16 %v3488_v15 }
  0x2b   : > { %v2274_v25 = vsel %vm1116_vm1, %v2272_v11, %v2273_v16  ;;  %v2276_v26 = vsel %vm1116_vm1, %v2273_v16, %v2275_v12  ;;  %v618_v27 = vmul.f32 %v3706_v6, %v584_v19  ;;  %v688_v37 = vmul.f32 %v3714_v10, %v584_v19 }
  0x2c   : > { %v2384_v32 = vadd.f32 %v2274_v25, %v2015_v50  ;;  %v2385_v34 = vadd.f32 %v2276_v26, %v2016_v52  ;;  %v689_v38 = vmul.f32 %v3714_v10, %v661_v21  ;;  %v769_v40 = vmul.f32 %v3722_v22, %v743_v24 }
  0x2d   : > { %v770_v42 = vmul.f32 %v3722_v22, %v584_v19  ;;  %v771_v44 = vmul.f32 %v3722_v22, %v661_v21  ;;  %v3849_v45 = vunpack.c.h.bf16 %v3488_v15  ;;  %v880_v48 = vmul.f32 %v3736_v29, %v3835_v30 }
  0x2e   : > { %v2576_v46 = vadd.f32 %v2466_v54, %v2384_v32  ;;  %v2577_v47 = vadd.f32 %v2468_v57, %v2385_v34  ;;  %v924_v50 = vunpack.c.l.bf16 %v3224_v31  ;;  %v950_v53 = vmul.f32 %v3747_v35, %v3835_v30 }
  0x2f   : > { %v881_v52 = vmul.f32 %v3736_v29, %v3849_v45  ;;  %v951_v49 = vmul.f32 %v3747_v35, %v3849_v45  ;;  %v1006_v51 = vunpack.c.l.bf16 %v3240_v39  ;;  %v1033_v57 = vmul.f32 %v3757_v41, %v3849_v45 }
  0x30   : > { %v2612_v55 = vadd.f32 %v3841_v36, %v2576_v46  ;;  %v2613_v56 = vadd.f32 %v3841_v36, %v2577_v47  ;;  %v952_v54 = vmul.f32 %v3747_v35, %v924_v50  ;;  %v1034_v59 = vmul.f32 %v3757_v41, %v924_v50  ;;  %v386_v50 = vld [vmem:[%s3696_s10 + $0x68] sm:$0x1] }
  0x31   : > { %v1137_v43 = vrot.slane %v424_v63, 1  ;;  %v1138_v60 = vrot.slane %v425_v2, 1  ;;  %v1140_v61 = vrot.slane %v426_v13, 1  ;;  %v1306_v7 = vrot.slane %v617_v20, 6 }
  0x32   : > { %v2644_v62 = vmax.f32 %v2612_v55, 0.0  ;;  %v2645_v0 = vmax.f32 %v2613_v56, 0.0  ;;  %v1307_v8 = vrot.slane %v618_v27, 6  ;;  %v1506_v12 = vrot.slane %v769_v40, 1 }
  0x33   : > { %v1139_v9 = vsel %vm1116_vm1, %v1137_v43, %v1138_v60  ;;  %v1141_v11 = vsel %vm1116_vm1, %v1138_v60, %v1140_v61  ;;  %v1507_v15 = vrot.slane %v770_v42, 1  ;;  %v1032_v19 = vmul.f32 %v3757_v41, %v1006_v51 }
  0x34   : > { %v2740_v16 = vpack.c.bf16 %v2645_v0, %v2644_v62  ;;  %v1237_v21 = vadd.f32 %v1139_v9, %v3815_v58  ;;  %v1308_v24 = vsel %vm1293_vm0, %v1306_v7, %v1307_v8  ;;  %v1402_v63 = vadd.f32 %v1306_v7, %v506_v14  ;;  %v468_v62 = vld [vmem:[%s3696_s10 + $0x60] sm:$0xe] }
  0x35   : > { %v1403_v2 = vadd.f32 %v1308_v24, %v507_v17  ;;  %v1404_v13 = vadd.f32 %v1307_v8, %v508_v18  ;;  %v1508_v20 = vsel %vm1116_vm1, %v1506_v12, %v1507_v15  ;;  %v1238_v25 = vadd.f32 %v1141_v11, %v3820_v1  ;;  %v3474_v18 = vld [vmem:[%s3696_s10 + $0x60] sm:$0xff]   ;;  %v3164_v12 = vld [vmem:[%s3696_s10 + $0x74] sm:$0x1]  ;;  %v3180_v24 = vld [vmem:[%s3696_s10 + $0x6c] sm:$0xe] }
  0x36   : > { %2832 = vmatmul.bf16.vlgmr.msra.gmra.mxu0 %v2740_v16  ;;  %v1509_v26 = vrot.slane %v771_v44, 1  ;;  %v1730_v27 = vrot.slane %v950_v53, 1  ;;  %v1731_v31 = vrot.slane %v951_v49, 1  ;;  %v1733_v32 = vrot.slane %v952_v54, 1 }
  0x37   : > { %v1923_v34 = vrot.slane %v1402_v63, 2  ;;  %v1924_v39 = vrot.slane %v1403_v2, 2  ;;  %v1926_v40 = vrot.slane %v1404_v13, 2  ;;  %v1626_v42 = vadd.f32 %v1508_v20, %v687_v23 }
  0x38   : > { %v1510_v58 = vsel %vm1116_vm1, %v1507_v15, %v1509_v26  ;;  %v1628_v14 = vadd.f32 %v1509_v26, %v689_v38  ;;  %v1732_v17 = vsel %vm1116_vm1, %v1730_v27, %v1731_v31  ;;  %v1734_v46 = vsel %vm1116_vm1, %v1731_v31, %v1733_v32 }
  0x39   : > { %v1830_v47 = vadd.f32 %v1732_v17, %v880_v48  ;;  %v1925_v1 = vsel %vm1902_vm2, %v1923_v34, %v1924_v39  ;;  %v2484_v44 = vrot.slane %v1032_v19, 2  ;;  %v1627_v53 = vadd.f32 %v1510_v58, %v688_v37 }
  0x3a   : > { %v1831_v49 = vadd.f32 %v1734_v46, %v881_v52  ;;  %v1927_v51 = vsel %vm1902_vm2, %v1924_v39, %v1926_v40  ;;  %v2485_v55 = vrot.slane %v1033_v57, 2  ;;  %v2023_v56 = vadd.f32 %v1925_v1, %v1237_v21  ;;  %v3140_v57 = vld [vmem:[%s3696_s10 + $0x6c] sm:$0xff]   ;;  %v3228_v46 = vld [vmem:[%s3696_s10 + $0x80] sm:$0x1] }
  0x3b   : > { %v2092_v23 = vrot.slane %v1830_v47, 7  ;;  %v2487_v38 = vrot.slane %v1034_v59, 2  ;;  %v3313_v54 = vunpack.c.l.bf16 %v3474_v18  ;;  %v2024_v43 = vadd.f32 %v1927_v51, %v1238_v25  ;;  %v3490_v25 = vld [vmem:[%s3696_s10 + $0x78] sm:$0xff]  }
  0x3c   : > { %v2093_v60 = vrot.slane %v1831_v49, 7  ;;  %v3314_v61 = vunpack.c.h.bf16 %v3474_v18  ;;  %v402_v48 = vunpack.c.l.bf16 %v386_v50  ;;  %v2486_v7 = vsel %vm1902_vm2, %v2484_v44, %v2485_v55 }
  0x3d   : > { %v2188_v0 = vadd.f32 %v2092_v23, %v1626_v42  ;;  %v2488_v37 = vsel %vm1902_vm2, %v2485_v55, %v2487_v38  ;;  %v3883_v52 = vmul.f32 %v3686_v3, %v3313_v54  ;;  %v436_v11 = vmul.f32 %v3691_v4, %v3313_v54 }
  0x3e   : > { %v2094_v59 = vsel %vm2079_vm3, %v2092_v23, %v2093_v60  ;;  %v2190_v8 = vadd.f32 %v2093_v60, %v1628_v14  ;;  %v3888_v9 = vmul.f32 %v3686_v3, %v3314_v61  ;;  %v437_v19 = vmul.f32 %v3691_v4, %v3314_v61 }
  0x3f   : > { %v2189_v15 = vadd.f32 %v2094_v59, %v1627_v53  ;;  %v2292_v16 = vrot.slane %v2188_v0, 1  ;;  %v484_v21 = vunpack.c.l.bf16 %v468_v62  ;;  %v438_v2 = vmul.f32 %v3691_v4, %v402_v48  ;;  %v3244_v53 = vld [vmem:[%s3696_s10 + $0x78] sm:$0xe] }
  0x40   : > { %v2295_v63 = vrot.slane %v2190_v8, 1  ;;  %v519_v13 = vmul.f32 %v3701_v5, %v3314_v61  ;;  %v591_v20 = vunpack.c.l.bf16 %v3140_v57  ;;  %v520_v27 = vmul.f32 %v3701_v5, %v402_v48 }
  0x41   : > { %v2293_v26 = vrot.slane %v2189_v15, 1  ;;  %v592_v31 = vunpack.c.h.bf16 %v3140_v57  ;;  %v665_v32 = vunpack.c.l.bf16 %v3164_v12  ;;  %v518_v34 = vmul.f32 %v3701_v5, %v484_v21 }
  0x42   : > { %v625_v39 = vmul.f32 %v3706_v6, %v591_v20  ;;  %v699_v40 = vmul.f32 %v3714_v10, %v591_v20  ;;  %v747_v58 = vunpack.c.l.bf16 %v3180_v24  ;;  %v3904_v18 = vunpack.c.l.bf16 %v3490_v25 }
  0x43   : > { %v2294_v42 = vsel %vm1116_vm1, %v2292_v16, %v2293_v26  ;;  %v2296_v14 = vsel %vm1116_vm1, %v2293_v26, %v2295_v63  ;;  %v626_v17 = vmul.f32 %v3706_v6, %v592_v31  ;;  %v700_v44 = vmul.f32 %v3714_v10, %v592_v31 }
  0x44   : > { %v2392_v47 = vadd.f32 %v2294_v42, %v2023_v56  ;;  %v2393_v1 = vadd.f32 %v2296_v14, %v2024_v43  ;;  %v701_v50 = vmul.f32 %v3714_v10, %v665_v32  ;;  %v781_v49 = vmul.f32 %v3722_v22, %v747_v58 }
  0x45   : > { %v782_v51 = vmul.f32 %v3722_v22, %v592_v31  ;;  %v783_v55 = vmul.f32 %v3722_v22, %v665_v32  ;;  %v3913_v23 = vunpack.c.h.bf16 %v3490_v25  ;;  %v888_v60 = vmul.f32 %v3736_v29, %v3904_v18 }
  0x46   : > { %v2584_v38 = vadd.f32 %v2486_v7, %v2392_v47  ;;  %v2585_v54 = vadd.f32 %v2488_v37, %v2393_v1  ;;  %v928_v56 = vunpack.c.l.bf16 %v3228_v46  ;;  %v962_v61 = vmul.f32 %v3747_v35, %v3904_v18 }
  0x47   : > { %v889_v43 = vmul.f32 %v3736_v29, %v3913_v23  ;;  %v963_v48 = vmul.f32 %v3747_v35, %v3913_v23  ;;  %v1010_v62 = vunpack.c.l.bf16 %v3244_v53  ;;  %v1045_v37 = vmul.f32 %v3757_v41, %v3913_v23 }
  0x48   : > { %v2620_v0 = vadd.f32 %v3841_v36, %v2584_v38  ;;  %v2621_v57 = vadd.f32 %v3841_v36, %v2585_v54  ;;  %v964_v7 = vmul.f32 %v3747_v35, %v928_v56  ;;  %v1046_v59 = vmul.f32 %v3757_v41, %v928_v56 }
  0x49   : > { %v1157_v8 = vrot.slane %v436_v11, 1  ;;  %v1158_v12 = vrot.slane %v437_v19, 1  ;;  %v1160_v15 = vrot.slane %v438_v2, 1  ;;  %v1318_v24 = vrot.slane %v625_v39, 6 }
  0x4a   : > { %v2652_v16 = vmax.f32 %v2620_v0, 0.0  ;;  %v2653_v21 = vmax.f32 %v2621_v57, 0.0  ;;  %v1319_v63 = vrot.slane %v626_v17, 6  ;;  %v1526_v26 = vrot.slane %v781_v49, 1 }
  0x4b   : > { %v1159_v20 = vsel %vm1116_vm1, %v1157_v8, %v1158_v12  ;;  %v1161_v25 = vsel %vm1116_vm1, %v1158_v12, %v1160_v15  ;;  %v1527_v31 = vrot.slane %v782_v51, 1  ;;  %v1044_v58 = vmul.f32 %v3757_v41, %v1010_v62 }
  0x4c   : > { %v2744_v32 = vpack.c.bf16 %v2653_v21, %v2652_v16  ;;  %v1245_v42 = vadd.f32 %v1159_v20, %v3883_v52  ;;  %v1320_v14 = vsel %vm1293_vm0, %v1318_v24, %v1319_v63  ;;  %v1414_v11 = vadd.f32 %v1318_v24, %v518_v34  ;;  %v472_v24 = vld [vmem:[%s3696_s10 + $0x90] sm:$0xe] }
  0x4d   : > { %v1415_v19 = vadd.f32 %v1320_v14, %v519_v13  ;;  %v1416_v2 = vadd.f32 %v1319_v63, %v520_v27  ;;  %v1528_v39 = vsel %vm1116_vm1, %v1526_v26, %v1527_v31  ;;  %v1246_v17 = vadd.f32 %v1161_v25, %v3888_v9  ;;  %v3476_v27 = vld [vmem:[%s3696_s10 + $0x90] sm:$0xff]  }
  0x4e   : > { %2852 = vmatmul.bf16.vlgmr.msra.gmra.mxu1 %v2744_v32  ;;  %v1529_v46 = vrot.slane %v783_v55, 1  ;;  %v1750_v47 = vrot.slane %v962_v61, 1  ;;  %v1751_v1 = vrot.slane %v963_v48, 1  ;;  %v1753_v53 = vrot.slane %v964_v7, 1  ;;  %v390_v61 = vld [vmem:[%s3696_s10 + $0x98] sm:$0x1] }
  0x4f   : > { %v1943_v49 = vrot.slane %v1414_v11, 2  ;;  %v1944_v51 = vrot.slane %v1415_v19, 2  ;;  %v1946_v38 = vrot.slane %v1416_v2, 2  ;;  %v1638_v54 = vadd.f32 %v1528_v39, %v699_v40  ;;  %v3168_v32 = vld [vmem:[%s3696_s10 + $0xa4] sm:$0x1] }
  0x50   : > { %v1530_v52 = vsel %vm1116_vm1, %v1527_v31, %v1529_v46  ;;  %v1640_v34 = vadd.f32 %v1529_v46, %v701_v50  ;;  %v1752_v13 = vsel %vm1116_vm1, %v1750_v47, %v1751_v1  ;;  %v1754_v56 = vsel %vm1116_vm1, %v1751_v1, %v1753_v53  ;;  %v3184_v19 = vld [vmem:[%s3696_s10 + $0x9c] sm:$0xe]  ;;  %v3492_v47 = vld [vmem:[%s3696_s10 + $0xa8] sm:$0xff]  }
  0x51   : > { %v1838_v62 = vadd.f32 %v1752_v13, %v888_v60  ;;  %v1945_v9 = vsel %vm1902_vm2, %v1943_v49, %v1944_v51  ;;  %v2504_v55 = vrot.slane %v1044_v58, 2  ;;  %v1639_v48 = vadd.f32 %v1530_v52, %v700_v44 }
  0x52   : > { %v1839_v0 = vadd.f32 %v1754_v56, %v889_v43  ;;  %v1947_v57 = vsel %vm1902_vm2, %v1944_v51, %v1946_v38  ;;  %v2505_v7 = vrot.slane %v1045_v37, 2  ;;  %v2031_v8 = vadd.f32 %v1945_v9, %v1245_v42  ;;  %v3148_v37 = vld [vmem:[%s3696_s10 + $0x9c] sm:$0xff]   ;;  %v3232_v9 = vld [vmem:[%s3696_s10 + $0xb0] sm:$0x1] }
  0x53   : > { %v2104_v40 = vrot.slane %v1838_v62, 7  ;;  %v2507_v50 = vrot.slane %v1046_v59, 2  ;;  %v3321_v12 = vunpack.c.l.bf16 %v3476_v27  ;;  %v2032_v15 = vadd.f32 %v1947_v57, %v1246_v17  ;;  %v3248_v57 = vld [vmem:[%s3696_s10 + $0xa8] sm:$0xe] }
  0x54   : > { %v2105_v16 = vrot.slane %v1839_v0, 7  ;;  %v3322_v21 = vunpack.c.h.bf16 %v3476_v27  ;;  %v406_v60 = vunpack.c.l.bf16 %v390_v61  ;;  %v2506_v20 = vsel %vm1902_vm2, %v2504_v55, %v2505_v7 }
  0x55   : > { %v2200_v63 = vadd.f32 %v2104_v40, %v1638_v54  ;;  %v2508_v44 = vsel %vm1902_vm2, %v2505_v7, %v2507_v50  ;;  %v3947_v43 = vmul.f32 %v3686_v3, %v3321_v12  ;;  %v448_v31 = vmul.f32 %v3691_v4, %v3321_v12 }
  0x56   : > { %v2106_v59 = vsel %vm2079_vm3, %v2104_v40, %v2105_v16  ;;  %v2202_v25 = vadd.f32 %v2105_v16, %v1640_v34  ;;  %v3952_v26 = vmul.f32 %v3686_v3, %v3322_v21  ;;  %v449_v14 = vmul.f32 %v3691_v4, %v3322_v21 }
  0x57   : > { %v2201_v58 = vadd.f32 %v2106_v59, %v1639_v48  ;;  %v2312_v42 = vrot.slane %v2200_v63, 1  ;;  %v488_v11 = vunpack.c.l.bf16 %v472_v24  ;;  %v450_v39 = vmul.f32 %v3691_v4, %v406_v60 }
  0x58   : > { %v2315_v2 = vrot.slane %v2202_v25, 1  ;;  %v531_v17 = vmul.f32 %v3701_v5, %v3322_v21  ;;  %v599_v46 = vunpack.c.l.bf16 %v3148_v37  ;;  %v532_v53 = vmul.f32 %v3701_v5, %v406_v60 }
  0x59   : > { %v2313_v1 = vrot.slane %v2201_v58, 1  ;;  %v600_v49 = vunpack.c.h.bf16 %v3148_v37  ;;  %v669_v51 = vunpack.c.l.bf16 %v3168_v32  ;;  %v530_v38 = vmul.f32 %v3701_v5, %v488_v11 }
  0x5a   : > { %v633_v52 = vmul.f32 %v3706_v6, %v599_v46  ;;  %v711_v54 = vmul.f32 %v3714_v10, %v599_v46  ;;  %v751_v34 = vunpack.c.l.bf16 %v3184_v19  ;;  %v3968_v62 = vunpack.c.l.bf16 %v3492_v47 }
  0x5b   : > { %v2314_v13 = vsel %vm1116_vm1, %v2312_v42, %v2313_v1  ;;  %v2316_v27 = vsel %vm1116_vm1, %v2313_v1, %v2315_v2  ;;  %v634_v56 = vmul.f32 %v3706_v6, %v600_v49  ;;  %v712_v48 = vmul.f32 %v3714_v10, %v600_v49 }
  0x5c   : > { %v2400_v55 = vadd.f32 %v2314_v13, %v2031_v8  ;;  %v2401_v61 = vadd.f32 %v2316_v27, %v2032_v15  ;;  %v713_v0 = vmul.f32 %v3714_v10, %v669_v51  ;;  %v793_v7 = vmul.f32 %v3722_v22, %v751_v34 }
  0x5d   : > { %v794_v40 = vmul.f32 %v3722_v22, %v600_v49  ;;  %v795_v50 = vmul.f32 %v3722_v22, %v669_v51  ;;  %v3977_v12 = vunpack.c.h.bf16 %v3492_v47  ;;  %v896_v60 = vmul.f32 %v3736_v29, %v3968_v62 }
  0x5e   : > { %v2592_v16 = vadd.f32 %v2506_v20, %v2400_v55  ;;  %v2593_v21 = vadd.f32 %v2508_v44, %v2401_v61  ;;  %v932_v8 = vunpack.c.l.bf16 %v3232_v9  ;;  %v974_v24 = vmul.f32 %v3747_v35, %v3968_v62 }
  0x5f   : > { %v897_v15 = vmul.f32 %v3736_v29, %v3977_v12  ;;  %v975_v63 = vmul.f32 %v3747_v35, %v3977_v12  ;;  %v1014_v37 = vunpack.c.l.bf16 %v3248_v57  ;;  %v1057_v44 = vmul.f32 %v3757_v41, %v3977_v12 }
  0x60   : > { %v2628_v59 = vadd.f32 %v3841_v36, %v2592_v16  ;;  %v2629_v25 = vadd.f32 %v3841_v36, %v2593_v21  ;;  %v976_v20 = vmul.f32 %v3747_v35, %v932_v8  ;;  %v1058_v32 = vmul.f32 %v3757_v41, %v932_v8 }
  0x61   : > { %v1177_v58 = vrot.slane %v448_v31, 1  ;;  %v1178_v42 = vrot.slane %v449_v14, 1  ;;  %v1180_v11 = vrot.slane %v450_v39, 1  ;;  %v1330_v46 = vrot.slane %v633_v52, 6 }
  0x62   : > { %v2660_v19 = vmax.f32 %v2628_v59, 0.0  ;;  %v2661_v2 = vmax.f32 %v2629_v25, 0.0  ;;  %v1331_v47 = vrot.slane %v634_v56, 6  ;;  %v1546_v51 = vrot.slane %v793_v7, 1 }
  0x63   : > { %v1179_v1 = vsel %vm1116_vm1, %v1177_v58, %v1178_v42  ;;  %v1181_v49 = vsel %vm1116_vm1, %v1178_v42, %v1180_v11  ;;  %v1547_v34 = vrot.slane %v794_v40, 1  ;;  %v1056_v27 = vmul.f32 %v3757_v41, %v1014_v37 }
  0x64   : > { %v2748_v13 = vpack.c.bf16 %v2661_v2, %v2660_v19  ;;  %v1253_v9 = vadd.f32 %v1179_v1, %v3947_v43  ;;  %v1332_v55 = vsel %vm1293_vm0, %v1330_v46, %v1331_v47  ;;  %v1426_v31 = vadd.f32 %v1330_v46, %v530_v38  ;;  %v461_v1 = vld [vmem:[%s3696_s10 + $0xc] sm:$0xe] }
  0x65   : > { %v1427_v14 = vadd.f32 %v1332_v55, %v531_v17  ;;  %v1428_v39 = vadd.f32 %v1331_v47, %v532_v53  ;;  %v1548_v52 = vsel %vm1116_vm1, %v1546_v51, %v1547_v34  ;;  %v1254_v56 = vadd.f32 %v1181_v49, %v3952_v26  ;;  %v282_v53 = vld [vmem:[%s3696_s10 + $0xc] sm:$0xff]  }
  0x66   : > { %2872 = vmatmul.bf16.vlgmr.msra.gmra.mxu2 %v2748_v13  ;;  %v1549_v61 = vrot.slane %v795_v50, 1  ;;  %v1770_v57 = vrot.slane %v974_v24, 1  ;;  %v1771_v7 = vrot.slane %v975_v63, 1  ;;  %v1773_v40 = vrot.slane %v976_v20, 1  ;;  %v379_v24 = vld [vmem:[%s3696_s10 + $0x14] sm:$0x1] }
  0x67   : > { %v1963_v16 = vrot.slane %v1426_v31, 2  ;;  %v1964_v21 = vrot.slane %v1427_v14, 2  ;;  %v1966_v8 = vrot.slane %v1428_v39, 2  ;;  %v1650_v37 = vadd.f32 %v1548_v52, %v711_v54  ;;  %v3173_v39 = vld [vmem:[%s3696_s10 + $0x18] sm:$0xe] }
  0x68   : > { %v1550_v43 = vsel %vm1116_vm1, %v1547_v34, %v1549_v61  ;;  %v1652_v38 = vadd.f32 %v1549_v61, %v713_v0  ;;  %v1772_v17 = vsel %vm1116_vm1, %v1770_v57, %v1771_v7  ;;  %v1774_v59 = vsel %vm1116_vm1, %v1771_v7, %v1773_v40 }
  0x69   : > { %v1846_v25 = vadd.f32 %v1772_v17, %v896_v60  ;;  %v1965_v26 = vsel %vm1902_vm2, %v1963_v16, %v1964_v21  ;;  %v2524_v50 = vrot.slane %v1056_v27, 2  ;;  %v1651_v63 = vadd.f32 %v1550_v43, %v712_v48  ;;  %v3157_v27 = vld [vmem:[%s3696_s10 + $0x20] sm:$0x1]  ;;  %v3237_v17 = vld [vmem:[%s3696_s10 + $0x24] sm:$0xe] }
  0x6a   : > { %v1847_v20 = vadd.f32 %v1774_v59, %v897_v15  ;;  %v1967_v58 = vsel %vm1902_vm2, %v1964_v21, %v1966_v8  ;;  %v2525_v42 = vrot.slane %v1057_v44, 2  ;;  %v2039_v11 = vadd.f32 %v1965_v26, %v1253_v9  ;;  %v3190_v21 = vld [vmem:[%s3696_s10 + $0x24] sm:$0xff]  }
  0x6b   : > { %v2116_v19 = vrot.slane %v1846_v25, 7  ;;  %v2527_v54 = vrot.slane %v1058_v32, 2  ;;  %v314_v0 = vunpack.c.l.bf16 %v282_v53  ;;  %v2040_v2 = vadd.f32 %v1967_v58, %v1254_v56 }
  0x6c   : > { %v2117_v46 = vrot.slane %v1847_v20, 7  ;;  %v315_v47 = vunpack.c.h.bf16 %v282_v53  ;;  %v395_v60 = vunpack.c.l.bf16 %v379_v24  ;;  %v2526_v51 = vsel %vm1902_vm2, %v2524_v50, %v2525_v42 }
  0x6d   : > { %v2212_v49 = vadd.f32 %v2116_v19, %v1650_v37  ;;  %v2528_v48 = vsel %vm1902_vm2, %v2525_v42, %v2527_v54  ;;  %v4011_v15 = vmul.f32 %v3686_v3, %v314_v0  ;;  %v415_v13 = vmul.f32 %v3691_v4, %v314_v0 }
  0x6e   : > { %v2118_v44 = vsel %vm2079_vm3, %v2116_v19, %v2117_v46  ;;  %v2214_v34 = vadd.f32 %v2117_v46, %v1652_v38  ;;  %v4015_v32 = vmul.f32 %v3686_v3, %v315_v47  ;;  %v416_v31 = vmul.f32 %v3691_v4, %v315_v47  ;;  %v3221_v38 = vld [vmem:[%s3696_s10 + $0x2c] sm:$0x1] }
  0x6f   : > { %v2213_v9 = vadd.f32 %v2118_v44, %v1651_v63  ;;  %v2332_v55 = vrot.slane %v2212_v49, 1  ;;  %v477_v14 = vunpack.c.l.bf16 %v461_v1  ;;  %v417_v56 = vmul.f32 %v3691_v4, %v395_v60 }
  0x70   : > { %v2335_v52 = vrot.slane %v2214_v34, 1  ;;  %v498_v61 = vmul.f32 %v3701_v5, %v315_v47  ;;  %v499_v3 = vmul.f32 %v3701_v5, %v395_v60  ;;  %v611_v40 = vmul.f32 %v3706_v6, %v3731_v28 }
  0x71   : > { %v2333_v57 = vrot.slane %v2213_v9, 1  ;;  %v497_v7 = vmul.f32 %v3701_v5, %v477_v14  ;;  %v658_v16 = vunpack.c.l.bf16 %v3157_v27  ;;  %v612_v8 = vmul.f32 %v3706_v6, %v3741_v33 }
  0x72   : > { %v678_v43 = vmul.f32 %v3714_v10, %v3731_v28  ;;  %v4034_v4 = vmul.f32 %v3714_v10, %v3741_v33  ;;  %v740_v37 = vunpack.c.l.bf16 %v3173_v39  ;;  %v761_v25 = vmul.f32 %v3722_v22, %v3741_v33 }
  0x73   : > { %v2334_v5 = vsel %vm1116_vm1, %v2332_v55, %v2333_v57  ;;  %v2336_v53 = vsel %vm1116_vm1, %v2333_v57, %v2335_v52  ;;  %v680_v59 = vmul.f32 %v3714_v10, %v658_v16  ;;  %v762_v28 = vmul.f32 %v3722_v22, %v658_v16 }
  0x74   : > { %v2408_v6 = vadd.f32 %v2334_v5, %v2039_v11  ;;  %v2409_v26 = vadd.f32 %v2336_v53, %v2040_v2  ;;  %v840_v50 = vunpack.c.l.bf16 %v3190_v21  ;;  %v760_v24 = vmul.f32 %v3722_v22, %v740_v37 }
  0x75   : > { %v841_v63 = vunpack.c.h.bf16 %v3190_v21  ;;  %v921_v20 = vunpack.c.l.bf16 %v3221_v38  ;;  %v1003_v58 = vunpack.c.l.bf16 %v3237_v17  ;;  %v1122_v0 = vrot.slane %v415_v13, 1 }
  0x76   : > { %v2600_v42 = vadd.f32 %v2526_v51, %v2408_v6  ;;  %v2601_v19 = vadd.f32 %v2528_v48, %v2409_v26  ;;  %v874_v54 = vmul.f32 %v3736_v29, %v840_v50  ;;  %v941_v46 = vmul.f32 %v3747_v35, %v840_v50  ;;  %v383_v50 = vld [vmem:[%s3696_s10 + $0x44] sm:$0x1] }
  0x77   : > { %v875_v10 = vmul.f32 %v3736_v29, %v841_v63  ;;  %v942_v33 = vmul.f32 %v3747_v35, %v841_v63  ;;  %v943_v11 = vmul.f32 %v3747_v35, %v921_v20  ;;  %v1023_v47 = vmul.f32 %v3757_v41, %v1003_v58 }
  0x78   : > { %v2636_v2 = vadd.f32 %v3841_v36, %v2600_v42  ;;  %v2637_v22 = vadd.f32 %v3841_v36, %v2601_v19  ;;  %v1024_v60 = vmul.f32 %v3757_v41, %v841_v63  ;;  %v1123_v1 = vrot.slane %v416_v31, 1 }
  0x79   : > { %v1125_v49 = vrot.slane %v417_v56, 1  ;;  %v1297_v51 = vrot.slane %v611_v40, 6  ;;  %v1298_v48 = vrot.slane %v612_v8, 6  ;;  %v1491_v34 = vrot.slane %v760_v24, 1  ;;  %v465_v24 = vld [vmem:[%s3696_s10 + $0x3c] sm:$0xe] }
  0x7a   : > { %v2668_v44 = vmax.f32 %v2636_v2, 0.0  ;;  %v2669_v29 = vmax.f32 %v2637_v22, 0.0  ;;  %v1492_v13 = vrot.slane %v761_v25, 1  ;;  %v1124_v27 = vsel %vm1116_vm1, %v1122_v0, %v1123_v1  ;;  %v290_v25 = vld [vmem:[%s3696_s10 + $0x3c] sm:$0xff]  }
  0x7b   : > { %v1126_v35 = vsel %vm1116_vm1, %v1123_v1, %v1125_v49  ;;  %v1299_v9 = vsel %vm1293_vm0, %v1297_v51, %v1298_v48  ;;  %v1393_v55 = vadd.f32 %v1297_v51, %v497_v7  ;;  %v1025_v39 = vmul.f32 %v3757_v41, %v921_v20  ;;  %v4087_v51 = vld [vmem:[%s4955_s1 + $0x1] ss:$0 sm:$0xff] }
  0x7c   : > { %v2752_v14 = vpack.c.bf16 %v2669_v29, %v2668_v44  ;;  %v1231_v52 = vadd.f32 %v1124_v27, %v4011_v15  ;;  %v1394_v31 = vadd.f32 %v1299_v9, %v498_v61  ;;  %v1395_v56 = vadd.f32 %v1298_v48, %v499_v3  ;;  %v3161_v44 = vld [vmem:[%s3696_s10 + $0x50] sm:$0x1] }
  0x7d   : > { %v1493_v57 = vsel %vm1116_vm1, %v1491_v34, %v1492_v13  ;;  %v1494_v40 = vrot.slane %v762_v28, 1  ;;  %v1715_v16 = vrot.slane %v941_v46, 1  ;;  %v1232_v21 = vadd.f32 %v1126_v35, %v4015_v32  ;;  %v3177_v35 = vld [vmem:[%s3696_s10 + $0x48] sm:$0xe] }
  0x7e   : > { %2892 = vmatmul.bf16.vlgmr.msra.gmra.mxu3 %v2752_v14  ;;  %v1716_v8 = vrot.slane %v942_v33, 1  ;;  %v1718_v37 = vrot.slane %v943_v11, 1  ;;  %v1908_v7 = vrot.slane %v1393_v55, 2  ;;  %v1617_v41 = vadd.f32 %v1493_v57, %v678_v43  ;;  %v4097_v55 = vld [vmem:[%s4955_s1 + $0x2] ss:$0 sm:$0xff] }
  0x7f   : > { %v1495_v38 = vsel %vm1116_vm1, %v1492_v13, %v1494_v40  ;;  %v1909_v17 = vrot.slane %v1394_v31, 2  ;;  %v1911_v15 = vrot.slane %v1395_v56, 2  ;;  %v1619_v61 = vadd.f32 %v1494_v40, %v680_v59  ;;  %v4105_v31 = vld [vmem:[%s4955_s1 + $0x3] ss:$0 sm:$0xff] }
  0x80   : > { %v1717_v3 = vsel %vm1116_vm1, %v1715_v16, %v1716_v8  ;;  %v1719_v5 = vsel %vm1116_vm1, %v1716_v8, %v1718_v37  ;;  %v2469_v53 = vrot.slane %v1023_v47, 2  ;;  %v1618_v63 = vadd.f32 %v1495_v38, %v4034_v4  ;;  %v4114_v16 = vld [vmem:[%s4955_s1 + $0x4] ss:$0 sm:$0xff]  ;;  %v3198_v8 = vld [vmem:[%s3696_s10 + $0x54] sm:$0xff]   ;;  %v3225_v37 = vld [vmem:[%s3696_s10 + $0x5c] sm:$0x1] }
  0x81   : > { %v1824_v6 = vadd.f32 %v1717_v3, %v874_v54  ;;  %v1825_v26 = vadd.f32 %v1719_v5, %v875_v10  ;;  %v1910_v32 = vsel %vm1902_vm2, %v1908_v7, %v1909_v17  ;;  %v1912_v28 = vsel %vm1902_vm2, %v1909_v17, %v1911_v15  ;;  %v3241_v15 = vld [vmem:[%s3696_s10 + $0x54] sm:$0xe] }
  0x82   : > { %v2017_v43 = vadd.f32 %v1910_v32, %v1231_v52  ;;  %v2470_v20 = vrot.slane %v1024_v60, 2  ;;  %v2472_v58 = vrot.slane %v1025_v39, 2  ;;  %v322_v19 = vunpack.c.l.bf16 %v290_v25  ;;  %v4076_v60 = vld [vmem:[%s4955_s1] ss:$0 sm:$0xff] }
  0x83   : > { %v2083_v59 = vrot.slane %v1824_v6, 7  ;;  %v2084_v42 = vrot.slane %v1825_v26, 7  ;;  %v323_v0 = vunpack.c.h.bf16 %v290_v25  ;;  %v2018_v46 = vadd.f32 %v1912_v28, %v1232_v21 }
  0x84   : > { %v2471_v54 = vsel %vm1902_vm2, %v2469_v53, %v2470_v20  ;;  %v399_v10 = vunpack.c.l.bf16 %v383_v50  ;;  %v481_v33 = vunpack.c.l.bf16 %v465_v24  ;;  %v2473_v4 = vsel %vm1902_vm2, %v2470_v20, %v2472_v58 }
  0x85   : > { %v2085_v11 = vsel %vm2079_vm3, %v2083_v59, %v2084_v42  ;;  %v2179_v2 = vadd.f32 %v2083_v59, %v1617_v41  ;;  %v2181_v22 = vadd.f32 %v2084_v42, %v1619_v61  ;;  %v4079_v1 = vmul.f32 %v4076_v60, %v322_v19 }
  0x86   : > { %v2180_v47 = vadd.f32 %v2085_v11, %v1618_v63  ;;  %v4082_v49 = vmul.f32 %v4076_v60, %v323_v0  ;;  %v427_v48 = vmul.f32 %v4087_v51, %v322_v19  ;;  %v428_v13 = vmul.f32 %v4087_v51, %v323_v0 }
  0x87   : > { %v2277_v29 = vrot.slane %v2179_v2, 1  ;;  %v2280_v34 = vrot.slane %v2181_v22, 1  ;;  %v429_v27 = vmul.f32 %v4087_v51, %v399_v10  ;;  %v509_v14 = vmul.f32 %v4097_v55, %v481_v33 }
  0x88   : > { %v2278_v9 = vrot.slane %v2180_v47, 1  ;;  %v510_v39 = vmul.f32 %v4097_v55, %v323_v0  ;;  %v511_v52 = vmul.f32 %v4097_v55, %v399_v10  ;;  %v619_v56 = vmul.f32 %v4105_v31, %v3835_v30  ;;  %v4159_v10 = vld [vmem:[%s4955_s1 + $0x8] ss:$0 sm:$0xff] }
  0x89   : > { %v620_v57 = vmul.f32 %v4105_v31, %v3849_v45  ;;  %v662_v40 = vunpack.c.l.bf16 %v3161_v44  ;;  %v4118_v21 = vmul.f32 %v4114_v16, %v3835_v30  ;;  %v4126_v41 = vmul.f32 %v4114_v16, %v3849_v45  ;;  %v4133_v30 = vld [vmem:[%s4955_s1 + $0x5] ss:$0 sm:$0xff] }
  0x8a   : > { %v2279_v7 = vsel %vm1116_vm1, %v2277_v29, %v2278_v9  ;;  %v2281_v38 = vsel %vm1116_vm1, %v2278_v9, %v2280_v34  ;;  %v744_v17 = vunpack.c.l.bf16 %v3177_v35  ;;  %v773_v53 = vmul.f32 %v4133_v30, %v3849_v45  ;;  %v4149_v45 = vld [vmem:[%s4955_s1 + $0x7] ss:$0 sm:$0xff] }
  0x8b   : > { %v2386_v61 = vadd.f32 %v2279_v7, %v2017_v43  ;;  %v2387_v3 = vadd.f32 %v2281_v38, %v2018_v46  ;;  %v692_v5 = vmul.f32 %v4114_v16, %v662_v40  ;;  %v774_v25 = vmul.f32 %v4133_v30, %v662_v40  ;;  %v4142_v43 = vld [vmem:[%s4955_s1 + $0x6] ss:$0 sm:$0xff] }
  0x8c   : > { %v848_v6 = vunpack.c.l.bf16 %v3198_v8  ;;  %v849_v26 = vunpack.c.h.bf16 %v3198_v8  ;;  %v925_v32 = vunpack.c.l.bf16 %v3225_v37  ;;  %v772_v24 = vmul.f32 %v4133_v30, %v744_v17 }
  0x8d   : > { %v2578_v28 = vadd.f32 %v2471_v54, %v2386_v61  ;;  %v2579_v50 = vadd.f32 %v2473_v4, %v2387_v3  ;;  %v1007_v63 = vunpack.c.l.bf16 %v3241_v15  ;;  %v1142_v42 = vrot.slane %v427_v48, 1 }
  0x8e   : > { %v882_v20 = vmul.f32 %v4142_v43, %v848_v6  ;;  %v883_v58 = vmul.f32 %v4142_v43, %v849_v26  ;;  %v953_v59 = vmul.f32 %v4149_v45, %v848_v6  ;;  %v954_v46 = vmul.f32 %v4149_v45, %v849_v26 }
  0x8f   : > { %v2614_v19 = vadd.f32 %v3841_v36, %v2578_v28  ;;  %v2615_v0 = vadd.f32 %v3841_v36, %v2579_v50  ;;  %v955_v54 = vmul.f32 %v4149_v45, %v925_v32  ;;  %v1035_v33 = vmul.f32 %v4159_v10, %v1007_v63  ;;  %v387_v50 = vld [vmem:[%s3696_s10 + $0x74] sm:$0x1] }
  0x90   : > { %v1036_v11 = vmul.f32 %v4159_v10, %v849_v26  ;;  %v1143_v2 = vrot.slane %v428_v13, 1  ;;  %v1145_v22 = vrot.slane %v429_v27, 1  ;;  %v1309_v48 = vrot.slane %v619_v56, 6  ;;  %v298_v26 = vld [vmem:[%s3696_s10 + $0x6c] sm:$0xff]  }
  0x91   : > { %v2646_v4 = vmax.f32 %v2614_v19, 0.0  ;;  %v2647_v47 = vmax.f32 %v2615_v0, 0.0  ;;  %v1310_v44 = vrot.slane %v620_v57, 6  ;;  %v1511_v34 = vrot.slane %v772_v24, 1 }
  0x92   : > { %v1144_v36 = vsel %vm1116_vm1, %v1142_v42, %v1143_v2  ;;  %v1146_v29 = vsel %vm1116_vm1, %v1143_v2, %v1145_v22  ;;  %v1512_v35 = vrot.slane %v773_v53, 1  ;;  %v1037_v40 = vmul.f32 %v4159_v10, %v925_v32  ;;  %v469_v22 = vld [vmem:[%s3696_s10 + $0x6c] sm:$0xe] }
  0x93   : > { %v2741_v9 = vpack.c.bf16 %v2647_v47, %v2646_v4  ;;  %v1239_v8 = vadd.f32 %v1144_v36, %v4079_v1  ;;  %v1311_v37 = vsel %vm1293_vm0, %v1309_v48, %v1310_v44  ;;  %v1405_v7 = vadd.f32 %v1309_v48, %v509_v14  ;;  %v3165_v36 = vld [vmem:[%s3696_s10 + $0x80] sm:$0x1] }
  0x94   : > { %v1406_v13 = vadd.f32 %v1311_v37, %v510_v39  ;;  %v1407_v27 = vadd.f32 %v1310_v44, %v511_v52  ;;  %v1513_v56 = vsel %vm1116_vm1, %v1511_v34, %v1512_v35  ;;  %v1240_v57 = vadd.f32 %v1146_v29, %v4082_v49 }
  0x95   : > { %2837 = vmatmul.bf16.gmra.mxu0 %v2741_v9  ;;  %v1514_v38 = vrot.slane %v774_v25, 1  ;;  %v1735_v17 = vrot.slane %v953_v59, 1  ;;  %v1736_v15 = vrot.slane %v954_v46, 1  ;;  %v1738_v61 = vrot.slane %v955_v54, 1 }
  0x96   : > { %v1928_v3 = vrot.slane %v1405_v7, 2  ;;  %v1929_v53 = vrot.slane %v1406_v13, 2  ;;  %v1931_v6 = vrot.slane %v1407_v27, 2  ;;  %v1629_v14 = vadd.f32 %v1513_v56, %v4118_v21 }
  0x97   : > { %v1515_v1 = vsel %vm1116_vm1, %v1512_v35, %v1514_v38  ;;  %v1631_v39 = vadd.f32 %v1514_v38, %v692_v5  ;;  %v1737_v52 = vsel %vm1116_vm1, %v1735_v17, %v1736_v15  ;;  %v1739_v32 = vsel %vm1116_vm1, %v1736_v15, %v1738_v61  ;;  %v3206_v17 = vld [vmem:[%s3696_s10 + $0x84] sm:$0xff]  }
  0x98   : > { %v1832_v28 = vadd.f32 %v1737_v52, %v882_v20  ;;  %v1930_v49 = vsel %vm1902_vm2, %v1928_v3, %v1929_v53  ;;  %v2489_v25 = vrot.slane %v1035_v33, 2  ;;  %v1630_v24 = vadd.f32 %v1515_v1, %v4126_v41  ;;  %v3245_v1 = vld [vmem:[%s3696_s10 + $0x84] sm:$0xe] }
  0x99   : > { %v1833_v63 = vadd.f32 %v1739_v32, %v883_v58  ;;  %v1932_v59 = vsel %vm1902_vm2, %v1929_v53, %v1931_v6  ;;  %v2490_v42 = vrot.slane %v1036_v11, 2  ;;  %v2025_v19 = vadd.f32 %v1930_v49, %v1239_v8  ;;  %v3229_v6 = vld [vmem:[%s3696_s10 + $0x8c] sm:$0x1] }
  0x9a   : > { %v2095_v21 = vrot.slane %v1832_v28, 7  ;;  %v2492_v5 = vrot.slane %v1037_v40, 2  ;;  %v330_v0 = vunpack.c.l.bf16 %v298_v26  ;;  %v2026_v46 = vadd.f32 %v1932_v59, %v1240_v57  ;;  %v3181_v40 = vld [vmem:[%s3696_s10 + $0x78] sm:$0xe] }
  0x9b   : > { %v2096_v54 = vrot.slane %v1833_v63, 7  ;;  %v331_v2 = vunpack.c.h.bf16 %v298_v26  ;;  %v403_v20 = vunpack.c.l.bf16 %v387_v50  ;;  %v2491_v33 = vsel %vm1902_vm2, %v2489_v25, %v2490_v42 }
  0x9c   : > { %v2191_v4 = vadd.f32 %v2095_v21, %v1629_v14  ;;  %v2493_v41 = vsel %vm1902_vm2, %v2490_v42, %v2492_v5  ;;  %v4183_v58 = vmul.f32 %v4076_v60, %v330_v0  ;;  %v439_v44 = vmul.f32 %v4087_v51, %v330_v0 }
  0x9d   : > { %v2097_v11 = vsel %vm2079_vm3, %v2095_v21, %v2096_v54  ;;  %v2193_v47 = vadd.f32 %v2096_v54, %v1631_v39  ;;  %v4187_v48 = vmul.f32 %v4076_v60, %v331_v2  ;;  %v440_v35 = vmul.f32 %v4087_v51, %v331_v2 }
  0x9e   : > { %v2192_v29 = vadd.f32 %v2097_v11, %v1630_v24  ;;  %v2297_v34 = vrot.slane %v2191_v4, 1  ;;  %v485_v9 = vunpack.c.l.bf16 %v469_v22  ;;  %v441_v37 = vmul.f32 %v4087_v51, %v403_v20 }
  0x9f   : > { %v2300_v8 = vrot.slane %v2193_v47, 1  ;;  %v522_v7 = vmul.f32 %v4097_v55, %v331_v2  ;;  %v523_v13 = vmul.f32 %v4097_v55, %v403_v20  ;;  %v627_v57 = vmul.f32 %v4105_v31, %v3904_v18 }
  0xa0   : > { %v2298_v27 = vrot.slane %v2192_v29, 1  ;;  %v521_v56 = vmul.f32 %v4097_v55, %v485_v9  ;;  %v666_v38 = vunpack.c.l.bf16 %v3165_v36  ;;  %v628_v15 = vmul.f32 %v4105_v31, %v3913_v23 }
  0xa1   : > { %v702_v61 = vmul.f32 %v4114_v16, %v3904_v18  ;;  %v4206_v3 = vmul.f32 %v4114_v16, %v3913_v23  ;;  %v748_v53 = vunpack.c.l.bf16 %v3181_v40  ;;  %v785_v26 = vmul.f32 %v4133_v30, %v3913_v23 }
  0xa2   : > { %v2299_v14 = vsel %vm1116_vm1, %v2297_v34, %v2298_v27  ;;  %v2301_v39 = vsel %vm1116_vm1, %v2298_v27, %v2300_v8  ;;  %v704_v52 = vmul.f32 %v4114_v16, %v666_v38  ;;  %v786_v18 = vmul.f32 %v4133_v30, %v666_v38 }
  0xa3   : > { %v2394_v32 = vadd.f32 %v2299_v14, %v2025_v19  ;;  %v2395_v28 = vadd.f32 %v2301_v39, %v2026_v46  ;;  %v856_v49 = vunpack.c.l.bf16 %v3206_v17  ;;  %v784_v25 = vmul.f32 %v4133_v30, %v748_v53  ;;  %v4225_v46 = vld [vmem:[%s4956_s2] ss:$0 sm:$0xff] }
  0xa4   : > { %v857_v50 = vunpack.c.h.bf16 %v3206_v17  ;;  %v929_v24 = vunpack.c.l.bf16 %v3229_v6  ;;  %v1011_v63 = vunpack.c.l.bf16 %v3245_v1  ;;  %v1162_v5 = vrot.slane %v439_v44, 1 }
  0xa5   : > { %v2586_v59 = vadd.f32 %v2491_v33, %v2394_v32  ;;  %v2587_v42 = vadd.f32 %v2493_v41, %v2395_v28  ;;  %v890_v21 = vmul.f32 %v4142_v43, %v856_v49  ;;  %v965_v54 = vmul.f32 %v4149_v45, %v856_v49 }
  0xa6   : > { %v891_v0 = vmul.f32 %v4142_v43, %v857_v50  ;;  %v966_v23 = vmul.f32 %v4149_v45, %v857_v50  ;;  %v967_v19 = vmul.f32 %v4149_v45, %v929_v24  ;;  %v1047_v22 = vmul.f32 %v4159_v10, %v1011_v63 }
  0xa7   : > { %v2622_v2 = vadd.f32 %v4225_v46, %v2586_v59  ;;  %v2623_v20 = vadd.f32 %v4225_v46, %v2587_v42  ;;  %v1048_v4 = vmul.f32 %v4159_v10, %v857_v50  ;;  %v1163_v33 = vrot.slane %v440_v35, 1  ;;  %v391_v59 = vld [vmem:[%s3696_s10 + $0xa4] sm:$0x1]  ;;  %v473_v42 = vld [vmem:[%s3696_s10 + $0x9c] sm:$0xe] }
  0xa8   : > { %v1165_v41 = vrot.slane %v441_v37, 1  ;;  %v1321_v11 = vrot.slane %v627_v57, 6  ;;  %v1322_v47 = vrot.slane %v628_v15, 6  ;;  %v1531_v29 = vrot.slane %v784_v25, 1  ;;  %v306_v25 = vld [vmem:[%s3696_s10 + $0x9c] sm:$0xff]  }
  0xa9   : > { %v2654_v44 = vmax.f32 %v2622_v2, 0.0  ;;  %v2655_v36 = vmax.f32 %v2623_v20, 0.0  ;;  %v1532_v34 = vrot.slane %v785_v26, 1  ;;  %v1164_v9 = vsel %vm1116_vm1, %v1162_v5, %v1163_v33 }
  0xaa   : > { %v1166_v40 = vsel %vm1116_vm1, %v1163_v33, %v1165_v41  ;;  %v1323_v8 = vsel %vm1293_vm0, %v1321_v11, %v1322_v47  ;;  %v1417_v27 = vadd.f32 %v1321_v11, %v521_v56  ;;  %v1049_v17 = vmul.f32 %v4159_v10, %v929_v24 }
  0xab   : > { %v2745_v38 = vpack.c.bf16 %v2655_v36, %v2654_v44  ;;  %v1247_v53 = vadd.f32 %v1164_v9, %v4183_v58  ;;  %v1418_v35 = vadd.f32 %v1323_v8, %v522_v7  ;;  %v1419_v37 = vadd.f32 %v1322_v47, %v523_v13 }
  0xac   : > { %v1533_v57 = vsel %vm1116_vm1, %v1531_v29, %v1532_v34  ;;  %v1534_v15 = vrot.slane %v786_v18, 1  ;;  %v1755_v6 = vrot.slane %v965_v54, 1  ;;  %v1248_v1 = vadd.f32 %v1166_v40, %v4187_v48 }
  0xad   : > { %2857 = vmatmul.bf16.gmra.mxu1 %v2745_v38  ;;  %v1756_v14 = vrot.slane %v966_v23, 1  ;;  %v1758_v39 = vrot.slane %v967_v19, 1  ;;  %v1948_v56 = vrot.slane %v1417_v27, 2  ;;  %v1641_v32 = vadd.f32 %v1533_v57, %v702_v61  ;;  %v3185_v38 = vld [vmem:[%s3696_s10 + $0xa8] sm:$0xe] }
  0xae   : > { %v1535_v26 = vsel %vm1116_vm1, %v1532_v34, %v1534_v15  ;;  %v1949_v28 = vrot.slane %v1418_v35, 2  ;;  %v1951_v58 = vrot.slane %v1419_v37, 2  ;;  %v1643_v7 = vadd.f32 %v1534_v15, %v704_v52  ;;  %v3169_v34 = vld [vmem:[%s3696_s10 + $0xb0] sm:$0x1] }
  0xaf   : > { %v1757_v13 = vsel %vm1116_vm1, %v1755_v6, %v1756_v14  ;;  %v1759_v49 = vsel %vm1116_vm1, %v1756_v14, %v1758_v39  ;;  %v2509_v18 = vrot.slane %v1047_v22, 2  ;;  %v1642_v5 = vadd.f32 %v1535_v26, %v4206_v3  ;;  %v3214_v14 = vld [vmem:[%s3696_s10 + $0xb4] sm:$0xff]   ;;  %v3233_v39 = vld [vmem:[%s3696_s10 + $0xbc] sm:$0x1] }
  0xb0   : > { %v1840_v50 = vadd.f32 %v1757_v13, %v890_v21  ;;  %v1841_v24 = vadd.f32 %v1759_v49, %v891_v0  ;;  %v1950_v48 = vsel %vm1902_vm2, %v1948_v56, %v1949_v28  ;;  %v1952_v63 = vsel %vm1902_vm2, %v1949_v28, %v1951_v58  ;;  %v3249_v58 = vld [vmem:[%s3696_s10 + $0xb4] sm:$0xe] }
  0xb1   : > { %v2033_v61 = vadd.f32 %v1950_v48, %v1247_v53  ;;  %v2510_v54 = vrot.slane %v1048_v4, 2  ;;  %v2512_v23 = vrot.slane %v1049_v17, 2  ;;  %v338_v2 = vunpack.c.l.bf16 %v306_v25 }
  0xb2   : > { %v2107_v52 = vrot.slane %v1840_v50, 7  ;;  %v2108_v19 = vrot.slane %v1841_v24, 7  ;;  %v339_v20 = vunpack.c.h.bf16 %v306_v25  ;;  %v2034_v22 = vadd.f32 %v1952_v63, %v1248_v1 }
  0xb3   : > { %v2511_v21 = vsel %vm1902_vm2, %v2509_v18, %v2510_v54  ;;  %v407_v0 = vunpack.c.l.bf16 %v391_v59  ;;  %v489_v33 = vunpack.c.l.bf16 %v473_v42  ;;  %v2513_v3 = vsel %vm1902_vm2, %v2510_v54, %v2512_v23 }
  0xb4   : > { %v2109_v41 = vsel %vm2079_vm3, %v2107_v52, %v2108_v19  ;;  %v2203_v11 = vadd.f32 %v2107_v52, %v1641_v32  ;;  %v2205_v47 = vadd.f32 %v2108_v19, %v1643_v7  ;;  %v372_v4 = vmul.f32 %v4076_v60, %v338_v2 }
  0xb5   : > { %v2204_v44 = vadd.f32 %v2109_v41, %v1642_v5  ;;  %v4252_v36 = vmul.f32 %v4076_v60, %v339_v20  ;;  %v451_v29 = vmul.f32 %v4087_v51, %v338_v2  ;;  %v452_v8 = vmul.f32 %v4087_v51, %v339_v20 }
  0xb6   : > { %v2317_v9 = vrot.slane %v2203_v11, 1  ;;  %v2320_v40 = vrot.slane %v2205_v47, 1  ;;  %v453_v27 = vmul.f32 %v4087_v51, %v407_v0  ;;  %v533_v53 = vmul.f32 %v4097_v55, %v489_v33 }
  0xb7   : > { %v2318_v17 = vrot.slane %v2204_v44, 1  ;;  %v534_v35 = vmul.f32 %v4097_v55, %v339_v20  ;;  %v535_v37 = vmul.f32 %v4097_v55, %v407_v0  ;;  %v635_v57 = vmul.f32 %v4105_v31, %v3968_v62 }
  0xb8   : > { %v636_v15 = vmul.f32 %v4105_v31, %v3977_v12  ;;  %v670_v6 = vunpack.c.l.bf16 %v3169_v34  ;;  %v714_v1 = vmul.f32 %v4114_v16, %v3968_v62  ;;  %v715_v32 = vmul.f32 %v4114_v16, %v3977_v12 }
  0xb9   : > { %v2319_v56 = vsel %vm1116_vm1, %v2317_v9, %v2318_v17  ;;  %v2321_v26 = vsel %vm1116_vm1, %v2318_v17, %v2320_v40  ;;  %v752_v28 = vunpack.c.l.bf16 %v3185_v38  ;;  %v797_v18 = vmul.f32 %v4133_v30, %v3977_v12 }
  0xba   : > { %v2402_v7 = vadd.f32 %v2319_v56, %v2033_v61  ;;  %v2403_v13 = vadd.f32 %v2321_v26, %v2034_v22  ;;  %v716_v49 = vmul.f32 %v4114_v16, %v670_v6  ;;  %v798_v62 = vmul.f32 %v4133_v30, %v670_v6 }
  0xbb   : > { %v864_v25 = vunpack.c.l.bf16 %v3214_v14  ;;  %v865_v50 = vunpack.c.h.bf16 %v3214_v14  ;;  %v933_v24 = vunpack.c.l.bf16 %v3233_v39  ;;  %v796_v59 = vmul.f32 %v4133_v30, %v752_v28 }
  0xbc   : > { %v2594_v48 = vadd.f32 %v2511_v21, %v2402_v7  ;;  %v2595_v63 = vadd.f32 %v2513_v3, %v2403_v13  ;;  %v1015_v42 = vunpack.c.l.bf16 %v3249_v58  ;;  %v1182_v23 = vrot.slane %v451_v29, 1 }
  0xbd   : > { %v898_v5 = vmul.f32 %v4142_v43, %v864_v25  ;;  %v899_v61 = vmul.f32 %v4142_v43, %v865_v50  ;;  %v977_v54 = vmul.f32 %v4149_v45, %v864_v25  ;;  %v978_v19 = vmul.f32 %v4149_v45, %v865_v50 }
  0xbe   : > { %v2630_v52 = vadd.f32 %v4225_v46, %v2594_v48  ;;  %v2631_v12 = vadd.f32 %v4225_v46, %v2595_v63  ;;  %v979_v2 = vmul.f32 %v4149_v45, %v933_v24  ;;  %v1059_v20 = vmul.f32 %v4159_v10, %v1015_v42 }
  0xbf   : > { %v1060_v22 = vmul.f32 %v4159_v10, %v865_v50  ;;  %v1183_v21 = vrot.slane %v452_v8, 1  ;;  %v1185_v0 = vrot.slane %v453_v27, 1  ;;  %v1333_v11 = vrot.slane %v635_v57, 6  ;;  %v380_v50 = vld [vmem:[%s3696_s10 + $0x20] sm:$0x1] }
  0xc0   : > { %v2662_v33 = vmax.f32 %v2630_v52, 0.0  ;;  %v2663_v41 = vmax.f32 %v2631_v12, 0.0  ;;  %v1334_v47 = vrot.slane %v636_v15, 6  ;;  %v1551_v29 = vrot.slane %v796_v59, 1 }
  0xc1   : > { %v1184_v3 = vsel %vm1116_vm1, %v1182_v23, %v1183_v21  ;;  %v1186_v44 = vsel %vm1116_vm1, %v1183_v21, %v1185_v0  ;;  %v1552_v34 = vrot.slane %v797_v18, 1  ;;  %v1061_v40 = vmul.f32 %v4159_v10, %v933_v24 }
  0xc2   : > { %v2749_v9 = vpack.c.bf16 %v2663_v41, %v2662_v33  ;;  %v1255_v38 = vadd.f32 %v1184_v3, %v372_v4  ;;  %v1335_v17 = vsel %vm1293_vm0, %v1333_v11, %v1334_v47  ;;  %v1429_v6 = vadd.f32 %v1333_v11, %v533_v53  ;;  %v3158_v11 = vld [vmem:[%s3696_s10 + $0x2c] sm:$0x1] }
  0xc3   : > { %v1430_v14 = vadd.f32 %v1335_v17, %v534_v35  ;;  %v1431_v8 = vadd.f32 %v1334_v47, %v535_v37  ;;  %v1553_v27 = vsel %vm1116_vm1, %v1551_v29, %v1552_v34  ;;  %v1256_v57 = vadd.f32 %v1186_v44, %v4252_v36  ;;  %v3471_v37 = vld [vmem:[%s3696_s10 + $0x18] sm:$0xff]  }
  0xc4   : > { %2877 = vmatmul.bf16.gmra.mxu2 %v2749_v9  ;;  %v1554_v15 = vrot.slane %v798_v62, 1  ;;  %v1775_v39 = vrot.slane %v977_v54, 1  ;;  %v1776_v56 = vrot.slane %v978_v19, 1  ;;  %v1778_v26 = vrot.slane %v979_v2, 1  ;;  %v462_v19 = vld [vmem:[%s3696_s10 + $0x18] sm:$0xe] }
  0xc5   : > { %v1968_v28 = vrot.slane %v1429_v6, 2  ;;  %v1969_v58 = vrot.slane %v1430_v14, 2  ;;  %v1971_v7 = vrot.slane %v1431_v8, 2  ;;  %v1653_v13 = vadd.f32 %v1553_v27, %v714_v1  ;;  %v3487_v6 = vld [vmem:[%s3696_s10 + $0x30] sm:$0xff]  }
  0xc6   : > { %v1555_v4 = vsel %vm1116_vm1, %v1552_v34, %v1554_v15  ;;  %v1655_v53 = vadd.f32 %v1554_v15, %v716_v49  ;;  %v1777_v35 = vsel %vm1116_vm1, %v1775_v39, %v1776_v56  ;;  %v1779_v18 = vsel %vm1116_vm1, %v1776_v56, %v1778_v26  ;;  %v3174_v34 = vld [vmem:[%s3696_s10 + $0x24] sm:$0xe] }
  0xc7   : > { %v1848_v25 = vadd.f32 %v1777_v35, %v898_v5  ;;  %v1970_v36 = vsel %vm1902_vm2, %v1968_v28, %v1969_v58  ;;  %v2529_v62 = vrot.slane %v1059_v20, 2  ;;  %v1654_v24 = vadd.f32 %v1555_v4, %v715_v32 }
  0xc8   : > { %v1849_v48 = vadd.f32 %v1779_v18, %v899_v61  ;;  %v1972_v63 = vsel %vm1902_vm2, %v1969_v58, %v1971_v7  ;;  %v2530_v59 = vrot.slane %v1060_v22, 2  ;;  %v2041_v42 = vadd.f32 %v1970_v36, %v1255_v38  ;;  %v3128_v22 = vld [vmem:[%s3696_s10 + $0x24] sm:$0xff]  }
  0xc9   : > { %v2119_v1 = vrot.slane %v1848_v25, 7  ;;  %v2532_v49 = vrot.slane %v1061_v40, 2  ;;  %v3301_v54 = vunpack.c.l.bf16 %v3471_v37  ;;  %v2042_v23 = vadd.f32 %v1972_v63, %v1256_v57  ;;  %v3238_v25 = vld [vmem:[%s3696_s10 + $0x30] sm:$0xe] }
  0xca   : > { %v2120_v52 = vrot.slane %v1849_v48, 7  ;;  %v3302_v12 = vunpack.c.h.bf16 %v3471_v37  ;;  %v396_v5 = vunpack.c.l.bf16 %v380_v50  ;;  %v2531_v20 = vsel %vm1902_vm2, %v2529_v62, %v2530_v59 }
  0xcb   : > { %v2215_v2 = vadd.f32 %v2119_v1, %v1653_v13  ;;  %v2533_v32 = vsel %vm1902_vm2, %v2530_v59, %v2532_v49  ;;  %v4306_v61 = vmul.f32 %v4076_v60, %v3301_v54  ;;  %v418_v41 = vmul.f32 %v4087_v51, %v3301_v54  ;;  %v3222_v13 = vld [vmem:[%s3696_s10 + $0x38] sm:$0x1] }
  0xcc   : > { %v2121_v21 = vsel %vm2079_vm3, %v2119_v1, %v2120_v52  ;;  %v2217_v0 = vadd.f32 %v2120_v52, %v1655_v53  ;;  %v4311_v33 = vmul.f32 %v4076_v60, %v3302_v12  ;;  %v419_v44 = vmul.f32 %v4087_v51, %v3302_v12 }
  0xcd   : > { %v2216_v47 = vadd.f32 %v2121_v21, %v1654_v24  ;;  %v2337_v3 = vrot.slane %v2215_v2, 1  ;;  %v478_v29 = vunpack.c.l.bf16 %v462_v19  ;;  %v420_v40 = vmul.f32 %v4087_v51, %v396_v5 }
  0xce   : > { %v2340_v9 = vrot.slane %v2217_v0, 1  ;;  %v501_v38 = vmul.f32 %v4097_v55, %v3302_v12  ;;  %v579_v17 = vunpack.c.l.bf16 %v3128_v22  ;;  %v502_v8 = vmul.f32 %v4097_v55, %v396_v5 }
  0xcf   : > { %v2338_v14 = vrot.slane %v2216_v47, 1  ;;  %v580_v27 = vunpack.c.h.bf16 %v3128_v22  ;;  %v659_v57 = vunpack.c.l.bf16 %v3158_v11  ;;  %v500_v15 = vmul.f32 %v4097_v55, %v478_v29 }
  0xd0   : > { %v613_v39 = vmul.f32 %v4105_v31, %v579_v17  ;;  %v681_v56 = vmul.f32 %v4114_v16, %v579_v17  ;;  %v741_v26 = vunpack.c.l.bf16 %v3174_v34  ;;  %v4327_v4 = vunpack.c.l.bf16 %v3487_v6 }
  0xd1   : > { %v2339_v28 = vsel %vm1116_vm1, %v2337_v3, %v2338_v14  ;;  %v2341_v58 = vsel %vm1116_vm1, %v2338_v14, %v2340_v9  ;;  %v614_v7 = vmul.f32 %v4105_v31, %v580_v27  ;;  %v682_v37 = vmul.f32 %v4114_v16, %v580_v27 }
  0xd2   : > { %v2410_v53 = vadd.f32 %v2339_v28, %v2041_v42  ;;  %v2411_v35 = vadd.f32 %v2341_v58, %v2042_v23  ;;  %v683_v18 = vmul.f32 %v4114_v16, %v659_v57  ;;  %v763_v36 = vmul.f32 %v4133_v30, %v741_v26 }
  0xd3   : > { %v764_v62 = vmul.f32 %v4133_v30, %v580_v27  ;;  %v765_v50 = vmul.f32 %v4133_v30, %v659_v57  ;;  %v4336_v24 = vunpack.c.h.bf16 %v3487_v6  ;;  %v876_v59 = vmul.f32 %v4142_v43, %v4327_v4 }
  0xd4   : > { %v2602_v48 = vadd.f32 %v2531_v20, %v2410_v53  ;;  %v2603_v63 = vadd.f32 %v2533_v32, %v2411_v35  ;;  %v922_v42 = vunpack.c.l.bf16 %v3222_v13  ;;  %v944_v49 = vmul.f32 %v4149_v45, %v4327_v4 }
  0xd5   : > { %v877_v1 = vmul.f32 %v4142_v43, %v4336_v24  ;;  %v945_v54 = vmul.f32 %v4149_v45, %v4336_v24  ;;  %v1004_v23 = vunpack.c.l.bf16 %v3238_v25  ;;  %v1027_v19 = vmul.f32 %v4159_v10, %v4336_v24 }
  0xd6   : > { %v2638_v52 = vadd.f32 %v4225_v46, %v2602_v48  ;;  %v2639_v12 = vadd.f32 %v4225_v46, %v2603_v63  ;;  %v946_v5 = vmul.f32 %v4149_v45, %v922_v42  ;;  %v1028_v2 = vmul.f32 %v4159_v10, %v922_v42  ;;  %v384_v48 = vld [vmem:[%s3696_s10 + $0x50] sm:$0x1] }
  0xd7   : > { %v1127_v20 = vrot.slane %v418_v41, 1  ;;  %v1128_v32 = vrot.slane %v419_v44, 1  ;;  %v1130_v22 = vrot.slane %v420_v40, 1  ;;  %v1300_v11 = vrot.slane %v613_v39, 6 }
  0xd8   : > { %v2670_v21 = vmax.f32 %v2638_v52, 0.0  ;;  %v2671_v0 = vmax.f32 %v2639_v12, 0.0  ;;  %v1301_v47 = vrot.slane %v614_v7, 6  ;;  %v1496_v34 = vrot.slane %v763_v36, 1 }
  0xd9   : > { %v1129_v3 = vsel %vm1116_vm1, %v1127_v20, %v1128_v32  ;;  %v1131_v29 = vsel %vm1116_vm1, %v1128_v32, %v1130_v22  ;;  %v1497_v9 = vrot.slane %v764_v62, 1  ;;  %v1026_v6 = vmul.f32 %v4159_v10, %v1004_v23  ;;  %v466_v32 = vld [vmem:[%s3696_s10 + $0x48] sm:$0xe] }
  0xda   : > { %v2753_v17 = vpack.c.bf16 %v2671_v0, %v2670_v21  ;;  %v1233_v14 = vadd.f32 %v1129_v3, %v4306_v61  ;;  %v1302_v27 = vsel %vm1293_vm0, %v1300_v11, %v1301_v47  ;;  %v1396_v41 = vadd.f32 %v1300_v11, %v500_v15  ;;  %v3162_v3 = vld [vmem:[%s3696_s10 + $0x5c] sm:$0x1] }
  0xdb   : > { %v1397_v44 = vadd.f32 %v1302_v27, %v501_v38  ;;  %v1398_v40 = vadd.f32 %v1301_v47, %v502_v8  ;;  %v1498_v57 = vsel %vm1116_vm1, %v1496_v34, %v1497_v9  ;;  %v1234_v39 = vadd.f32 %v1131_v29, %v4311_v33  ;;  %v3473_v8 = vld [vmem:[%s3696_s10 + $0x48] sm:$0xff]  }
  0xdc   : > { %2897 = vmatmul.bf16.gmra.mxu3 %v2753_v17  ;;  %v1499_v26 = vrot.slane %v765_v50, 1  ;;  %v1720_v28 = vrot.slane %v944_v49, 1  ;;  %v1721_v58 = vrot.slane %v945_v54, 1  ;;  %v1723_v7 = vrot.slane %v946_v5, 1 }
  0xdd   : > { %v1913_v13 = vrot.slane %v1396_v41, 2  ;;  %v1914_v53 = vrot.slane %v1397_v44, 2  ;;  %v1916_v35 = vrot.slane %v1398_v40, 2  ;;  %v1620_v25 = vadd.f32 %v1498_v57, %v681_v56  ;;  %v3489_v40 = vld [vmem:[%s3696_s10 + $0x60] sm:$0xff]  }
  0xde   : > { %v1500_v61 = vsel %vm1116_vm1, %v1497_v9, %v1499_v26  ;;  %v1622_v15 = vadd.f32 %v1499_v26, %v683_v18  ;;  %v1722_v38 = vsel %vm1116_vm1, %v1720_v28, %v1721_v58  ;;  %v1724_v36 = vsel %vm1116_vm1, %v1721_v58, %v1723_v7 }
  0xdf   : > { %v1826_v62 = vadd.f32 %v1722_v38, %v876_v59  ;;  %v1915_v33 = vsel %vm1902_vm2, %v1913_v13, %v1914_v53  ;;  %v2474_v50 = vrot.slane %v1026_v6, 2  ;;  %v1621_v63 = vadd.f32 %v1500_v61, %v682_v37  ;;  %v3178_v6 = vld [vmem:[%s3696_s10 + $0x54] sm:$0xe] }
  0xe0   : > { %v1827_v42 = vadd.f32 %v1724_v36, %v877_v1  ;;  %v1917_v49 = vsel %vm1902_vm2, %v1914_v53, %v1916_v35  ;;  %v2475_v54 = vrot.slane %v1027_v19, 2  ;;  %v2019_v23 = vadd.f32 %v1915_v33, %v1233_v14  ;;  %v3136_v19 = vld [vmem:[%s3696_s10 + $0x54] sm:$0xff]   ;;  %v3242_v36 = vld [vmem:[%s3696_s10 + $0x60] sm:$0xe] }
  0xe1   : > { %v2086_v56 = vrot.slane %v1826_v62, 7  ;;  %v2477_v18 = vrot.slane %v1028_v2, 2  ;;  %v3309_v52 = vunpack.c.l.bf16 %v3473_v8  ;;  %v2020_v12 = vadd.f32 %v1917_v49, %v1234_v39 }
  0xe2   : > { %v2087_v5 = vrot.slane %v1827_v42, 7  ;;  %v3310_v20 = vunpack.c.h.bf16 %v3473_v8  ;;  %v400_v59 = vunpack.c.l.bf16 %v384_v48  ;;  %v2476_v21 = vsel %vm1902_vm2, %v2474_v50, %v2475_v54 }
  0xe3   : > { %v2182_v22 = vadd.f32 %v2086_v56, %v1620_v25  ;;  %v2478_v37 = vsel %vm1902_vm2, %v2475_v54, %v2477_v18  ;;  %v4370_v1 = vmul.f32 %v4076_v60, %v3309_v52  ;;  %v430_v47 = vmul.f32 %v4087_v51, %v3309_v52  ;;  %v3226_v25 = vld [vmem:[%s3696_s10 + $0x68] sm:$0x1] }
  0xe4   : > { %v2088_v2 = vsel %vm2079_vm3, %v2086_v56, %v2087_v5  ;;  %v2184_v0 = vadd.f32 %v2087_v5, %v1622_v15  ;;  %v4375_v11 = vmul.f32 %v4076_v60, %v3310_v20  ;;  %v431_v9 = vmul.f32 %v4087_v51, %v3310_v20 }
  0xe5   : > { %v2183_v29 = vadd.f32 %v2088_v2, %v1621_v63  ;;  %v2282_v34 = vrot.slane %v2182_v22, 1  ;;  %v482_v17 = vunpack.c.l.bf16 %v466_v32  ;;  %v432_v27 = vmul.f32 %v4087_v51, %v400_v59 }
  0xe6   : > { %v2285_v14 = vrot.slane %v2184_v0, 1  ;;  %v513_v41 = vmul.f32 %v4097_v55, %v3310_v20  ;;  %v587_v44 = vunpack.c.l.bf16 %v3136_v19  ;;  %v514_v60 = vmul.f32 %v4097_v55, %v400_v59 }
  0xe7   : > { %v2283_v57 = vrot.slane %v2183_v29, 1  ;;  %v588_v39 = vunpack.c.h.bf16 %v3136_v19  ;;  %v663_v26 = vunpack.c.l.bf16 %v3162_v3  ;;  %v512_v28 = vmul.f32 %v4097_v55, %v482_v17 }
  0xe8   : > { %v621_v58 = vmul.f32 %v4105_v31, %v587_v44  ;;  %v693_v7 = vmul.f32 %v4114_v16, %v587_v44  ;;  %v745_v13 = vunpack.c.l.bf16 %v3178_v6  ;;  %v4391_v61 = vunpack.c.l.bf16 %v3489_v40 }
  0xe9   : > { %v2284_v51 = vsel %vm1116_vm1, %v2282_v34, %v2283_v57  ;;  %v2286_v53 = vsel %vm1116_vm1, %v2283_v57, %v2285_v14  ;;  %v622_v35 = vmul.f32 %v4105_v31, %v588_v39  ;;  %v694_v8 = vmul.f32 %v4114_v16, %v588_v39 }
  0xea   : > { %v2388_v15 = vadd.f32 %v2284_v51, %v2019_v23  ;;  %v2389_v38 = vadd.f32 %v2286_v53, %v2020_v12  ;;  %v695_v55 = vmul.f32 %v4114_v16, %v663_v26  ;;  %v775_v62 = vmul.f32 %v4133_v30, %v745_v13 }
  0xeb   : > { %v776_v33 = vmul.f32 %v4133_v30, %v588_v39  ;;  %v777_v50 = vmul.f32 %v4133_v30, %v663_v26  ;;  %v4400_v48 = vunpack.c.h.bf16 %v3489_v40  ;;  %v884_v42 = vmul.f32 %v4142_v43, %v4391_v61 }
  0xec   : > { %v2580_v63 = vadd.f32 %v2476_v21, %v2388_v15  ;;  %v2581_v31 = vadd.f32 %v2478_v37, %v2389_v38  ;;  %v926_v49 = vunpack.c.l.bf16 %v3226_v25  ;;  %v956_v16 = vmul.f32 %v4149_v45, %v4391_v61  ;;  %v388_v25 = vld [vmem:[%s3696_s10 + $0x80] sm:$0x1] }
  0xed   : > { %v885_v54 = vmul.f32 %v4142_v43, %v4400_v48  ;;  %v957_v23 = vmul.f32 %v4149_v45, %v4400_v48  ;;  %v1008_v56 = vunpack.c.l.bf16 %v3242_v36  ;;  %v1039_v12 = vmul.f32 %v4159_v10, %v4400_v48 }
  0xee   : > { %v2616_v30 = vadd.f32 %v4225_v46, %v2580_v63  ;;  %v2617_v18 = vadd.f32 %v4225_v46, %v2581_v31  ;;  %v958_v52 = vmul.f32 %v4149_v45, %v926_v49  ;;  %v1040_v5 = vmul.f32 %v4159_v10, %v926_v49 }
  0xef   : > { %v1147_v20 = vrot.slane %v430_v47, 1  ;;  %v1148_v43 = vrot.slane %v431_v9, 1  ;;  %v1150_v59 = vrot.slane %v432_v27, 1  ;;  %v1312_v21 = vrot.slane %v621_v58, 6 }
  0xf0   : > { %v2648_v32 = vmax.f32 %v2616_v30, 0.0  ;;  %v2649_v22 = vmax.f32 %v2617_v18, 0.0  ;;  %v1313_v37 = vrot.slane %v622_v35, 6  ;;  %v1516_v0 = vrot.slane %v775_v62, 1  ;;  %v3144_v18 = vld [vmem:[%s3696_s10 + $0x84] sm:$0xff]  }
  0xf1   : > { %v1149_v19 = vsel %vm1116_vm1, %v1147_v20, %v1148_v43  ;;  %v1151_v2 = vsel %vm1116_vm1, %v1148_v43, %v1150_v59  ;;  %v1517_v3 = vrot.slane %v776_v33, 1  ;;  %v1038_v45 = vmul.f32 %v4159_v10, %v1008_v56  ;;  %v4449_v20 = vld [vmem:[%s4955_s1 + $0x1] ss:$0 sm:$0xff]  ;;  %v3166_v59 = vld [vmem:[%s3696_s10 + $0x8c] sm:$0x1] }
  0xf2   : > { %v2742_v29 = vpack.c.bf16 %v2649_v22, %v2648_v32  ;;  %v1241_v34 = vadd.f32 %v1149_v19, %v4370_v1  ;;  %v1314_v17 = vsel %vm1293_vm0, %v1312_v21, %v1313_v37  ;;  %v1408_v47 = vadd.f32 %v1312_v21, %v512_v28  ;;  %v3182_v19 = vld [vmem:[%s3696_s10 + $0x84] sm:$0xe] }
  0xf3   : > { %v1409_v9 = vadd.f32 %v1314_v17, %v513_v41  ;;  %v1410_v6 = vadd.f32 %v1313_v37, %v514_v60  ;;  %v1518_v14 = vsel %vm1116_vm1, %v1516_v0, %v1517_v3  ;;  %v1242_v27 = vadd.f32 %v1151_v2, %v4375_v11  ;;  %v3475_v60 = vld [vmem:[%s3696_s10 + $0x78] sm:$0xff]  }
  0xf4   : > { %2842 = vmatmul.bf16.gmra.mxu0 %v2742_v29  ;;  %v1519_v44 = vrot.slane %v777_v50, 1  ;;  %v1740_v40 = vrot.slane %v956_v16, 1  ;;  %v1741_v57 = vrot.slane %v957_v23, 1  ;;  %v1743_v39 = vrot.slane %v958_v52, 1  ;;  %v470_v16 = vld [vmem:[%s3696_s10 + $0x78] sm:$0xe] }
  0xf5   : > { %v1933_v26 = vrot.slane %v1408_v47, 2  ;;  %v1934_v10 = vrot.slane %v1409_v9, 2  ;;  %v1936_v58 = vrot.slane %v1410_v6, 2  ;;  %v1632_v13 = vadd.f32 %v1518_v14, %v693_v7 }
  0xf6   : > { %v1520_v1 = vsel %vm1116_vm1, %v1517_v3, %v1519_v44  ;;  %v1634_v28 = vadd.f32 %v1519_v44, %v695_v55  ;;  %v1742_v41 = vsel %vm1116_vm1, %v1740_v40, %v1741_v57  ;;  %v1744_v51 = vsel %vm1116_vm1, %v1741_v57, %v1743_v39  ;;  %v4461_v3 = vld [vmem:[%s4955_s1 + $0x2] ss:$0 sm:$0xff]  ;;  %v4476_v40 = vld [vmem:[%s4955_s1 + $0x4] ss:$0 sm:$0xff] }
  0xf7   : > { %v1834_v53 = vadd.f32 %v1742_v41, %v884_v42  ;;  %v1935_v11 = vsel %vm1902_vm2, %v1933_v26, %v1934_v10  ;;  %v2494_v35 = vrot.slane %v1038_v45, 2  ;;  %v1633_v15 = vadd.f32 %v1520_v1, %v694_v8 }
  0xf8   : > { %v1835_v38 = vadd.f32 %v1744_v51, %v885_v54  ;;  %v1937_v36 = vsel %vm1902_vm2, %v1934_v10, %v1936_v58  ;;  %v2495_v62 = vrot.slane %v1039_v12, 2  ;;  %v2027_v33 = vadd.f32 %v1935_v11, %v1241_v34  ;;  %v4436_v54 = vld [vmem:[%s4955_s1] ss:$0 sm:$0xff]  ;;  %v3491_v34 = vld [vmem:[%s3696_s10 + $0x90] sm:$0xff]   ;;  %v4493_v11 = vld [vmem:[%s4955_s1 + $0x5] ss:$0 sm:$0xff] }
  0xf9   : > { %v2098_v7 = vrot.slane %v1834_v53, 7  ;;  %v2497_v55 = vrot.slane %v1040_v5, 2  ;;  %v3317_v50 = vunpack.c.l.bf16 %v3475_v60  ;;  %v2028_v63 = vadd.f32 %v1937_v36, %v1242_v27  ;;  %v4470_v27 = vld [vmem:[%s4955_s1 + $0x3] ss:$0 sm:$0xff]  ;;  %v3246_v53 = vld [vmem:[%s3696_s10 + $0x90] sm:$0xe] }
  0xfa   : > { %v2099_v31 = vrot.slane %v1835_v38, 7  ;;  %v3318_v49 = vunpack.c.h.bf16 %v3475_v60  ;;  %v404_v42 = vunpack.c.l.bf16 %v388_v25  ;;  %v2496_v56 = vsel %vm1902_vm2, %v2494_v35, %v2495_v62 }
  0xfb   : > { %v2194_v23 = vadd.f32 %v2098_v7, %v1632_v13  ;;  %v2498_v8 = vsel %vm1902_vm2, %v2495_v62, %v2497_v55  ;;  %v4439_v30 = vmul.f32 %v4436_v54, %v3317_v50  ;;  %v4452_v43 = vmul.f32 %v4449_v20, %v3317_v50  ;;  %v3230_v13 = vld [vmem:[%s3696_s10 + $0x98] sm:$0x1] }
  0xfc   : > { %v2100_v52 = vsel %vm2079_vm3, %v2098_v7, %v2099_v31  ;;  %v2196_v12 = vadd.f32 %v2099_v31, %v1634_v28  ;;  %v4444_v5 = vmul.f32 %v4436_v54, %v3318_v49  ;;  %v443_v21 = vmul.f32 %v4449_v20, %v3318_v49 }
  0xfd   : > { %v2195_v32 = vadd.f32 %v2100_v52, %v1633_v15  ;;  %v2302_v22 = vrot.slane %v2194_v23, 1  ;;  %v486_v37 = vunpack.c.l.bf16 %v470_v16  ;;  %v444_v0 = vmul.f32 %v4449_v20, %v404_v42 }
  0xfe   : > { %v2305_v2 = vrot.slane %v2196_v12, 1  ;;  %v525_v29 = vmul.f32 %v4461_v3, %v3318_v49  ;;  %v595_v45 = vunpack.c.l.bf16 %v3144_v18  ;;  %v526_v47 = vmul.f32 %v4461_v3, %v404_v42 }
  0xff   : > { %v2303_v17 = vrot.slane %v2195_v32, 1  ;;  %v596_v9 = vunpack.c.h.bf16 %v3144_v18  ;;  %v667_v6 = vunpack.c.l.bf16 %v3166_v59  ;;  %v524_v14 = vmul.f32 %v4461_v3, %v486_v37 }
 0x100   : > { %v629_v44 = vmul.f32 %v4470_v27, %v595_v45  ;;  %v4479_v57 = vmul.f32 %v4476_v40, %v595_v45  ;;  %v749_v39 = vunpack.c.l.bf16 %v3182_v19  ;;  %v4484_v1 = vunpack.c.l.bf16 %v3491_v34 }
 0x101   : > { %v2304_v26 = vsel %vm1116_vm1, %v2302_v22, %v2303_v17  ;;  %v2306_v10 = vsel %vm1116_vm1, %v2303_v17, %v2305_v2  ;;  %v630_v58 = vmul.f32 %v4470_v27, %v596_v9  ;;  %v706_v60 = vmul.f32 %v4476_v40, %v596_v9 }
 0x102   : > { %v2396_v28 = vadd.f32 %v2304_v26, %v2027_v33  ;;  %v2397_v41 = vadd.f32 %v2306_v10, %v2028_v63  ;;  %v707_v51 = vmul.f32 %v4476_v40, %v667_v6  ;;  %v787_v35 = vmul.f32 %v4493_v11, %v749_v39  ;;  %v4503_v33 = vld [vmem:[%s4955_s1 + $0x6] ss:$0 sm:$0xff]  ;;  %v4512_v63 = vld [vmem:[%s4955_s1 + $0x7] ss:$0 sm:$0xff] }
 0x103   : > { %v788_v25 = vmul.f32 %v4493_v11, %v596_v9  ;;  %v789_v15 = vmul.f32 %v4493_v11, %v667_v6  ;;  %v4498_v38 = vunpack.c.h.bf16 %v3491_v34  ;;  %v892_v7 = vmul.f32 %v4503_v33, %v4484_v1 }
 0x104   : > { %v2588_v36 = vadd.f32 %v2496_v56, %v2396_v28  ;;  %v2589_v62 = vadd.f32 %v2498_v8, %v2397_v41  ;;  %v930_v55 = vunpack.c.l.bf16 %v3230_v13  ;;  %v968_v31 = vmul.f32 %v4512_v63, %v4484_v1  ;;  %v4524_v8 = vld [vmem:[%s4955_s1 + $0x8] ss:$0 sm:$0xff] }
 0x105   : > { %v893_v50 = vmul.f32 %v4503_v33, %v4498_v38  ;;  %v969_v49 = vmul.f32 %v4512_v63, %v4498_v38  ;;  %v1012_v42 = vunpack.c.l.bf16 %v3246_v53  ;;  %v1051_v18 = vmul.f32 %v4524_v8, %v4498_v38 }
 0x106   : > { %v2624_v16 = vadd.f32 %v4225_v46, %v2588_v36  ;;  %v2625_v23 = vadd.f32 %v4225_v46, %v2589_v62  ;;  %v970_v56 = vmul.f32 %v4512_v63, %v930_v55  ;;  %v1052_v52 = vmul.f32 %v4524_v8, %v930_v55  ;;  %v3477_v36 = vld [vmem:[%s3696_s10 + $0xa8] sm:$0xff]  }
 0x107   : > { %v1167_v12 = vrot.slane %v4452_v43, 1  ;;  %v1168_v59 = vrot.slane %v443_v21, 1  ;;  %v1170_v32 = vrot.slane %v444_v0, 1  ;;  %v1324_v19 = vrot.slane %v629_v44, 6 }
 0x108   : > { %v2656_v22 = vmax.f32 %v2624_v16, 0.0  ;;  %v2657_v37 = vmax.f32 %v2625_v23, 0.0  ;;  %v1325_v46 = vrot.slane %v630_v58, 6  ;;  %v1536_v34 = vrot.slane %v787_v35, 1 }
 0x109   : > { %v1169_v2 = vsel %vm1116_vm1, %v1167_v12, %v1168_v59  ;;  %v1171_v45 = vsel %vm1116_vm1, %v1168_v59, %v1170_v32  ;;  %v1537_v17 = vrot.slane %v788_v25, 1  ;;  %v1050_v6 = vmul.f32 %v4524_v8, %v1012_v42 }
 0x10a   : > { %v2746_v9 = vpack.c.bf16 %v2657_v37, %v2656_v22  ;;  %v1249_v39 = vadd.f32 %v1169_v2, %v4439_v30  ;;  %v1326_v26 = vsel %vm1293_vm0, %v1324_v19, %v1325_v46  ;;  %v1420_v43 = vadd.f32 %v1324_v19, %v524_v14  ;;  %v474_v37 = vld [vmem:[%s3696_s10 + $0xa8] sm:$0xe] }
 0x10b   : > { %v1421_v21 = vadd.f32 %v1326_v26, %v525_v29  ;;  %v1422_v0 = vadd.f32 %v1325_v46, %v526_v47  ;;  %v1538_v44 = vsel %vm1116_vm1, %v1536_v34, %v1537_v17  ;;  %v1250_v10 = vadd.f32 %v1171_v45, %v4444_v5 }
 0x10c   : > { %2862 = vmatmul.bf16.gmra.mxu1 %v2746_v9  ;;  %v1539_v58 = vrot.slane %v789_v15, 1  ;;  %v1760_v13 = vrot.slane %v968_v31, 1  ;;  %v1761_v28 = vrot.slane %v969_v49, 1  ;;  %v1763_v41 = vrot.slane %v970_v56, 1  ;;  %v392_v31 = vld [vmem:[%s3696_s10 + $0xb0] sm:$0x1] }
 0x10d   : > { %v1953_v53 = vrot.slane %v1420_v43, 2  ;;  %v1954_v35 = vrot.slane %v1421_v21, 2  ;;  %v1956_v25 = vrot.slane %v1422_v0, 2  ;;  %v1644_v14 = vadd.f32 %v1538_v44, %v4479_v57  ;;  %v3186_v43 = vld [vmem:[%s3696_s10 + $0xb4] sm:$0xe] }
 0x10e   : > { %v1540_v30 = vsel %vm1116_vm1, %v1537_v17, %v1539_v58  ;;  %v1646_v29 = vadd.f32 %v1539_v58, %v707_v51  ;;  %v1762_v47 = vsel %vm1116_vm1, %v1760_v13, %v1761_v28  ;;  %v1764_v62 = vsel %vm1116_vm1, %v1761_v28, %v1763_v41  ;;  %v3170_v17 = vld [vmem:[%s3696_s10 + $0xbc] sm:$0x1]  ;;  %v3493_v58 = vld [vmem:[%s3696_s10 + $0xc0] sm:$0xff]  }
 0x10f   : > { %v1842_v55 = vadd.f32 %v1762_v47, %v892_v7  ;;  %v1955_v5 = vsel %vm1902_vm2, %v1953_v53, %v1954_v35  ;;  %v2514_v15 = vrot.slane %v1050_v6, 2  ;;  %v1645_v49 = vadd.f32 %v1540_v30, %v706_v60 }
 0x110   : > { %v1843_v42 = vadd.f32 %v1764_v62, %v893_v50  ;;  %v1957_v16 = vsel %vm1902_vm2, %v1954_v35, %v1956_v25  ;;  %v2515_v23 = vrot.slane %v1051_v18, 2  ;;  %v2035_v56 = vadd.f32 %v1955_v5, %v1249_v39  ;;  %v3152_v18 = vld [vmem:[%s3696_s10 + $0xb4] sm:$0xff]  }
 0x111   : > { %v2110_v57 = vrot.slane %v1842_v55, 7  ;;  %v2517_v51 = vrot.slane %v1052_v52, 2  ;;  %v3325_v12 = vunpack.c.l.bf16 %v3477_v36  ;;  %v2036_v59 = vadd.f32 %v1957_v16, %v1250_v10  ;;  %v3234_v55 = vld [vmem:[%s3696_s10 + $0xc8] sm:$0x1] }
 0x112   : > { %v2111_v32 = vrot.slane %v1843_v42, 7  ;;  %v3326_v22 = vunpack.c.h.bf16 %v3477_v36  ;;  %v408_v7 = vunpack.c.l.bf16 %v392_v31  ;;  %v2516_v46 = vsel %vm1902_vm2, %v2514_v15, %v2515_v23  ;;  %v3250_v42 = vld [vmem:[%s3696_s10 + $0xc0] sm:$0xe] }
 0x113   : > { %v2206_v19 = vadd.f32 %v2110_v57, %v1644_v14  ;;  %v2518_v60 = vsel %vm1902_vm2, %v2515_v23, %v2517_v51  ;;  %v4549_v50 = vmul.f32 %v4436_v54, %v3325_v12  ;;  %v454_v34 = vmul.f32 %v4449_v20, %v3325_v12 }
 0x114   : > { %v2112_v52 = vsel %vm2079_vm3, %v2110_v57, %v2111_v32  ;;  %v2208_v2 = vadd.f32 %v2111_v32, %v1646_v29  ;;  %v4554_v45 = vmul.f32 %v4436_v54, %v3326_v22  ;;  %v455_v39 = vmul.f32 %v4449_v20, %v3326_v22 }
 0x115   : > { %v2207_v9 = vadd.f32 %v2112_v52, %v1645_v49  ;;  %v2322_v6 = vrot.slane %v2206_v19, 1  ;;  %v490_v26 = vunpack.c.l.bf16 %v474_v37  ;;  %v456_v0 = vmul.f32 %v4449_v20, %v408_v7 }
 0x116   : > { %v2325_v21 = vrot.slane %v2208_v2, 1  ;;  %v537_v44 = vmul.f32 %v4461_v3, %v3326_v22  ;;  %v603_v10 = vunpack.c.l.bf16 %v3152_v18  ;;  %v538_v28 = vmul.f32 %v4461_v3, %v408_v7 }
 0x117   : > { %v2323_v13 = vrot.slane %v2207_v9, 1  ;;  %v604_v41 = vunpack.c.h.bf16 %v3152_v18  ;;  %v671_v53 = vunpack.c.l.bf16 %v3170_v17  ;;  %v536_v35 = vmul.f32 %v4461_v3, %v490_v26  ;;  %v4592_v18 = vld [vmem:[%s4956_s2] ss:$0 sm:$0xff] }
 0x118   : > { %v637_v25 = vmul.f32 %v4470_v27, %v603_v10  ;;  %v717_v30 = vmul.f32 %v4476_v40, %v603_v10  ;;  %v753_v14 = vunpack.c.l.bf16 %v3186_v43  ;;  %v4570_v62 = vunpack.c.l.bf16 %v3493_v58 }
 0x119   : > { %v2324_v29 = vsel %vm1116_vm1, %v2322_v6, %v2323_v13  ;;  %v2326_v47 = vsel %vm1116_vm1, %v2323_v13, %v2325_v21  ;;  %v638_v36 = vmul.f32 %v4470_v27, %v604_v41  ;;  %v718_v31 = vmul.f32 %v4476_v40, %v604_v41 }
 0x11a   : > { %v2404_v5 = vadd.f32 %v2324_v29, %v2035_v56  ;;  %v2405_v15 = vadd.f32 %v2326_v47, %v2036_v59  ;;  %v719_v49 = vmul.f32 %v4476_v40, %v671_v53  ;;  %v799_v16 = vmul.f32 %v4493_v11, %v753_v14 }
 0x11b   : > { %v800_v23 = vmul.f32 %v4493_v11, %v604_v41  ;;  %v801_v57 = vmul.f32 %v4493_v11, %v671_v53  ;;  %v4579_v51 = vunpack.c.h.bf16 %v3493_v58  ;;  %v900_v22 = vmul.f32 %v4503_v33, %v4570_v62 }
 0x11c   : > { %v2596_v12 = vadd.f32 %v2516_v46, %v2404_v5  ;;  %v2597_v32 = vadd.f32 %v2518_v60, %v2405_v15  ;;  %v934_v56 = vunpack.c.l.bf16 %v3234_v55  ;;  %v980_v7 = vmul.f32 %v4512_v63, %v4570_v62 }
 0x11d   : > { %v901_v59 = vmul.f32 %v4503_v33, %v4579_v51  ;;  %v981_v37 = vmul.f32 %v4512_v63, %v4579_v51  ;;  %v1016_v19 = vunpack.c.l.bf16 %v3250_v42  ;;  %v1063_v2 = vmul.f32 %v4524_v8, %v4579_v51 }
 0x11e   : > { %v2632_v46 = vadd.f32 %v4592_v18, %v2596_v12  ;;  %v2633_v60 = vadd.f32 %v4592_v18, %v2597_v32  ;;  %v982_v52 = vmul.f32 %v4512_v63, %v934_v56  ;;  %v1064_v17 = vmul.f32 %v4524_v8, %v934_v56 }
 0x11f   : > { %v1187_v9 = vrot.slane %v454_v34, 1  ;;  %v1188_v6 = vrot.slane %v455_v39, 1  ;;  %v1190_v26 = vrot.slane %v456_v0, 1  ;;  %v1336_v10 = vrot.slane %v637_v25, 6 }
 0x120   : > { %v2664_v43 = vmax.f32 %v2632_v46, 0.0  ;;  %v2665_v21 = vmax.f32 %v2633_v60, 0.0  ;;  %v1337_v58 = vrot.slane %v638_v36, 6  ;;  %v1556_v53 = vrot.slane %v799_v16, 1 }
 0x121   : > { %v1189_v13 = vsel %vm1116_vm1, %v1187_v9, %v1188_v6  ;;  %v1191_v41 = vsel %vm1116_vm1, %v1188_v6, %v1190_v26  ;;  %v1557_v14 = vrot.slane %v800_v23, 1  ;;  %v1062_v47 = vmul.f32 %v4524_v8, %v1016_v19 }
 0x122   : > { %v2750_v29 = vpack.c.bf16 %v2665_v21, %v2664_v43  ;;  %v1257_v55 = vadd.f32 %v1189_v13, %v4549_v50  ;;  %v1338_v5 = vsel %vm1293_vm0, %v1336_v10, %v1337_v58  ;;  %v1432_v34 = vadd.f32 %v1336_v10, %v536_v35  ;;  %v463_v13 = vld [vmem:[%s3696_s10 + $0x24] sm:$0xe] }
 0x123   : > { %v1433_v39 = vadd.f32 %v1338_v5, %v537_v44  ;;  %v1434_v0 = vadd.f32 %v1337_v58, %v538_v28  ;;  %v1558_v25 = vsel %vm1116_vm1, %v1556_v53, %v1557_v14  ;;  %v1258_v36 = vadd.f32 %v1191_v41, %v4554_v45  ;;  %v286_v28 = vld [vmem:[%s3696_s10 + $0x24] sm:$0xff]  }
 0x124   : > { %2882 = vmatmul.bf16.gmra.mxu2 %v2750_v29  ;;  %v1559_v15 = vrot.slane %v801_v57, 1  ;;  %v1780_v42 = vrot.slane %v980_v7, 1  ;;  %v1781_v16 = vrot.slane %v981_v37, 1  ;;  %v1783_v23 = vrot.slane %v982_v52, 1  ;;  %v381_v7 = vld [vmem:[%s3696_s10 + $0x2c] sm:$0x1] }
 0x125   : > { %v1973_v12 = vrot.slane %v1432_v34, 2  ;;  %v1974_v32 = vrot.slane %v1433_v39, 2  ;;  %v1976_v56 = vrot.slane %v1434_v0, 2  ;;  %v1656_v19 = vadd.f32 %v1558_v25, %v717_v30  ;;  %v3175_v0 = vld [vmem:[%s3696_s10 + $0x30] sm:$0xe] }
 0x126   : > { %v1560_v50 = vsel %vm1116_vm1, %v1557_v14, %v1559_v15  ;;  %v1658_v35 = vadd.f32 %v1559_v15, %v719_v49  ;;  %v1782_v44 = vsel %vm1116_vm1, %v1780_v42, %v1781_v16  ;;  %v1784_v46 = vsel %vm1116_vm1, %v1781_v16, %v1783_v23 }
 0x127   : > { %v1850_v60 = vadd.f32 %v1782_v44, %v900_v22  ;;  %v1975_v45 = vsel %vm1902_vm2, %v1973_v12, %v1974_v32  ;;  %v2534_v57 = vrot.slane %v1062_v47, 2  ;;  %v1657_v37 = vadd.f32 %v1560_v50, %v718_v31  ;;  %v3159_v47 = vld [vmem:[%s3696_s10 + $0x38] sm:$0x1] }
 0x128   : > { %v1851_v52 = vadd.f32 %v1784_v46, %v901_v59  ;;  %v1977_v9 = vsel %vm1902_vm2, %v1974_v32, %v1976_v56  ;;  %v2535_v6 = vrot.slane %v1063_v2, 2  ;;  %v2043_v26 = vadd.f32 %v1975_v45, %v1257_v55  ;;  %v3194_v56 = vld [vmem:[%s3696_s10 + $0x3c] sm:$0xff]  }
 0x129   : > { %v2122_v43 = vrot.slane %v1850_v60, 7  ;;  %v2537_v30 = vrot.slane %v1064_v17, 2  ;;  %v318_v49 = vunpack.c.l.bf16 %v286_v28  ;;  %v2044_v21 = vadd.f32 %v1977_v9, %v1258_v36  ;;  %v3239_v46 = vld [vmem:[%s3696_s10 + $0x3c] sm:$0xe] }
 0x12a   : > { %v2123_v10 = vrot.slane %v1851_v52, 7  ;;  %v319_v58 = vunpack.c.h.bf16 %v286_v28  ;;  %v397_v22 = vunpack.c.l.bf16 %v381_v7  ;;  %v2536_v53 = vsel %vm1902_vm2, %v2534_v57, %v2535_v6  ;;  %v3223_v28 = vld [vmem:[%s3696_s10 + $0x44] sm:$0x1] }
 0x12b   : > { %v2218_v41 = vadd.f32 %v2122_v43, %v1656_v19  ;;  %v2538_v31 = vsel %vm1902_vm2, %v2535_v6, %v2537_v30  ;;  %v4618_v59 = vmul.f32 %v4436_v54, %v318_v49  ;;  %v421_v29 = vmul.f32 %v4449_v20, %v318_v49 }
 0x12c   : > { %v2124_v2 = vsel %vm2079_vm3, %v2122_v43, %v2123_v10  ;;  %v2220_v14 = vadd.f32 %v2123_v10, %v1658_v35  ;;  %v4622_v17 = vmul.f32 %v4436_v54, %v319_v58  ;;  %v422_v34 = vmul.f32 %v4449_v20, %v319_v58 }
 0x12d   : > { %v2219_v55 = vadd.f32 %v2124_v2, %v1657_v37  ;;  %v2342_v5 = vrot.slane %v2218_v41, 1  ;;  %v479_v39 = vunpack.c.l.bf16 %v463_v13  ;;  %v423_v36 = vmul.f32 %v4449_v20, %v397_v22 }
 0x12e   : > { %v2345_v25 = vrot.slane %v2220_v14, 1  ;;  %v504_v15 = vmul.f32 %v4461_v3, %v319_v58  ;;  %v505_v42 = vmul.f32 %v4461_v3, %v397_v22  ;;  %v615_v12 = vmul.f32 %v4470_v27, %v4327_v4 }
 0x12f   : > { %v2343_v16 = vrot.slane %v2219_v55, 1  ;;  %v503_v23 = vmul.f32 %v4461_v3, %v479_v39  ;;  %v660_v32 = vunpack.c.l.bf16 %v3159_v47  ;;  %v616_v50 = vmul.f32 %v4470_v27, %v4336_v24 }
 0x130   : > { %v684_v19 = vmul.f32 %v4476_v40, %v4327_v4  ;;  %v4641_v35 = vmul.f32 %v4476_v40, %v4336_v24  ;;  %v742_v44 = vunpack.c.l.bf16 %v3175_v0  ;;  %v767_v7 = vmul.f32 %v4493_v11, %v4336_v24 }
 0x131   : > { %v2344_v60 = vsel %vm1116_vm1, %v2342_v5, %v2343_v16  ;;  %v2346_v45 = vsel %vm1116_vm1, %v2343_v16, %v2345_v25  ;;  %v686_v57 = vmul.f32 %v4476_v40, %v660_v32  ;;  %v768_v4 = vmul.f32 %v4493_v11, %v660_v32 }
 0x132   : > { %v2412_v37 = vadd.f32 %v2344_v60, %v2043_v26  ;;  %v2413_v52 = vadd.f32 %v2346_v45, %v2044_v21  ;;  %v844_v9 = vunpack.c.l.bf16 %v3194_v56  ;;  %v766_v6 = vmul.f32 %v4493_v11, %v742_v44 }
 0x133   : > { %v845_v43 = vunpack.c.h.bf16 %v3194_v56  ;;  %v923_v30 = vunpack.c.l.bf16 %v3223_v28  ;;  %v1005_v49 = vunpack.c.l.bf16 %v3239_v46  ;;  %v1132_v13 = vrot.slane %v421_v29, 1 }
 0x134   : > { %v2604_v10 = vadd.f32 %v2536_v53, %v2412_v37  ;;  %v2605_v58 = vadd.f32 %v2538_v31, %v2413_v52  ;;  %v878_v22 = vmul.f32 %v4503_v33, %v844_v9  ;;  %v947_v2 = vmul.f32 %v4512_v63, %v844_v9 }
 0x135   : > { %v879_v41 = vmul.f32 %v4503_v33, %v845_v43  ;;  %v948_v24 = vmul.f32 %v4512_v63, %v845_v43  ;;  %v949_v26 = vmul.f32 %v4512_v63, %v923_v30  ;;  %v1029_v47 = vmul.f32 %v4524_v8, %v1005_v49 }
 0x136   : > { %v2640_v21 = vadd.f32 %v4592_v18, %v2604_v10  ;;  %v2641_v14 = vadd.f32 %v4592_v18, %v2605_v58  ;;  %v1030_v53 = vmul.f32 %v4524_v8, %v845_v43  ;;  %v1133_v31 = vrot.slane %v422_v34, 1  ;;  %v294_v10 = vld [vmem:[%s3696_s10 + $0x54] sm:$0xff]  }
 0x137   : > { %v1135_v55 = vrot.slane %v423_v36, 1  ;;  %v1303_v5 = vrot.slane %v615_v12, 6  ;;  %v1304_v29 = vrot.slane %v616_v50, 6  ;;  %v1501_v25 = vrot.slane %v766_v6, 1 }
 0x138   : > { %v2672_v39 = vmax.f32 %v2640_v21, 0.0  ;;  %v2673_v0 = vmax.f32 %v2641_v14, 0.0  ;;  %v1502_v16 = vrot.slane %v767_v7, 1  ;;  %v1134_v32 = vsel %vm1116_vm1, %v1132_v13, %v1133_v31 }
 0x139   : > { %v1136_v56 = vsel %vm1116_vm1, %v1133_v31, %v1135_v55  ;;  %v1305_v44 = vsel %vm1293_vm0, %v1303_v5, %v1304_v29  ;;  %v1399_v28 = vadd.f32 %v1303_v5, %v503_v23  ;;  %v1031_v60 = vmul.f32 %v4524_v8, %v923_v30 }
 0x13a   : > { %v2754_v46 = vpack.c.bf16 %v2673_v0, %v2672_v39  ;;  %v1235_v45 = vadd.f32 %v1134_v32, %v4618_v59  ;;  %v1400_v34 = vadd.f32 %v1305_v44, %v504_v15  ;;  %v1401_v36 = vadd.f32 %v1304_v29, %v505_v42 }
 0x13b   : > { %v1503_v12 = vsel %vm1116_vm1, %v1501_v25, %v1502_v16  ;;  %v1504_v50 = vrot.slane %v768_v4, 1  ;;  %v1725_v37 = vrot.slane %v947_v2, 1  ;;  %v1236_v7 = vadd.f32 %v1136_v56, %v4622_v17 }
 0x13c   : > { %2902 = vmatmul.bf16.gmra.mxu3 %v2754_v46  ;;  %v1726_v52 = vrot.slane %v948_v24, 1  ;;  %v1728_v9 = vrot.slane %v949_v26, 1  ;;  %v1918_v23 = vrot.slane %v1399_v28, 2  ;;  %v1623_v43 = vadd.f32 %v1503_v12, %v684_v19  ;;  %v385_v24 = vld [vmem:[%s3696_s10 + $0x5c] sm:$0x1] }
 0x13d   : > { %v1505_v6 = vsel %vm1116_vm1, %v1502_v16, %v1504_v50  ;;  %v1919_v30 = vrot.slane %v1400_v34, 2  ;;  %v1921_v59 = vrot.slane %v1401_v36, 2  ;;  %v1625_v15 = vadd.f32 %v1504_v50, %v686_v57  ;;  %v467_v26 = vld [vmem:[%s3696_s10 + $0x54] sm:$0xe]  ;;  %v3163_v28 = vld [vmem:[%s3696_s10 + $0x68] sm:$0x1] }
 0x13e   : > { %v1727_v42 = vsel %vm1116_vm1, %v1725_v37, %v1726_v52  ;;  %v1729_v49 = vsel %vm1116_vm1, %v1726_v52, %v1728_v9  ;;  %v2479_v4 = vrot.slane %v1029_v47, 2  ;;  %v1624_v21 = vadd.f32 %v1505_v6, %v4641_v35  ;;  %v3179_v36 = vld [vmem:[%s3696_s10 + $0x60] sm:$0xe] }
 0x13f   : > { %v1828_v58 = vadd.f32 %v1727_v42, %v878_v22  ;;  %v1829_v13 = vadd.f32 %v1729_v49, %v879_v41  ;;  %v1920_v17 = vsel %vm1902_vm2, %v1918_v23, %v1919_v30  ;;  %v1922_v2 = vsel %vm1902_vm2, %v1919_v30, %v1921_v59  ;;  %v3227_v30 = vld [vmem:[%s3696_s10 + $0x74] sm:$0x1] }
 0x140   : > { %v2021_v19 = vadd.f32 %v1920_v17, %v1235_v45  ;;  %v2480_v14 = vrot.slane %v1030_v53, 2  ;;  %v2482_v31 = vrot.slane %v1031_v60, 2  ;;  %v326_v5 = vunpack.c.l.bf16 %v294_v10 }
 0x141   : > { %v2089_v57 = vrot.slane %v1828_v58, 7  ;;  %v2090_v55 = vrot.slane %v1829_v13, 7  ;;  %v327_v29 = vunpack.c.h.bf16 %v294_v10  ;;  %v2022_v47 = vadd.f32 %v1922_v2, %v1236_v7 }
 0x142   : > { %v2481_v22 = vsel %vm1902_vm2, %v2479_v4, %v2480_v14  ;;  %v401_v41 = vunpack.c.l.bf16 %v385_v24  ;;  %v483_v39 = vunpack.c.l.bf16 %v467_v26  ;;  %v2483_v35 = vsel %vm1902_vm2, %v2480_v14, %v2482_v31  ;;  %v3243_v4 = vld [vmem:[%s3696_s10 + $0x6c] sm:$0xe] }
 0x143   : > { %v2091_v0 = vsel %vm2079_vm3, %v2089_v57, %v2090_v55  ;;  %v2185_v25 = vadd.f32 %v2089_v57, %v1623_v43  ;;  %v2187_v16 = vadd.f32 %v2090_v55, %v1625_v15  ;;  %v360_v53 = vmul.f32 %v4436_v54, %v326_v5  ;;  %v3202_v43 = vld [vmem:[%s3696_s10 + $0x6c] sm:$0xff]  }
 0x144   : > { %v2186_v32 = vadd.f32 %v2091_v0, %v1624_v21  ;;  %v4682_v56 = vmul.f32 %v4436_v54, %v327_v29  ;;  %v433_v44 = vmul.f32 %v4449_v20, %v326_v5  ;;  %v434_v45 = vmul.f32 %v4449_v20, %v327_v29 }
 0x145   : > { %v2287_v46 = vrot.slane %v2185_v25, 1  ;;  %v2290_v60 = vrot.slane %v2187_v16, 1  ;;  %v435_v34 = vmul.f32 %v4449_v20, %v401_v41  ;;  %v515_v50 = vmul.f32 %v4461_v3, %v483_v39 }
 0x146   : > { %v2288_v12 = vrot.slane %v2186_v32, 1  ;;  %v516_v37 = vmul.f32 %v4461_v3, %v327_v29  ;;  %v517_v7 = vmul.f32 %v4461_v3, %v401_v41  ;;  %v623_v52 = vmul.f32 %v4470_v27, %v4391_v61 }
 0x147   : > { %v624_v9 = vmul.f32 %v4470_v27, %v4400_v48  ;;  %v664_v23 = vunpack.c.l.bf16 %v3163_v28  ;;  %v696_v6 = vmul.f32 %v4476_v40, %v4391_v61  ;;  %v697_v42 = vmul.f32 %v4476_v40, %v4400_v48 }
 0x148   : > { %v2289_v59 = vsel %vm1116_vm1, %v2287_v46, %v2288_v12  ;;  %v2291_v15 = vsel %vm1116_vm1, %v2288_v12, %v2290_v60  ;;  %v746_v49 = vunpack.c.l.bf16 %v3179_v36  ;;  %v779_v17 = vmul.f32 %v4493_v11, %v4400_v48 }
 0x149   : > { %v2390_v10 = vadd.f32 %v2289_v59, %v2021_v19  ;;  %v2391_v58 = vadd.f32 %v2291_v15, %v2022_v47  ;;  %v698_v13 = vmul.f32 %v4476_v40, %v664_v23  ;;  %v780_v61 = vmul.f32 %v4493_v11, %v664_v23 }
 0x14a   : > { %v852_v2 = vunpack.c.l.bf16 %v3202_v43  ;;  %v853_v24 = vunpack.c.h.bf16 %v3202_v43  ;;  %v927_v26 = vunpack.c.l.bf16 %v3227_v30  ;;  %v778_v31 = vmul.f32 %v4493_v11, %v746_v49 }
 0x14b   : > { %v2582_v21 = vadd.f32 %v2481_v22, %v2390_v10  ;;  %v2583_v14 = vadd.f32 %v2483_v35, %v2391_v58  ;;  %v1009_v57 = vunpack.c.l.bf16 %v3243_v4  ;;  %v1152_v29 = vrot.slane %v433_v44, 1 }
 0x14c   : > { %v886_v55 = vmul.f32 %v4503_v33, %v852_v2  ;;  %v887_v19 = vmul.f32 %v4503_v33, %v853_v24  ;;  %v959_v5 = vmul.f32 %v4512_v63, %v852_v2  ;;  %v960_v41 = vmul.f32 %v4512_v63, %v853_v24 }
 0x14d   : > { %v2618_v47 = vadd.f32 %v4592_v18, %v2582_v21  ;;  %v2619_v48 = vadd.f32 %v4592_v18, %v2583_v14  ;;  %v961_v39 = vmul.f32 %v4512_v63, %v927_v26  ;;  %v1041_v22 = vmul.f32 %v4524_v8, %v1009_v57 }
 0x14e   : > { %v1042_v0 = vmul.f32 %v4524_v8, %v853_v24  ;;  %v1153_v25 = vrot.slane %v434_v45, 1  ;;  %v1155_v16 = vrot.slane %v435_v34, 1  ;;  %v1315_v28 = vrot.slane %v623_v52, 6 }
 0x14f   : > { %v2650_v35 = vmax.f32 %v2618_v47, 0.0  ;;  %v2651_v32 = vmax.f32 %v2619_v48, 0.0  ;;  %v1316_v46 = vrot.slane %v624_v9, 6  ;;  %v1521_v36 = vrot.slane %v778_v31, 1  ;;  %v389_v31 = vld [vmem:[%s3696_s10 + $0x8c] sm:$0x1] }
 0x150   : > { %v1154_v44 = vsel %vm1116_vm1, %v1152_v29, %v1153_v25  ;;  %v1156_v60 = vsel %vm1116_vm1, %v1153_v25, %v1155_v16  ;;  %v1522_v12 = vrot.slane %v779_v17, 1  ;;  %v1043_v43 = vmul.f32 %v4524_v8, %v927_v26 }
 0x151   : > { %v2743_v23 = vpack.c.bf16 %v2651_v32, %v2650_v35  ;;  %v1243_v30 = vadd.f32 %v1154_v44, %v360_v53  ;;  %v1317_v59 = vsel %vm1293_vm0, %v1315_v28, %v1316_v46  ;;  %v1411_v15 = vadd.f32 %v1315_v28, %v515_v50  ;;  %v471_v35 = vld [vmem:[%s3696_s10 + $0x84] sm:$0xe] }
 0x152   : > { %v1412_v49 = vadd.f32 %v1317_v59, %v516_v37  ;;  %v1413_v45 = vadd.f32 %v1316_v46, %v517_v7  ;;  %v1523_v34 = vsel %vm1116_vm1, %v1521_v36, %v1522_v12  ;;  %v1244_v52 = vadd.f32 %v1156_v60, %v4682_v56  ;;  %v302_v7 = vld [vmem:[%s3696_s10 + $0x84] sm:$0xff]   ;;  %v3167_v60 = vld [vmem:[%s3696_s10 + $0x98] sm:$0x1] }
 0x153   : > { %2847 = vmatmul.bf16.gmra.mxu0 %v2743_v23  ;;  %v1524_v9 = vrot.slane %v780_v61, 1  ;;  %v1745_v4 = vrot.slane %v959_v5, 1  ;;  %v1746_v10 = vrot.slane %v960_v41, 1  ;;  %v1748_v58 = vrot.slane %v961_v39, 1 }
 0x154   : > { %v1938_v17 = vrot.slane %v1411_v15, 2  ;;  %v1939_v2 = vrot.slane %v1412_v49, 2  ;;  %v1941_v24 = vrot.slane %v1413_v45, 2  ;;  %v1635_v26 = vadd.f32 %v1523_v34, %v696_v6 }
 0x155   : > { %v1525_v53 = vsel %vm1116_vm1, %v1522_v12, %v1524_v9  ;;  %v1637_v50 = vadd.f32 %v1524_v9, %v698_v13  ;;  %v1747_v37 = vsel %vm1116_vm1, %v1745_v4, %v1746_v10  ;;  %v1749_v21 = vsel %vm1116_vm1, %v1746_v10, %v1748_v58  ;;  %v3210_v4 = vld [vmem:[%s3696_s10 + $0x9c] sm:$0xff]  }
 0x156   : > { %v1836_v14 = vadd.f32 %v1747_v37, %v886_v55  ;;  %v1940_v56 = vsel %vm1902_vm2, %v1938_v17, %v1939_v2  ;;  %v2499_v61 = vrot.slane %v1041_v22, 2  ;;  %v1636_v57 = vadd.f32 %v1525_v53, %v697_v42 }
 0x157   : > { %v1837_v5 = vadd.f32 %v1749_v21, %v887_v19  ;;  %v1942_v29 = vsel %vm1902_vm2, %v1939_v2, %v1941_v24  ;;  %v2500_v47 = vrot.slane %v1042_v0, 2  ;;  %v2029_v48 = vadd.f32 %v1940_v56, %v1243_v30  ;;  %v3183_v30 = vld [vmem:[%s3696_s10 + $0x90] sm:$0xe]  ;;  %v3231_v2 = vld [vmem:[%s3696_s10 + $0xa4] sm:$0x1] }
 0x158   : > { %v2101_v41 = vrot.slane %v1836_v14, 7  ;;  %v2502_v6 = vrot.slane %v1043_v43, 2  ;;  %v334_v13 = vunpack.c.l.bf16 %v302_v7  ;;  %v2030_v39 = vadd.f32 %v1942_v29, %v1244_v52  ;;  %v3247_v24 = vld [vmem:[%s3696_s10 + $0x9c] sm:$0xe] }
 0x159   : > { %v2102_v25 = vrot.slane %v1837_v5, 7  ;;  %v335_v16 = vunpack.c.h.bf16 %v302_v7  ;;  %v405_v55 = vunpack.c.l.bf16 %v389_v31  ;;  %v2501_v22 = vsel %vm1902_vm2, %v2499_v61, %v2500_v47 }
 0x15a   : > { %v2197_v32 = vadd.f32 %v2101_v41, %v1635_v26  ;;  %v2503_v42 = vsel %vm1902_vm2, %v2500_v47, %v2502_v6  ;;  %v4736_v19 = vmul.f32 %v4436_v54, %v334_v13  ;;  %v445_v44 = vmul.f32 %v4449_v20, %v334_v13 }
 0x15b   : > { %v2103_v0 = vsel %vm2079_vm3, %v2101_v41, %v2102_v25  ;;  %v2199_v28 = vadd.f32 %v2102_v25, %v1637_v50  ;;  %v4740_v46 = vmul.f32 %v4436_v54, %v335_v16  ;;  %v446_v23 = vmul.f32 %v4449_v20, %v335_v16 }
 0x15c   : > { %v2198_v36 = vadd.f32 %v2103_v0, %v1636_v57  ;;  %v2307_v12 = vrot.slane %v2197_v32, 1  ;;  %v487_v43 = vunpack.c.l.bf16 %v471_v35  ;;  %v447_v15 = vmul.f32 %v4449_v20, %v405_v55 }
 0x15d   : > { %v2310_v59 = vrot.slane %v2199_v28, 1  ;;  %v528_v49 = vmul.f32 %v4461_v3, %v335_v16  ;;  %v529_v54 = vmul.f32 %v4461_v3, %v405_v55  ;;  %v631_v52 = vmul.f32 %v4470_v27, %v4484_v1 }
 0x15e   : > { %v2308_v45 = vrot.slane %v2198_v36, 1  ;;  %v527_v34 = vmul.f32 %v4461_v3, %v487_v43  ;;  %v668_v9 = vunpack.c.l.bf16 %v3167_v60  ;;  %v632_v10 = vmul.f32 %v4470_v27, %v4498_v38 }
 0x15f   : > { %v708_v58 = vmul.f32 %v4476_v40, %v4484_v1  ;;  %v4759_v20 = vmul.f32 %v4476_v40, %v4498_v38  ;;  %v750_v17 = vunpack.c.l.bf16 %v3183_v30  ;;  %v791_v50 = vmul.f32 %v4493_v11, %v4498_v38 }
 0x160   : > { %v2309_v3 = vsel %vm1116_vm1, %v2307_v12, %v2308_v45  ;;  %v2311_v53 = vsel %vm1116_vm1, %v2308_v45, %v2310_v59  ;;  %v710_v26 = vmul.f32 %v4476_v40, %v668_v9  ;;  %v792_v1 = vmul.f32 %v4493_v11, %v668_v9 }
 0x161   : > { %v2398_v27 = vadd.f32 %v2309_v3, %v2029_v48  ;;  %v2399_v37 = vadd.f32 %v2311_v53, %v2030_v39  ;;  %v860_v7 = vunpack.c.l.bf16 %v3210_v4  ;;  %v790_v21 = vmul.f32 %v4493_v11, %v750_v17 }
 0x162   : > { %v861_v14 = vunpack.c.h.bf16 %v3210_v4  ;;  %v931_v56 = vunpack.c.l.bf16 %v3231_v2  ;;  %v1013_v61 = vunpack.c.l.bf16 %v3247_v24  ;;  %v1172_v29 = vrot.slane %v445_v44, 1  ;;  %v310_v2 = vld [vmem:[%s3696_s10 + $0xb4] sm:$0xff]  }
 0x163   : > { %v2590_v31 = vadd.f32 %v2501_v22, %v2398_v27  ;;  %v2591_v57 = vadd.f32 %v2503_v42, %v2399_v37  ;;  %v894_v5 = vmul.f32 %v4503_v33, %v860_v7  ;;  %v971_v47 = vmul.f32 %v4512_v63, %v860_v7  ;;  %v475_v27 = vld [vmem:[%s3696_s10 + $0xb4] sm:$0xe] }
 0x164   : > { %v895_v40 = vmul.f32 %v4503_v33, %v861_v14  ;;  %v972_v38 = vmul.f32 %v4512_v63, %v861_v14  ;;  %v973_v48 = vmul.f32 %v4512_v63, %v931_v56  ;;  %v1053_v6 = vmul.f32 %v4524_v8, %v1013_v61 }
 0x165   : > { %v2626_v41 = vadd.f32 %v4592_v18, %v2590_v31  ;;  %v2627_v11 = vadd.f32 %v4592_v18, %v2591_v57  ;;  %v1054_v13 = vmul.f32 %v4524_v8, %v861_v14  ;;  %v1173_v39 = vrot.slane %v446_v23, 1 }
 0x166   : > { %v1175_v25 = vrot.slane %v447_v15, 1  ;;  %v1327_v16 = vrot.slane %v631_v52, 6  ;;  %v1328_v55 = vrot.slane %v632_v10, 6  ;;  %v1541_v32 = vrot.slane %v790_v21, 1 }
 0x167   : > { %v2658_v35 = vmax.f32 %v2626_v41, 0.0  ;;  %v2659_v33 = vmax.f32 %v2627_v11, 0.0  ;;  %v1542_v22 = vrot.slane %v791_v50, 1  ;;  %v1174_v42 = vsel %vm1116_vm1, %v1172_v29, %v1173_v39  ;;  %v393_v50 = vld [vmem:[%s3696_s10 + $0xbc] sm:$0x1] }
 0x168   : > { %v1176_v63 = vsel %vm1116_vm1, %v1173_v39, %v1175_v25  ;;  %v1329_v0 = vsel %vm1293_vm0, %v1327_v16, %v1328_v55  ;;  %v1423_v28 = vadd.f32 %v1327_v16, %v527_v34  ;;  %v1055_v60 = vmul.f32 %v4524_v8, %v931_v56  ;;  %v3590_v25 = vld [vmem:[%s4955_s1 + $0x1] ss:$0 sm:$0xff] }
 0x169   : > { %v2747_v44 = vpack.c.bf16 %v2659_v33, %v2658_v35  ;;  %v1251_v36 = vadd.f32 %v1174_v42, %v4736_v19  ;;  %v1424_v12 = vadd.f32 %v1329_v0, %v528_v49  ;;  %v1425_v23 = vadd.f32 %v1328_v55, %v529_v54  ;;  %v3187_v35 = vld [vmem:[%s3696_s10 + $0xc0] sm:$0xe] }
 0x16a   : > { %v1543_v43 = vsel %vm1116_vm1, %v1541_v32, %v1542_v22  ;;  %v1544_v30 = vrot.slane %v792_v1, 1  ;;  %v1765_v59 = vrot.slane %v971_v47, 1  ;;  %v1252_v15 = vadd.f32 %v1176_v63, %v4740_v46 }
 0x16b   : > { %2867 = vmatmul.bf16.gmra.mxu1 %v2747_v44  ;;  %v1766_v45 = vrot.slane %v972_v38, 1  ;;  %v1768_v52 = vrot.slane %v973_v48, 1  ;;  %v1958_v34 = vrot.slane %v1423_v28, 2  ;;  %v1647_v8 = vadd.f32 %v1543_v43, %v708_v58  ;;  %v3589_v48 = vld [vmem:[%s4955_s1] ss:$0 sm:$0xff] }
 0x16c   : > { %v1545_v9 = vsel %vm1116_vm1, %v1542_v22, %v1544_v30  ;;  %v1959_v4 = vrot.slane %v1424_v12, 2  ;;  %v1961_v19 = vrot.slane %v1425_v23, 2  ;;  %v1649_v49 = vadd.f32 %v1544_v30, %v710_v26  ;;  %v3591_v22 = vld [vmem:[%s4955_s1 + $0x2] ss:$0 sm:$0xff]  ;;  %v3592_v28 = vld [vmem:[%s4955_s1 + $0x3] ss:$0 sm:$0xff] }
 0x16d   : > { %v1767_v54 = vsel %vm1116_vm1, %v1765_v59, %v1766_v45  ;;  %v1769_v10 = vsel %vm1116_vm1, %v1766_v45, %v1768_v52  ;;  %v2519_v17 = vrot.slane %v1053_v6, 2  ;;  %v1648_v37 = vadd.f32 %v1545_v9, %v4759_v20  ;;  %v3171_v6 = vld [vmem:[%s3696_s10 + $0xc8] sm:$0x1]  ;;  %v3218_v12 = vld [vmem:[%s3696_s10 + $0xcc] sm:$0xff]   ;;  %v3235_v23 = vld [vmem:[%s3696_s10 + $0xd4] sm:$0x1] }
 0x16e   : > { %v1844_v24 = vadd.f32 %v1767_v54, %v894_v5  ;;  %v1845_v3 = vadd.f32 %v1769_v10, %v895_v40  ;;  %v1960_v46 = vsel %vm1902_vm2, %v1958_v34, %v1959_v4  ;;  %v1962_v53 = vsel %vm1902_vm2, %v1959_v4, %v1961_v19  ;;  %v3593_v59 = vld [vmem:[%s4955_s1 + $0x4] ss:$0 sm:$0xff]  ;;  %v3251_v52 = vld [vmem:[%s3696_s10 + $0xcc] sm:$0xe]  ;;  %v3594_v4 = vld [vmem:[%s4955_s1 + $0x5] ss:$0 sm:$0xff] }
 0x16f   : > { %v2520_v58 = vrot.slane %v1054_v13, 2  ;;  %v2522_v1 = vrot.slane %v1055_v60, 2  ;;  %v342_v21 = vunpack.c.l.bf16 %v310_v2  ;;  %v343_v14 = vunpack.c.h.bf16 %v310_v2 }
 0x170   : > { %v2113_v7 = vrot.slane %v1844_v24, 7  ;;  %v2114_v26 = vrot.slane %v1845_v3, 7  ;;  %v2037_v56 = vadd.f32 %v1960_v46, %v1251_v36  ;;  %v2038_v61 = vadd.f32 %v1962_v53, %v1252_v15  ;;  %v4840_v46 = vpop.f32.mrf.mxu0  ;;  %v4842_v53 = vpop.f32.mrf.mxu1 }
 0x171   : > { %v409_v31 = vunpack.c.l.bf16 %v393_v50  ;;  %v491_v57 = vunpack.c.l.bf16 %v475_v27  ;;  %v2521_v47 = vsel %vm1902_vm2, %v2519_v17, %v2520_v58  ;;  %v2523_v20 = vsel %vm1902_vm2, %v2520_v58, %v2522_v1  ;;  %v3595_v27 = vld [vmem:[%s4955_s1 + $0x6] ss:$0 sm:$0xff]  ;;  %v4847_v1 = vpop.f32.mrf.mxu2 }
 0x172   : > { %v2115_v5 = vsel %vm2079_vm3, %v2113_v7, %v2114_v26  ;;  %v2209_v29 = vadd.f32 %v2113_v7, %v1647_v8  ;;  %v2211_v40 = vadd.f32 %v2114_v26, %v1649_v49  ;;  %v4801_v41 = vmul.f32 %v3589_v48, %v342_v21  ;;  %v4849_v7 = vpop.f32.mrf.mxu3 }
 0x173   : > { %v2210_v38 = vadd.f32 %v2115_v5, %v1648_v37  ;;  %v4803_v11 = vmul.f32 %v3589_v48, %v343_v14  ;;  %v457_v16 = vmul.f32 %v3590_v25, %v342_v21  ;;  %v4809_v55 = vmul.f32 %v3590_v25, %v343_v14 }
 0x174   : > { %v2327_v13 = vrot.slane %v2209_v29, 1  ;;  %v2330_v39 = vrot.slane %v2211_v40, 1  ;;  %v459_v32 = vmul.f32 %v3590_v25, %v409_v31  ;;  %v539_v42 = vmul.f32 %v3591_v22, %v491_v57  ;;  %v3597_v57 = vld [vmem:[%s4955_s1 + $0x8] ss:$0 sm:$0xff] }
 0x175   : > { %v2328_v33 = vrot.slane %v2210_v38, 1  ;;  %v540_v63 = vmul.f32 %v3591_v22, %v343_v14  ;;  %v541_v0 = vmul.f32 %v3591_v22, %v409_v31  ;;  %v639_v44 = vmul.f32 %v3592_v28, %v4570_v62  ;;  %v3596_v14 = vld [vmem:[%s4955_s1 + $0x7] ss:$0 sm:$0xff] }
 0x176   : > { %v640_v60 = vmul.f32 %v3592_v28, %v4579_v51  ;;  %v672_v36 = vunpack.c.l.bf16 %v3171_v6  ;;  %v4828_v15 = vmul.f32 %v3593_v59, %v4570_v62  ;;  %v754_v45 = vunpack.c.l.bf16 %v3187_v35 }
 0x177   : > { %v2329_v43 = vsel %vm1116_vm1, %v2327_v13, %v2328_v33  ;;  %v2331_v30 = vsel %vm1116_vm1, %v2328_v33, %v2330_v39  ;;  %v4832_v8 = vmul.f32 %v3593_v59, %v4579_v51  ;;  %v803_v19 = vmul.f32 %v3594_v4, %v4579_v51 }
 0x178   : > { %v2406_v34 = vadd.f32 %v2329_v43, %v2037_v56  ;;  %v2407_v9 = vadd.f32 %v2331_v30, %v2038_v61  ;;  %v4838_v49 = vmul.f32 %v3593_v59, %v672_v36  ;;  %v868_v54 = vunpack.c.l.bf16 %v3218_v12  ;;  %v2855_v43 = vpop.f32.mrf.mxu1 }
 0x179   : > { %v869_v10 = vunpack.c.h.bf16 %v3218_v12  ;;  %v935_v17 = vunpack.c.l.bf16 %v3235_v23  ;;  %v804_v24 = vmul.f32 %v3594_v4, %v672_v36  ;;  %v1017_v3 = vunpack.c.l.bf16 %v3251_v52  ;;  %v2835_v23 = vpop.f32.mrf.mxu0 }
 0x17a   : > { %v2598_v62 = vadd.f32 %v2521_v47, %v2406_v34  ;;  %v2599_v2 = vadd.f32 %v2523_v20, %v2407_v9  ;;  %v802_v50 = vmul.f32 %v3594_v4, %v754_v45  ;;  %v902_v37 = vmul.f32 %v3595_v27, %v868_v54 }
 0x17b   : > { %v903_v51 = vmul.f32 %v3595_v27, %v869_v10  ;;  %v1192_v58 = vrot.slane %v457_v16, 1  ;;  %v983_v56 = vmul.f32 %v3596_v14, %v868_v54  ;;  %v984_v61 = vmul.f32 %v3596_v14, %v869_v10 }
 0x17c   : > { %v2634_v26 = vadd.f32 %v4592_v18, %v2598_v62  ;;  %v2635_v21 = vadd.f32 %v4592_v18, %v2599_v2  ;;  %v985_v31 = vmul.f32 %v3596_v14, %v935_v17  ;;  %v1065_v5 = vmul.f32 %v3597_v57, %v1017_v3 }
 0x17d   : > { %v1193_v29 = vrot.slane %v4809_v55, 1  ;;  %v1195_v40 = vrot.slane %v459_v32, 1  ;;  %v1339_v20 = vrot.slane %v639_v44, 6  ;;  %v1340_v48 = vrot.slane %v640_v60, 6 }
 0x17e   : > { %v2666_v47 = vmax.f32 %v2634_v26, 0.0  ;;  %v2667_v38 = vmax.f32 %v2635_v21, 0.0  ;;  %v1066_v18 = vmul.f32 %v3597_v57, %v869_v10  ;;  %v1561_v13 = vrot.slane %v802_v50, 1 }
 0x17f   : > { %v1194_v6 = vsel %vm1116_vm1, %v1192_v58, %v1193_v29  ;;  %v1562_v39 = vrot.slane %v803_v19, 1  ;;  %v1067_v16 = vmul.f32 %v3597_v57, %v935_v17  ;;  %v1196_v35 = vsel %vm1116_vm1, %v1193_v29, %v1195_v40 }
 0x180   : > { %v2751_v25 = vpack.c.bf16 %v2667_v38, %v2666_v47  ;;  %v1341_v33 = vsel %vm1293_vm0, %v1339_v20, %v1340_v48  ;;  %v1435_v22 = vadd.f32 %v1339_v20, %v539_v42  ;;  %v1437_v36 = vadd.f32 %v1340_v48, %v541_v0  ;;  %v4868_v42 = vld [vmem:[%s4958_s4] ss:$0 sm:$0xff]  ;;  %v2895_v0 = vpop.f32.mrf.mxu3 }
 0x181   : > { %v1436_v28 = vadd.f32 %v1341_v33, %v540_v63  ;;  %v1563_v55 = vsel %vm1116_vm1, %v1561_v13, %v1562_v39  ;;  %v1259_v32 = vadd.f32 %v1194_v6, %v4801_v41  ;;  %v1564_v44 = vrot.slane %v804_v24, 1  ;;  %v2875_v63 = vpop.f32.mrf.mxu2  ;;  %v2838_v57 = vpop.f32.mrf.mxu0 }
 0x182   : > { %2887 = vmatmul.bf16.gmra.mxu2 %v2751_v25  ;;  %v1785_v60 = vrot.slane %v983_v56, 1  ;;  %v1786_v12 = vrot.slane %v984_v61, 1  ;;  %v1788_v30 = vrot.slane %v985_v31, 1  ;;  %v1978_v59 = vrot.slane %v1435_v22, 2 }
 0x183   : > { %v1979_v45 = vrot.slane %v1436_v28, 2  ;;  %v1981_v52 = vrot.slane %v1437_v36, 2  ;;  %v1260_v34 = vadd.f32 %v1196_v35, %v4803_v11  ;;  %v1565_v41 = vsel %vm1116_vm1, %v1562_v39, %v1564_v44 }
 0x184   : > { %v1659_v9 = vadd.f32 %v1563_v55, %v4828_v15  ;;  %v1787_v4 = vsel %vm1116_vm1, %v1785_v60, %v1786_v12  ;;  %v1789_v19 = vsel %vm1116_vm1, %v1786_v12, %v1788_v30  ;;  %v2539_v17 = vrot.slane %v1065_v5, 2  ;;  %v2858_v5 = vpop.f32.mrf.mxu1 }
 0x185   : > { %v1852_v54 = vadd.f32 %v1787_v4, %v902_v37  ;;  %v1980_v10 = vsel %vm1902_vm2, %v1978_v59, %v1979_v45  ;;  %v1661_v62 = vadd.f32 %v1564_v44, %v4838_v49  ;;  %v1853_v2 = vadd.f32 %v1789_v19, %v903_v51 }
 0x186   : > { %v1982_v24 = vsel %vm1902_vm2, %v1979_v45, %v1981_v52  ;;  %v2540_v3 = vrot.slane %v1066_v18, 2  ;;  %v1660_v11 = vadd.f32 %v1565_v41, %v4832_v8  ;;  %v2542_v27 = vrot.slane %v1067_v16, 2 }
 0x187   : > { %v2125_v50 = vrot.slane %v1852_v54, 7  ;;  %v2834_v15 = vadd.f32 %v4868_v42, %v4840_v46  ;;  %v2045_v58 = vadd.f32 %v1980_v10, %v1259_v32  ;;  %v2046_v26 = vadd.f32 %v1982_v24, %v1260_v34  ;;  %v3598_v10 = vld [vmem:[%s4956_s2] ss:$0 sm:$0xff] }
 0x188   : > { %v2126_v37 = vrot.slane %v1853_v2, 7  ;;  %v2854_v21 = vadd.f32 %v4868_v42, %v4842_v53  ;;  %v2541_v49 = vsel %vm1902_vm2, %v2539_v17, %v2540_v3  ;;  %v2874_v51 = vadd.f32 %v4868_v42, %v4847_v1  ;;  %v2898_v20 = vpop.f32.mrf.mxu3 }
 0x189   : > { %v2221_v14 = vadd.f32 %v2125_v50, %v1659_v9  ;;  %v2894_v8 = vadd.f32 %v4868_v42, %v4849_v7  ;;  %v2543_v46 = vsel %vm1902_vm2, %v2540_v3, %v2542_v27  ;;  %v2913_v31 = vmax.f32 %v2834_v15, 0.0  ;;  %v2878_v38 = vpop.f32.mrf.mxu2 }
 0x18a   : > { %v2127_v56 = vsel %vm2079_vm3, %v2125_v50, %v2126_v37  ;;  %v2223_v61 = vadd.f32 %v2126_v37, %v1661_v62  ;;  %v2921_v53 = vmax.f32 %v2854_v21, 0.0  ;;  %v2836_v47 = vadd.f32 %v4868_v42, %v2835_v23 }
 0x18b   : > { %v2222_v29 = vadd.f32 %v2127_v56, %v1660_v11  ;;  %v2347_v40 = vrot.slane %v2221_v14, 1  ;;  %v2856_v48 = vadd.f32 %v4868_v42, %v2855_v43  ;;  %v2876_v7 = vadd.f32 %v4868_v42, %v2875_v63  ;;  %v2840_v63 = vpop.f32.mrf.mxu0 }
 0x18c   : > { %v2350_v1 = vrot.slane %v2223_v61, 1  ;;  %v2896_v18 = vadd.f32 %v4868_v42, %v2895_v0  ;;  %v2929_v13 = vmax.f32 %v2874_v51, 0.0  ;;  %v2937_v39 = vmax.f32 %v2894_v8, 0.0  ;;  %v2860_v0 = vpop.f32.mrf.mxu1 }
 0x18d   : > { %v2348_v6 = vrot.slane %v2222_v29, 1  ;;  %v2914_v25 = vmax.f32 %v2836_v47, 0.0  ;;  %v2922_v16 = vmax.f32 %v2856_v48, 0.0  ;;  %v2930_v35 = vmax.f32 %v2876_v7, 0.0 }
 0x18e   : > { %v2938_v33 = vmax.f32 %v2896_v18, 0.0  ;;  %v2839_v22 = vadd.f32 %v4868_v42, %v2838_v57  ;;  %v2859_v32 = vadd.f32 %v4868_v42, %v2858_v5  ;;  %v2879_v30 = vadd.f32 %v4868_v42, %v2878_v38 }
 0x18f   : > { %v2349_v28 = vsel %vm1116_vm1, %v2347_v40, %v2348_v6  ;;  %v2351_v36 = vsel %vm1116_vm1, %v2348_v6, %v2350_v1  ;;  %v3394_v55 = vpack.c.bf16 %v2914_v25, %v2913_v31  ;;  %v3414_v12 = vpack.c.bf16 %v2922_v16, %v2921_v53 }
 0x190   : > { %v2414_v44 = vadd.f32 %v2349_v28, %v2045_v58  ;;  %v2415_v60 = vadd.f32 %v2351_v36, %v2046_v26  ;;  %v3434_v23 = vpack.c.bf16 %v2930_v35, %v2929_v13  ;;  %v3454_v43 = vpack.c.bf16 %v2938_v33, %v2937_v39  ;;  %v2900_v54 = vpop.f32.mrf.mxu3 }
 0x191   : > { %3395 = vst [vmem:[%s4898_s23] sm:$0xff] %v3394_v55   ;;  %v2899_v59 = vadd.f32 %v4868_v42, %v2898_v20  ;;  %v2915_v34 = vmax.f32 %v2839_v22, 0.0  ;;  %v2923_v41 = vmax.f32 %v2859_v32, 0.0  ;;  %v2841_v9 = vadd.f32 %v4868_v42, %v2840_v63  ;;  %v2880_v19 = vpop.f32.mrf.mxu2 }
 0x192   : > { %v2606_v45 = vadd.f32 %v2541_v49, %v2414_v44  ;;  %v2607_v52 = vadd.f32 %v2543_v46, %v2415_v60  ;;  %3497 = vst [vmem:[%s4898_s23 + $0x20] sm:$0xff] %v3414_v12   ;;  %v2861_v4 = vadd.f32 %v4868_v42, %v2860_v0  ;;  %v2881_v2 = vadd.f32 %v4868_v42, %v2880_v19 }
 0x193   : > { %3501 = vst [vmem:[%s4898_s23 + $0x40] sm:$0xff] %v3434_v23   ;;  %v2901_v24 = vadd.f32 %v4868_v42, %v2900_v54  ;;  %v2931_v3 = vmax.f32 %v2879_v30, 0.0  ;;  %v2939_v11 = vmax.f32 %v2899_v59, 0.0  ;;  %v2916_v50 = vmax.f32 %v2841_v9, 0.0  ;;  %v2843_v56 = vpop.f32.mrf.mxu0 }
 0x194   : > { %v2642_v17 = vadd.f32 %v3598_v10, %v2606_v45  ;;  %v2643_v62 = vadd.f32 %v3598_v10, %v2607_v52  ;;  %3505 = vst [vmem:[%s4898_s23 + $0x60] sm:$0xff] %v3454_v43   ;;  %v2924_v27 = vmax.f32 %v2861_v4, 0.0  ;;  %v2932_v26 = vmax.f32 %v2881_v2, 0.0  ;;  %v2863_v61 = vpop.f32.mrf.mxu1 }
 0x195   : > { %v2940_v37 = vmax.f32 %v2901_v24, 0.0  ;;  %v3399_v21 = vpack.c.bf16 %v2916_v50, %v2915_v34  ;;  %v2844_v46 = vadd.f32 %v4868_v42, %v2843_v56  ;;  %v2864_v31 = vadd.f32 %v4868_v42, %v2863_v61 }
 0x196   : > { %v2674_v15 = vmax.f32 %v2642_v17, 0.0  ;;  %v2675_v58 = vmax.f32 %v2643_v62, 0.0  ;;  %v3419_v14 = vpack.c.bf16 %v2924_v27, %v2923_v41  ;;  %v3439_v51 = vpack.c.bf16 %v2932_v26, %v2931_v3 }
 0x197   : > { %v3459_v8 = vpack.c.bf16 %v2940_v37, %v2939_v11  ;;  %3494 = vst [vmem:[%s4898_s23 + $0x8] sm:$0xff] %v3399_v21   ;;  %v2917_v53 = vmax.f32 %v2844_v46, 0.0  ;;  %v2925_v47 = vmax.f32 %v2864_v31, 0.0 }
 0x198   : > { %v2755_v49 = vpack.c.bf16 %v2675_v58, %v2674_v15  ;;  %3498 = vst [vmem:[%s4898_s23 + $0x28] sm:$0xff] %v3419_v14  }
 0x199   : > { %3502 = vst [vmem:[%s4898_s23 + $0x48] sm:$0xff] %v3439_v51  }
 0x19a   : > { %2907 = vmatmul.bf16.gmra.mxu3 %v2755_v49  ;;  %3506 = vst [vmem:[%s4898_s23 + $0x68] sm:$0xff] %v3459_v8  }
 0x19b   : > { %v2845_v57 = vpop.f32.mrf.mxu0 }
 0x19c   : > { %v2865_v5 = vpop.f32.mrf.mxu1  ;;  %v2846_v29 = vadd.f32 %v4868_v42, %v2845_v57 }
 0x19d   : > { %v2866_v40 = vadd.f32 %v4868_v42, %v2865_v5 }
 0x19e   : > { %v2918_v38 = vmax.f32 %v2846_v29, 0.0 }
 0x19f   : > { %v2926_v20 = vmax.f32 %v2866_v40, 0.0 }
 0x1a0   : > { %v3404_v48 = vpack.c.bf16 %v2918_v38, %v2917_v53 }
 0x1a1   : > { %v3424_v7 = vpack.c.bf16 %v2926_v20, %v2925_v47 }
 0x1a2   : > { %3495 = vst [vmem:[%s4898_s23 + $0x10] sm:$0xff] %v3404_v48  }
 0x1a3   : > { %3499 = vst [vmem:[%s4898_s23 + $0x30] sm:$0xff] %v3424_v7  }
 0x1a7   : > { %v2883_v1 = vpop.f32.mrf.mxu2 }
 0x1a8   : > { %v2884_v18 = vadd.f32 %v4868_v42, %v2883_v1 }
 0x1aa   : > { %v2933_v39 = vmax.f32 %v2884_v18, 0.0 }
 0x1af   : > { %v2885_v6 = vpop.f32.mrf.mxu2 }
 0x1b0   : > { %v2886_v13 = vadd.f32 %v4868_v42, %v2885_v6 }
 0x1b2   : > { %v2934_v25 = vmax.f32 %v2886_v13, 0.0 }
 0x1b4   : > { %v3444_v16 = vpack.c.bf16 %v2934_v25, %v2933_v39 }
 0x1b6   : > { %3503 = vst [vmem:[%s4898_s23 + $0x50] sm:$0xff] %v3444_v16  }
 0x1bf   : > { %v2903_v35 = vpop.f32.mrf.mxu3 }
 0x1c0   : > { %v2904_v33 = vadd.f32 %v4868_v42, %v2903_v35 }
 0x1c2   : > { %v2941_v36 = vmax.f32 %v2904_v33, 0.0 }
 0x1c7   : > { %v2905_v22 = vpop.f32.mrf.mxu3 }
 0x1c8   : > { %v2906_v28 = vadd.f32 %v4868_v42, %v2905_v22 }
 0x1ca   : > { %v2942_v55 = vmax.f32 %v2906_v28, 0.0 }
 0x1cc   : > { %v3464_v32 = vpack.c.bf16 %v2942_v55, %v2941_v36 }
 0x1ce   : > { %3507 = vst [vmem:[%s4898_s23 + $0x70] sm:$0xff] %v3464_v32  }
 0x1d0   : > { %v2848_v44 = vpop.f32.mrf.mxu0 }
 0x1d1   : > { %v2849_v12 = vadd.f32 %v4868_v42, %v2848_v44 }
 0x1d3   : > { %v2919_v52 = vmax.f32 %v2849_v12, 0.0 }
 0x1d8   : > { %v2850_v43 = vpop.f32.mrf.mxu0 }
 0x1d9   : > { %v2851_v59 = vadd.f32 %v4868_v42, %v2850_v43 }
 0x1db   : > { %v2920_v0 = vmax.f32 %v2851_v59, 0.0 }
 0x1dd   : > { %v3409_v41 = vpack.c.bf16 %v2920_v0, %v2919_v52 }
 0x1df   : > { %3496 = vst [vmem:[%s4898_s23 + $0x18] sm:$0xff] %v3409_v41  }
 0x1e8   : > { %v2868_v60 = vpop.f32.mrf.mxu1 }
 0x1e9   : > { %v2869_v23 = vadd.f32 %v4868_v42, %v2868_v60 }
 0x1eb   : > { %v2927_v63 = vmax.f32 %v2869_v23, 0.0 }
 0x1f0   : > { %v2870_v30 = vpop.f32.mrf.mxu1 }
 0x1f1   : > { %v2871_v45 = vadd.f32 %v4868_v42, %v2870_v30 }
 0x1f3   : > { %v2928_v34 = vmax.f32 %v2871_v45, 0.0 }
 0x1f5   : > { %v3429_v9 = vpack.c.bf16 %v2928_v34, %v2927_v63 }
 0x1f7   : > { %3500 = vst [vmem:[%s4898_s23 + $0x38] sm:$0xff] %v3429_v9  }
 0x205   : > { %v2888_v4 = vpop.f32.mrf.mxu2 }
 0x206   : > { %v2889_v19 = vadd.f32 %v4868_v42, %v2888_v4 }
 0x208   : > { %v2935_v17 = vmax.f32 %v2889_v19, 0.0 }
 0x20d   : > { %v2890_v54 = vpop.f32.mrf.mxu2 }
 0x20e   : > { %v2891_v10 = vadd.f32 %v4868_v42, %v2890_v54 }
 0x210   : > { %v2936_v62 = vmax.f32 %v2891_v10, 0.0 }
 0x212   : > { %v3449_v2 = vpack.c.bf16 %v2936_v62, %v2935_v17 }
 0x214   : > { %3504 = vst [vmem:[%s4898_s23 + $0x58] sm:$0xff] %v3449_v2  }
 0x21d   : > { %v2908_v24 = vpop.f32.mrf.mxu3 }
 0x21e   : > { %v2909_v3 = vadd.f32 %v4868_v42, %v2908_v24 }
 0x220   : > { %v2943_v27 = vmax.f32 %v2909_v3, 0.0 }
 0x225   : > { %v2910_v11 = vpop.f32.mrf.mxu3 }
 0x226   : > { %v2911_v50 = vadd.f32 %v4868_v42, %v2910_v11 }
 0x228   : > { %v2944_v15 = vmax.f32 %v2911_v50, 0.0 }
 0x22a   : > { %v3469_v58 = vpack.c.bf16 %v2944_v15, %v2943_v27 }
 0x22c   : > { %3508 = vst [vmem:[%s4898_s23 + $0x78] sm:$0xff] %v3469_v58  }
 0x22d PF: > { %s15_s20 = sadd.s32 1, %s3621_s20   ;;  %s4960_s18 = smov %s3617_s19 }
 0x22e   : > { %p12_p5 = scmp.ge.s32.totalorder %s15_s20, 4   ;;  %s4961_s19 = smov %s4963_s21 }
 0x230   :  { %14 = sbr.rel (!%p12_p5) target bundleno = 2 (0x2), region = 82 }

// kernel: mobilenet_v1.15
= control target key start
LH: loop header
LB: loop body
LE: loop exit
PB: predicated region body
PF: predicated region fallthrough
CT: control target
= control target key end

     0   :  { %s1502_s18 = smov 0   ;;  %s1504_s19 = smov 0   ;;  %s2001_s0 = inlined_call_operand.vmem [shape: bf16[1,2,10,10,128], index: 0, kind: input, shape index: {}]   ;;  %s2002_s1 = inlined_call_operand.vmem [shape: f32[9,128], index: 1, kind: input, shape index: {}]   ;;  %s2003_s2 = inlined_call_operand.vmem [shape: f32[1,128], index: 2, kind: input, shape index: {}]   ;;  %s2004_s3 = inlined_call_operand.vmem [shape: bf16[128,128], index: 3, kind: input, shape index: {}]   ;;  %s2005_s4 = inlined_call_operand.vmem [shape: f32[1,128], index: 4, kind: input, shape index: {}]   ;;  %s2006_s5 = inlined_call_operand.vmem [shape: bf16[2,64,128], index: 5, kind: output, shape index: {}]  }
   0x1   :  { %s1506_s20 = smov 0  }
   0x2 LB: > { %s27_s21 = sadd.s32 1, %s1466_s19  ;;  %p1270_p0 = scmp.ge.s32.totalorder %s1470_s20, 1  ;;  %s1470_s20 = sphi %s1506_s20, %s15_s20   ;;  %s1466_s19 = sphi %s1504_s19, %s2008_s19   ;;  %s1462_s18 = sphi %s1502_s18, %s2007_s18  }
   0x3   : > { %p29_p1 = scmp.ge.s32.totalorder %s27_s21, 2  ;;  %p218_p2 = scmp.lt.s32.totalorder %s1470_s20, 3 }
   0x5   : > { %s2010_s21 = smov (%p29_p1, %s27_s21), 0  ;;  %p219_p3 = pnand %p1270_p0, %p218_p2 }
   0x6   : > { %p256_p4 = scmp.lt.s32.totalorder (!%p219_p3), %s1462_s18, 1 }
   0x7   : > { %222 = sbr.rel (%p219_p3) target bundleno = 290 (0x122), region = 40 }
   0xc   : > { %v1364_v0 = vld [vmem:[%s2004_s3 + $0x38] sm:$0xff]  ;;  %v1363_v1 = vld [vmem:[%s2004_s3 + $0x30] sm:$0xff]  ;;  %s2012_s18 = smov (!%p256_p4, %s1462_s18), 1  ;;  %v1362_v2 = vld [vmem:[%s2004_s3 + $0x28] sm:$0xff]  ;;  %vm580_vm0 = vcmask 1046528   ;;  %vm805_vm1 = vcmask 1045504  }
   0xd   : > { %1106 = vmatpush.bf16.msra.mxu0 %v1364_v0  ;;  %1388 = vmatpush.bf16.msra.mxu1 %v1364_v0  ;;  %s1412_s28 = smul.u32 80, %s2012_s18  ;;  %v1535_v3 = vld [vmem:[%s2002_s1] ss:$0 sm:$0xff]  ;;  %v1545_v4 = vld [vmem:[%s2002_s1 + $0x1] ss:$0 sm:$0xff]  ;;  %v1360_v36 = vld [vmem:[%s2004_s3 + $0x18] sm:$0xff] }
   0xe   : > { %1389 = vmatpush.bf16.msra.mxu2 %v1364_v0  ;;  %1390 = vmatpush.bf16.msra.mxu3 %v1364_v0  ;;  %v1550_v5 = vld [vmem:[%s2002_s1 + $0x2] ss:$0 sm:$0xff]  ;;  %v1558_v9 = vld [vmem:[%s2002_s1 + $0x3] ss:$0 sm:$0xff]  ;;  %v1571_v22 = vld [vmem:[%s2002_s1 + $0x4] ss:$0 sm:$0xff] }
   0xf   : > { %s1540_s8 = scalar_lea.vmem %s2001_s0, %s1412_s28  ;;  %v1361_v10 = vld [vmem:[%s2004_s3 + $0x20] sm:$0xff]  ;;  %v1649_v61 = vld [vmem:[%s2002_s1 + $0x8] ss:$0 sm:$0xff]  ;;  %s1356_s22 = sshll.u32 %s2012_s18, 5 }
  0x10   : > { %v280_v6 = vld [vmem:[%s1540_s8] sm:$0xf]  ;;  %v281_v7 = vld [vmem:[%s1540_s8 + $0x8] sm:$0xf]  ;;  %v306_v8 = vld [vmem:[%s1540_s8 + $0x4] sm:$0x1]  ;;  %s275_s25 = scalar_lea.vmem %s2006_s5, %s1356_s22 }
  0x11   : > { %1107 = vmatpush.bf16.msra.mxu0 %v1363_v1  ;;  %1391 = vmatpush.bf16.msra.mxu1 %v1363_v1  ;;  %v288_v11 = vunpack.c.l.bf16 %v280_v6  ;;  %v289_v12 = vunpack.c.l.bf16 %v281_v7  ;;  %v307_v13 = vld [vmem:[%s1540_s8 + $0xc] sm:$0x1]  ;;  %v314_v14 = vunpack.c.l.bf16 %v306_v8  ;;  %v340_v15 = vld [vmem:[%s1540_s8] sm:$0xe]  ;;  %v341_v16 = vld [vmem:[%s1540_s8 + $0x8] sm:$0xe] }
  0x12   : > { %1392 = vmatpush.bf16.msra.mxu2 %v1363_v1  ;;  %1393 = vmatpush.bf16.msra.mxu3 %v1363_v1  ;;  %v315_v17 = vunpack.c.l.bf16 %v307_v13  ;;  %v348_v18 = vunpack.c.l.bf16 %v340_v15  ;;  %v349_v19 = vunpack.c.l.bf16 %v341_v16  ;;  %v1274_v20 = vld [vmem:[%s1540_s8 + $0x8] sm:$0xf]  ;;  %v1275_v21 = vld [vmem:[%s1540_s8 + $0x10] sm:$0xf]  ;;  %v1282_v27 = vld [vmem:[%s1540_s8 + $0xc] sm:$0x1] }
  0x13   : > { %v1574_v23 = vmul.f32 %v1535_v3, %v288_v11  ;;  %v1577_v24 = vmul.f32 %v1535_v3, %v289_v12  ;;  %v1580_v25 = vmul.f32 %v1545_v4, %v288_v11  ;;  %v383_v26 = vunpack.c.l.bf16 %v1274_v20  ;;  %v1283_v28 = vld [vmem:[%s1540_s8 + $0x14] sm:$0x1]  ;;  %v1587_v29 = vld [vmem:[%s2002_s1 + $0x5] ss:$0 sm:$0xff]  ;;  %v1290_v34 = vld [vmem:[%s1540_s8 + $0x8] sm:$0xe] }
  0x14   : > { %v1590_v30 = vmul.f32 %v1545_v4, %v314_v14  ;;  %v1593_v31 = vmul.f32 %v1545_v4, %v289_v12  ;;  %v1596_v32 = vmul.f32 %v1545_v4, %v315_v17  ;;  %v384_v33 = vunpack.c.l.bf16 %v1275_v21  ;;  %v1291_v35 = vld [vmem:[%s1540_s8 + $0x10] sm:$0xe]  ;;  %v1299_v42 = vld [vmem:[%s1540_s8 + $0x18] sm:$0xf]  ;;  %v1620_v43 = vld [vmem:[%s2002_s1 + $0x6] ss:$0 sm:$0xff] }
  0x15   : > { %1108 = vmatpush.bf16.msra.mxu0 %v1362_v2  ;;  %1394 = vmatpush.bf16.msra.mxu1 %v1362_v2  ;;  %v1604_v37 = vmul.f32 %v1550_v5, %v348_v18  ;;  %v1607_v38 = vmul.f32 %v1550_v5, %v314_v14  ;;  %v1610_v39 = vmul.f32 %v1550_v5, %v349_v19  ;;  %v1298_v41 = vld [vmem:[%s1540_s8 + $0x10] sm:$0xf]  ;;  %v409_v46 = vunpack.c.l.bf16 %v1282_v27  ;;  %v1306_v48 = vld [vmem:[%s1540_s8 + $0x14] sm:$0x1]  ;;  %v1632_v49 = vld [vmem:[%s2002_s1 + $0x7] ss:$0 sm:$0xff] }
  0x16   : > { %1395 = vmatpush.bf16.msra.mxu2 %v1362_v2  ;;  %1396 = vmatpush.bf16.msra.mxu3 %v1362_v2  ;;  %v1613_v40 = vmul.f32 %v1550_v5, %v315_v17  ;;  %v1623_v44 = vmul.f32 %v1558_v9, %v383_v26  ;;  %v1626_v45 = vmul.f32 %v1558_v9, %v384_v33  ;;  %v410_v47 = vunpack.c.l.bf16 %v1283_v28  ;;  %v1307_v54 = vld [vmem:[%s1540_s8 + $0x1c] sm:$0x1]  ;;  %v1314_v55 = vld [vmem:[%s1540_s8 + $0x10] sm:$0xe]  ;;  %v1315_v60 = vld [vmem:[%s1540_s8 + $0x18] sm:$0xe] }
  0x17   : > { %v1635_v50 = vmul.f32 %v1571_v22, %v383_v26  ;;  %v1638_v51 = vmul.f32 %v1571_v22, %v384_v33  ;;  %v443_v52 = vunpack.c.l.bf16 %v1290_v34  ;;  %v444_v53 = vunpack.c.l.bf16 %v1291_v35 }
  0x18   : > { %v420_v56 = vmul.f32 %v1571_v22, %v409_v46  ;;  %v422_v57 = vmul.f32 %v1571_v22, %v410_v47  ;;  %v454_v58 = vmul.f32 %v1587_v29, %v409_v46  ;;  %v478_v59 = vunpack.c.l.bf16 %v1298_v41 }
  0x19   : > { %1109 = vmatpush.bf16.msra.mxu0 %v1361_v10  ;;  %1397 = vmatpush.bf16.msra.mxu1 %v1361_v10  ;;  %v453_v62 = vmul.f32 %v1587_v29, %v443_v52  ;;  %v455_v63 = vmul.f32 %v1587_v29, %v444_v53  ;;  %v456_v0 = vmul.f32 %v1587_v29, %v410_v47  ;;  %v479_v1 = vunpack.c.l.bf16 %v1299_v42 }
  0x1a   : > { %1398 = vmatpush.bf16.msra.mxu2 %v1361_v10  ;;  %1399 = vmatpush.bf16.msra.mxu3 %v1361_v10  ;;  %v1655_v2 = vmul.f32 %v1620_v43, %v478_v59  ;;  %v504_v6 = vunpack.c.l.bf16 %v1306_v48  ;;  %v505_v7 = vunpack.c.l.bf16 %v1307_v54  ;;  %v514_v8 = vmul.f32 %v1632_v49, %v478_v59  ;;  %v1359_v10 = vld [vmem:[%s2004_s3 + $0x10] sm:$0xff] }
  0x1b   : > { %v1662_v11 = vmul.f32 %v1620_v43, %v479_v1  ;;  %v516_v12 = vmul.f32 %v1632_v49, %v479_v1  ;;  %v538_v13 = vunpack.c.l.bf16 %v1314_v55  ;;  %v539_v14 = vunpack.c.l.bf16 %v1315_v60 }
  0x1c   : > { %v515_v15 = vmul.f32 %v1632_v49, %v504_v6  ;;  %v517_v16 = vmul.f32 %v1632_v49, %v505_v7  ;;  %v1668_v17 = vmul.f32 %v1649_v61, %v504_v6  ;;  %v581_v18 = vrot.slane %v1580_v25, 1  ;;  %v1358_v25 = vld [vmem:[%s2004_s3 + $0x8] sm:$0xff] }
  0x1d   : > { %1110 = vmatpush.bf16.msra.mxu0 %v1360_v36  ;;  %1400 = vmatpush.bf16.msra.mxu1 %v1360_v36  ;;  %v1672_v19 = vmul.f32 %v1649_v61, %v538_v13  ;;  %v1675_v20 = vmul.f32 %v1649_v61, %v539_v14  ;;  %v1678_v21 = vmul.f32 %v1649_v61, %v505_v7  ;;  %v582_v26 = vrot.slane %v1590_v30, 1  ;;  %v283_v7 = vld [vmem:[%s1540_s8 + $0x18] sm:$0xf] }
  0x1e   : > { %1401 = vmatpush.bf16.msra.mxu2 %v1360_v36  ;;  %1402 = vmatpush.bf16.msra.mxu3 %v1360_v36  ;;  %v584_v27 = vrot.slane %v1593_v31, 1  ;;  %v585_v28 = vrot.slane %v1596_v32, 1  ;;  %v629_v33 = vrot.slane %v1623_v44, 6  ;;  %v630_v34 = vrot.slane %v1626_v45, 6 }
  0x1f   : > { %v583_v35 = vsel %vm580_vm0, %v581_v18, %v582_v26  ;;  %v677_v36 = vrot.slane %v453_v62, 1  ;;  %v678_v41 = vrot.slane %v454_v58, 1  ;;  %v680_v42 = vrot.slane %v455_v63, 1 }
  0x20   : > { %v586_v30 = vsel %vm580_vm0, %v584_v27, %v585_v28  ;;  %v613_v31 = vadd.f32 %v583_v35, %v1574_v23  ;;  %v645_v32 = vadd.f32 %v629_v33, %v1604_v37  ;;  %v681_v44 = vrot.slane %v456_v0, 1  ;;  %v1357_v23 = vld [vmem:[%s2004_s3] sm:$0xff] }
  0x21   : > { %1111 = vmatpush.bf16.msra.mxu0 %v1359_v10  ;;  %1403 = vmatpush.bf16.msra.mxu1 %v1359_v10  ;;  %v614_v45 = vadd.f32 %v586_v30, %v1577_v24  ;;  %v646_v46 = vadd.f32 %v629_v33, %v1607_v38  ;;  %v647_v47 = vadd.f32 %v630_v34, %v1610_v39  ;;  %v749_v38 = vrot.slane %v514_v8, 1  ;;  %v308_v8 = vld [vmem:[%s1540_s8 + $0x14] sm:$0x1] }
  0x22   : > { %1404 = vmatpush.bf16.msra.mxu2 %v1359_v10  ;;  %1405 = vmatpush.bf16.msra.mxu3 %v1359_v10  ;;  %v648_v48 = vadd.f32 %v630_v34, %v1613_v40  ;;  %v679_v52 = vsel %vm580_vm0, %v677_v36, %v678_v41  ;;  %v682_v53 = vsel %vm580_vm0, %v680_v42, %v681_v44  ;;  %v750_v39 = vrot.slane %v515_v15, 1  ;;  %v309_v15 = vld [vmem:[%s1540_s8 + $0x1c] sm:$0x1]  ;;  %v343_v42 = vld [vmem:[%s1540_s8 + $0x18] sm:$0xe] }
  0x23   : > { %v718_v54 = vadd.f32 %v678_v41, %v420_v56  ;;  %v720_v55 = vadd.f32 %v681_v44, %v422_v57  ;;  %v717_v24 = vadd.f32 %v679_v52, %v1635_v50  ;;  %v719_v37 = vadd.f32 %v682_v53, %v1638_v51  ;;  %v282_v50 = vld [vmem:[%s1540_s8 + $0x10] sm:$0xf]  ;;  %v1277_v53 = vld [vmem:[%s1540_s8 + $0x20] sm:$0xf] }
  0x24   : > { %v752_v40 = vrot.slane %v516_v12, 1  ;;  %v753_v56 = vrot.slane %v517_v16, 1  ;;  %v806_v57 = vrot.slane %v645_v32, 2  ;;  %v807_v58 = vrot.slane %v646_v46, 2 }
  0x25   : > { %1112 = vmatpush.bf16.msra.mxu0 %v1358_v25  ;;  %1406 = vmatpush.bf16.msra.mxu1 %v1358_v25  ;;  %v751_v59 = vsel %vm580_vm0, %v749_v38, %v750_v39  ;;  %v809_v60 = vrot.slane %v647_v47, 2  ;;  %v810_v62 = vrot.slane %v648_v48, 2  ;;  %v958_v63 = vrot.slane %v1672_v19, 2  ;;  %v1285_v38 = vld [vmem:[%s1540_s8 + $0x24] sm:$0x1] }
  0x26   : > { %1407 = vmatpush.bf16.msra.mxu2 %v1358_v25  ;;  %1408 = vmatpush.bf16.msra.mxu3 %v1358_v25  ;;  %v754_v51 = vsel %vm580_vm0, %v752_v40, %v753_v56  ;;  %v781_v0 = vadd.f32 %v751_v59, %v1655_v2  ;;  %v808_v1 = vsel %vm805_vm1, %v806_v57, %v807_v58  ;;  %v959_v6 = vrot.slane %v1668_v17, 2  ;;  %v1751_v56 = vld [vmem:[%s2003_s2] ss:$0 sm:$0xff] }
  0x27   : > { %v782_v10 = vadd.f32 %v754_v51, %v1662_v11  ;;  %v811_v12 = vsel %vm805_vm1, %v809_v60, %v810_v62  ;;  %v838_v13 = vadd.f32 %v808_v1, %v613_v31  ;;  %v961_v14 = vrot.slane %v1675_v20, 2 }
  0x28   : > { %v839_v16 = vadd.f32 %v811_v12, %v614_v45  ;;  %v854_v2 = vrot.slane %v781_v0, 7  ;;  %v960_v17 = vsel %vm805_vm1, %v958_v63, %v959_v6  ;;  %v962_v18 = vrot.slane %v1678_v21, 2  ;;  %v342_v21 = vld [vmem:[%s1540_s8 + $0x10] sm:$0xe]  ;;  %v1276_v45 = vld [vmem:[%s1540_s8 + $0x18] sm:$0xf] }
  0x29   : > { %1113 = vmatpush.bf16.msra.mxu0 %v1357_v23  ;;  %1409 = vmatpush.bf16.msra.mxu1 %v1357_v23  ;;  %v855_v19 = vrot.slane %v782_v10, 7  ;;  %v290_v26 = vunpack.c.l.bf16 %v282_v50  ;;  %v291_v27 = vunpack.c.l.bf16 %v283_v7  ;;  %v316_v11 = vunpack.c.l.bf16 %v308_v8  ;;  %v1292_v50 = vld [vmem:[%s1540_s8 + $0x18] sm:$0xe]  ;;  %v1293_v7 = vld [vmem:[%s1540_s8 + $0x20] sm:$0xe] }
  0x2a   : > { %1410 = vmatpush.bf16.msra.mxu2 %v1357_v23  ;;  %1411 = vmatpush.bf16.msra.mxu3 %v1357_v23  ;;  %v870_v28 = vadd.f32 %v854_v2, %v717_v24  ;;  %v871_v33 = vadd.f32 %v854_v2, %v718_v54  ;;  %v963_v20 = vsel %vm805_vm1, %v961_v14, %v962_v18  ;;  %v317_v34 = vunpack.c.l.bf16 %v309_v15  ;;  %v1300_v14 = vld [vmem:[%s1540_s8 + $0x20] sm:$0xf]  ;;  %v1301_v15 = vld [vmem:[%s1540_s8 + $0x28] sm:$0xf] }
  0x2b   : > { %v872_v25 = vadd.f32 %v855_v19, %v719_v37  ;;  %v873_v35 = vadd.f32 %v855_v19, %v720_v55  ;;  %v1720_v36 = vmul.f32 %v1535_v3, %v290_v26  ;;  %v1723_v41 = vmul.f32 %v1535_v3, %v291_v27  ;;  %v1284_v37 = vld [vmem:[%s1540_s8 + $0x1c] sm:$0x1]  ;;  %v1308_v19 = vld [vmem:[%s1540_s8 + $0x24] sm:$0x1] }
  0x2c   : > { %v902_v30 = vrot.slane %v870_v28, 1  ;;  %v903_v31 = vrot.slane %v871_v33, 1  ;;  %v1728_v32 = vmul.f32 %v1545_v4, %v290_v26  ;;  %v1731_v44 = vmul.f32 %v1545_v4, %v316_v11  ;;  %v1309_v26 = vld [vmem:[%s1540_s8 + $0x2c] sm:$0x1] }
  0x2d   : > { %v905_v46 = vrot.slane %v872_v25, 1  ;;  %v906_v47 = vrot.slane %v873_v35, 1  ;;  %v1735_v48 = vmul.f32 %v1545_v4, %v291_v27  ;;  %v1738_v52 = vmul.f32 %v1545_v4, %v317_v34 }
  0x2e   : > { %v904_v54 = vsel %vm580_vm0, %v902_v30, %v903_v31  ;;  %v350_v55 = vunpack.c.l.bf16 %v342_v21  ;;  %v351_v23 = vunpack.c.l.bf16 %v343_v42  ;;  %v1743_v24 = vmul.f32 %v1550_v5, %v316_v11  ;;  %v1316_v21 = vld [vmem:[%s1540_s8 + $0x20] sm:$0xe] }
  0x2f   : > { %v907_v39 = vsel %vm580_vm0, %v905_v46, %v906_v47  ;;  %v934_v40 = vadd.f32 %v904_v54, %v838_v13  ;;  %v1754_v57 = vmul.f32 %v1550_v5, %v317_v34  ;;  %v385_v58 = vunpack.c.l.bf16 %v1276_v45  ;;  %v1317_v46 = vld [vmem:[%s1540_s8 + $0x28] sm:$0xe] }
  0x30   : > { %v935_v59 = vadd.f32 %v907_v39, %v839_v16  ;;  %v362_v60 = vmul.f32 %v1550_v5, %v350_v55  ;;  %v1758_v62 = vmul.f32 %v1550_v5, %v351_v23  ;;  %v386_v63 = vunpack.c.l.bf16 %v1277_v53 }
  0x31   : > { %v990_v51 = vadd.f32 %v960_v17, %v934_v40  ;;  %v395_v0 = vmul.f32 %v1558_v9, %v385_v58  ;;  %v411_v1 = vunpack.c.l.bf16 %v1284_v37  ;;  %v412_v6 = vunpack.c.l.bf16 %v1285_v38 }
  0x32   : > { %v991_v8 = vadd.f32 %v963_v20, %v935_v59  ;;  %v396_v10 = vmul.f32 %v1558_v9, %v386_v63  ;;  %v423_v12 = vmul.f32 %v1571_v22, %v385_v58  ;;  %v1766_v13 = vmul.f32 %v1571_v22, %v386_v63 }
  0x33   : > { %v1002_v16 = vadd.f32 %v1751_v56, %v990_v51  ;;  %v424_v2 = vmul.f32 %v1571_v22, %v411_v1  ;;  %v426_v17 = vmul.f32 %v1571_v22, %v412_v6  ;;  %v445_v18 = vunpack.c.l.bf16 %v1292_v50 }
  0x34   : > { %v1003_v27 = vadd.f32 %v1751_v56, %v991_v8  ;;  %v446_v11 = vunpack.c.l.bf16 %v1293_v7  ;;  %v458_v28 = vmul.f32 %v1587_v29, %v411_v1  ;;  %v460_v33 = vmul.f32 %v1587_v29, %v412_v6 }
  0x35   : > { %v1010_v20 = vmax.f32 %v1002_v16, 0.0  ;;  %v457_v34 = vmul.f32 %v1587_v29, %v445_v18  ;;  %v480_v25 = vunpack.c.l.bf16 %v1300_v14  ;;  %v481_v35 = vunpack.c.l.bf16 %v1301_v15 }
  0x36   : > { %v1011_v42 = vmax.f32 %v1003_v27, 0.0  ;;  %v459_v30 = vmul.f32 %v1587_v29, %v446_v11  ;;  %v506_v31 = vunpack.c.l.bf16 %v1308_v19  ;;  %v507_v45 = vunpack.c.l.bf16 %v1309_v26 }
  0x37   : > { %v490_v47 = vmul.f32 %v1620_v43, %v480_v25  ;;  %v491_v53 = vmul.f32 %v1620_v43, %v481_v35  ;;  %v518_v54 = vmul.f32 %v1632_v49, %v480_v25  ;;  %v520_v55 = vmul.f32 %v1632_v49, %v481_v35 }
  0x38   : > { %v1034_v23 = vpack.c.bf16 %v1011_v42, %v1010_v20  ;;  %v519_v37 = vmul.f32 %v1632_v49, %v506_v31  ;;  %v521_v38 = vmul.f32 %v1632_v49, %v507_v45  ;;  %v540_v39 = vunpack.c.l.bf16 %v1316_v21 }
  0x39   : > { %v541_v40 = vunpack.c.l.bf16 %v1317_v46  ;;  %v553_v58 = vmul.f32 %v1649_v61, %v506_v31  ;;  %v1790_v59 = vmul.f32 %v1649_v61, %v507_v45  ;;  %v587_v63 = vrot.slane %v1728_v32, 1  ;;  %v284_v46 = vld [vmem:[%s1540_s8 + $0x20] sm:$0xf] }
  0x3a   : > { %1114 = vmatmul.bf16.vlgmr.msra.gmra.mxu0 %v1034_v23  ;;  %v552_v50 = vmul.f32 %v1649_v61, %v540_v39  ;;  %v588_v51 = vrot.slane %v1731_v44, 1  ;;  %v590_v1 = vrot.slane %v1735_v48, 1  ;;  %v591_v6 = vrot.slane %v1738_v52, 1  ;;  %v310_v23 = vld [vmem:[%s1540_s8 + $0x24] sm:$0x1] }
  0x3b   : > { %v554_v7 = vmul.f32 %v1649_v61, %v541_v40  ;;  %v631_v8 = vrot.slane %v395_v0, 6  ;;  %v632_v14 = vrot.slane %v396_v10, 6  ;;  %v683_v15 = vrot.slane %v457_v34, 1 }
  0x3c   : > { %v589_v16 = vsel %vm580_vm0, %v587_v63, %v588_v51  ;;  %v592_v18 = vsel %vm580_vm0, %v590_v1, %v591_v6  ;;  %v684_v19 = vrot.slane %v458_v28, 1  ;;  %v686_v32 = vrot.slane %v459_v30, 1  ;;  %v311_v1 = vld [vmem:[%s1540_s8 + $0x2c] sm:$0x1] }
  0x3d   : > { %v615_v26 = vadd.f32 %v589_v16, %v1720_v36  ;;  %v616_v27 = vadd.f32 %v592_v18, %v1723_v41  ;;  %v649_v44 = vadd.f32 %v631_v8, %v362_v60  ;;  %v650_v48 = vadd.f32 %v631_v8, %v1743_v24  ;;  %v345_v18 = vld [vmem:[%s1540_s8 + $0x28] sm:$0xe] }
  0x3e   : > { %v651_v52 = vadd.f32 %v632_v14, %v1758_v62  ;;  %v652_v11 = vadd.f32 %v632_v14, %v1754_v57  ;;  %v685_v0 = vsel %vm580_vm0, %v683_v15, %v684_v19  ;;  %v687_v10 = vrot.slane %v460_v33, 1 }
  0x3f   : > { %v721_v20 = vadd.f32 %v685_v0, %v423_v12  ;;  %v722_v34 = vadd.f32 %v684_v19, %v424_v2  ;;  %v755_v25 = vrot.slane %v518_v54, 1  ;;  %v756_v35 = vrot.slane %v519_v37, 1  ;;  %v1278_v0 = vld [vmem:[%s1540_s8 + $0x28] sm:$0xf] }
  0x40   : > { %v688_v28 = vsel %vm580_vm0, %v686_v32, %v687_v10  ;;  %v724_v36 = vadd.f32 %v687_v10, %v426_v17  ;;  %v758_v21 = vrot.slane %v520_v55, 1  ;;  %v759_v41 = vrot.slane %v521_v38, 1  ;;  %v1279_v10 = vld [vmem:[%s1540_s8 + $0x30] sm:$0xf] }
  0x41   : > { %v723_v60 = vadd.f32 %v688_v28, %v1766_v13  ;;  %v757_v24 = vsel %vm580_vm0, %v755_v25, %v756_v35  ;;  %v812_v62 = vrot.slane %v649_v44, 2  ;;  %v813_v57 = vrot.slane %v650_v48, 2  ;;  %v1286_v28 = vld [vmem:[%s1540_s8 + $0x2c] sm:$0x1] }
  0x42   : > { %v760_v42 = vsel %vm580_vm0, %v758_v21, %v759_v41  ;;  %v783_v12 = vadd.f32 %v757_v24, %v490_v47  ;;  %v815_v2 = vrot.slane %v651_v52, 2  ;;  %v816_v33 = vrot.slane %v652_v11, 2  ;;  %v285_v47 = vld [vmem:[%s1540_s8 + $0x28] sm:$0xf] }
  0x43   : > { %v784_v30 = vadd.f32 %v760_v42, %v491_v53  ;;  %v814_v31 = vsel %vm805_vm1, %v812_v62, %v813_v57  ;;  %v964_v17 = vrot.slane %v552_v50, 2  ;;  %v965_v45 = vrot.slane %v553_v58, 2  ;;  %v1287_v62 = vld [vmem:[%s1540_s8 + $0x34] sm:$0x1] }
  0x44   : > { %v817_v13 = vsel %vm805_vm1, %v815_v2, %v816_v33  ;;  %v856_v54 = vrot.slane %v783_v12, 7  ;;  %v967_v55 = vrot.slane %v554_v7, 2  ;;  %v840_v37 = vadd.f32 %v814_v31, %v615_v26  ;;  %v344_v7 = vld [vmem:[%s1540_s8 + $0x20] sm:$0xe] }
  0x45   : > { %v857_v38 = vrot.slane %v784_v30, 7  ;;  %v968_v39 = vrot.slane %v1790_v59, 2  ;;  %v841_v40 = vadd.f32 %v817_v13, %v616_v27  ;;  %v292_v51 = vunpack.c.l.bf16 %v284_v46 }
  0x46   : > { %v874_v53 = vadd.f32 %v856_v54, %v721_v20  ;;  %v875_v63 = vadd.f32 %v856_v54, %v722_v34  ;;  %v966_v6 = vsel %vm805_vm1, %v964_v17, %v965_v45  ;;  %v318_v8 = vunpack.c.l.bf16 %v310_v23  ;;  %v1295_v17 = vld [vmem:[%s1540_s8 + $0x30] sm:$0xe] }
  0x47   : > { %v876_v50 = vadd.f32 %v857_v38, %v723_v60  ;;  %v877_v58 = vadd.f32 %v857_v38, %v724_v36  ;;  %v969_v16 = vsel %vm805_vm1, %v967_v55, %v968_v39  ;;  %v293_v59 = vunpack.c.l.bf16 %v285_v47  ;;  %v1294_v36 = vld [vmem:[%s1540_s8 + $0x28] sm:$0xe]  ;;  %v1302_v23 = vld [vmem:[%s1540_s8 + $0x30] sm:$0xf] }
  0x48   : > { %v908_v14 = vrot.slane %v874_v53, 1  ;;  %v909_v15 = vrot.slane %v875_v63, 1  ;;  %v1822_v26 = vmul.f32 %v1535_v3, %v292_v51  ;;  %v319_v27 = vunpack.c.l.bf16 %v311_v1  ;;  %v1310_v53 = vld [vmem:[%s1540_s8 + $0x34] sm:$0x1]  ;;  %v1311_v63 = vld [vmem:[%s1540_s8 + $0x3c] sm:$0x1] }
  0x49   : > { %v911_v19 = vrot.slane %v876_v50, 1  ;;  %v912_v32 = vrot.slane %v877_v58, 1  ;;  %v1826_v48 = vmul.f32 %v1535_v3, %v293_v59  ;;  %v1829_v52 = vmul.f32 %v1545_v4, %v292_v51  ;;  %v1318_v51 = vld [vmem:[%s1540_s8 + $0x30] sm:$0xe] }
  0x4a   : > { %v910_v44 = vsel %vm580_vm0, %v908_v14, %v909_v15  ;;  %v352_v11 = vunpack.c.l.bf16 %v344_v7  ;;  %v1835_v25 = vmul.f32 %v1545_v4, %v318_v8  ;;  %v353_v35 = vunpack.c.l.bf16 %v345_v18 }
  0x4b   : > { %v913_v20 = vsel %vm580_vm0, %v911_v19, %v912_v32  ;;  %v936_v34 = vadd.f32 %v910_v44, %v840_v37  ;;  %v1840_v41 = vmul.f32 %v1545_v4, %v293_v59  ;;  %v335_v60 = vmul.f32 %v1545_v4, %v319_v27  ;;  %v1303_v37 = vld [vmem:[%s1540_s8 + $0x38] sm:$0xf] }
  0x4c   : > { %v937_v21 = vadd.f32 %v913_v20, %v841_v40  ;;  %v1844_v24 = vmul.f32 %v1550_v5, %v352_v11  ;;  %v367_v42 = vmul.f32 %v1550_v5, %v318_v8  ;;  %v387_v12 = vunpack.c.l.bf16 %v1278_v0  ;;  %v1319_v19 = vld [vmem:[%s1540_s8 + $0x38] sm:$0xe] }
  0x4d   : > { %v992_v57 = vadd.f32 %v966_v6, %v936_v34  ;;  %v388_v2 = vunpack.c.l.bf16 %v1279_v10  ;;  %v369_v30 = vmul.f32 %v1550_v5, %v319_v27  ;;  %v413_v31 = vunpack.c.l.bf16 %v1286_v28 }
  0x4e   : > { %v993_v33 = vadd.f32 %v969_v16, %v937_v21  ;;  %v447_v45 = vunpack.c.l.bf16 %v1294_v36  ;;  %v368_v13 = vmul.f32 %v1550_v5, %v353_v35  ;;  %v397_v54 = vmul.f32 %v1558_v9, %v387_v12 }
  0x4f   : > { %v1004_v46 = vadd.f32 %v1751_v56, %v992_v57  ;;  %v414_v55 = vunpack.c.l.bf16 %v1287_v62  ;;  %v398_v39 = vmul.f32 %v1558_v9, %v388_v2  ;;  %v427_v47 = vmul.f32 %v1571_v22, %v387_v12 }
  0x50   : > { %v1005_v38 = vadd.f32 %v1751_v56, %v993_v33  ;;  %v428_v40 = vmul.f32 %v1571_v22, %v413_v31  ;;  %v429_v50 = vmul.f32 %v1571_v22, %v388_v2  ;;  %v448_v6 = vunpack.c.l.bf16 %v1295_v17 }
  0x51   : > { %v1012_v1 = vmax.f32 %v1004_v46, 0.0  ;;  %v430_v58 = vmul.f32 %v1571_v22, %v414_v55  ;;  %v461_v7 = vmul.f32 %v1587_v29, %v447_v45  ;;  %v482_v14 = vunpack.c.l.bf16 %v1302_v23 }
  0x52   : > { %v1013_v8 = vmax.f32 %v1005_v38, 0.0  ;;  %v483_v15 = vunpack.c.l.bf16 %v1303_v37  ;;  %v462_v16 = vmul.f32 %v1587_v29, %v413_v31  ;;  %v508_v59 = vunpack.c.l.bf16 %v1310_v53 }
  0x53   : > { %v509_v18 = vunpack.c.l.bf16 %v1311_v63  ;;  %v542_v32 = vunpack.c.l.bf16 %v1318_v51  ;;  %v463_v44 = vmul.f32 %v1587_v29, %v448_v6  ;;  %v464_v11 = vmul.f32 %v1587_v29, %v414_v55 }
  0x54   : > { %v1035_v27 = vpack.c.bf16 %v1013_v8, %v1012_v1  ;;  %v492_v0 = vmul.f32 %v1620_v43, %v482_v14  ;;  %v493_v10 = vmul.f32 %v1620_v43, %v483_v15  ;;  %v522_v20 = vmul.f32 %v1632_v49, %v482_v14 }
  0x55   : > { %v523_v34 = vmul.f32 %v1632_v49, %v508_v59  ;;  %v524_v35 = vmul.f32 %v1632_v49, %v483_v15  ;;  %v525_v28 = vmul.f32 %v1632_v49, %v509_v18  ;;  %v543_v36 = vunpack.c.l.bf16 %v1319_v19 }
  0x56   : > { %1119 = vmatmul.bf16.vlgmr.msra.gmra.mxu1 %v1035_v27  ;;  %v1876_v21 = vmul.f32 %v1649_v61, %v542_v32  ;;  %v593_v62 = vrot.slane %v1829_v52, 1  ;;  %v1880_v57 = vmul.f32 %v1649_v61, %v508_v59  ;;  %v594_v12 = vrot.slane %v1835_v25, 1  ;;  %v286_v27 = vld [vmem:[%s1540_s8 + $0x30] sm:$0xf] }
  0x57   : > { %v596_v2 = vrot.slane %v1840_v41, 1  ;;  %v597_v33 = vrot.slane %v335_v60, 1  ;;  %v633_v31 = vrot.slane %v397_v54, 6  ;;  %v634_v17 = vrot.slane %v398_v39, 6 }
  0x58   : > { %v689_v45 = vrot.slane %v461_v7, 1  ;;  %v690_v46 = vrot.slane %v462_v16, 1  ;;  %v595_v55 = vsel %vm580_vm0, %v593_v62, %v594_v12  ;;  %v692_v37 = vrot.slane %v463_v44, 1  ;;  %v287_v44 = vld [vmem:[%s1540_s8 + $0x38] sm:$0xf] }
  0x59   : > { %v598_v23 = vsel %vm580_vm0, %v596_v2, %v597_v33  ;;  %v693_v38 = vrot.slane %v464_v11, 1  ;;  %v558_v52 = vmul.f32 %v1649_v61, %v543_v36  ;;  %v559_v53 = vmul.f32 %v1649_v61, %v509_v18  ;;  %v312_v11 = vld [vmem:[%s1540_s8 + $0x34] sm:$0x1] }
  0x5a   : > { %v653_v63 = vadd.f32 %v633_v31, %v1844_v24  ;;  %v654_v25 = vadd.f32 %v633_v31, %v367_v42  ;;  %v617_v41 = vadd.f32 %v595_v55, %v1822_v26  ;;  %v655_v60 = vadd.f32 %v634_v17, %v368_v13 }
  0x5b   : > { %v656_v54 = vadd.f32 %v634_v17, %v369_v30  ;;  %v691_v39 = vsel %vm580_vm0, %v689_v45, %v690_v46  ;;  %v618_v51 = vadd.f32 %v598_v23, %v1826_v48  ;;  %v694_v1 = vsel %vm580_vm0, %v692_v37, %v693_v38 }
  0x5c   : > { %v725_v6 = vadd.f32 %v691_v39, %v427_v47  ;;  %v726_v8 = vadd.f32 %v690_v46, %v428_v40  ;;  %v761_v7 = vrot.slane %v522_v20, 1  ;;  %v762_v14 = vrot.slane %v523_v34, 1  ;;  %v347_v46 = vld [vmem:[%s1540_s8 + $0x38] sm:$0xe] }
  0x5d   : > { %v764_v15 = vrot.slane %v524_v35, 1  ;;  %v765_v24 = vrot.slane %v525_v28, 1  ;;  %v818_v42 = vrot.slane %v653_v63, 2  ;;  %v819_v16 = vrot.slane %v654_v25, 2  ;;  %v1280_v39 = vld [vmem:[%s1540_s8 + $0x38] sm:$0xf] }
  0x5e   : > { %v821_v26 = vrot.slane %v655_v60, 2  ;;  %v822_v30 = vrot.slane %v656_v54, 2  ;;  %v727_v13 = vadd.f32 %v694_v1, %v429_v50  ;;  %v728_v59 = vadd.f32 %v693_v38, %v430_v58  ;;  %v313_v58 = vld [vmem:[%s1540_s8 + $0x3c] sm:$0x1] }
  0x5f   : > { %v763_v48 = vsel %vm580_vm0, %v761_v7, %v762_v14  ;;  %v766_v18 = vsel %vm580_vm0, %v764_v15, %v765_v24  ;;  %v820_v19 = vsel %vm805_vm1, %v818_v42, %v819_v16  ;;  %v970_v20 = vrot.slane %v1876_v21, 2  ;;  %v1296_v14 = vld [vmem:[%s1540_s8 + $0x38] sm:$0xe]  ;;  %v1288_v16 = vld [vmem:[%s1540_s8 + $0x3c] sm:$0x1] }
  0x60   : > { %v785_v47 = vadd.f32 %v763_v48, %v492_v0  ;;  %v786_v40 = vadd.f32 %v766_v18, %v493_v10  ;;  %v823_v32 = vsel %vm805_vm1, %v821_v26, %v822_v30  ;;  %v971_v34 = vrot.slane %v1880_v57, 2  ;;  %v346_v0 = vld [vmem:[%s1540_s8 + $0x30] sm:$0xe]  ;;  %v1289_v26 = vld [vmem:[%s1540_s8 + $0x44] sm:$0x1] }
  0x61   : > { %v973_v50 = vrot.slane %v558_v52, 2  ;;  %v842_v35 = vadd.f32 %v820_v19, %v617_v41  ;;  %v974_v62 = vrot.slane %v559_v53, 2  ;;  %v843_v10 = vadd.f32 %v823_v32, %v618_v51  ;;  %v1281_v51 = vld [vmem:[%s1540_s8 + $0x40] sm:$0xf] }
  0x62   : > { %v858_v28 = vrot.slane %v785_v47, 7  ;;  %v859_v36 = vrot.slane %v786_v40, 7  ;;  %v294_v12 = vunpack.c.l.bf16 %v286_v27  ;;  %v295_v2 = vunpack.c.l.bf16 %v287_v44  ;;  %v1297_v30 = vld [vmem:[%s1540_s8 + $0x40] sm:$0xe] }
  0x63   : > { %v320_v33 = vunpack.c.l.bf16 %v312_v11  ;;  %v972_v57 = vsel %vm805_vm1, %v970_v20, %v971_v34  ;;  %v975_v55 = vsel %vm805_vm1, %v973_v50, %v974_v62  ;;  %v321_v23 = vunpack.c.l.bf16 %v313_v58  ;;  %v1304_v20 = vld [vmem:[%s1540_s8 + $0x40] sm:$0xf]  ;;  %v1305_v34 = vld [vmem:[%s1540_s8 + $0x48] sm:$0xf]  ;;  %v1313_v62 = vld [vmem:[%s1540_s8 + $0x4c] sm:$0x1] }
  0x64   : > { %v878_v31 = vadd.f32 %v858_v28, %v725_v6  ;;  %v879_v17 = vadd.f32 %v858_v28, %v726_v8  ;;  %v880_v45 = vadd.f32 %v859_v36, %v727_v13  ;;  %v881_v21 = vadd.f32 %v859_v36, %v728_v59  ;;  %v1312_v36 = vld [vmem:[%s1540_s8 + $0x44] sm:$0x1] }
  0x65   : > { %v354_v37 = vunpack.c.l.bf16 %v346_v0  ;;  %v1908_v25 = vmul.f32 %v1535_v3, %v294_v12  ;;  %v1911_v41 = vmul.f32 %v1535_v3, %v295_v2  ;;  %v1914_v60 = vmul.f32 %v1545_v4, %v294_v12 }
  0x66   : > { %v914_v38 = vrot.slane %v878_v31, 1  ;;  %v915_v52 = vrot.slane %v879_v17, 1  ;;  %v917_v53 = vrot.slane %v880_v45, 1  ;;  %v918_v63 = vrot.slane %v881_v21, 1 }
  0x67   : > { %v355_v54 = vunpack.c.l.bf16 %v347_v46  ;;  %v1921_v8 = vmul.f32 %v1545_v4, %v320_v33  ;;  %v1924_v7 = vmul.f32 %v1545_v4, %v295_v2  ;;  %v1928_v24 = vmul.f32 %v1545_v4, %v321_v23 }
  0x68   : > { %v916_v1 = vsel %vm580_vm0, %v914_v38, %v915_v52  ;;  %v919_v6 = vsel %vm580_vm0, %v917_v53, %v918_v63  ;;  %v370_v42 = vmul.f32 %v1550_v5, %v354_v37  ;;  %v371_v13 = vmul.f32 %v1550_v5, %v320_v33  ;;  %v1321_v33 = vld [vmem:[%s1540_s8 + $0x48] sm:$0xe] }
  0x69   : > { %v938_v3 = vadd.f32 %v916_v1, %v842_v35  ;;  %v939_v15 = vadd.f32 %v919_v6, %v843_v10  ;;  %v372_v59 = vmul.f32 %v1550_v5, %v355_v54  ;;  %v389_v48 = vunpack.c.l.bf16 %v1280_v39 }
  0x6a   : > { %v390_v18 = vunpack.c.l.bf16 %v1281_v51  ;;  %v373_v4 = vmul.f32 %v1550_v5, %v321_v23  ;;  %v449_v19 = vunpack.c.l.bf16 %v1296_v14  ;;  %v415_v27 = vunpack.c.l.bf16 %v1288_v16  ;;  %v1320_v5 = vld [vmem:[%s1540_s8 + $0x40] sm:$0xe] }
  0x6b   : > { %v994_v47 = vadd.f32 %v972_v57, %v938_v3  ;;  %v995_v40 = vadd.f32 %v975_v55, %v939_v15  ;;  %v399_v32 = vmul.f32 %v1558_v9, %v389_v48  ;;  %v416_v44 = vunpack.c.l.bf16 %v1289_v26 }
  0x6c   : > { %v450_v11 = vunpack.c.l.bf16 %v1297_v30  ;;  %v400_v35 = vmul.f32 %v1558_v9, %v390_v18  ;;  %v431_v28 = vmul.f32 %v1571_v22, %v389_v48  ;;  %v432_v0 = vmul.f32 %v1571_v22, %v415_v27 }
  0x6d   : > { %v1006_v50 = vadd.f32 %v1751_v56, %v994_v47  ;;  %v1007_v58 = vadd.f32 %v1751_v56, %v995_v40  ;;  %v433_v10 = vmul.f32 %v1571_v22, %v390_v18  ;;  %v434_v12 = vmul.f32 %v1571_v22, %v416_v44 }
  0x6e   : > { %v465_v2 = vmul.f32 %v1587_v29, %v449_v19  ;;  %v484_v45 = vunpack.c.l.bf16 %v1304_v20  ;;  %v485_v21 = vunpack.c.l.bf16 %v1305_v34  ;;  %v466_v9 = vmul.f32 %v1587_v29, %v415_v27 }
  0x6f   : > { %v1014_v31 = vmax.f32 %v1006_v50, 0.0  ;;  %v1015_v17 = vmax.f32 %v1007_v58, 0.0  ;;  %v510_v46 = vunpack.c.l.bf16 %v1312_v36  ;;  %v511_v57 = vunpack.c.l.bf16 %v1313_v62 }
  0x70   : > { %v544_v55 = vunpack.c.l.bf16 %v1320_v5  ;;  %v467_v37 = vmul.f32 %v1587_v29, %v450_v11  ;;  %v468_v38 = vmul.f32 %v1587_v29, %v416_v44  ;;  %v545_v52 = vunpack.c.l.bf16 %v1321_v33 }
  0x71   : > { %v1036_v23 = vpack.c.bf16 %v1015_v17, %v1014_v31  ;;  %v494_v22 = vmul.f32 %v1620_v43, %v484_v45  ;;  %v495_v53 = vmul.f32 %v1620_v43, %v485_v21  ;;  %v526_v63 = vmul.f32 %v1632_v49, %v484_v45 }
  0x72   : > { %v527_v54 = vmul.f32 %v1632_v49, %v510_v46  ;;  %v528_v39 = vmul.f32 %v1632_v49, %v485_v21  ;;  %v529_v51 = vmul.f32 %v1632_v49, %v511_v57  ;;  %v560_v1 = vmul.f32 %v1649_v61, %v544_v55 }
  0x73   : > { %1124 = vmatmul.bf16.vlgmr.msra.gmra.mxu2 %v1036_v23  ;;  %v599_v6 = vrot.slane %v1914_v60, 1  ;;  %v600_v29 = vrot.slane %v1921_v8, 1  ;;  %v602_v14 = vrot.slane %v1924_v7, 1  ;;  %v603_v3 = vrot.slane %v1928_v24, 1 }
  0x74   : > { %v635_v43 = vrot.slane %v399_v32, 6  ;;  %v561_v15 = vmul.f32 %v1649_v61, %v510_v46  ;;  %v636_v16 = vrot.slane %v400_v35, 6  ;;  %v695_v26 = vrot.slane %v465_v2, 1 }
  0x75   : > { %v696_v30 = vrot.slane %v466_v9, 1  ;;  %v562_v48 = vmul.f32 %v1649_v61, %v545_v52  ;;  %v698_v47 = vrot.slane %v467_v37, 1  ;;  %v563_v40 = vmul.f32 %v1649_v61, %v511_v57 }
  0x76   : > { %v657_v18 = vadd.f32 %v635_v43, %v370_v42  ;;  %v658_v49 = vadd.f32 %v635_v43, %v371_v13  ;;  %v601_v60 = vsel %vm580_vm0, %v599_v6, %v600_v29  ;;  %v604_v8 = vsel %vm580_vm0, %v602_v14, %v603_v3 }
  0x77   : > { %v659_v7 = vadd.f32 %v636_v16, %v372_v59  ;;  %v660_v19 = vadd.f32 %v636_v16, %v373_v4  ;;  %v697_v24 = vsel %vm580_vm0, %v695_v26, %v696_v30  ;;  %v699_v32 = vrot.slane %v468_v38, 1 }
  0x78   : > { %v767_v27 = vrot.slane %v526_v63, 1  ;;  %v730_v44 = vadd.f32 %v696_v30, %v432_v0  ;;  %v768_v11 = vrot.slane %v527_v54, 1  ;;  %v770_v20 = vrot.slane %v528_v39, 1 }
  0x79   : > { %v771_v34 = vrot.slane %v529_v51, 1  ;;  %v700_v42 = vsel %vm580_vm0, %v698_v47, %v699_v32  ;;  %v729_v13 = vadd.f32 %v697_v24, %v431_v28  ;;  %v824_v50 = vrot.slane %v657_v18, 2 }
  0x7a   : > { %v825_v58 = vrot.slane %v658_v49, 2  ;;  %v732_v61 = vadd.f32 %v699_v32, %v434_v12  ;;  %v769_v35 = vsel %vm580_vm0, %v767_v27, %v768_v11  ;;  %v827_v59 = vrot.slane %v659_v7, 2 }
  0x7b   : > { %v772_v36 = vsel %vm580_vm0, %v770_v20, %v771_v34  ;;  %v731_v4 = vadd.f32 %v700_v42, %v433_v10  ;;  %v787_v62 = vadd.f32 %v769_v35, %v494_v22  ;;  %v828_v2 = vrot.slane %v660_v19, 2 }
  0x7c   : > { %v788_v5 = vadd.f32 %v772_v36, %v495_v53  ;;  %v619_v0 = vadd.f32 %v601_v60, %v1908_v25  ;;  %v620_v33 = vadd.f32 %v604_v8, %v1911_v41  ;;  %v826_v31 = vsel %vm805_vm1, %v824_v50, %v825_v58 }
  0x7d   : > { %v829_v28 = vsel %vm805_vm1, %v827_v59, %v828_v2  ;;  %v860_v17 = vrot.slane %v787_v62, 7  ;;  %v976_v12 = vrot.slane %v560_v1, 2  ;;  %v977_v21 = vrot.slane %v561_v15, 2 }
  0x7e   : > { %v861_v45 = vrot.slane %v788_v5, 7  ;;  %v979_v9 = vrot.slane %v562_v48, 2  ;;  %v980_v46 = vrot.slane %v563_v40, 2  ;;  %v844_v37 = vadd.f32 %v826_v31, %v619_v0  ;;  %v1447_v48 = vld [vmem:[%s2005_s4] ss:$0 sm:$0xff] }
  0x7f   : > { %v882_v57 = vadd.f32 %v860_v17, %v729_v13  ;;  %v883_v55 = vadd.f32 %v860_v17, %v730_v44  ;;  %v845_v38 = vadd.f32 %v829_v28, %v620_v33  ;;  %v978_v54 = vsel %vm805_vm1, %v976_v12, %v977_v21 }
  0x80   : > { %v884_v10 = vadd.f32 %v861_v45, %v731_v4  ;;  %v885_v23 = vadd.f32 %v861_v45, %v732_v61  ;;  %v981_v39 = vsel %vm805_vm1, %v979_v9, %v980_v46 }
  0x81   : > { %v920_v52 = vrot.slane %v882_v57, 1  ;;  %v921_v25 = vrot.slane %v883_v55, 1 }
  0x82   : > { %v923_v22 = vrot.slane %v884_v10, 1  ;;  %v924_v41 = vrot.slane %v885_v23, 1 }
  0x83   : > { %v922_v53 = vsel %vm580_vm0, %v920_v52, %v921_v25 }
  0x84   : > { %v925_v63 = vsel %vm580_vm0, %v923_v22, %v924_v41  ;;  %v940_v51 = vadd.f32 %v922_v53, %v844_v37 }
  0x85   : > { %v941_v1 = vadd.f32 %v925_v63, %v845_v38 }
  0x86   : > { %v996_v6 = vadd.f32 %v978_v54, %v940_v51 }
  0x87   : > { %v997_v29 = vadd.f32 %v981_v39, %v941_v1 }
  0x88   : > { %v1008_v14 = vadd.f32 %v1751_v56, %v996_v6 }
  0x89   : > { %v1009_v3 = vadd.f32 %v1751_v56, %v997_v29 }
  0x8a   : > { %v1016_v43 = vmax.f32 %v1008_v14, 0.0 }
  0x8b   : > { %v1017_v15 = vmax.f32 %v1009_v3, 0.0 }
  0x8d   : > { %v1037_v16 = vpack.c.bf16 %v1017_v15, %v1016_v43 }
  0x8f   : > { %1129 = vmatmul.bf16.vlgmr.msra.gmra.mxu3 %v1037_v16 }
  0xb7   : > { %v1115_v26 = vpop.f32.mrf.mxu0 }
  0xb8   : > { %v1116_v18 = vadd.f32 %v1447_v48, %v1115_v26 }
  0xba   : > { %v1135_v19 = vmax.f32 %v1116_v18, 0.0 }
  0xbf   : > { %v1117_v47 = vpop.f32.mrf.mxu0 }
  0xc0   : > { %v1118_v60 = vadd.f32 %v1447_v48, %v1117_v47 }
  0xc2   : > { %v1136_v24 = vmax.f32 %v1118_v60, 0.0 }
  0xc4   : > { %v1368_v27 = vpack.c.bf16 %v1136_v24, %v1135_v19 }
  0xc6   : > { %1369 = vst [vmem:[%s275_s25] sm:$0xff] %v1368_v27  }
  0xd3   : > { %v1120_v30 = vpop.f32.mrf.mxu1 }
  0xd4   : > { %v1121_v49 = vadd.f32 %v1447_v48, %v1120_v30 }
  0xd6   : > { %v1137_v56 = vmax.f32 %v1121_v49, 0.0 }
  0xdb   : > { %v1122_v40 = vpop.f32.mrf.mxu1 }
  0xdc   : > { %v1123_v8 = vadd.f32 %v1447_v48, %v1122_v40 }
  0xde   : > { %v1138_v32 = vmax.f32 %v1123_v8, 0.0 }
  0xe0   : > { %v1373_v44 = vpack.c.bf16 %v1138_v32, %v1137_v56 }
  0xe2   : > { %1385 = vst [vmem:[%s275_s25 + $0x8] sm:$0xff] %v1373_v44  }
  0xf6   : > { %v1125_v7 = vpop.f32.mrf.mxu2 }
  0xf7   : > { %v1126_v11 = vadd.f32 %v1447_v48, %v1125_v7 }
  0xf9   : > { %v1139_v42 = vmax.f32 %v1126_v11, 0.0 }
  0xfe   : > { %v1127_v20 = vpop.f32.mrf.mxu2 }
  0xff   : > { %v1128_v34 = vadd.f32 %v1447_v48, %v1127_v20 }
 0x101   : > { %v1140_v13 = vmax.f32 %v1128_v34, 0.0 }
 0x103   : > { %v1378_v50 = vpack.c.bf16 %v1140_v13, %v1139_v42 }
 0x105   : > { %1386 = vst [vmem:[%s275_s25 + $0x10] sm:$0xff] %v1378_v50  }
 0x112   : > { %v1130_v58 = vpop.f32.mrf.mxu3 }
 0x113   : > { %v1131_v61 = vadd.f32 %v1447_v48, %v1130_v58 }
 0x115   : > { %v1141_v59 = vmax.f32 %v1131_v61, 0.0 }
 0x11a   : > { %v1132_v35 = vpop.f32.mrf.mxu3 }
 0x11b   : > { %v1133_v36 = vadd.f32 %v1447_v48, %v1132_v35 }
 0x11d   : > { %v1142_v4 = vmax.f32 %v1133_v36, 0.0 }
 0x11f   : > { %v1383_v62 = vpack.c.bf16 %v1142_v4, %v1141_v59 }
 0x121   : > { %1387 = vst [vmem:[%s275_s25 + $0x18] sm:$0xff] %v1383_v62  }
 0x122 PF: > { %s15_s20 = sadd.s32 1, %s1470_s20   ;;  %s2007_s18 = smov %s1466_s19 }
 0x123   : > { %p12_p5 = scmp.ge.s32.totalorder %s15_s20, 4   ;;  %s2008_s19 = smov %s2010_s21 }
 0x125   :  { %14 = sbr.rel (!%p12_p5) target bundleno = 2 (0x2), region = 82 }

// kernel: mobilenet_v1.16
= control target key start
LH: loop header
LB: loop body
LE: loop exit
PB: predicated region body
PF: predicated region fallthrough
CT: control target
= control target key end

     0   :  { %s1139_s18 = smov 0   ;;  %s1141_s19 = smov 0   ;;  %s1495_s0 = inlined_call_operand.vmem [shape: bf16[4,2,5,5,128], index: 0, kind: input, shape index: {}]   ;;  %s1496_s1 = inlined_call_operand.vmem [shape: f32[9,128], index: 1, kind: input, shape index: {}]   ;;  %s1497_s2 = inlined_call_operand.vmem [shape: f32[1,128], index: 2, kind: input, shape index: {}]   ;;  %s1498_s3 = inlined_call_operand.vmem [shape: bf16[128,256], index: 3, kind: input, shape index: {}]   ;;  %s1499_s4 = inlined_call_operand.vmem [shape: f32[1,256], index: 4, kind: input, shape index: {}]   ;;  %s1500_s5 = inlined_call_operand.vmem [shape: bf16[2,16,256], index: 5, kind: output, shape index: {}]  }
   0x1   :  { %s1143_s20 = smov 0   ;;  %s1145_s21 = smov 0  }
   0x2   :  { %s1147_s22 = smov 0  }
   0x3 LB: > { %s27_s23 = sadd.s32 1, %s1103_s21  ;;  %p41_p1 = scmp.ne.s32.totalorder %s1095_s19, %s1091_s18  ;;  %s1107_s22 = sphi %s1147_s22, %s15_s22   ;;  %s1103_s21 = sphi %s1145_s21, %s1504_s21   ;;  %s1099_s20 = sphi %s1143_s20, %s1503_s20   ;;  %s1095_s19 = sphi %s1141_s19, %s1502_s19   ;;  %s1091_s18 = sphi %s1139_s18, %s1501_s18  }
   0x4   : > { %p29_p0 = scmp.ge.s32.totalorder %s27_s23, 2  ;;  %p42_p2 = scmp.eq.s32.totalorder %s1107_s22, 0 }
   0x5   : > { %s34_s25 = sadd.s32 1, %s1095_s19  ;;  %p900_p5 = scmp.ge.s32.totalorder %s1107_s22, 2 }
   0x6   : > { %s1506_s23 = smov (%p29_p0, %s27_s23), 0  ;;  %p43_p3 = por %p42_p2, %p41_p1 }
   0x7   : > { %s31_s24 = ssub.s32 %s1103_s21, %s1506_s23  ;;  %212 = sbr.rel (%p900_p5) target bundleno = 29 (0x1d), region = 32 }
   0x8   : > { %p32_p4 = scmp.eq.s32.totalorder %s31_s24, 0 }
   0xa   : > { %s1174_s26 = scalar_select %p32_p4, %s1095_s19, %s34_s25  }
   0xc   : > { %215 = sbr.rel (!%p43_p3) target bundleno = 29 (0x1d), region = 36  ;;  %s217_s27 = sand.u32 (%p43_p3), 1, %s1095_s19  }
   0xd   : > { %s1017_s28 = smul.u32 (%p43_p3), 20, %s1103_s21 }
   0xe   : > { %s1016_s29 = smul.u32 (%p43_p3), 80, %s217_s27 }
   0xf   : > { %s222_s7 = scalar_lea.vmem (%p43_p3), %s1495_s0, %s1017_s28 }
  0x10   : > { %v239_v0 = vld [vmem:[%s222_s7] sm:$0xff] (%p43_p3)   ;;  %v243_v1 = vld [vmem:[%s222_s7 + $0x8] sm:$0xff] (%p43_p3)   ;;  %v247_v2 = vld [vmem:[%s222_s7 + $0x10] sm:$0xf] (%p43_p3)  ;;  %s219_s8 = scalar_lea.vmem (%p43_p3), [#allocation3], %s1016_s29 }
  0x11   : > { %240 = vst [vmem:[%s219_s8] sm:$0xff] %v239_v0   ;;  %v249_v3 = vld [vmem:[%s222_s7 + $0x28] sm:$0xff]   ;;  %v253_v4 = vld [vmem:[%s222_s7 + $0x30] sm:$0xff]   ;;  %v257_v5 = vld [vmem:[%s222_s7 + $0x38] sm:$0xf] }
  0x12   : > { %244 = vst [vmem:[%s219_s8 + $0x8] sm:$0xff] %v243_v1   ;;  %v259_v6 = vld [vmem:[%s222_s7 + $0x50] sm:$0xff]   ;;  %v263_v7 = vld [vmem:[%s222_s7 + $0x58] sm:$0xff]   ;;  %v267_v8 = vld [vmem:[%s222_s7 + $0x60] sm:$0xf] }
  0x13   : > { %248 = vst [vmem:[%s219_s8 + $0x10] sm:$0xf] %v247_v2  ;;  %v269_v9 = vld [vmem:[%s222_s7 + $0x78] sm:$0xff]   ;;  %v273_v10 = vld [vmem:[%s222_s7 + $0x80] sm:$0xff]   ;;  %v277_v11 = vld [vmem:[%s222_s7 + $0x88] sm:$0xf] }
  0x14   : > { %250 = vst [vmem:[%s219_s8 + $0x14] sm:$0xff] %v249_v3  }
  0x15   : > { %254 = vst [vmem:[%s219_s8 + $0x1c] sm:$0xff] %v253_v4  }
  0x16   : > { %258 = vst [vmem:[%s219_s8 + $0x24] sm:$0xf] %v257_v5 }
  0x17   : > { %260 = vst [vmem:[%s219_s8 + $0x28] sm:$0xff] %v259_v6  }
  0x18   : > { %264 = vst [vmem:[%s219_s8 + $0x30] sm:$0xff] %v263_v7  }
  0x19   : > { %268 = vst [vmem:[%s219_s8 + $0x38] sm:$0xf] %v267_v8 }
  0x1a   : > { %270 = vst [vmem:[%s219_s8 + $0x3c] sm:$0xff] %v269_v9  }
  0x1b   : > { %274 = vst [vmem:[%s219_s8 + $0x44] sm:$0xff] %v273_v10  }
  0x1c   : > { %278 = vst [vmem:[%s219_s8 + $0x4c] sm:$0xf] %v277_v11 }
  0x1d PF: > { %p902_p6 = scmp.ge.s32.totalorder %s1107_s22, 1  ;;  %p341_p7 = scmp.lt.s32.totalorder %s1107_s22, 3 }
  0x1f   : > { %p342_p8 = pnand %p902_p6, %p341_p7 }
  0x20   : > { %s348_s15 = sand.u32 (!%p342_p8), 1, %s1091_s18   ;;  %p400_p9 = scmp.lt.s32.totalorder (!%p342_p8), %s1099_s20, 1 }
  0x21   : > { %345 = sbr.rel (%p342_p8) target bundleno = 240 (0xf0), region = 77 }
  0x22   : > { %s1018_s27 = smul.u32 (!%p342_p8), 80, %s348_s15 }
  0x24   : > { %s1331_s6 = scalar_lea.vmem (!%p342_p8), [#allocation3], %s1018_s27 }
  0x26   : > { %v991_v12 = vld [vmem:[%s1498_s3 + $0x70] sm:$0xf]  ;;  %v1015_v13 = vld [vmem:[%s1498_s3 + $0x74] sm:$0xf0]  ;;  %v1014_v14 = vld [vmem:[%s1498_s3 + $0x74] sm:$0xf] }
  0x27   : > { %v992_v15 = vor.u32 %v1015_v13, %v991_v12  ;;  %v993_v16 = vld [vmem:[%s1498_s3 + $0x78] sm:$0xf0]  ;;  %v983_v17 = vld [vmem:[%s1498_s3 + $0x60] sm:$0xf]  ;;  %v1013_v18 = vld [vmem:[%s1498_s3 + $0x64] sm:$0xf0] }
  0x28   : > { %v996_v19 = vor.u32 %v1014_v14, %v993_v16  ;;  %v1012_v20 = vld [vmem:[%s1498_s3 + $0x64] sm:$0xf]  ;;  %v985_v21 = vld [vmem:[%s1498_s3 + $0x68] sm:$0xf0]  ;;  %v984_v22 = vor.u32 %v1013_v18, %v983_v17  ;;  %v975_v24 = vld [vmem:[%s1498_s3 + $0x50] sm:$0xf] }
  0x29   : > { %745 = vmatpush.bf16.msra.mxu0 %v992_v15  ;;  %v988_v23 = vor.u32 %v1012_v20, %v985_v21  ;;  %v1011_v25 = vld [vmem:[%s1498_s3 + $0x54] sm:$0xf0]  ;;  %v1010_v26 = vld [vmem:[%s1498_s3 + $0x54] sm:$0xf]  ;;  %v977_v27 = vld [vmem:[%s1498_s3 + $0x58] sm:$0xf0] }
  0x2a   : > { %759 = vmatpush.bf16.msra.mxu1 %v996_v19  ;;  %v967_v28 = vld [vmem:[%s1498_s3 + $0x40] sm:$0xf]  ;;  %v976_v29 = vor.u32 %v1011_v25, %v975_v24  ;;  %v1009_v30 = vld [vmem:[%s1498_s3 + $0x44] sm:$0xf0]  ;;  %v1008_v31 = vld [vmem:[%s1498_s3 + $0x44] sm:$0xf]  ;;  %v980_v33 = vor.u32 %v1010_v26, %v977_v27 }
  0x2b   : > { %v969_v32 = vld [vmem:[%s1498_s3 + $0x48] sm:$0xf0]  ;;  %v1235_v34 = vld [vmem:[%s1498_s3 + $0x30] sm:$0xf]  ;;  %v1240_v35 = vld [vmem:[%s1498_s3 + $0x34] sm:$0xf0]  ;;  %v968_v48 = vor.u32 %v1009_v30, %v967_v28 }
  0x2c   : > { %v1245_v36 = vld [vmem:[%s1498_s3 + $0x34] sm:$0xf]  ;;  %v1250_v37 = vld [vmem:[%s1498_s3 + $0x38] sm:$0xf0]  ;;  %v1255_v38 = vld [vmem:[%s1498_s3 + $0x20] sm:$0xf]  ;;  %v972_v51 = vor.u32 %v1008_v31, %v969_v32  ;;  %v960_v53 = vor.u32 %v1240_v35, %v1235_v34 }
  0x2d   : > { %746 = vmatpush.bf16.msra.mxu0 %v984_v22  ;;  %v1260_v39 = vld [vmem:[%s1498_s3 + $0x24] sm:$0xf0]  ;;  %v1265_v40 = vld [vmem:[%s1498_s3 + $0x24] sm:$0xf]  ;;  %v1270_v41 = vld [vmem:[%s1498_s3 + $0x28] sm:$0xf0]  ;;  %v964_v54 = vor.u32 %v1245_v36, %v1250_v37 }
  0x2e   : > { %760 = vmatpush.bf16.msra.mxu1 %v988_v23  ;;  %v1275_v42 = vld [vmem:[%s1498_s3 + $0x10] sm:$0xf]  ;;  %v1280_v43 = vld [vmem:[%s1498_s3 + $0x14] sm:$0xf0]  ;;  %v1285_v44 = vld [vmem:[%s1498_s3 + $0x14] sm:$0xf]  ;;  %v952_v56 = vor.u32 %v1260_v39, %v1255_v38  ;;  %v956_v57 = vor.u32 %v1265_v40, %v1270_v41 }
  0x2f   : > { %v1290_v45 = vld [vmem:[%s1498_s3 + $0x18] sm:$0xf0]  ;;  %v1295_v46 = vld [vmem:[%s1498_s3] sm:$0xf]  ;;  %v1300_v47 = vld [vmem:[%s1498_s3 + $0x4] sm:$0xf0]  ;;  %v944_v58 = vor.u32 %v1280_v43, %v1275_v42 }
  0x30   : > { %v1306_v49 = vld [vmem:[%s1498_s3 + $0x4] sm:$0xf]  ;;  %v1311_v50 = vld [vmem:[%s1498_s3 + $0x8] sm:$0xf0]  ;;  %v1059_v52 = vld [vmem:[%s1496_s1] ss:$0 sm:$0xff]  ;;  %v948_v59 = vor.u32 %v1285_v44, %v1290_v45  ;;  %v936_v63 = vor.u32 %v1300_v47, %v1295_v46 }
  0x31   : > { %747 = vmatpush.bf16.msra.mxu0 %v976_v29  ;;  %v1060_v55 = vld [vmem:[%s1496_s1 + $0x1] ss:$0 sm:$0xff]  ;;  %v414_v61 = vld [vmem:[%s1331_s6 + $0x4] sm:$0x3]  ;;  %v415_v62 = vld [vmem:[%s1331_s6 + $0x8] sm:$0x3]  ;;  %v940_v7 = vor.u32 %v1306_v49, %v1311_v50 }
  0x32   : > { %761 = vmatpush.bf16.msra.mxu1 %v980_v33  ;;  %v413_v60 = vld [vmem:[%s1331_s6] sm:$0x3]  ;;  %v416_v0 = vld [vmem:[%s1331_s6 + $0xc] sm:$0x3]  ;;  %v418_v2 = vunpack.c.l.bf16 %v414_v61  ;;  %v419_v3 = vunpack.c.l.bf16 %v415_v62  ;;  %v905_v4 = vld [vmem:[%s1331_s6 + $0x14] sm:$0x3] }
  0x33   : > { %v417_v1 = vunpack.c.l.bf16 %v413_v60  ;;  %v906_v5 = vld [vmem:[%s1331_s6 + $0x18] sm:$0x3]  ;;  %v1061_v6 = vld [vmem:[%s1496_s1 + $0x2] ss:$0 sm:$0xff]  ;;  %v420_v8 = vunpack.c.l.bf16 %v416_v0  ;;  %v907_v9 = vld [vmem:[%s1331_s6 + $0x1c] sm:$0x3]  ;;  %v432_v11 = vunpack.c.l.bf16 %v905_v4 }
  0x34   : > { %v908_v10 = vld [vmem:[%s1331_s6 + $0x20] sm:$0x3]  ;;  %v433_v12 = vunpack.c.l.bf16 %v906_v5  ;;  %v1351_v15 = vmul.f32 %v1059_v52, %v418_v2  ;;  %v1353_v16 = vmul.f32 %v1059_v52, %v419_v3  ;;  %v434_v17 = vunpack.c.l.bf16 %v907_v9  ;;  %v443_v18 = vld [vmem:[%s1331_s6 + $0x4] sm:$0x7]  ;;  %v444_v19 = vld [vmem:[%s1331_s6 + $0x8] sm:$0x7] }
  0x35   : > { %748 = vmatpush.bf16.msra.mxu0 %v968_v48  ;;  %v442_v13 = vld [vmem:[%s1331_s6] sm:$0x7]  ;;  %v1349_v14 = vmul.f32 %v1059_v52, %v417_v1  ;;  %v445_v20 = vld [vmem:[%s1331_s6 + $0xc] sm:$0x7]  ;;  %v1358_v21 = vmul.f32 %v1059_v52, %v420_v8  ;;  %v435_v22 = vunpack.c.l.bf16 %v908_v10  ;;  %v1360_v23 = vmul.f32 %v1060_v55, %v432_v11  ;;  %v909_v25 = vld [vmem:[%s1331_s6 + $0x28] sm:$0x3] }
  0x36   : > { %762 = vmatpush.bf16.msra.mxu1 %v972_v51  ;;  %v1362_v24 = vmul.f32 %v1060_v55, %v433_v12  ;;  %v910_v26 = vld [vmem:[%s1331_s6 + $0x2c] sm:$0x3]  ;;  %v911_v27 = vld [vmem:[%s1331_s6 + $0x30] sm:$0x3]  ;;  %v1367_v28 = vmul.f32 %v1060_v55, %v434_v17  ;;  %v446_v29 = vunpack.c.l.bf16 %v442_v13  ;;  %v447_v30 = vunpack.c.l.bf16 %v443_v18  ;;  %v912_v32 = vld [vmem:[%s1331_s6 + $0x34] sm:$0x3] }
  0x37   : > { %v448_v31 = vunpack.c.l.bf16 %v444_v19  ;;  %v1062_v33 = vld [vmem:[%s1496_s1 + $0x3] ss:$0 sm:$0xff]  ;;  %v913_v34 = vld [vmem:[%s1331_s6 + $0x3c] sm:$0x3]  ;;  %v1374_v35 = vmul.f32 %v1060_v55, %v435_v22  ;;  %v449_v36 = vunpack.c.l.bf16 %v445_v20  ;;  %v461_v37 = vunpack.c.l.bf16 %v909_v25  ;;  %v914_v51 = vld [vmem:[%s1331_s6 + $0x40] sm:$0x3] }
  0x38   : > { %v462_v48 = vunpack.c.l.bf16 %v910_v26  ;;  %v915_v52 = vld [vmem:[%s1331_s6 + $0x44] sm:$0x3]  ;;  %v1379_v60 = vmul.f32 %v1061_v6, %v446_v29  ;;  %v1381_v61 = vmul.f32 %v1061_v6, %v447_v30  ;;  %v463_v0 = vunpack.c.l.bf16 %v911_v27  ;;  %v917_v55 = vld [vmem:[%s1331_s6 + $0x28] sm:$0x7]  ;;  %v918_v5 = vld [vmem:[%s1331_s6 + $0x2c] sm:$0x7] }
  0x39   : > { %749 = vmatpush.bf16.msra.mxu0 %v960_v53  ;;  %v916_v53 = vld [vmem:[%s1331_s6 + $0x48] sm:$0x3]  ;;  %v1383_v62 = vmul.f32 %v1061_v6, %v448_v31  ;;  %v1389_v1 = vmul.f32 %v1061_v6, %v449_v36  ;;  %v464_v2 = vunpack.c.l.bf16 %v912_v32  ;;  %v1391_v3 = vmul.f32 %v1062_v33, %v461_v37  ;;  %v919_v8 = vld [vmem:[%s1331_s6 + $0x30] sm:$0x7]  ;;  %v920_v9 = vld [vmem:[%s1331_s6 + $0x34] sm:$0x7] }
  0x3a   : > { %763 = vmatpush.bf16.msra.mxu1 %v964_v54  ;;  %v1063_v54 = vld [vmem:[%s1496_s1 + $0x4] ss:$0 sm:$0xff]  ;;  %v1393_v4 = vmul.f32 %v1062_v33, %v462_v48  ;;  %v1401_v10 = vmul.f32 %v1062_v33, %v463_v0  ;;  %v476_v11 = vunpack.c.l.bf16 %v913_v34  ;;  %v477_v6 = vunpack.c.l.bf16 %v914_v51  ;;  %v1064_v13 = vld [vmem:[%s1496_s1 + $0x5] ss:$0 sm:$0xff]  ;;  %v923_v20 = vld [vmem:[%s1331_s6 + $0xc] sm:$0x3] }
  0x3b   : > { %v478_v12 = vunpack.c.l.bf16 %v915_v52  ;;  %v921_v17 = vld [vmem:[%s1331_s6 + $0x4] sm:$0x3]  ;;  %v1410_v18 = vmul.f32 %v1062_v33, %v464_v2  ;;  %v479_v19 = vunpack.c.l.bf16 %v916_v53  ;;  %v490_v38 = vunpack.c.l.bf16 %v917_v55  ;;  %v924_v22 = vld [vmem:[%s1331_s6 + $0x10] sm:$0x3]  ;;  %v1065_v40 = vld [vmem:[%s1496_s1 + $0x6] ss:$0 sm:$0xff] }
  0x3c   : > { %v491_v39 = vunpack.c.l.bf16 %v918_v5  ;;  %v1415_v25 = vmul.f32 %v1063_v54, %v476_v11  ;;  %v1417_v26 = vmul.f32 %v1063_v54, %v477_v6  ;;  %v492_v29 = vunpack.c.l.bf16 %v919_v8  ;;  %v925_v41 = vld [vmem:[%s1331_s6 + $0x18] sm:$0x3]  ;;  %v926_v33 = vld [vmem:[%s1331_s6 + $0x1c] sm:$0x3]  ;;  %v927_v34 = vld [vmem:[%s1331_s6 + $0x20] sm:$0x3] }
  0x3d   : > { %750 = vmatpush.bf16.msra.mxu0 %v952_v56  ;;  %v922_v56 = vld [vmem:[%s1331_s6 + $0x8] sm:$0x3]  ;;  %v1419_v27 = vmul.f32 %v1063_v54, %v478_v12  ;;  %v493_v30 = vunpack.c.l.bf16 %v920_v9  ;;  %v496_v31 = vmul.f32 %v1064_v13, %v490_v38  ;;  %v928_v36 = vld [vmem:[%s1331_s6 + $0x24] sm:$0x3]  ;;  %v505_v48 = vunpack.c.l.bf16 %v921_v17  ;;  %v1066_v53 = vld [vmem:[%s1496_s1 + $0x7] ss:$0 sm:$0xff] }
  0x3e   : > { %764 = vmatpush.bf16.msra.mxu1 %v956_v57  ;;  %v485_v57 = vmul.f32 %v1063_v54, %v479_v19  ;;  %v497_v32 = vmul.f32 %v1064_v13, %v491_v39  ;;  %v498_v37 = vmul.f32 %v1064_v13, %v492_v29  ;;  %v506_v51 = vunpack.c.l.bf16 %v922_v56  ;;  %v929_v0 = vld [vmem:[%s1331_s6 + $0x4] sm:$0x7]  ;;  %v930_v8 = vld [vmem:[%s1331_s6 + $0x8] sm:$0x7]  ;;  %v931_v42 = vld [vmem:[%s1331_s6 + $0xc] sm:$0x7] }
  0x3f   : > { %v507_v52 = vunpack.c.l.bf16 %v923_v20  ;;  %v499_v54 = vmul.f32 %v1064_v13, %v493_v30  ;;  %v508_v55 = vunpack.c.l.bf16 %v924_v22  ;;  %v520_v2 = vunpack.c.l.bf16 %v925_v41  ;;  %v932_v43 = vld [vmem:[%s1331_s6 + $0x10] sm:$0x7]  ;;  %v1067_v12 = vld [vmem:[%s1496_s1 + $0x8] ss:$0 sm:$0xff]  ;;  %s1508_s20 = smov (!%p400_p9, %s1099_s20), 1 }
  0x40   : > { %v521_v5 = vunpack.c.l.bf16 %v926_v33  ;;  %v512_v9 = vmul.f32 %v1065_v40, %v506_v51  ;;  %v522_v6 = vunpack.c.l.bf16 %v927_v34  ;;  %v523_v19 = vunpack.c.l.bf16 %v928_v36  ;;  %s999_s6 = sshll.u32 %s1508_s20, 4 }
  0x41   : > { %751 = vmatpush.bf16.msra.mxu0 %v944_v58  ;;  %v511_v58 = vmul.f32 %v1065_v40, %v505_v48  ;;  %v513_v11 = vmul.f32 %v1065_v40, %v507_v52  ;;  %v514_v17 = vmul.f32 %v1065_v40, %v508_v55  ;;  %v526_v38 = vmul.f32 %v1066_v53, %v520_v2  ;;  %s407_s9 = scalar_lea.vmem %s1500_s5, %s999_s6 }
  0x42   : > { %765 = vmatpush.bf16.msra.mxu1 %v948_v59  ;;  %v527_v44 = vmul.f32 %v1066_v53, %v521_v5  ;;  %v528_v45 = vmul.f32 %v1066_v53, %v522_v6  ;;  %v534_v59 = vunpack.c.l.bf16 %v929_v0  ;;  %v535_v13 = vunpack.c.l.bf16 %v930_v8  ;;  %v1068_v8 = vld [vmem:[%s1497_s2] ss:$0 sm:$0xff] }
  0x43   : > { %v536_v39 = vunpack.c.l.bf16 %v931_v42  ;;  %v529_v56 = vmul.f32 %v1066_v53, %v523_v19  ;;  %v537_v20 = vunpack.c.l.bf16 %v932_v43  ;;  %v544_v22 = vadd.f32 %v1360_v23, %v1349_v14 }
  0x44   : > { %v545_v29 = vadd.f32 %v1362_v24, %v1351_v15  ;;  %v540_v40 = vmul.f32 %v1067_v12, %v534_v59  ;;  %v541_v41 = vmul.f32 %v1067_v12, %v535_v13  ;;  %v546_v47 = vadd.f32 %v1367_v28, %v1353_v16 }
  0x45   : > { %752 = vmatpush.bf16.msra.mxu0 %v936_v63  ;;  %v542_v46 = vmul.f32 %v1067_v12, %v536_v39  ;;  %v543_v63 = vmul.f32 %v1067_v12, %v537_v20  ;;  %v547_v30 = vadd.f32 %v1374_v35, %v1358_v21  ;;  %v552_v49 = vrot.slane %v1391_v3, 7 }
  0x46   : > { %766 = vmatpush.bf16.msra.mxu1 %v940_v7  ;;  %v553_v50 = vrot.slane %v1393_v4, 7  ;;  %v554_v7 = vrot.slane %v1401_v10, 7  ;;  %v555_v14 = vrot.slane %v1410_v18, 7  ;;  %v568_v23 = vrot.slane %v496_v31, 1 }
  0x47   : > { %v569_v15 = vrot.slane %v497_v32, 1  ;;  %v560_v24 = vadd.f32 %v552_v49, %v1379_v60  ;;  %v570_v34 = vrot.slane %v498_v37, 1  ;;  %v571_v16 = vrot.slane %v499_v54, 1 }
  0x48   : > { %v561_v33 = vadd.f32 %v553_v50, %v1381_v61  ;;  %v562_v28 = vadd.f32 %v554_v7, %v1383_v62  ;;  %v563_v21 = vadd.f32 %v555_v14, %v1389_v1  ;;  %v576_v35 = vadd.f32 %v568_v23, %v1415_v25 }
  0x49   : > { %v577_v3 = vadd.f32 %v569_v15, %v1417_v26  ;;  %v578_v4 = vadd.f32 %v570_v34, %v1419_v27  ;;  %v579_v10 = vadd.f32 %v571_v16, %v485_v57  ;;  %v580_v18 = vadd.f32 %v526_v38, %v511_v58 }
  0x4a   : > { %v581_v31 = vadd.f32 %v527_v44, %v512_v9  ;;  %v582_v32 = vadd.f32 %v528_v45, %v513_v11  ;;  %v583_v36 = vadd.f32 %v529_v56, %v514_v17  ;;  %v588_v60 = vrot.slane %v560_v24, 1 }
  0x4b   : > { %v589_v48 = vrot.slane %v561_v33, 1  ;;  %v590_v61 = vrot.slane %v562_v28, 1  ;;  %v591_v37 = vrot.slane %v563_v21, 1  ;;  %v600_v51 = vadd.f32 %v580_v18, %v576_v35 }
  0x4c   : > { %v601_v52 = vadd.f32 %v581_v31, %v577_v3  ;;  %v596_v62 = vadd.f32 %v588_v60, %v544_v22  ;;  %v602_v1 = vadd.f32 %v582_v32, %v578_v4  ;;  %v603_v0 = vadd.f32 %v583_v36, %v579_v10  ;;  %v659_v22 = vld [vmem:[%s1499_s4] sm:$0x3] }
  0x4d   : > { %v597_v53 = vadd.f32 %v589_v48, %v545_v29  ;;  %v598_v25 = vadd.f32 %v590_v61, %v546_v47  ;;  %v599_v54 = vadd.f32 %v591_v37, %v547_v30  ;;  %v612_v26 = vrot.slane %v540_v40, 1 }
  0x4e   : > { %v613_v55 = vrot.slane %v541_v41, 1  ;;  %v604_v27 = vadd.f32 %v600_v51, %v596_v62  ;;  %v614_v2 = vrot.slane %v542_v46, 1  ;;  %v615_v5 = vrot.slane %v543_v63, 1 }
  0x4f   : > { %v605_v57 = vadd.f32 %v601_v52, %v597_v53  ;;  %v606_v42 = vadd.f32 %v602_v1, %v598_v25  ;;  %v607_v43 = vadd.f32 %v603_v0, %v599_v54  ;;  %v661_v29 = vperm.slane %v659_v22, 0 }
  0x50   : > { %v620_v58 = vadd.f32 %v612_v26, %v604_v27  ;;  %v662_v40 = vperm.slane %v659_v22, 1 }
  0x51   : > { %v621_v9 = vadd.f32 %v613_v55, %v605_v57  ;;  %v622_v11 = vadd.f32 %v614_v2, %v606_v42  ;;  %v623_v6 = vadd.f32 %v615_v5, %v607_v43 }
  0x52   : > { %v628_v12 = vadd.f32 %v1068_v8, %v620_v58 }
  0x53   : > { %v629_v17 = vadd.f32 %v1068_v8, %v621_v9  ;;  %v630_v19 = vadd.f32 %v1068_v8, %v622_v11  ;;  %v631_v38 = vadd.f32 %v1068_v8, %v623_v6 }
  0x54   : > { %v632_v44 = vmax.f32 %v628_v12, 0.0 }
  0x55   : > { %v633_v45 = vmax.f32 %v629_v17, 0.0  ;;  %v634_v59 = vmax.f32 %v630_v19, 0.0  ;;  %v635_v13 = vmax.f32 %v631_v38, 0.0 }
  0x56   : > { %636 = vst [vmem:[#allocation2] sm:$0xf] %v632_v44 }
  0x57   : > { %637 = vst [vmem:[#allocation2 + $0x4] sm:$0xf] %v633_v45 }
  0x58   : > { %638 = vst [vmem:[#allocation2 + $0x8] sm:$0xf] %v634_v59 }
  0x59   : > { %639 = vst [vmem:[#allocation2 + $0xc] sm:$0xf] %v635_v13 }
  0x5e   : > { %v640_v39 = vld [vmem:[#allocation2] sm:$0xff] }
  0x60   : > { %v641_v56 = vld [vmem:[#allocation2 + $0x8] sm:$0xff] }
  0x61   : > { %v642_v20 = vpack.c.bf16 %v641_v56, %v640_v39 }
  0x63   : > { %753 = vmatmul.bf16.vlgmr.msra.gmra.mxu0 %v642_v20  ;;  %767 = vmatmul.bf16.vlgmr.msra.gmra.mxu1 %v642_v20 }
  0xe0   : > { %v754_v41 = vpop.f32.mrf.mxu0  ;;  %v768_v46 = vpop.f32.mrf.mxu1 }
  0xe1   : > { %v755_v47 = vadd.f32 %v754_v41, %v661_v29  ;;  %v769_v63 = vadd.f32 %v768_v46, %v662_v40 }
  0xe3   : > { %v773_v30 = vmax.f32 %v755_v47, 0.0  ;;  %v774_v49 = vmax.f32 %v769_v63, 0.0 }
  0xe5   : > { %v777_v50 = vpack.c.bf16 %v774_v49, %v773_v30 }
  0xe7   : > { %779 = vst [vmem:[%s407_s9] sm:$0xff] %v777_v50 }
  0xe8   : > { %v756_v7 = vpop.f32.mrf.mxu0  ;;  %v770_v14 = vpop.f32.mrf.mxu1 }
  0xe9   : > { %v757_v23 = vadd.f32 %v756_v7, %v661_v29  ;;  %v771_v15 = vadd.f32 %v770_v14, %v662_v40 }
  0xeb   : > { %v775_v24 = vmax.f32 %v757_v23, 0.0  ;;  %v776_v33 = vmax.f32 %v771_v15, 0.0 }
  0xed   : > { %v778_v34 = vpack.c.bf16 %v776_v33, %v775_v24 }
  0xef   : > { %780 = vst [vmem:[%s407_s9 + $0x8] sm:$0xff] %v778_v34 }
  0xf0 PF: > { %s15_s22 = sadd.s32 1, %s1107_s22   ;;  %s1501_s18 = smov %s1095_s19 }
  0xf1   : > { %p12_p10 = scmp.ge.s32.totalorder %s15_s22, 4   ;;  %s1502_s19 = smov %s1174_s26 }
  0xf2   : > { %s1503_s20 = smov %s1103_s21  ;;  %s1504_s21 = smov %s1506_s23 }
  0xf3   :  { %14 = sbr.rel (!%p12_p10) target bundleno = 3 (0x3), region = 131 }

// kernel: mobilenet_v1.17
= control target key start
LH: loop header
LB: loop body
LE: loop exit
PB: predicated region body
PF: predicated region fallthrough
CT: control target
= control target key end

     0   :  { %s1495_s18 = smov 0   ;;  %s1497_s19 = smov 0   ;;  %s2114_s0 = inlined_call_operand.vmem [shape: bf16[1,2,6,6,256], index: 0, kind: input, shape index: {}]   ;;  %s2115_s1 = inlined_call_operand.vmem [shape: f32[9,256], index: 1, kind: input, shape index: {}]   ;;  %s2116_s2 = inlined_call_operand.vmem [shape: f32[1,256], index: 2, kind: input, shape index: {}]   ;;  %s2117_s3 = inlined_call_operand.vmem [shape: bf16[256,256], index: 3, kind: input, shape index: {}]   ;;  %s2118_s4 = inlined_call_operand.vmem [shape: f32[1,256], index: 4, kind: input, shape index: {}]   ;;  %s2119_s5 = inlined_call_operand.vmem [shape: bf16[2,16,256], index: 5, kind: output, shape index: {}]  }
   0x1   :  { %s1499_s20 = smov 0  }
   0x2 LB: > { %s27_s21 = sadd.s32 1, %s1459_s19  ;;  %p1217_p0 = scmp.ge.s32.totalorder %s1463_s20, 1  ;;  %s1463_s20 = sphi %s1499_s20, %s15_s20   ;;  %s1459_s19 = sphi %s1497_s19, %s2212_s19   ;;  %s1455_s18 = sphi %s1495_s18, %s2211_s18  }
   0x3   : > { %p29_p1 = scmp.ge.s32.totalorder %s27_s21, 2  ;;  %p222_p2 = scmp.lt.s32.totalorder %s1463_s20, 3 }
   0x5   : > { %s2214_s21 = smov (%p29_p1, %s27_s21), 0  ;;  %p223_p3 = pnand %p1217_p0, %p222_p2 }
   0x7   : > { %226 = sbr.rel (%p223_p3) target bundleno = 285 (0x11d), region = 40 }
   0xc   : > { %v1311_v0 = vld [vmem:[%s2117_s3 + $0x70] sm:$0xf]  ;;  %v1399_v1 = vld [vmem:[%s2117_s3 + $0x74] sm:$0xf0]  ;;  %v1398_v5 = vld [vmem:[%s2117_s3 + $0x74] sm:$0xf] }
   0xd   : > { %v1375_v2 = vld [vmem:[%s2117_s3 + $0xf0] sm:$0xf]  ;;  %v1312_v3 = vor.u32 %v1399_v1, %v1311_v0  ;;  %v1415_v4 = vld [vmem:[%s2117_s3 + $0xf4] sm:$0xf0]  ;;  %v1313_v6 = vld [vmem:[%s2117_s3 + $0x78] sm:$0xf0] }
   0xe   : > { %v1376_v7 = vor.u32 %v1415_v4, %v1375_v2  ;;  %v1316_v8 = vor.u32 %v1398_v5, %v1313_v6  ;;  %v1414_v9 = vld [vmem:[%s2117_s3 + $0xf4] sm:$0xf]  ;;  %v1377_v10 = vld [vmem:[%s2117_s3 + $0xf8] sm:$0xf0]  ;;  %v1303_v11 = vld [vmem:[%s2117_s3 + $0x60] sm:$0xf] }
   0xf   : > { %1039 = vmatpush.bf16.msra.mxu0 %v1312_v3  ;;  %v1380_v12 = vor.u32 %v1414_v9, %v1377_v10  ;;  %v1397_v13 = vld [vmem:[%s2117_s3 + $0x64] sm:$0xf0]  ;;  %v1367_v14 = vld [vmem:[%s2117_s3 + $0xe0] sm:$0xf]  ;;  %v1396_v18 = vld [vmem:[%s2117_s3 + $0x64] sm:$0xf] }
  0x10   : > { %v1413_v15 = vld [vmem:[%s2117_s3 + $0xe4] sm:$0xf0]  ;;  %1053 = vmatpush.bf16.msra.mxu1 %v1376_v7  ;;  %1067 = vmatpush.bf16.msra.mxu2 %v1316_v8  ;;  %v1304_v16 = vor.u32 %v1397_v13, %v1303_v11  ;;  %v1305_v19 = vld [vmem:[%s2117_s3 + $0x68] sm:$0xf0]  ;;  %v1412_v20 = vld [vmem:[%s2117_s3 + $0xe4] sm:$0xf] }
  0x11   : > { %v1368_v17 = vor.u32 %v1413_v15, %v1367_v14  ;;  %1081 = vmatpush.bf16.msra.mxu3 %v1380_v12  ;;  %v1308_v21 = vor.u32 %v1396_v18, %v1305_v19  ;;  %v1369_v22 = vld [vmem:[%s2117_s3 + $0xe8] sm:$0xf0]  ;;  %v1295_v23 = vld [vmem:[%s2117_s3 + $0x50] sm:$0xf]  ;;  %v1395_v24 = vld [vmem:[%s2117_s3 + $0x54] sm:$0xf0] }
  0x12   : > { %v1372_v25 = vor.u32 %v1412_v20, %v1369_v22  ;;  %v1359_v26 = vld [vmem:[%s2117_s3 + $0xd0] sm:$0xf]  ;;  %v1411_v27 = vld [vmem:[%s2117_s3 + $0xd4] sm:$0xf0]  ;;  %v1394_v28 = vld [vmem:[%s2117_s3 + $0x54] sm:$0xf]  ;;  %v1296_v29 = vor.u32 %v1395_v24, %v1295_v23 }
  0x13   : > { %1040 = vmatpush.bf16.msra.mxu0 %v1304_v16  ;;  %v1297_v30 = vld [vmem:[%s2117_s3 + $0x58] sm:$0xf0]  ;;  %v1410_v31 = vld [vmem:[%s2117_s3 + $0xd4] sm:$0xf]  ;;  %v1360_v33 = vor.u32 %v1411_v27, %v1359_v26  ;;  %v1287_v35 = vld [vmem:[%s2117_s3 + $0x40] sm:$0xf] }
  0x14   : > { %v1361_v32 = vld [vmem:[%s2117_s3 + $0xd8] sm:$0xf0]  ;;  %1054 = vmatpush.bf16.msra.mxu1 %v1368_v17  ;;  %1068 = vmatpush.bf16.msra.mxu2 %v1308_v21  ;;  %v1300_v34 = vor.u32 %v1394_v28, %v1297_v30  ;;  %v1393_v36 = vld [vmem:[%s2117_s3 + $0x44] sm:$0xf0]  ;;  %v1351_v37 = vld [vmem:[%s2117_s3 + $0xc0] sm:$0xf] }
  0x15   : > { %1082 = vmatpush.bf16.msra.mxu3 %v1372_v25  ;;  %v1364_v38 = vor.u32 %v1410_v31, %v1361_v32  ;;  %v1409_v39 = vld [vmem:[%s2117_s3 + $0xc4] sm:$0xf0]  ;;  %v1392_v40 = vld [vmem:[%s2117_s3 + $0x44] sm:$0xf]  ;;  %v1289_v41 = vld [vmem:[%s2117_s3 + $0x48] sm:$0xf0]  ;;  %v1288_v44 = vor.u32 %v1393_v36, %v1287_v35 }
  0x16   : > { %v1408_v42 = vld [vmem:[%s2117_s3 + $0xc4] sm:$0xf]  ;;  %v1353_v43 = vld [vmem:[%s2117_s3 + $0xc8] sm:$0xf0]  ;;  %v1352_v45 = vor.u32 %v1409_v39, %v1351_v37  ;;  %v1292_v46 = vor.u32 %v1392_v40, %v1289_v41  ;;  %v1279_v47 = vld [vmem:[%s2117_s3 + $0x30] sm:$0xf] }
  0x17   : > { %1041 = vmatpush.bf16.msra.mxu0 %v1296_v29  ;;  %v1391_v48 = vld [vmem:[%s2117_s3 + $0x34] sm:$0xf0]  ;;  %v1343_v49 = vld [vmem:[%s2117_s3 + $0xb0] sm:$0xf]  ;;  %v1356_v50 = vor.u32 %v1408_v42, %v1353_v43  ;;  %v1390_v52 = vld [vmem:[%s2117_s3 + $0x34] sm:$0xf] }
  0x18   : > { %1055 = vmatpush.bf16.msra.mxu1 %v1360_v33  ;;  %1069 = vmatpush.bf16.msra.mxu2 %v1300_v34  ;;  %v1407_v51 = vld [vmem:[%s2117_s3 + $0xb4] sm:$0xf0]  ;;  %v1281_v53 = vld [vmem:[%s2117_s3 + $0x38] sm:$0xf0]  ;;  %v1406_v54 = vld [vmem:[%s2117_s3 + $0xb4] sm:$0xf]  ;;  %v1280_v56 = vor.u32 %v1391_v48, %v1279_v47 }
  0x19   : > { %1083 = vmatpush.bf16.msra.mxu3 %v1364_v38  ;;  %v1345_v55 = vld [vmem:[%s2117_s3 + $0xb8] sm:$0xf0]  ;;  %v1344_v57 = vor.u32 %v1407_v51, %v1343_v49  ;;  %v1284_v58 = vor.u32 %v1390_v52, %v1281_v53  ;;  %v1271_v59 = vld [vmem:[%s2117_s3 + $0x20] sm:$0xf]  ;;  %v1389_v60 = vld [vmem:[%s2117_s3 + $0x24] sm:$0xf0] }
  0x1a   : > { %v1335_v61 = vld [vmem:[%s2117_s3 + $0xa0] sm:$0xf]  ;;  %v1348_v62 = vor.u32 %v1406_v54, %v1345_v55  ;;  %v1405_v63 = vld [vmem:[%s2117_s3 + $0xa4] sm:$0xf0]  ;;  %v1388_v0 = vld [vmem:[%s2117_s3 + $0x24] sm:$0xf]  ;;  %v1272_v5 = vor.u32 %v1389_v60, %v1271_v59 }
  0x1b   : > { %1042 = vmatpush.bf16.msra.mxu0 %v1288_v44  ;;  %v1273_v1 = vld [vmem:[%s2117_s3 + $0x28] sm:$0xf0]  ;;  %v1404_v2 = vld [vmem:[%s2117_s3 + $0xa4] sm:$0xf]  ;;  %v1263_v4 = vld [vmem:[%s2117_s3 + $0x10] sm:$0xf]  ;;  %v1336_v9 = vor.u32 %v1405_v63, %v1335_v61 }
  0x1c   : > { %1056 = vmatpush.bf16.msra.mxu1 %v1352_v45  ;;  %1070 = vmatpush.bf16.msra.mxu2 %v1292_v46  ;;  %v1337_v3 = vld [vmem:[%s2117_s3 + $0xa8] sm:$0xf0]  ;;  %v1387_v6 = vld [vmem:[%s2117_s3 + $0x14] sm:$0xf0]  ;;  %v1327_v7 = vld [vmem:[%s2117_s3 + $0x90] sm:$0xf]  ;;  %v1276_v10 = vor.u32 %v1388_v0, %v1273_v1 }
  0x1d   : > { %1084 = vmatpush.bf16.msra.mxu3 %v1356_v50  ;;  %v1403_v8 = vld [vmem:[%s2117_s3 + $0x94] sm:$0xf0]  ;;  %v1386_v11 = vld [vmem:[%s2117_s3 + $0x14] sm:$0xf]  ;;  %v1265_v12 = vld [vmem:[%s2117_s3 + $0x18] sm:$0xf0]  ;;  %v1340_v14 = vor.u32 %v1404_v2, %v1337_v3  ;;  %v1264_v19 = vor.u32 %v1387_v6, %v1263_v4 }
  0x1e   : > { %v1402_v13 = vld [vmem:[%s2117_s3 + $0x94] sm:$0xf]  ;;  %v1329_v15 = vld [vmem:[%s2117_s3 + $0x98] sm:$0xf0]  ;;  %v1255_v16 = vld [vmem:[%s2117_s3] sm:$0xf]  ;;  %v1328_v25 = vor.u32 %v1403_v8, %v1327_v7  ;;  %v1268_v26 = vor.u32 %v1386_v11, %v1265_v12 }
  0x1f   : > { %1043 = vmatpush.bf16.msra.mxu0 %v1280_v56  ;;  %p263_p4 = scmp.lt.s32.totalorder %s1455_s18, 1  ;;  %v1385_v17 = vld [vmem:[%s2117_s3 + $0x4] sm:$0xf0]  ;;  %v1319_v20 = vld [vmem:[%s2117_s3 + $0x80] sm:$0xf]  ;;  %v1332_v30 = vor.u32 %v1402_v13, %v1329_v15 }
  0x20   : > { %1057 = vmatpush.bf16.msra.mxu1 %v1344_v57  ;;  %1071 = vmatpush.bf16.msra.mxu2 %v1284_v58  ;;  %v1693_v18 = vld [vmem:[%s2115_s1] ss:$8 sm:$0x3]  ;;  %v1384_v22 = vld [vmem:[%s2117_s3 + $0x4] sm:$0xf]  ;;  %v1256_v33 = vor.u32 %v1385_v17, %v1255_v16 }
  0x21   : > { %1085 = vmatpush.bf16.msra.mxu3 %v1348_v62  ;;  %v1401_v21 = vld [vmem:[%s2117_s3 + $0x84] sm:$0xf0]  ;;  %v1257_v23 = vld [vmem:[%s2117_s3 + $0x8] sm:$0xf0]  ;;  %s2216_s18 = smov (!%p263_p4, %s1455_s18), 1  ;;  %v307_v34 = vperm.slane %v1693_v18, 0 }
  0x22   : > { %v1713_v24 = vld [vmem:[%s2115_s1 + $0x1] ss:$8 sm:$0x3]  ;;  %v1400_v27 = vld [vmem:[%s2117_s3 + $0x84] sm:$0xf]  ;;  %s1416_s7 = smul.u32 48, %s2216_s18  ;;  %v1320_v41 = vor.u32 %v1401_v21, %v1319_v20  ;;  %v1260_v42 = vor.u32 %v1384_v22, %v1257_v23 }
  0x23   : > { %1044 = vmatpush.bf16.msra.mxu0 %v1272_v5  ;;  %v1721_v28 = vld [vmem:[%s2115_s1 + $0x2] ss:$8 sm:$0x3]  ;;  %v1726_v29 = vld [vmem:[%s2115_s1 + $0x3] ss:$8 sm:$0x3] }
  0x24   : > { %1058 = vmatpush.bf16.msra.mxu1 %v1336_v9  ;;  %1072 = vmatpush.bf16.msra.mxu2 %v1276_v10  ;;  %2150 = vst [vmem:[#allocation3_spill] sm:$0xff] %v1721_v28  ;;  %v1321_v31 = vld [vmem:[%s2117_s3 + $0x88] sm:$0xf0]  ;;  %v334_v35 = vperm.slane %v1713_v24, 0  ;;  %s1747_s14 = scalar_lea.vmem %s2114_s0, %s1416_s7  ;;  %v1750_v37 = vperm.slane %v1721_v28, 0  ;;  %v1753_v38 = vperm.slane %v1726_v29, 0 }
  0x25   : > { %2151 = vst [vmem:[#allocation4_spill] sm:$0xff] %v1726_v29  ;;  %1086 = vmatpush.bf16.msra.mxu3 %v1340_v14  ;;  %v1735_v32 = vld [vmem:[%s2115_s1 + $0x4] ss:$8 sm:$0x3]  ;;  %v1768_v45 = vld [vmem:[%s1747_s14 + $0x10] sm:$0x33]  ;;  %v1324_v46 = vor.u32 %v1400_v27, %v1321_v31 }
  0x26   : > { %2152 = vst [vmem:[#allocation5_spill] sm:$0xff] %v1735_v32  ;;  %v1742_v36 = vld [vmem:[%s2115_s1 + $0x5] ss:$8 sm:$0x3]  ;;  %v1756_v39 = vperm.slane %v1735_v32, 0  ;;  %v301_v50 = vunpack.c.l.bf16 %v1768_v45  ;;  %s1383_s29 = sshll.u32 %s2216_s18, 4 }
  0x27   : > { %2153 = vst [vmem:[#allocation6_spill] sm:$0xff] %v1742_v36  ;;  %1045 = vmatpush.bf16.msra.mxu0 %v1264_v19  ;;  %v1759_v40 = vperm.slane %v1742_v36, 0  ;;  %v1762_v43 = vld [vmem:[%s1747_s14] sm:$0x33]  ;;  %v1765_v44 = vld [vmem:[%s1747_s14 + $0x8] sm:$0x33]  ;;  %s287_s7 = scalar_lea.vmem %s2119_s5, %s1383_s29 }
  0x28   : > { %1059 = vmatpush.bf16.msra.mxu1 %v1328_v25  ;;  %1073 = vmatpush.bf16.msra.mxu2 %v1268_v26  ;;  %v1771_v47 = vld [vmem:[%s1747_s14 + $0x18] sm:$0x33]  ;;  %v297_v48 = vunpack.c.l.bf16 %v1762_v43  ;;  %v299_v49 = vunpack.c.l.bf16 %v1765_v44  ;;  %v1777_v51 = vld [vmem:[%s1747_s14] sm:$0x77]  ;;  %v1780_v52 = vld [vmem:[%s1747_s14 + $0x8] sm:$0x77]  ;;  %v1809_v2 = vmul.f32 %v307_v34, %v301_v50 }
  0x29   : > { %1087 = vmatpush.bf16.msra.mxu3 %v1332_v30  ;;  %v303_v53 = vunpack.c.l.bf16 %v1771_v47  ;;  %v1784_v54 = vld [vmem:[%s1747_s14 + $0x10] sm:$0x77]  ;;  %v1787_v55 = vld [vmem:[%s1747_s14 + $0x18] sm:$0x77]  ;;  %v323_v56 = vunpack.c.l.bf16 %v1777_v51  ;;  %v325_v57 = vunpack.c.l.bf16 %v1780_v52  ;;  %v1792_v58 = vld [vmem:[%s1747_s14] sm:$0x66] }
  0x2a   : > { %v1794_v59 = vmul.f32 %v307_v34, %v297_v48  ;;  %v1796_v60 = vmul.f32 %v307_v34, %v299_v49  ;;  %v327_v61 = vunpack.c.l.bf16 %v1784_v54  ;;  %v1800_v62 = vld [vmem:[%s1747_s14 + $0x8] sm:$0x66]  ;;  %v1803_v63 = vld [vmem:[%s1747_s14 + $0x10] sm:$0x66]  ;;  %v1806_v0 = vld [vmem:[%s1747_s14 + $0x18] sm:$0x66]  ;;  %v329_v4 = vunpack.c.l.bf16 %v1787_v55 }
  0x2b   : > { %1046 = vmatpush.bf16.msra.mxu0 %v1256_v33  ;;  %2154 = vst [vmem:[#allocation7_spill] sm:$0xff] %v1806_v0  ;;  %v1811_v3 = vmul.f32 %v307_v34, %v303_v53  ;;  %v1814_v5 = vmul.f32 %v334_v35, %v323_v56  ;;  %v1817_v6 = vld [vmem:[%s1747_s14 + $0x8] sm:$0x33]  ;;  %v1820_v7 = vld [vmem:[%s1747_s14 + $0x10] sm:$0x33]  ;;  %v1825_v9 = vmul.f32 %v334_v35, %v325_v57  ;;  %v350_v10 = vunpack.c.l.bf16 %v1792_v58 }
  0x2c   : > { %1060 = vmatpush.bf16.msra.mxu1 %v1320_v41  ;;  %1074 = vmatpush.bf16.msra.mxu2 %v1260_v42  ;;  %2155 = vst [vmem:[#allocation8_spill] sm:$0xff] %v1817_v6  ;;  %v1823_v8 = vld [vmem:[%s1747_s14 + $0x18] sm:$0x33]  ;;  %v352_v11 = vunpack.c.l.bf16 %v1800_v62  ;;  %v354_v12 = vunpack.c.l.bf16 %v1803_v63  ;;  %v1831_v13 = vld [vmem:[%s1747_s14 + $0x20] sm:$0x33]  ;;  %v1833_v14 = vmul.f32 %v334_v35, %v327_v61  ;;  %v356_v15 = vunpack.c.l.bf16 %v1806_v0 }
  0x2d   : > { %2156 = vst [vmem:[#allocation9_spill] sm:$0xff] %v1820_v7  ;;  %1088 = vmatpush.bf16.msra.mxu3 %v1324_v46  ;;  %v378_v16 = vunpack.c.l.bf16 %v1817_v6  ;;  %v380_v17 = vunpack.c.l.bf16 %v1820_v7  ;;  %v1839_v19 = vld [vmem:[%s1747_s14 + $0x8] sm:$0x77]  ;;  %v1842_v20 = vld [vmem:[%s1747_s14 + $0x10] sm:$0x77]  ;;  %v1847_v22 = vmul.f32 %v334_v35, %v329_v4  ;;  %v1850_v23 = vmul.f32 %v1750_v37, %v350_v10 }
  0x2e   : > { %2157 = vst [vmem:[#allocation10_spill] sm:$0xff] %v1823_v8  ;;  %v1845_v21 = vld [vmem:[%s1747_s14 + $0x18] sm:$0x77]  ;;  %v1853_v25 = vmul.f32 %v1750_v37, %v352_v11  ;;  %v382_v26 = vunpack.c.l.bf16 %v1823_v8  ;;  %v1857_v27 = vld [vmem:[%s1747_s14 + $0x20] sm:$0x77]  ;;  %v1866_v33 = vmul.f32 %v1750_v37, %v354_v12  ;;  %v1869_v34 = vmul.f32 %v1750_v37, %v356_v15 }
  0x2f   : > { %2158 = vst [vmem:[#allocation11_spill] sm:$0xff] %v1831_v13  ;;  %v1860_v30 = vld [vmem:[%s1747_s14 + $0x8] sm:$0x66]  ;;  %v1863_v31 = vld [vmem:[%s1747_s14 + $0x10] sm:$0x66]  ;;  %v384_v35 = vunpack.c.l.bf16 %v1831_v13  ;;  %v1873_v41 = vmul.f32 %v1753_v38, %v378_v16  ;;  %v1879_v46 = vmul.f32 %v1753_v38, %v380_v17  ;;  %v405_v48 = vunpack.c.l.bf16 %v1839_v19 }
  0x30   : > { %2159 = vst [vmem:[#allocation12_spill] sm:$0xff] %v1839_v19  ;;  %v1876_v42 = vld [vmem:[%s1747_s14 + $0x18] sm:$0x66]  ;;  %v407_v49 = vunpack.c.l.bf16 %v1842_v20  ;;  %v409_v37 = vunpack.c.l.bf16 %v1845_v21  ;;  %v1885_v50 = vld [vmem:[%s1747_s14 + $0x20] sm:$0x66]  ;;  %v1896_v57 = vmul.f32 %v1753_v38, %v382_v26  ;;  %v411_v61 = vunpack.c.l.bf16 %v1857_v27 }
  0x31   : > { %2160 = vst [vmem:[#allocation13_spill] sm:$0xff] %v1842_v20  ;;  %v1888_v53 = vld [vmem:[%s1747_s14 + $0x10] sm:$0x33]  ;;  %v1893_v56 = vld [vmem:[%s2115_s1 + $0x6] ss:$8 sm:$0x3]  ;;  %v432_v4 = vunpack.c.l.bf16 %v1860_v30  ;;  %v434_v10 = vunpack.c.l.bf16 %v1863_v31  ;;  %v1911_v16 = vmul.f32 %v1753_v38, %v384_v35  ;;  %v1914_v17 = vmul.f32 %v1756_v39, %v405_v48 }
  0x32   : > { %2161 = vst [vmem:[#allocation14_spill] sm:$0xff] %v1845_v21  ;;  %v1902_v11 = vld [vmem:[%s1747_s14 + $0x18] sm:$0x33]  ;;  %v1905_v12 = vld [vmem:[%s1747_s14 + $0x20] sm:$0x33]  ;;  %v1917_v26 = vmul.f32 %v1756_v39, %v407_v49  ;;  %v436_v1 = vunpack.c.l.bf16 %v1876_v42  ;;  %v1930_v32 = vmul.f32 %v1756_v39, %v409_v37  ;;  %v1933_v38 = vmul.f32 %v1756_v39, %v411_v61 }
  0x33   : > { %2162 = vst [vmem:[#allocation15_spill] sm:$0xff] %v1857_v27  ;;  %v1908_v15 = vld [vmem:[%s1747_s14 + $0x28] sm:$0x33]  ;;  %v1921_v36 = vld [vmem:[%s1747_s14 + $0x10] sm:$0x77]  ;;  %v438_v35 = vunpack.c.l.bf16 %v1885_v50  ;;  %v447_v48 = vmul.f32 %v1759_v40, %v432_v4  ;;  %v449_v27 = vmul.f32 %v1759_v40, %v434_v10  ;;  %v460_v37 = vunpack.c.l.bf16 %v1888_v53 }
  0x34   : > { %2163 = vst [vmem:[#allocation16_spill] sm:$0xff] %v1860_v30  ;;  %v1927_v30 = vld [vmem:[%s1747_s14 + $0x20] sm:$0x77]  ;;  %v1938_v49 = vld [vmem:[%s1747_s14 + $0x28] sm:$0x77]  ;;  %v462_v39 = vunpack.c.l.bf16 %v1902_v11  ;;  %v464_v61 = vunpack.c.l.bf16 %v1905_v12  ;;  %v466_v4 = vunpack.c.l.bf16 %v1908_v15  ;;  %v471_v21 = vperm.slane %v1893_v56, 0 }
  0x35   : > { %2164 = vst [vmem:[#allocation17_spill] sm:$0xff] %v1863_v31  ;;  %v1924_v31 = vld [vmem:[%s1747_s14 + $0x18] sm:$0x77]  ;;  %v487_v20 = vunpack.c.l.bf16 %v1921_v36  ;;  %v1954_v19 = vld [vmem:[%s1747_s14 + $0x10] sm:$0x66]  ;;  %v491_v10 = vunpack.c.l.bf16 %v1927_v30 }
  0x36   : > { %2165 = vst [vmem:[#allocation18_spill] sm:$0xff] %v1876_v42  ;;  %v1943_v42 = vld [vmem:[%s2115_s1 + $0x7] ss:$8 sm:$0x3]  ;;  %v489_v29 = vunpack.c.l.bf16 %v1924_v31  ;;  %v477_v13 = vmul.f32 %v471_v21, %v462_v39  ;;  %v481_v8 = vmul.f32 %v471_v21, %v466_v4  ;;  %v514_v28 = vunpack.c.l.bf16 %v1954_v19 }
  0x37   : > { %2166 = vst [vmem:[#allocation19_spill] sm:$0xff] %v1885_v50  ;;  %v451_v50 = vmul.f32 %v1759_v40, %v436_v1  ;;  %v1964_v1 = vld [vmem:[%s1747_s14 + $0x20] sm:$0x66]  ;;  %v547_v39 = vrot.slane %v1825_v9, 1 }
  0x38   : > { %2167 = vst [vmem:[#allocation20_spill] sm:$0xff] %v1888_v53  ;;  %v493_v53 = vunpack.c.l.bf16 %v1938_v49 }
  0x39   : > { %2168 = vst [vmem:[#allocation21_spill] sm:$0xff] %v1893_v56  ;;  %v475_v56 = vmul.f32 %v471_v21, %v460_v37  ;;  %v545_v37 = vrot.slane %v1814_v5, 1  ;;  %v563_v9 = vadd.f32 %v547_v39, %v1796_v60 }
  0x3a   : > { %2169 = vst [vmem:[#allocation22_spill] sm:$0xff] %v1902_v11  ;;  %v498_v11 = vperm.slane %v1943_v42, 0 }
  0x3b   : > { %2170 = vst [vmem:[#allocation23_spill] sm:$0xff] %v1905_v12  ;;  %v1961_v12 = vld [vmem:[%s1747_s14 + $0x18] sm:$0x66]  ;;  %v561_v5 = vadd.f32 %v545_v37, %v1794_v59 }
  0x3c   : > { %2171 = vst [vmem:[#allocation24_spill] sm:$0xff] %v1908_v15  ;;  %v453_v15 = vmul.f32 %v1759_v40, %v438_v35  ;;  %v504_v7 = vmul.f32 %v498_v11, %v489_v29  ;;  %v508_v6 = vmul.f32 %v498_v11, %v493_v53  ;;  %v516_v0 = vunpack.c.l.bf16 %v1961_v12 }
  0x3d   : > { %2172 = vst [vmem:[#allocation25_spill] sm:$0xff] %v1921_v36  ;;  %v479_v36 = vmul.f32 %v471_v21, %v464_v61  ;;  %v518_v40 = vunpack.c.l.bf16 %v1964_v1  ;;  %v549_v21 = vrot.slane %v1833_v14, 1  ;;  %v551_v29 = vrot.slane %v1847_v22, 1 }
  0x3e   : > { %2173 = vst [vmem:[#allocation26_spill] sm:$0xff] %v1924_v31  ;;  %v1970_v31 = vld [vmem:[%s2115_s1 + $0x10] ss:$8 sm:$0x3]  ;;  %v579_v53 = vrot.slane %v1879_v46, 6  ;;  %v643_v60 = vrot.slane %v504_v7, 1 }
  0x3f   : > { %2174 = vst [vmem:[#allocation27_spill] sm:$0xff] %v1927_v30  ;;  %v502_v30 = vmul.f32 %v498_v11, %v487_v20  ;;  %v525_v35 = vperm.slane %v1970_v31, 0  ;;  %v577_v20 = vrot.slane %v1873_v41, 6  ;;  %v565_v14 = vadd.f32 %v549_v21, %v1809_v2 }
  0x40   : > { %2175 = vst [vmem:[#allocation28_spill] sm:$0xff] %v1938_v49  ;;  %v506_v49 = vmul.f32 %v498_v11, %v491_v10  ;;  %v581_v11 = vrot.slane %v1896_v57, 6  ;;  %v567_v22 = vadd.f32 %v551_v29, %v1811_v3  ;;  %v583_v41 = vrot.slane %v1911_v16, 6 }
  0x41   : > { %2176 = vst [vmem:[#allocation29_spill] sm:$0xff] %v1943_v42  ;;  %v1973_v42 = vld [vmem:[%s1747_s14 + $0x28] sm:$0x66]  ;;  %v1987_v4 = vmul.f32 %v525_v35, %v514_v28  ;;  %v1989_v10 = vmul.f32 %v525_v35, %v516_v0  ;;  %v593_v46 = vadd.f32 %v577_v20, %v1850_v23  ;;  %v595_v57 = vadd.f32 %v579_v53, %v1853_v25 }
  0x42   : > { %2177 = vst [vmem:[#allocation30_spill] sm:$0xff] %v1964_v1  ;;  %v520_v61 = vunpack.c.l.bf16 %v1973_v42  ;;  %v597_v28 = vadd.f32 %v581_v11, %v1866_v33  ;;  %v609_v0 = vrot.slane %v447_v48, 1  ;;  %v615_v1 = vrot.slane %v453_v15, 1 }
  0x43   : > { %2178 = vst [vmem:[#allocation31_spill] sm:$0xff] %v1970_v31  ;;  %v1991_v31 = vmul.f32 %v525_v35, %v518_v40  ;;  %v613_v40 = vrot.slane %v451_v50, 1  ;;  %v599_v59 = vadd.f32 %v583_v41, %v1869_v34  ;;  %v641_v37 = vrot.slane %v502_v30, 1 }
  0x44   : > { %2179 = vst [vmem:[#allocation32_spill] sm:$0xff] %v1973_v42  ;;  %v611_v42 = vrot.slane %v449_v27, 1  ;;  %v645_v39 = vrot.slane %v506_v49, 1  ;;  %v625_v2 = vadd.f32 %v609_v0, %v1914_v17  ;;  %v631_v23 = vadd.f32 %v615_v1, %v1933_v38 }
  0x45   : > { %v629_v16 = vadd.f32 %v613_v40, %v1930_v32  ;;  %v647_v25 = vrot.slane %v508_v6, 1  ;;  %v657_v21 = vadd.f32 %v641_v37, %v475_v56  ;;  %v659_v33 = vadd.f32 %v643_v60, %v477_v13 }
  0x46   : > { %v627_v3 = vadd.f32 %v611_v42, %v1917_v26  ;;  %v661_v48 = vadd.f32 %v645_v39, %v479_v36  ;;  %v673_v27 = vrot.slane %v593_v46, 2  ;;  %v675_v50 = vrot.slane %v595_v57, 2  ;;  %v2009_v36 = vld [vmem:[%s2116_s2] sm:$0x3] }
  0x47   : > { %v677_v15 = vrot.slane %v597_v28, 2  ;;  %v679_v29 = vrot.slane %v599_v59, 2  ;;  %v663_v34 = vadd.f32 %v647_v25, %v481_v8  ;;  %v705_v30 = vrot.slane %v657_v21, 7 }
  0x48   : > { %v707_v7 = vrot.slane %v659_v33, 7  ;;  %v709_v49 = vrot.slane %v661_v48, 7  ;;  %v535_v20 = vmul.f32 %v525_v35, %v520_v61  ;;  %v689_v17 = vadd.f32 %v673_v27, %v561_v5 }
  0x49   : > { %v691_v53 = vadd.f32 %v675_v50, %v563_v9  ;;  %v693_v42 = vadd.f32 %v677_v15, %v565_v14  ;;  %v711_v26 = vrot.slane %v663_v34, 7  ;;  %v721_v32 = vadd.f32 %v705_v30, %v625_v2 }
  0x4a   : > { %v723_v11 = vadd.f32 %v707_v7, %v627_v3  ;;  %v725_v38 = vadd.f32 %v709_v49, %v629_v16  ;;  %v695_v6 = vadd.f32 %v679_v29, %v567_v22  ;;  %v769_v13 = vrot.slane %v1987_v4, 2  ;;  %v2181_v49 = vld [vmem:[#allocation7_spill] sm:$0xff] }
  0x4b   : > { %v771_v8 = vrot.slane %v1989_v10, 2  ;;  %v773_v56 = vrot.slane %v1991_v31, 2  ;;  %v727_v1 = vadd.f32 %v711_v26, %v631_v23  ;;  %v737_v35 = vrot.slane %v721_v32, 1  ;;  %v2185_v26 = vld [vmem:[#allocation10_spill] sm:$0xff] }
  0x4c   : > { %v739_v61 = vrot.slane %v723_v11, 1  ;;  %v741_v5 = vrot.slane %v725_v38, 1  ;;  %v775_v9 = vrot.slane %v535_v20, 2  ;;  %v795_v14 = vperm.slane %v2009_v36, 0  ;;  %v2186_v11 = vld [vmem:[#allocation11_spill] sm:$0xff] }
  0x4d   : > { %v300_v41 = vunpack.c.h.bf16 %v1765_v44  ;;  %v308_v46 = vperm.slane %v1693_v18, 1  ;;  %v743_v57 = vrot.slane %v727_v1, 1  ;;  %v753_v28 = vadd.f32 %v737_v35, %v689_v17  ;;  %v2182_v17 = vld [vmem:[#allocation3_spill] sm:$0xff]  ;;  %v2188_v1 = vld [vmem:[#allocation12_spill] sm:$0xff] }
  0x4e   : > { %v755_v22 = vadd.f32 %v739_v61, %v691_v53  ;;  %v757_v0 = vadd.f32 %v741_v5, %v693_v42  ;;  %v302_v4 = vunpack.c.h.bf16 %v1768_v45  ;;  %v304_v10 = vunpack.c.h.bf16 %v1771_v47  ;;  %v2183_v53 = vld [vmem:[#allocation8_spill] sm:$0xff]  ;;  %v2184_v42 = vld [vmem:[#allocation9_spill] sm:$0xff] }
  0x4f   : > { %v759_v31 = vadd.f32 %v743_v57, %v695_v6  ;;  %v785_v40 = vadd.f32 %v769_v13, %v753_v28  ;;  %v2180_v60 = vunpack.c.h.bf16 %v1762_v43  ;;  %v2023_v2 = vmul.f32 %v308_v46, %v300_v41  ;;  %v2189_v61 = vld [vmem:[#allocation13_spill] sm:$0xff]  ;;  %v2191_v41 = vld [vmem:[#allocation15_spill] sm:$0xff] }
  0x50   : > { %v787_v59 = vadd.f32 %v771_v8, %v755_v22  ;;  %v789_v37 = vadd.f32 %v773_v56, %v757_v0  ;;  %v324_v18 = vunpack.c.h.bf16 %v1777_v51  ;;  %v326_v44 = vunpack.c.h.bf16 %v1780_v52  ;;  %v2187_v8 = vld [vmem:[#allocation4_spill] sm:$0xff]  ;;  %v2192_v57 = vld [vmem:[#allocation5_spill] sm:$0xff] }
  0x51   : > { %v2021_v39 = vmul.f32 %v308_v46, %v2180_v60  ;;  %v791_v3 = vadd.f32 %v775_v9, %v759_v31  ;;  %v799_v16 = vadd.f32 %v795_v14, %v785_v40  ;;  %v2027_v25 = vmul.f32 %v308_v46, %v302_v4  ;;  %v2190_v9 = vld [vmem:[#allocation14_spill] sm:$0xff] }
  0x52   : > { %v801_v23 = vadd.f32 %v795_v14, %v787_v59  ;;  %v803_v45 = vadd.f32 %v795_v14, %v789_v37  ;;  %v2029_v47 = vmul.f32 %v308_v46, %v304_v10  ;;  %v328_v21 = vunpack.c.h.bf16 %v1784_v54  ;;  %v2193_v10 = vld [vmem:[#allocation16_spill] sm:$0xff] }
  0x53   : > { %v335_v43 = vperm.slane %v1713_v24, 1  ;;  %v805_v33 = vadd.f32 %v795_v14, %v791_v3  ;;  %v807_v48 = vmax.f32 %v799_v16, 0.0  ;;  %v330_v51 = vunpack.c.h.bf16 %v1787_v55  ;;  %v2195_v16 = vld [vmem:[#allocation18_spill] sm:$0xff] }
  0x54   : > { %v809_v27 = vmax.f32 %v801_v23, 0.0  ;;  %v811_v50 = vmax.f32 %v803_v45, 0.0  ;;  %v351_v52 = vunpack.c.h.bf16 %v1792_v58  ;;  %v353_v15 = vunpack.c.h.bf16 %v1800_v62  ;;  %v2196_v45 = vld [vmem:[#allocation6_spill] sm:$0xff] }
  0x55   : > { %v355_v29 = vunpack.c.h.bf16 %v1803_v63  ;;  %v813_v34 = vmax.f32 %v805_v33, 0.0  ;;  %815 = vst [vmem:[#allocation2 + $0x10] sm:$0xf] %v807_v48  ;;  %v2037_v7 = vmul.f32 %v335_v43, %v324_v18  ;;  %v2039_v54 = vmul.f32 %v335_v43, %v326_v44  ;;  %v2194_v44 = vld [vmem:[#allocation17_spill] sm:$0xff] }
  0x56   : > { %v819_v30 = vrot.slane %v809_v27, 4  ;;  %825 = vst [vmem:[#allocation2 + $0x18] sm:$0xf] %v811_v50  ;;  %v2041_v24 = vmul.f32 %v335_v43, %v328_v21  ;;  %v357_v20 = vunpack.c.h.bf16 %v2181_v49  ;;  %v362_v55 = vperm.slane %v2182_v17, 1  ;;  %v2197_v27 = vld [vmem:[#allocation19_spill] sm:$0xff] }
  0x57   : > { %v379_v58 = vunpack.c.h.bf16 %v2183_v53  ;;  %v829_v62 = vrot.slane %v813_v34, 4  ;;  %v381_v63 = vunpack.c.h.bf16 %v2184_v42  ;;  %v383_v32 = vunpack.c.h.bf16 %v2185_v26  ;;  %v2204_v42 = vld [vmem:[#allocation26_spill] sm:$0xff]  ;;  %v2205_v26 = vld [vmem:[#allocation27_spill] sm:$0xff] }
  0x58   : > { %823 = vst [vmem:[#allocation2 + $0x10] sm:$0xf0] %v819_v30  ;;  %v385_v38 = vunpack.c.h.bf16 %v2186_v11  ;;  %v2049_v6 = vmul.f32 %v335_v43, %v330_v51  ;;  %v2051_v13 = vmul.f32 %v362_v55, %v351_v52  ;;  %v390_v56 = vperm.slane %v2187_v8, 1  ;;  %v2198_v52 = vld [vmem:[#allocation20_spill] sm:$0xff]  ;;  %v2200_v30 = vld [vmem:[#allocation23_spill] sm:$0xff] }
  0x59   : > { %v406_v35 = vunpack.c.h.bf16 %v2188_v1  ;;  %833 = vst [vmem:[#allocation2 + $0x18] sm:$0xf0] %v829_v62  ;;  %v408_v5 = vunpack.c.h.bf16 %v2189_v61  ;;  %v410_v14 = vunpack.c.h.bf16 %v2190_v9  ;;  %v412_v46 = vunpack.c.h.bf16 %v2191_v41  ;;  %v2206_v1 = vld [vmem:[#allocation29_spill] sm:$0xff]  ;;  %v2207_v9 = vld [vmem:[#allocation28_spill] sm:$0xff] }
  0x5a   : > { %v417_v28 = vperm.slane %v2192_v57, 1  ;;  %v2059_v22 = vmul.f32 %v362_v55, %v353_v15  ;;  %v2061_v0 = vmul.f32 %v362_v55, %v355_v29  ;;  %v2063_v4 = vmul.f32 %v362_v55, %v357_v20  ;;  %v2199_v29 = vld [vmem:[#allocation22_spill] sm:$0xff]  ;;  %v2201_v20 = vld [vmem:[#allocation24_spill] sm:$0xff]  ;;  %v2202_v55 = vld [vmem:[#allocation21_spill] sm:$0xff] }
  0x5b   : > { %v433_v31 = vunpack.c.h.bf16 %v2193_v10  ;;  %v394_v40 = vmul.f32 %v390_v56, %v379_v58  ;;  %v396_v59 = vmul.f32 %v390_v56, %v381_v63  ;;  %v398_v37 = vmul.f32 %v390_v56, %v383_v32  ;;  %v2203_v58 = vld [vmem:[#allocation25_spill] sm:$0xff] }
  0x5c   : > { %v400_v60 = vmul.f32 %v390_v56, %v385_v38  ;;  %v421_v18 = vmul.f32 %v417_v28, %v406_v35  ;;  %v435_v3 = vunpack.c.h.bf16 %v2194_v44  ;;  %v437_v23 = vunpack.c.h.bf16 %v2195_v16 }
  0x5d   : > { %v444_v21 = vperm.slane %v2196_v45, 1  ;;  %v423_v43 = vmul.f32 %v417_v28, %v408_v5  ;;  %v425_v33 = vmul.f32 %v417_v28, %v410_v14  ;;  %v427_v48 = vmul.f32 %v417_v28, %v412_v46 }
  0x5e   : > { %v439_v50 = vunpack.c.h.bf16 %v2197_v27  ;;  %v461_v15 = vunpack.c.h.bf16 %v2198_v52  ;;  %v463_v34 = vunpack.c.h.bf16 %v2199_v29  ;;  %v465_v49 = vunpack.c.h.bf16 %v2200_v30  ;;  %v2209_v52 = vld [vmem:[#allocation32_spill] sm:$0xff]  ;;  %v2210_v29 = vld [vmem:[#allocation31_spill] sm:$0xff] }
  0x5f   : > { %v835_v51 = vld [vmem:[#allocation2 + $0x10] sm:$0xff]  ;;  %v467_v17 = vunpack.c.h.bf16 %v2201_v20  ;;  %v472_v53 = vperm.slane %v2202_v55, 1  ;;  %v488_v62 = vunpack.c.h.bf16 %v2203_v58  ;;  %v490_v63 = vunpack.c.h.bf16 %v2204_v42 }
  0x60   : > { %v492_v32 = vunpack.c.h.bf16 %v2205_v26  ;;  %v837_v11 = vld [vmem:[#allocation2 + $0x18] sm:$0xff]  ;;  %v448_v38 = vmul.f32 %v444_v21, %v433_v31  ;;  %v450_v8 = vmul.f32 %v444_v21, %v435_v3  ;;  %v452_v56 = vmul.f32 %v444_v21, %v437_v23 }
  0x61   : > { %v499_v35 = vperm.slane %v2206_v1, 1  ;;  %v839_v61 = vpack.c.bf16 %v837_v11, %v835_v51  ;;  %v454_v5 = vmul.f32 %v444_v21, %v439_v50  ;;  %v494_v14 = vunpack.c.h.bf16 %v2207_v9  ;;  %v2208_v50 = vld [vmem:[#allocation30_spill] sm:$0xff] }
  0x62   : > { %v515_v41 = vunpack.c.h.bf16 %v1954_v19  ;;  %v476_v46 = vmul.f32 %v472_v53, %v461_v15  ;;  %v478_v57 = vmul.f32 %v472_v53, %v463_v34  ;;  %v480_v28 = vmul.f32 %v472_v53, %v465_v49 }
  0x63   : > { %v482_v10 = vmul.f32 %v472_v53, %v467_v17  ;;  %1047 = vmatmul.bf16.vlgmr.msra.gmra.mxu0 %v839_v61  ;;  %v503_v44 = vmul.f32 %v499_v35, %v488_v62  ;;  %v505_v16 = vmul.f32 %v499_v35, %v490_v63  ;;  %v507_v45 = vmul.f32 %v499_v35, %v492_v32 }
  0x64   : > { %v517_v31 = vunpack.c.h.bf16 %v1961_v12  ;;  %1075 = vmatmul.bf16.vlgmr.msra.gmra.mxu2 %v839_v61  ;;  %v546_v3 = vrot.slane %v2037_v7, 1  ;;  %v548_v23 = vrot.slane %v2039_v54, 1  ;;  %v550_v21 = vrot.slane %v2041_v24, 1 }
  0x65   : > { %v552_v27 = vrot.slane %v2049_v6, 1  ;;  %v509_v19 = vmul.f32 %v499_v35, %v494_v14  ;;  %v519_v51 = vunpack.c.h.bf16 %v2208_v50  ;;  %v521_v15 = vunpack.c.h.bf16 %v2209_v52 }
  0x66   : > { %v526_v34 = vperm.slane %v2210_v29, 1  ;;  %v562_v30 = vadd.f32 %v546_v3, %v2021_v39  ;;  %v564_v12 = vadd.f32 %v548_v23, %v2023_v2  ;;  %v566_v49 = vadd.f32 %v550_v21, %v2027_v25 }
  0x67   : > { %v568_v7 = vadd.f32 %v552_v27, %v2029_v47  ;;  %v578_v54 = vrot.slane %v394_v40, 6  ;;  %v580_v20 = vrot.slane %v396_v59, 6  ;;  %v582_v24 = vrot.slane %v398_v37, 6 }
  0x68   : > { %v584_v17 = vrot.slane %v400_v60, 6  ;;  %v610_v6 = vrot.slane %v448_v38, 1  ;;  %v612_v55 = vrot.slane %v450_v8, 1  ;;  %v614_v53 = vrot.slane %v452_v56, 1 }
  0x69   : > { %v616_v58 = vrot.slane %v454_v5, 1  ;;  %v594_v62 = vadd.f32 %v578_v54, %v2051_v13  ;;  %v596_v42 = vadd.f32 %v580_v20, %v2059_v22  ;;  %v598_v39 = vadd.f32 %v582_v24, %v2061_v0 }
  0x6a   : > { %v600_v2 = vadd.f32 %v584_v17, %v2063_v4  ;;  %v626_v63 = vadd.f32 %v610_v6, %v421_v18  ;;  %v628_v25 = vadd.f32 %v612_v55, %v423_v43  ;;  %v630_v26 = vadd.f32 %v614_v53, %v425_v33 }
  0x6b   : > { %v632_v47 = vadd.f32 %v616_v58, %v427_v48  ;;  %v642_v40 = vrot.slane %v503_v44, 1  ;;  %v644_v59 = vrot.slane %v505_v16, 1  ;;  %v646_v37 = vrot.slane %v507_v45, 1 }
  0x6c   : > { %v648_v60 = vrot.slane %v509_v19, 1  ;;  %v674_v32 = vrot.slane %v594_v62, 2  ;;  %v676_v11 = vrot.slane %v596_v42, 2  ;;  %v678_v38 = vrot.slane %v598_v39, 2  ;;  %v873_v39 = vld [vmem:[%s2118_s4] sm:$0x3] }
  0x6d   : > { %v680_v8 = vrot.slane %v600_v2, 2  ;;  %v658_v56 = vadd.f32 %v642_v40, %v476_v46  ;;  %v660_v13 = vadd.f32 %v644_v59, %v478_v57  ;;  %v662_v1 = vadd.f32 %v646_v37, %v480_v28 }
  0x6e   : > { %v664_v22 = vadd.f32 %v648_v60, %v482_v10  ;;  %v530_v35 = vmul.f32 %v526_v34, %v515_v41  ;;  %v532_v0 = vmul.f32 %v526_v34, %v517_v31  ;;  %v534_v61 = vmul.f32 %v526_v34, %v519_v51 }
  0x6f   : > { %v536_v4 = vmul.f32 %v526_v34, %v521_v15  ;;  %v706_v18 = vrot.slane %v658_v56, 7  ;;  %v708_v43 = vrot.slane %v660_v13, 7  ;;  %v710_v33 = vrot.slane %v662_v1, 7 }
  0x70   : > { %v712_v48 = vrot.slane %v664_v22, 7  ;;  %v690_v5 = vadd.f32 %v674_v32, %v562_v30  ;;  %v692_v9 = vadd.f32 %v676_v11, %v564_v12  ;;  %v694_v14 = vadd.f32 %v678_v38, %v566_v49 }
  0x71   : > { %v696_v44 = vadd.f32 %v680_v8, %v568_v7  ;;  %v722_v16 = vadd.f32 %v706_v18, %v626_v63  ;;  %v724_v45 = vadd.f32 %v708_v43, %v628_v25  ;;  %v726_v3 = vadd.f32 %v710_v33, %v630_v26 }
  0x72   : > { %v728_v23 = vadd.f32 %v712_v48, %v632_v47  ;;  %v770_v46 = vrot.slane %v530_v35, 2  ;;  %v772_v57 = vrot.slane %v532_v0, 2  ;;  %v774_v28 = vrot.slane %v534_v61, 2 }
  0x73   : > { %v776_v10 = vrot.slane %v536_v4, 2  ;;  %v738_v41 = vrot.slane %v722_v16, 1  ;;  %v740_v31 = vrot.slane %v724_v45, 1  ;;  %v742_v21 = vrot.slane %v726_v3, 1 }
  0x74   : > { %v744_v27 = vrot.slane %v728_v23, 1  ;;  %v796_v19 = vperm.slane %v2009_v36, 1  ;;  %v875_v2 = vperm.slane %v873_v39, 0  ;;  %v876_v47 = vperm.slane %v873_v39, 1 }
  0x75   : > { %v754_v50 = vadd.f32 %v738_v41, %v690_v5  ;;  %v756_v51 = vadd.f32 %v740_v31, %v692_v9  ;;  %v758_v52 = vadd.f32 %v742_v21, %v694_v14 }
  0x76   : > { %v760_v15 = vadd.f32 %v744_v27, %v696_v44 }
  0x77   : > { %v786_v29 = vadd.f32 %v770_v46, %v754_v50  ;;  %v788_v34 = vadd.f32 %v772_v57, %v756_v51  ;;  %v790_v30 = vadd.f32 %v774_v28, %v758_v52 }
  0x78   : > { %v792_v12 = vadd.f32 %v776_v10, %v760_v15 }
  0x79   : > { %v800_v49 = vadd.f32 %v796_v19, %v786_v29  ;;  %v802_v7 = vadd.f32 %v796_v19, %v788_v34  ;;  %v804_v54 = vadd.f32 %v796_v19, %v790_v30 }
  0x7a   : > { %v806_v20 = vadd.f32 %v796_v19, %v792_v12 }
  0x7b   : > { %v808_v24 = vmax.f32 %v800_v49, 0.0  ;;  %v810_v17 = vmax.f32 %v802_v7, 0.0  ;;  %v812_v6 = vmax.f32 %v804_v54, 0.0 }
  0x7c   : > { %v814_v55 = vmax.f32 %v806_v20, 0.0 }
  0x7d   : > { %816 = vst [vmem:[#allocation2] sm:$0xf] %v808_v24  ;;  %v820_v53 = vrot.slane %v810_v17, 4 }
  0x7e   : > { %v830_v58 = vrot.slane %v814_v55, 4  ;;  %826 = vst [vmem:[#allocation2 + $0x8] sm:$0xf] %v812_v6 }
  0x7f   : > { %824 = vst [vmem:[#allocation2] sm:$0xf0] %v820_v53 }
  0x80   : > { %834 = vst [vmem:[#allocation2 + $0x8] sm:$0xf0] %v830_v58 }
  0x86   : > { %v836_v36 = vld [vmem:[#allocation2] sm:$0xff] }
  0x87   : > { %v838_v62 = vld [vmem:[#allocation2 + $0x8] sm:$0xff] }
  0x88   : > { %v840_v42 = vpack.c.bf16 %v838_v62, %v836_v36 }
  0x8a   : > { %1061 = vmatmul.bf16.vlgmr.msra.gmra.mxu1 %v840_v42  ;;  %1089 = vmatmul.bf16.vlgmr.msra.gmra.mxu3 %v840_v42 }
  0xe0   : > { %v1048_v63 = vpop.f32.mrf.mxu0 }
  0xe1   : > { %v1049_v26 = vadd.f32 %v1048_v63, %v875_v2 }
  0xe7   : > { %v1076_v25 = vpop.f32.mrf.mxu2 }
  0xe8   : > { %v1077_v37 = vadd.f32 %v1076_v25, %v876_v47  ;;  %v1050_v32 = vpop.f32.mrf.mxu0 }
  0xe9   : > { %v1051_v13 = vadd.f32 %v1050_v32, %v875_v2 }
  0xef   : > { %v1078_v8 = vpop.f32.mrf.mxu2 }
  0xf0   : > { %v1079_v22 = vadd.f32 %v1078_v8, %v876_v47 }
 0x107   : > { %v1062_v40 = vpop.f32.mrf.mxu1 }
 0x108   : > { %v1063_v59 = vadd.f32 %v1062_v40, %v1049_v26 }
 0x10a   : > { %v1095_v11 = vmax.f32 %v1063_v59, 0.0 }
 0x10d   : > { %v1090_v60 = vpop.f32.mrf.mxu3 }
 0x10e   : > { %v1091_v38 = vadd.f32 %v1090_v60, %v1077_v37 }
 0x10f   : > { %v1064_v35 = vpop.f32.mrf.mxu1 }
 0x110   : > { %v1096_v56 = vmax.f32 %v1091_v38, 0.0  ;;  %v1065_v0 = vadd.f32 %v1064_v35, %v1051_v13 }
 0x112   : > { %v1099_v1 = vpack.c.bf16 %v1096_v56, %v1095_v11  ;;  %v1097_v18 = vmax.f32 %v1065_v0, 0.0 }
 0x114   : > { %1101 = vst [vmem:[%s287_s7] sm:$0xff] %v1099_v1 }
 0x115   : > { %v1092_v61 = vpop.f32.mrf.mxu3 }
 0x116   : > { %v1093_v4 = vadd.f32 %v1092_v61, %v1079_v22 }
 0x118   : > { %v1098_v43 = vmax.f32 %v1093_v4, 0.0 }
 0x11a   : > { %v1100_v33 = vpack.c.bf16 %v1098_v43, %v1097_v18 }
 0x11c   : > { %1102 = vst [vmem:[%s287_s7 + $0x8] sm:$0xff] %v1100_v33 }
 0x11d PF: > { %s15_s20 = sadd.s32 1, %s1463_s20   ;;  %s2211_s18 = smov %s1459_s19 }
 0x11e   : > { %p12_p5 = scmp.ge.s32.totalorder %s15_s20, 4   ;;  %s2212_s19 = smov %s2214_s21 }
 0x120   :  { %14 = sbr.rel (!%p12_p5) target bundleno = 2 (0x2), region = 90 }

// kernel: mobilenet_v1.18
= control target key start
LH: loop header
LB: loop body
LE: loop exit
PB: predicated region body
PF: predicated region fallthrough
CT: control target
= control target key end

     0   :  { %s1520_s18 = smov 0   ;;  %s1522_s19 = smov 0   ;;  %s1865_s0 = inlined_call_operand.vmem [shape: bf16[4,2,3,3,256], index: 0, kind: input, shape index: {}]   ;;  %s1866_s1 = inlined_call_operand.vmem [shape: f32[9,256], index: 1, kind: input, shape index: {}]   ;;  %s1867_s2 = inlined_call_operand.vmem [shape: f32[1,256], index: 2, kind: input, shape index: {}]   ;;  %s1868_s3 = inlined_call_operand.vmem [shape: bf16[256,512], index: 3, kind: input, shape index: {}]   ;;  %s1869_s4 = inlined_call_operand.vmem [shape: f32[1,512], index: 4, kind: input, shape index: {}]   ;;  %s1870_s5 = inlined_call_operand.vmem [shape: bf16[2,8,512], index: 5, kind: output, shape index: {}]  }
   0x1   :  { %s1524_s20 = smov 0   ;;  %s1526_s21 = smov 0  }
   0x2   :  { %s1528_s22 = smov 0   ;;  %s1530_s23 = smov 0  }
   0x3   :  { %s1532_s24 = smov 0   ;;  %s1534_s25 = smov 0  }
   0x4   :  { %s1536_s26 = smov 0  }
   0x5 LB: > { %s24_s27 = sadd.s32 1, %s1479_s24  ;;  %s27_s28 = sadd.s32 1, %s1483_s25  ;;  %s1487_s26 = sphi %s1536_s26, %s15_s26   ;;  %s1483_s25 = sphi %s1534_s25, %s1880_s25   ;;  %s1479_s24 = sphi %s1532_s24, %s1879_s24   ;;  %s1475_s23 = sphi %s1530_s23, %s1878_s23   ;;  %s1471_s22 = sphi %s1528_s22, %s1877_s22   ;;  %s1467_s21 = sphi %s1526_s21, %s1876_s21   ;;  %s1463_s20 = sphi %s1524_s20, %s1875_s20   ;;  %s1459_s19 = sphi %s1522_s19, %s1874_s19   ;;  %s1455_s18 = sphi %s1520_s18, %s1873_s18  }
   0x6   : > { %p25_p0 = scmp.ge.s32.totalorder %s24_s27, 2  ;;  %s34_s29 = sadd.s32 1, %s1467_s21 }
   0x7   : > { %p41_p1 = scmp.ne.s32.totalorder %s1467_s21, %s1463_s20  ;;  %p42_p2 = scmp.eq.s32.totalorder %s1487_s26, 0 }
   0x8   : > { %s1882_s27 = smov (%p25_p0, %s24_s27), 0  ;;  %s1884_s28 = smov (!%p25_p0, %s27_s28), %s1483_s25 }
   0x9   : > { %p1574_p3 = por %p42_p2, %p41_p1  ;;  %s99_s6 = ssub.s32 %s1479_s24, %s1882_s27 }
   0xa   : > { %p29_p4 = scmp.ge.s32.totalorder %s1884_s28, 2  ;;  %p100_p5 = scmp.eq.s32.totalorder %s99_s6, 0 }
   0xb   : > { %s102_s7 = sadd.s32 1, %s1459_s19  ;;  %p109_p6 = scmp.ne.s32.totalorder %s1459_s19, %s1455_s18 }
   0xc   : > { %s1886_s28 = smov (%p29_p4, %s1884_s28), 0  ;;  %p1129_p9 = scmp.ge.s32.totalorder %s1487_s26, 4 }
   0xd   : > { %s1586_s8 = scalar_select %p100_p5, %s1459_s19, %s102_s7  }
   0xe   : > { %s31_s9 = ssub.s32 %s1483_s25, %s1886_s28  ;;  %p1590_p7 = por %p109_p6, %p42_p2 }
   0xf   : > { %p32_p8 = scmp.eq.s32.totalorder %s31_s9, 0  ;;  %195 = sbr.rel (%p1129_p9) target bundleno = 69 (0x45), region = 24 }
  0x11   : > { %s1595_s11 = scalar_select %p32_p8, %s1467_s21, %s34_s29  }
  0x14   : > { %198 = sbr.rel (!%p1574_p3) target bundleno = 33 (0x21), region = 28  ;;  %s200_s12 = sand.u32 (%p1574_p3), 1, %s1467_s21  }
  0x15   : > { %s1342_s13 = smul.u32 (%p1574_p3), 12, %s1483_s25 }
  0x16   : > { %s1341_s14 = smul.u32 (%p1574_p3), 48, %s200_s12 }
  0x17   : > { %s205_s17 = scalar_lea.vmem (%p1574_p3), %s1865_s0, %s1342_s13 }
  0x18   : > { %v222_v0 = vld [vmem:[%s205_s17] sm:$0xff] (%p1574_p3)   ;;  %v226_v1 = vld [vmem:[%s205_s17 + $0x8] sm:$0xf] (%p1574_p3)  ;;  %v228_v2 = vld [vmem:[%s205_s17 + $0x18] sm:$0xff] (%p1574_p3)   ;;  %s202_s29 = scalar_lea.vmem (%p1574_p3), [#allocation3], %s1341_s14 }
  0x19   : > { %223 = vst [vmem:[%s202_s29] sm:$0xff] %v222_v0   ;;  %v232_v3 = vld [vmem:[%s205_s17 + $0x20] sm:$0xf]  ;;  %v234_v4 = vld [vmem:[%s205_s17 + $0x30] sm:$0xff]   ;;  %v238_v5 = vld [vmem:[%s205_s17 + $0x38] sm:$0xf] }
  0x1a   : > { %227 = vst [vmem:[%s202_s29 + $0x8] sm:$0xf] %v226_v1  ;;  %v240_v6 = vld [vmem:[%s205_s17 + $0x48] sm:$0xff]   ;;  %v244_v7 = vld [vmem:[%s205_s17 + $0x50] sm:$0xf] }
  0x1b   : > { %229 = vst [vmem:[%s202_s29 + $0xc] sm:$0xff] %v228_v2  }
  0x1c   : > { %233 = vst [vmem:[%s202_s29 + $0x14] sm:$0xf] %v232_v3 }
  0x1d   : > { %235 = vst [vmem:[%s202_s29 + $0x18] sm:$0xff] %v234_v4  }
  0x1e   : > { %239 = vst [vmem:[%s202_s29 + $0x20] sm:$0xf] %v238_v5 }
  0x1f   : > { %241 = vst [vmem:[%s202_s29 + $0x24] sm:$0xff] %v240_v6  }
  0x20   : > { %245 = vst [vmem:[%s202_s29 + $0x2c] sm:$0xf] %v244_v7 }
  0x21 PF: > { %293 = sbr.rel (!%p1590_p7) target bundleno = 69 (0x45), region = 69  ;;  %s295_s30 = sand.u32 (%p1590_p7), 1, %s1459_s19  }
  0x22   : > { %s1299_s6 = sshll.u32 (%p1590_p7), %s1479_s24, 3  ;;  %s1131_s7 = sshll.u32 (%p1590_p7), %s295_s30, 8 }
  0x23   : > { %s1612_s13 = scalar_lea.vmem (%p1590_p7), %s1868_s3, %s1299_s6  ;;  %s1617_s10 = scalar_lea.vmem (%p1590_p7), [#allocation4], %s1131_s7 }
  0x24   : > { %v391_v8 = vld [vmem:[%s1612_s13] sm:$0xff] (%p1590_p7)  ;;  %v393_v9 = vld [vmem:[%s1612_s13 + $0x10] sm:$0xff] (%p1590_p7) }
  0x25   : > { %v395_v10 = vld [vmem:[%s1612_s13 + $0x20] sm:$0xff] (%p1590_p7)  ;;  %392 = vst [vmem:[%s1617_s10] sm:$0xff] (%p1590_p7), %v391_v8  ;;  %v397_v11 = vld [vmem:[%s1612_s13 + $0x30] sm:$0xff] (%p1590_p7) }
  0x26   : > { %394 = vst [vmem:[%s1617_s10 + $0x8] sm:$0xff] %v393_v9  ;;  %v399_v12 = vld [vmem:[%s1612_s13 + $0x40] sm:$0xff]  ;;  %v401_v13 = vld [vmem:[%s1612_s13 + $0x50] sm:$0xff] }
  0x27   : > { %396 = vst [vmem:[%s1617_s10 + $0x10] sm:$0xff] %v395_v10  ;;  %v403_v14 = vld [vmem:[%s1612_s13 + $0x60] sm:$0xff]  ;;  %v405_v15 = vld [vmem:[%s1612_s13 + $0x70] sm:$0xff] }
  0x28   : > { %398 = vst [vmem:[%s1617_s10 + $0x18] sm:$0xff] %v397_v11  ;;  %v407_v16 = vld [vmem:[%s1612_s13 + $0x80] sm:$0xff]  ;;  %v409_v17 = vld [vmem:[%s1612_s13 + $0x90] sm:$0xff] }
  0x29   : > { %400 = vst [vmem:[%s1617_s10 + $0x20] sm:$0xff] %v399_v12  ;;  %v411_v18 = vld [vmem:[%s1612_s13 + $0xa0] sm:$0xff]  ;;  %v413_v19 = vld [vmem:[%s1612_s13 + $0xb0] sm:$0xff] }
  0x2a   : > { %402 = vst [vmem:[%s1617_s10 + $0x28] sm:$0xff] %v401_v13  ;;  %v415_v20 = vld [vmem:[%s1612_s13 + $0xc0] sm:$0xff]  ;;  %v417_v21 = vld [vmem:[%s1612_s13 + $0xd0] sm:$0xff] }
  0x2b   : > { %404 = vst [vmem:[%s1617_s10 + $0x30] sm:$0xff] %v403_v14  ;;  %v419_v22 = vld [vmem:[%s1612_s13 + $0xe0] sm:$0xff]  ;;  %v421_v23 = vld [vmem:[%s1612_s13 + $0xf0] sm:$0xff] }
  0x2c   : > { %406 = vst [vmem:[%s1617_s10 + $0x38] sm:$0xff] %v405_v15  ;;  %v423_v24 = vld [vmem:[%s1612_s13 + $0x100] sm:$0xff]  ;;  %v425_v25 = vld [vmem:[%s1612_s13 + $0x110] sm:$0xff] }
  0x2d   : > { %408 = vst [vmem:[%s1617_s10 + $0x40] sm:$0xff] %v407_v16  ;;  %v427_v26 = vld [vmem:[%s1612_s13 + $0x120] sm:$0xff]  ;;  %v429_v27 = vld [vmem:[%s1612_s13 + $0x130] sm:$0xff] }
  0x2e   : > { %410 = vst [vmem:[%s1617_s10 + $0x48] sm:$0xff] %v409_v17  ;;  %v431_v28 = vld [vmem:[%s1612_s13 + $0x140] sm:$0xff]  ;;  %v433_v29 = vld [vmem:[%s1612_s13 + $0x150] sm:$0xff] }
  0x2f   : > { %412 = vst [vmem:[%s1617_s10 + $0x50] sm:$0xff] %v411_v18  ;;  %v435_v30 = vld [vmem:[%s1612_s13 + $0x160] sm:$0xff]  ;;  %v437_v31 = vld [vmem:[%s1612_s13 + $0x170] sm:$0xff] }
  0x30   : > { %414 = vst [vmem:[%s1617_s10 + $0x58] sm:$0xff] %v413_v19  ;;  %v439_v32 = vld [vmem:[%s1612_s13 + $0x180] sm:$0xff]  ;;  %v441_v33 = vld [vmem:[%s1612_s13 + $0x190] sm:$0xff] }
  0x31   : > { %416 = vst [vmem:[%s1617_s10 + $0x60] sm:$0xff] %v415_v20  ;;  %v443_v34 = vld [vmem:[%s1612_s13 + $0x1a0] sm:$0xff]  ;;  %v445_v35 = vld [vmem:[%s1612_s13 + $0x1b0] sm:$0xff] }
  0x32   : > { %418 = vst [vmem:[%s1617_s10 + $0x68] sm:$0xff] %v417_v21  ;;  %v447_v36 = vld [vmem:[%s1612_s13 + $0x1c0] sm:$0xff]  ;;  %v449_v37 = vld [vmem:[%s1612_s13 + $0x1d0] sm:$0xff] }
  0x33   : > { %420 = vst [vmem:[%s1617_s10 + $0x70] sm:$0xff] %v419_v22  ;;  %v451_v38 = vld [vmem:[%s1612_s13 + $0x1e0] sm:$0xff]  ;;  %v453_v39 = vld [vmem:[%s1612_s13 + $0x1f0] sm:$0xff] }
  0x34   : > { %422 = vst [vmem:[%s1617_s10 + $0x78] sm:$0xff] %v421_v23 }
  0x35   : > { %424 = vst [vmem:[%s1617_s10 + $0x80] sm:$0xff] %v423_v24 }
  0x36   : > { %426 = vst [vmem:[%s1617_s10 + $0x88] sm:$0xff] %v425_v25 }
  0x37   : > { %428 = vst [vmem:[%s1617_s10 + $0x90] sm:$0xff] %v427_v26 }
  0x38   : > { %430 = vst [vmem:[%s1617_s10 + $0x98] sm:$0xff] %v429_v27 }
  0x39   : > { %432 = vst [vmem:[%s1617_s10 + $0xa0] sm:$0xff] %v431_v28 }
  0x3a   : > { %434 = vst [vmem:[%s1617_s10 + $0xa8] sm:$0xff] %v433_v29 }
  0x3b   : > { %436 = vst [vmem:[%s1617_s10 + $0xb0] sm:$0xff] %v435_v30 }
  0x3c   : > { %438 = vst [vmem:[%s1617_s10 + $0xb8] sm:$0xff] %v437_v31 }
  0x3d   : > { %440 = vst [vmem:[%s1617_s10 + $0xc0] sm:$0xff] %v439_v32 }
  0x3e   : > { %442 = vst [vmem:[%s1617_s10 + $0xc8] sm:$0xff] %v441_v33 }
  0x3f   : > { %444 = vst [vmem:[%s1617_s10 + $0xd0] sm:$0xff] %v443_v34 }
  0x40   : > { %446 = vst [vmem:[%s1617_s10 + $0xd8] sm:$0xff] %v445_v35 }
  0x41   : > { %448 = vst [vmem:[%s1617_s10 + $0xe0] sm:$0xff] %v447_v36 }
  0x42   : > { %450 = vst [vmem:[%s1617_s10 + $0xe8] sm:$0xff] %v449_v37 }
  0x43   : > { %452 = vst [vmem:[%s1617_s10 + $0xf0] sm:$0xff] %v451_v38 }
  0x44   : > { %454 = vst [vmem:[%s1617_s10 + $0xf8] sm:$0xff] %v453_v39 }
  0x45 PF: > { %p1134_p10 = scmp.ge.s32.totalorder %s1487_s26, 1  ;;  %p467_p11 = scmp.lt.s32.totalorder %s1487_s26, 5 }
  0x47   : > { %p468_p12 = pnand %p1134_p10, %p467_p11 }
  0x48   : > { %s474_s14 = sand.u32 (!%p468_p12), 1, %s1463_s20   ;;  %s481_s15 = sand.u32 (!%p468_p12), 1, %s1455_s18  }
  0x49   : > { %471 = sbr.rel (%p468_p12) target bundleno = 318 (0x13e), region = 111  ;;  %s1135_s17 = sshll.u32 (!%p468_p12), %s481_s15, 8 }
  0x4a   : > { %s1343_s16 = smul.u32 (!%p468_p12), 48, %s474_s14  ;;  %s1136_s29 = sshll.u32 (!%p468_p12), %s1471_s22, 1 }
  0x4b   : > { %p522_p13 = scmp.lt.s32.totalorder (!%p468_p12), %s1136_s29, 3  ;;  %p527_p0 = scmp.lt.s32.totalorder (!%p468_p12), %s1475_s23, 1 }
  0x4c   : > { %s1699_s14 = scalar_lea.vmem (!%p468_p12), [#allocation3], %s1343_s16  ;;  %s1701_s15 = scalar_lea.vmem (!%p468_p12), [#allocation4], %s1135_s17 }
  0x4d   : > { %p1140_p1 = scmp.ne.s32.totalorder (!%p468_p12), %s1471_s22, 0 }
  0x4e   : > { %s1888_s29 = smov (!%p522_p13, %s1136_s29), 3  ;;  %s1890_s23 = smov (!%p527_p0, %s1475_s23), 1 }
  0x4f   : > { %s524_s7 = scalar_lea.vmem %s1869_s4, %s1888_s29  ;;  %s1138_s9 = sshll.u32 %s1890_s23, 2 }
  0x50   : > { %s532_s12 = sadd.s32 %s1138_s9, %s1888_s29  ;;  %539 = sbr.rel (%p1140_p1) target bundleno = 142 (0x8e), region = 123 }
  0x51   : > { %s1139_s13 = sshll.u32 %s532_s12, 2 }
  0x52   : > { %s1697_s18 = scalar_lea.vmem %s1870_s5, %s1139_s13 }
  0x55   : > { %v540_v40 = vld [vmem:[%s1699_s14] sm:$0x5]  ;;  %v541_v41 = vld [vmem:[%s1699_s14 + $0x4] sm:$0x5]  ;;  %vm549_vm0 = vcmask 1043456   ;;  %v1712_v45 = vld [vmem:[%s1699_s14 + $0x18] sm:$0xff]  }
  0x56   : > { %v1333_v42 = vld [vmem:[%s1699_s14] sm:$0xff]   ;;  %v1141_v44 = vld [vmem:[%s1699_s14 + $0xc] sm:$0x5]  ;;  %v542_v46 = vunpack.c.l.bf16 %v540_v40  ;;  %v543_v47 = vunpack.c.l.bf16 %v541_v41  ;;  %v1142_v50 = vld [vmem:[%s1699_s14 + $0x10] sm:$0x5]  ;;  %v1338_v57 = vunpack.c.l.bf16 %v1712_v45  ;;  %v1339_v4 = vunpack.c.h.bf16 %v1712_v45 }
  0x57   : > { %v544_v43 = vld [vmem:[%s1866_s1] ss:$8 sm:$0x3]  ;;  %v557_v52 = vunpack.c.l.bf16 %v1141_v44  ;;  %v1143_v53 = vld [vmem:[%s1866_s1 + $0x1] ss:$8 sm:$0x3]  ;;  %v1334_v54 = vunpack.c.l.bf16 %v1333_v42  ;;  %v1335_v55 = vunpack.c.h.bf16 %v1333_v42  ;;  %v558_v63 = vunpack.c.l.bf16 %v1142_v50 }
  0x58   : > { %v546_v48 = vperm.slane %v544_v43, 0  ;;  %v547_v49 = vperm.slane %v544_v43, 1  ;;  %v1145_v51 = vld [vmem:[%s1699_s14 + $0x18] sm:$0x5]  ;;  %v562_v59 = vperm.slane %v1143_v53, 0  ;;  %v563_v60 = vperm.slane %v1143_v53, 1 }
  0x59   : > { %v1144_v56 = vld [vmem:[%s1866_s1 + $0x2] ss:$8 sm:$0x3]  ;;  %v1146_v62 = vld [vmem:[%s1699_s14 + $0x1c] sm:$0x5]  ;;  %v587_v1 = vunpack.c.l.bf16 %v1145_v51 }
  0x5a   : > { %v548_v58 = vrot.slane %v547_v49, 4  ;;  %v576_v61 = vperm.slane %v1144_v56, 0  ;;  %v577_v0 = vperm.slane %v1144_v56, 1  ;;  %v1147_v2 = vld [vmem:[%s1866_s1 + $0x3] ss:$8 sm:$0x3]  ;;  %v588_v13 = vunpack.c.l.bf16 %v1146_v62 }
  0x5b   : > { %v1148_v3 = vld [vmem:[%s1699_s14 + $0x24] sm:$0x5]  ;;  %v564_v6 = vrot.slane %v563_v60, 4  ;;  %v592_v7 = vperm.slane %v1147_v2, 0  ;;  %v593_v8 = vperm.slane %v1147_v2, 1 }
  0x5c   : > { %v550_v5 = vsel %vm549_vm0, %v546_v48, %v548_v58  ;;  %v1149_v9 = vld [vmem:[%s1699_s14 + $0x28] sm:$0x5]  ;;  %v578_v12 = vrot.slane %v577_v0, 4  ;;  %v1150_v14 = vld [vmem:[%s1866_s1 + $0x4] ss:$8 sm:$0x3]  ;;  %v602_v17 = vunpack.c.l.bf16 %v1148_v3 }
  0x5d   : > { %v552_v10 = vmul.f32 %v550_v5, %v542_v46  ;;  %v1731_v11 = vmul.f32 %v550_v5, %v543_v47  ;;  %v565_v15 = vsel %vm549_vm0, %v562_v59, %v564_v6  ;;  %v594_v16 = vrot.slane %v593_v8, 4  ;;  %v1153_v19 = vld [vmem:[%s1866_s1 + $0x5] ss:$8 sm:$0x3]  ;;  %v1154_v24 = vld [vmem:[%s1699_s14 + $0x4] sm:$0x5] }
  0x5e   : > { %v603_v18 = vunpack.c.l.bf16 %v1149_v9  ;;  %v567_v20 = vmul.f32 %v565_v15, %v557_v52  ;;  %v579_v21 = vsel %vm549_vm0, %v576_v61, %v578_v12  ;;  %v607_v22 = vperm.slane %v1150_v14, 0  ;;  %v1155_v25 = vld [vmem:[%s1699_s14 + $0x8] sm:$0x5]  ;;  %v1156_v30 = vld [vmem:[%s1866_s1 + $0x6] ss:$8 sm:$0x3] }
  0x5f   : > { %v608_v23 = vperm.slane %v1150_v14, 1  ;;  %v580_v26 = vrot.slane %v579_v21, 7  ;;  %v595_v27 = vsel %vm549_vm0, %v592_v7, %v594_v16  ;;  %v621_v28 = vperm.slane %v1153_v19, 0  ;;  %v1157_v35 = vld [vmem:[%s1699_s14 + $0x10] sm:$0x5]  ;;  %v1160_v47 = vld [vmem:[%s1699_s14 + $0x4] sm:$0xff]  }
  0x60   : > { %v622_v29 = vperm.slane %v1153_v19, 1  ;;  %v568_v31 = vmul.f32 %v565_v15, %v558_v63  ;;  %v597_v32 = vmul.f32 %v595_v27, %v587_v1  ;;  %v598_v33 = vmul.f32 %v595_v27, %v588_v13  ;;  %v1158_v40 = vld [vmem:[%s1699_s14 + $0x14] sm:$0x5]  ;;  %v1159_v41 = vld [vmem:[%s1866_s1 + $0x7] ss:$8 sm:$0x3] }
  0x61   : > { %v609_v34 = vrot.slane %v608_v23, 4  ;;  %v582_v36 = vmul.f32 %v1334_v54, %v580_v26  ;;  %v583_v37 = vmul.f32 %v1335_v55, %v580_v26  ;;  %v632_v39 = vunpack.c.l.bf16 %v1154_v24  ;;  %v1162_v48 = vld [vmem:[%s1866_s1 + $0x10] ss:$8 sm:$0x3] }
  0x62   : > { %v623_v38 = vrot.slane %v622_v29, 4  ;;  %v633_v43 = vunpack.c.l.bf16 %v1155_v25  ;;  %v637_v44 = vperm.slane %v1156_v30, 0  ;;  %v638_v46 = vperm.slane %v1156_v30, 1 }
  0x63   : > { %v610_v42 = vsel %vm549_vm0, %v607_v22, %v609_v34  ;;  %v647_v52 = vunpack.c.l.bf16 %v1157_v35  ;;  %v652_v55 = vperm.slane %v1159_v41, 0  ;;  %v653_v56 = vperm.slane %v1159_v41, 1 }
  0x64   : > { %v612_v49 = vmul.f32 %v610_v42, %v602_v17  ;;  %v613_v50 = vmul.f32 %v610_v42, %v603_v18  ;;  %v624_v51 = vsel %vm549_vm0, %v621_v28, %v623_v38  ;;  %v639_v54 = vrot.slane %v638_v46, 4  ;;  %v720_v18 = vld [vmem:[%s1867_s2] sm:$0x3] }
  0x65   : > { %v625_v53 = vrot.slane %v624_v51, 7  ;;  %v648_v58 = vunpack.c.l.bf16 %v1158_v40  ;;  %v661_v59 = vunpack.c.l.bf16 %v1160_v47  ;;  %v666_v60 = vperm.slane %v1162_v48, 0 }
  0x66   : > { %v667_v61 = vperm.slane %v1162_v48, 1  ;;  %v640_v0 = vsel %vm549_vm0, %v637_v44, %v639_v54  ;;  %v654_v1 = vrot.slane %v653_v56, 4  ;;  %v662_v5 = vunpack.c.h.bf16 %v1160_v47 }
  0x67   : > { %v627_v62 = vmul.f32 %v1338_v57, %v625_v53  ;;  %v628_v63 = vmul.f32 %v1339_v4, %v625_v53  ;;  %v642_v2 = vmul.f32 %v640_v0, %v632_v39  ;;  %v643_v3 = vmul.f32 %v640_v0, %v633_v43 }
  0x68   : > { %v668_v6 = vrot.slane %v667_v61, 4  ;;  %v655_v7 = vsel %vm549_vm0, %v652_v55, %v654_v1  ;;  %v674_v8 = vadd.f32 %v567_v20, %v552_v10  ;;  %v678_v9 = vrot.slane %v597_v32, 7 }
  0x69   : > { %v679_v12 = vrot.slane %v598_v33, 7  ;;  %v657_v13 = vmul.f32 %v655_v7, %v647_v52  ;;  %v658_v14 = vmul.f32 %v655_v7, %v648_v58  ;;  %v1163_v16 = vrot.slane %v627_v62, 9 }
  0x6a   : > { %v669_v15 = vsel %vm549_vm0, %v666_v60, %v668_v6  ;;  %v682_v57 = vadd.f32 %v678_v9, %v582_v36  ;;  %v1164_v17 = vrot.slane %v628_v63, 9  ;;  %v675_v19 = vadd.f32 %v568_v31, %v1731_v11 }
  0x6b   : > { %v670_v45 = vrot.slane %v669_v15, 7  ;;  %v683_v4 = vadd.f32 %v679_v12, %v583_v37  ;;  %v692_v21 = vadd.f32 %v1163_v16, %v612_v49  ;;  %v694_v22 = vadd.f32 %v657_v13, %v642_v2 }
  0x6c   : > { %v695_v10 = vadd.f32 %v658_v14, %v643_v3  ;;  %v693_v23 = vadd.f32 %v1164_v17, %v613_v50  ;;  %v1165_v24 = vrot.slane %v682_v57, 9  ;;  %v722_v25 = vperm.slane %v720_v18, 0 }
  0x6d   : > { %v672_v20 = vmul.f32 %v670_v45, %v661_v59  ;;  %v1166_v26 = vrot.slane %v683_v4, 9  ;;  %v706_v27 = vadd.f32 %v694_v22, %v692_v21  ;;  %v723_v28 = vperm.slane %v720_v18, 1 }
  0x6e   : > { %v673_v29 = vmul.f32 %v670_v45, %v662_v5  ;;  %v704_v30 = vadd.f32 %v1165_v24, %v674_v8  ;;  %v707_v32 = vadd.f32 %v695_v10, %v693_v23  ;;  %v1489_v34 = vmov 0.0  }
  0x6f   : > { %v1167_v33 = vrot.slane %v672_v20, 9  ;;  %749 = vst [vmem:[#allocation2] sm:$0xf0] %v1489_v34  ;;  %v705_v35 = vadd.f32 %v1166_v26, %v675_v19  ;;  %v724_v36 = vrot.slane %v723_v28, 4 }
  0x70   : > { %750 = vst [vmem:[#allocation2 + $0x8] sm:$0xf0] %v1489_v34  ;;  %v708_v11 = vadd.f32 %v706_v27, %v704_v30  ;;  %v1168_v38 = vrot.slane %v673_v29, 9 }
  0x71   : > { %v725_v31 = vsel %vm549_vm0, %v722_v25, %v724_v36  ;;  %v709_v37 = vadd.f32 %v707_v32, %v705_v35 }
  0x72   : > { %v718_v39 = vadd.f32 %v1167_v33, %v708_v11 }
  0x73   : > { %v719_v41 = vadd.f32 %v1168_v38, %v709_v37 }
  0x74   : > { %v727_v40 = vadd.f32 %v725_v31, %v718_v39 }
  0x75   : > { %v728_v43 = vadd.f32 %v725_v31, %v719_v41 }
  0x76   : > { %v729_v42 = vmax.f32 %v727_v40, 0.0 }
  0x77   : > { %v730_v44 = vmax.f32 %v728_v43, 0.0 }
  0x78   : > { %732 = vst [vmem:[#allocation1] ss:$2 sm:$0xff] %v729_v42 }
  0x7f   : > { %v733_v46 = vld.sshfl [vmem:[#allocation1] sm:$0xff pattern:$0x75316420]  ;;  %v734_v47 = vld.sshfl [vmem:[#allocation1 + $0x8] sm:$0xff pattern:$0x75316420] }
  0x80   : > { %737 = vst [vmem:[#allocation2] sm:$0x3] %v733_v46 }
  0x81   : > { %738 = vst [vmem:[#allocation2 + $0x8] sm:$0x3] %v734_v47 }
  0x82   : > { %740 = vst [vmem:[#allocation1] ss:$2 sm:$0xff] %v730_v44 }
  0x89   : > { %v741_v48 = vld.sshfl [vmem:[#allocation1] sm:$0xff pattern:$0x75316420]  ;;  %v742_v49 = vld.sshfl [vmem:[#allocation1 + $0x8] sm:$0xff pattern:$0x75316420] }
  0x8a   : > { %v743_v50 = vrot.slane %v741_v48, 6  ;;  %v744_v51 = vrot.slane %v742_v49, 6 }
  0x8c   : > { %747 = vst [vmem:[#allocation2] sm:$0xc] %v743_v50 }
  0x8d   : > { %748 = vst [vmem:[#allocation2 + $0x8] sm:$0xc] %v744_v51 }
  0x8e PF: > { %v1227_v52 = vld [vmem:[%s1701_s15 + $0x70] sm:$0xf]  ;;  %v1315_v53 = vld [vmem:[%s1701_s15 + $0x74] sm:$0xf0]  ;;  %v1314_v58 = vld [vmem:[%s1701_s15 + $0x74] sm:$0xf] }
  0x8f   : > { %v1291_v54 = vld [vmem:[%s1701_s15 + $0xf0] sm:$0xf]  ;;  %v1228_v55 = vor.u32 %v1315_v53, %v1227_v52  ;;  %v1331_v56 = vld [vmem:[%s1701_s15 + $0xf4] sm:$0xf0]  ;;  %v1229_v59 = vld [vmem:[%s1701_s15 + $0x78] sm:$0xf0] }
  0x90   : > { %v1292_v60 = vor.u32 %v1331_v56, %v1291_v54  ;;  %v1232_v61 = vor.u32 %v1314_v58, %v1229_v59  ;;  %v1330_v62 = vld [vmem:[%s1701_s15 + $0xf4] sm:$0xf]  ;;  %v1293_v63 = vld [vmem:[%s1701_s15 + $0xf8] sm:$0xf0]  ;;  %v1219_v0 = vld [vmem:[%s1701_s15 + $0x60] sm:$0xf] }
  0x91   : > { %953 = vmatpush.bf16.msra.mxu0 %v1228_v55  ;;  %v1296_v1 = vor.u32 %v1330_v62, %v1293_v63  ;;  %v1313_v2 = vld [vmem:[%s1701_s15 + $0x64] sm:$0xf0]  ;;  %v1283_v3 = vld [vmem:[%s1701_s15 + $0xe0] sm:$0xf]  ;;  %v1312_v8 = vld [vmem:[%s1701_s15 + $0x64] sm:$0xf] }
  0x92   : > { %v1329_v5 = vld [vmem:[%s1701_s15 + $0xe4] sm:$0xf0]  ;;  %966 = vmatpush.bf16.msra.mxu1 %v1292_v60  ;;  %979 = vmatpush.bf16.msra.mxu2 %v1232_v61  ;;  %v1220_v6 = vor.u32 %v1313_v2, %v1219_v0  ;;  %v1221_v9 = vld [vmem:[%s1701_s15 + $0x68] sm:$0xf0]  ;;  %v1328_v12 = vld [vmem:[%s1701_s15 + $0xe4] sm:$0xf] }
  0x93   : > { %v1284_v7 = vor.u32 %v1329_v5, %v1283_v3  ;;  %992 = vmatpush.bf16.msra.mxu3 %v1296_v1  ;;  %v1224_v13 = vor.u32 %v1312_v8, %v1221_v9  ;;  %v1285_v14 = vld [vmem:[%s1701_s15 + $0xe8] sm:$0xf0]  ;;  %v1211_v15 = vld [vmem:[%s1701_s15 + $0x50] sm:$0xf]  ;;  %v1311_v16 = vld [vmem:[%s1701_s15 + $0x54] sm:$0xf0] }
  0x94   : > { %v1288_v45 = vor.u32 %v1328_v12, %v1285_v14  ;;  %v1275_v57 = vld [vmem:[%s1701_s15 + $0xd0] sm:$0xf]  ;;  %v1327_v4 = vld [vmem:[%s1701_s15 + $0xd4] sm:$0xf0]  ;;  %v1310_v17 = vld [vmem:[%s1701_s15 + $0x54] sm:$0xf]  ;;  %v1212_v18 = vor.u32 %v1311_v16, %v1211_v15 }
  0x95   : > { %954 = vmatpush.bf16.msra.mxu0 %v1220_v6  ;;  %v1213_v19 = vld [vmem:[%s1701_s15 + $0x58] sm:$0xf0]  ;;  %v1326_v21 = vld [vmem:[%s1701_s15 + $0xd4] sm:$0xf]  ;;  %v1276_v10 = vor.u32 %v1327_v4, %v1275_v57  ;;  %v1203_v23 = vld [vmem:[%s1701_s15 + $0x40] sm:$0xf] }
  0x96   : > { %v1277_v22 = vld [vmem:[%s1701_s15 + $0xd8] sm:$0xf0]  ;;  %967 = vmatpush.bf16.msra.mxu1 %v1284_v7  ;;  %980 = vmatpush.bf16.msra.mxu2 %v1224_v13  ;;  %v1216_v20 = vor.u32 %v1310_v17, %v1213_v19  ;;  %v1309_v24 = vld [vmem:[%s1701_s15 + $0x44] sm:$0xf0]  ;;  %v1267_v25 = vld [vmem:[%s1701_s15 + $0xc0] sm:$0xf] }
  0x97   : > { %993 = vmatpush.bf16.msra.mxu3 %v1288_v45  ;;  %v1280_v26 = vor.u32 %v1326_v21, %v1277_v22  ;;  %v1325_v27 = vld [vmem:[%s1701_s15 + $0xc4] sm:$0xf0]  ;;  %v1308_v28 = vld [vmem:[%s1701_s15 + $0x44] sm:$0xf]  ;;  %v1205_v29 = vld [vmem:[%s1701_s15 + $0x48] sm:$0xf0]  ;;  %v1204_v33 = vor.u32 %v1309_v24, %v1203_v23 }
  0x98   : > { %v1324_v30 = vld [vmem:[%s1701_s15 + $0xc4] sm:$0xf]  ;;  %v1269_v32 = vld [vmem:[%s1701_s15 + $0xc8] sm:$0xf0]  ;;  %v1268_v34 = vor.u32 %v1325_v27, %v1267_v25  ;;  %v1208_v35 = vor.u32 %v1308_v28, %v1205_v29  ;;  %v1195_v36 = vld [vmem:[%s1701_s15 + $0x30] sm:$0xf] }
  0x99   : > { %955 = vmatpush.bf16.msra.mxu0 %v1212_v18  ;;  %v1307_v11 = vld [vmem:[%s1701_s15 + $0x34] sm:$0xf0]  ;;  %v1259_v31 = vld [vmem:[%s1701_s15 + $0xb0] sm:$0xf]  ;;  %v1272_v37 = vor.u32 %v1324_v30, %v1269_v32  ;;  %v1306_v39 = vld [vmem:[%s1701_s15 + $0x34] sm:$0xf] }
  0x9a   : > { %968 = vmatpush.bf16.msra.mxu1 %v1276_v10  ;;  %981 = vmatpush.bf16.msra.mxu2 %v1216_v20  ;;  %v1323_v38 = vld [vmem:[%s1701_s15 + $0xb4] sm:$0xf0]  ;;  %v1197_v40 = vld [vmem:[%s1701_s15 + $0x38] sm:$0xf0]  ;;  %v1322_v41 = vld [vmem:[%s1701_s15 + $0xb4] sm:$0xf]  ;;  %v1196_v43 = vor.u32 %v1307_v11, %v1195_v36 }
  0x9b   : > { %994 = vmatpush.bf16.msra.mxu3 %v1280_v26  ;;  %v1261_v42 = vld [vmem:[%s1701_s15 + $0xb8] sm:$0xf0]  ;;  %v1260_v44 = vor.u32 %v1323_v38, %v1259_v31  ;;  %v1200_v46 = vor.u32 %v1306_v39, %v1197_v40  ;;  %v1187_v47 = vld [vmem:[%s1701_s15 + $0x20] sm:$0xf]  ;;  %v1305_v48 = vld [vmem:[%s1701_s15 + $0x24] sm:$0xf0] }
  0x9c   : > { %v1251_v49 = vld [vmem:[%s1701_s15 + $0xa0] sm:$0xf]  ;;  %v1264_v50 = vor.u32 %v1322_v41, %v1261_v42  ;;  %v1321_v51 = vld [vmem:[%s1701_s15 + $0xa4] sm:$0xf0]  ;;  %v1304_v52 = vld [vmem:[%s1701_s15 + $0x24] sm:$0xf]  ;;  %v1188_v56 = vor.u32 %v1305_v48, %v1187_v47 }
  0x9d   : > { %956 = vmatpush.bf16.msra.mxu0 %v1204_v33  ;;  %v1189_v53 = vld [vmem:[%s1701_s15 + $0x28] sm:$0xf0]  ;;  %v1320_v54 = vld [vmem:[%s1701_s15 + $0xa4] sm:$0xf]  ;;  %v1252_v58 = vor.u32 %v1321_v51, %v1251_v49  ;;  %v1179_v60 = vld [vmem:[%s1701_s15 + $0x10] sm:$0xf] }
  0x9e   : > { %969 = vmatpush.bf16.msra.mxu1 %v1268_v34  ;;  %982 = vmatpush.bf16.msra.mxu2 %v1208_v35  ;;  %v1253_v55 = vld [vmem:[%s1701_s15 + $0xa8] sm:$0xf0]  ;;  %v1192_v59 = vor.u32 %v1304_v52, %v1189_v53  ;;  %v1303_v61 = vld [vmem:[%s1701_s15 + $0x14] sm:$0xf0]  ;;  %v1243_v62 = vld [vmem:[%s1701_s15 + $0x90] sm:$0xf] }
  0x9f   : > { %995 = vmatpush.bf16.msra.mxu3 %v1272_v37  ;;  %v1256_v63 = vor.u32 %v1320_v54, %v1253_v55  ;;  %v1319_v0 = vld [vmem:[%s1701_s15 + $0x94] sm:$0xf0]  ;;  %v1302_v1 = vld [vmem:[%s1701_s15 + $0x14] sm:$0xf]  ;;  %v1181_v2 = vld [vmem:[%s1701_s15 + $0x18] sm:$0xf0]  ;;  %v1180_v6 = vor.u32 %v1303_v61, %v1179_v60 }
  0xa0   : > { %v1318_v3 = vld [vmem:[%s1701_s15 + $0x94] sm:$0xf]  ;;  %v1245_v5 = vld [vmem:[%s1701_s15 + $0x98] sm:$0xf0]  ;;  %v1244_v7 = vor.u32 %v1319_v0, %v1243_v62  ;;  %v1184_v8 = vor.u32 %v1302_v1, %v1181_v2  ;;  %v1171_v9 = vld [vmem:[%s1701_s15] sm:$0xf] }
  0xa1   : > { %957 = vmatpush.bf16.msra.mxu0 %v1196_v43  ;;  %v1301_v12 = vld [vmem:[%s1701_s15 + $0x4] sm:$0xf0]  ;;  %v1235_v13 = vld [vmem:[%s1701_s15 + $0x80] sm:$0xf]  ;;  %v1248_v14 = vor.u32 %v1318_v3, %v1245_v5  ;;  %v1300_v16 = vld [vmem:[%s1701_s15 + $0x4] sm:$0xf] }
  0xa2   : > { %970 = vmatpush.bf16.msra.mxu1 %v1260_v44  ;;  %983 = vmatpush.bf16.msra.mxu2 %v1200_v46  ;;  %v1317_v15 = vld [vmem:[%s1701_s15 + $0x84] sm:$0xf0]  ;;  %v1173_v45 = vld [vmem:[%s1701_s15 + $0x8] sm:$0xf0]  ;;  %v1316_v57 = vld [vmem:[%s1701_s15 + $0x84] sm:$0xf]  ;;  %v1172_v17 = vor.u32 %v1301_v12, %v1171_v9 }
  0xa3   : > { %996 = vmatpush.bf16.msra.mxu3 %v1264_v50  ;;  %v1237_v4 = vld [vmem:[%s1701_s15 + $0x88] sm:$0xf0]  ;;  %v751_v18 = vld [vmem:[#allocation2] sm:$0xff]  ;;  %v1236_v19 = vor.u32 %v1317_v15, %v1235_v13  ;;  %v1176_v21 = vor.u32 %v1300_v16, %v1173_v45  ;;  %v752_v22 = vld [vmem:[#allocation2 + $0x8] sm:$0xff] }
  0xa4   : > { %v1240_v10 = vor.u32 %v1316_v57, %v1237_v4  ;;  %v753_v20 = vpack.c.bf16 %v751_v18, %v751_v18  ;;  %v754_v23 = vpack.c.bf16 %v752_v22, %v752_v22  ;;  %v787_v24 = vld [vmem:[%s524_s7] sm:$0x3] }
  0xa5   : > { %958 = vmatpush.bf16.msra.mxu0 %v1188_v56  ;;  %v789_v25 = vperm.slane %v787_v24, 0  ;;  %v790_v29 = vperm.slane %v787_v24, 1 }
  0xa6   : > { %971 = vmatpush.bf16.msra.mxu1 %v1252_v58  ;;  %984 = vmatpush.bf16.msra.mxu2 %v1192_v59 }
  0xa7   : > { %997 = vmatpush.bf16.msra.mxu3 %v1256_v63 }
  0xa9   : > { %959 = vmatpush.bf16.msra.mxu0 %v1180_v6 }
  0xaa   : > { %972 = vmatpush.bf16.msra.mxu1 %v1244_v7  ;;  %985 = vmatpush.bf16.msra.mxu2 %v1184_v8 }
  0xab   : > { %998 = vmatpush.bf16.msra.mxu3 %v1248_v14 }
  0xad   : > { %960 = vmatpush.bf16.msra.mxu0 %v1172_v17 }
  0xae   : > { %973 = vmatpush.bf16.msra.mxu1 %v1236_v19  ;;  %986 = vmatpush.bf16.msra.mxu2 %v1176_v21 }
  0xaf   : > { %999 = vmatpush.bf16.msra.mxu3 %v1240_v10 }
  0xb0   : > { %961 = vmatmul.bf16.vlgmr.msra.gmra.mxu0 %v753_v20 }
  0xb1   : > { %974 = vmatmul.bf16.vlgmr.msra.gmra.mxu1 %v754_v23  ;;  %987 = vmatmul.bf16.vlgmr.msra.gmra.mxu2 %v753_v20 }
  0xb2   : > { %1000 = vmatmul.bf16.vlgmr.msra.gmra.mxu3 %v754_v23 }
 0x12d   : > { %v962_v26 = vpop.f32.mrf.mxu0 }
 0x12e   : > { %v975_v27 = vpop.f32.mrf.mxu1  ;;  %v963_v28 = vadd.f32 %v962_v26, %v789_v25 }
 0x130   : > { %v976_v30 = vadd.f32 %v975_v27, %v963_v28 }
 0x132   : > { %v1005_v11 = vmax.f32 %v976_v30, 0.0 }
 0x134   : > { %v988_v32 = vpop.f32.mrf.mxu2 }
 0x135   : > { %v989_v33 = vadd.f32 %v988_v32, %v790_v29  ;;  %v1001_v34 = vpop.f32.mrf.mxu3  ;;  %v964_v35 = vpop.f32.mrf.mxu0 }
 0x136   : > { %v977_v36 = vpop.f32.mrf.mxu1 }
 0x137   : > { %v1002_v31 = vadd.f32 %v1001_v34, %v989_v33 }
 0x139   : > { %v1006_v37 = vmax.f32 %v1002_v31, 0.0 }
 0x13b   : > { %v1007_v38 = vpack.c.bf16 %v1006_v37, %v1005_v11 }
 0x13c   : > { %v990_v39 = vpop.f32.mrf.mxu2 }
 0x13d   : > { %1008 = vst [vmem:[%s1697_s18] sm:$0xff] %v1007_v38  ;;  %v1003_v40 = vpop.f32.mrf.mxu3 }
 0x13e PF: > { %s15_s26 = sadd.s32 1, %s1487_s26   ;;  %s1873_s18 = smov %s1459_s19 }
 0x13f   : > { %p12_p2 = scmp.ge.s32.totalorder %s15_s26, 6   ;;  %s1874_s19 = smov %s1586_s8 }
 0x140   : > { %s1875_s20 = smov %s1467_s21  ;;  %s1876_s21 = smov %s1595_s11 }
 0x141   : > { %s1877_s22 = smov %s1479_s24  ;;  %s1878_s23 = smov %s1483_s25 }
 0x142   : > { %s1879_s24 = smov %s1882_s27  ;;  %s1880_s25 = smov %s1886_s28 }
 0x143   :  { %14 = sbr.rel (!%p12_p2) target bundleno = 5 (0x5), region = 182 }

// kernel: mobilenet_v1.19
= control target key start
LH: loop header
LB: loop body
LE: loop exit
PB: predicated region body
PF: predicated region fallthrough
CT: control target
= control target key end

     0   :  { %s2160_s18 = smov 0   ;;  %s2162_s19 = smov 0   ;;  %s2770_s0 = inlined_call_operand.vmem [shape: bf16[1,2,4,4,512], index: 0, kind: input, shape index: {}]   ;;  %s2771_s1 = inlined_call_operand.vmem [shape: f32[9,512], index: 1, kind: input, shape index: {}]   ;;  %s2772_s2 = inlined_call_operand.vmem [shape: f32[1,512], index: 2, kind: input, shape index: {}]   ;;  %s2773_s3 = inlined_call_operand.vmem [shape: bf16[512,512], index: 3, kind: input, shape index: {}]   ;;  %s2774_s4 = inlined_call_operand.vmem [shape: f32[1,512], index: 4, kind: input, shape index: {}]   ;;  %s2775_s5 = inlined_call_operand.vmem [shape: bf16[2,8,512], index: 5, kind: output, shape index: {}]  }
   0x1   :  { %s2164_s20 = smov 0   ;;  %s2166_s21 = smov 0  }
   0x2   :  { %s2168_s22 = smov 0   ;;  %s2170_s23 = smov 0  }
   0x3   :  { %s2172_s24 = smov 0  }
   0x4 LB: > { %s24_s25 = sadd.s32 1, %s2119_s22  ;;  %s27_s26 = sadd.s32 1, %s2123_s23  ;;  %s2127_s24 = sphi %s2172_s24, %s15_s24   ;;  %s2123_s23 = sphi %s2170_s23, %s2786_s23   ;;  %s2119_s22 = sphi %s2168_s22, %s2785_s22   ;;  %s2115_s21 = sphi %s2166_s21, %s2784_s21   ;;  %s2111_s20 = sphi %s2164_s20, %s2783_s20   ;;  %s2107_s19 = sphi %s2162_s19, %s2782_s19   ;;  %s2103_s18 = sphi %s2160_s18, %s2781_s18  }
   0x5   : > { %p25_p0 = scmp.ge.s32.totalorder %s24_s25, 2  ;;  %s102_s27 = sadd.s32 1, %s2107_s19 }
   0x6   : > { %p109_p1 = scmp.ne.s32.totalorder %s2107_s19, %s2103_s18  ;;  %p110_p2 = scmp.eq.s32.totalorder %s2127_s24, 0 }
   0x7   : > { %s2788_s25 = smov (%p25_p0, %s24_s25), 0  ;;  %s2790_s26 = smov (!%p25_p0, %s27_s26), %s2123_s23 }
   0x8   : > { %s99_s28 = ssub.s32 %s2119_s22, %s2788_s25  ;;  %p111_p3 = por %p110_p2, %p109_p1 }
   0x9   : > { %p29_p4 = scmp.ge.s32.totalorder %s2790_s26, 2  ;;  %p100_p5 = scmp.eq.s32.totalorder %s99_s28, 0 }
   0xa   : > { %p1635_p6 = scmp.ge.s32.totalorder %s2127_s24, 4 }
   0xb   : > { %s2792_s26 = smov (%p29_p4, %s2790_s26), 0 }
   0xc   : > { %s2209_s29 = scalar_select %p100_p5, %s2107_s19, %s102_s27  }
   0xd   : > { %195 = sbr.rel (%p1635_p6) target bundleno = 86 (0x56), region = 24 }
  0x12   : > { %206 = sbr.rel (!%p111_p3) target bundleno = 86 (0x56), region = 32  ;;  %s208_s30 = sand.u32 (%p111_p3), 1, %s2107_s19  }
  0x13   : > { %s1950_s6 = sshll.u32 (%p111_p3), %s2119_s22, 3  ;;  %s1636_s7 = sshll.u32 (%p111_p3), %s208_s30, 9 }
  0x14   : > { %s2217_s10 = scalar_lea.vmem (%p111_p3), %s2773_s3, %s1950_s6  ;;  %s2222_s11 = scalar_lea.vmem (%p111_p3), [#allocation3], %s1636_s7 }
  0x15   : > { %v368_v0 = vld [vmem:[%s2217_s10] sm:$0xff] (%p111_p3)  ;;  %v370_v1 = vld [vmem:[%s2217_s10 + $0x10] sm:$0xff] (%p111_p3) }
  0x16   : > { %v372_v2 = vld [vmem:[%s2217_s10 + $0x20] sm:$0xff] (%p111_p3)  ;;  %369 = vst [vmem:[%s2222_s11] sm:$0xff] (%p111_p3), %v368_v0  ;;  %v374_v3 = vld [vmem:[%s2217_s10 + $0x30] sm:$0xff] (%p111_p3) }
  0x17   : > { %371 = vst [vmem:[%s2222_s11 + $0x8] sm:$0xff] %v370_v1  ;;  %v376_v4 = vld [vmem:[%s2217_s10 + $0x40] sm:$0xff]  ;;  %v378_v5 = vld [vmem:[%s2217_s10 + $0x50] sm:$0xff] }
  0x18   : > { %373 = vst [vmem:[%s2222_s11 + $0x10] sm:$0xff] %v372_v2  ;;  %v380_v6 = vld [vmem:[%s2217_s10 + $0x60] sm:$0xff]  ;;  %v382_v7 = vld [vmem:[%s2217_s10 + $0x70] sm:$0xff] }
  0x19   : > { %375 = vst [vmem:[%s2222_s11 + $0x18] sm:$0xff] %v374_v3  ;;  %v384_v8 = vld [vmem:[%s2217_s10 + $0x80] sm:$0xff]  ;;  %v386_v9 = vld [vmem:[%s2217_s10 + $0x90] sm:$0xff] }
  0x1a   : > { %377 = vst [vmem:[%s2222_s11 + $0x20] sm:$0xff] %v376_v4  ;;  %v388_v10 = vld [vmem:[%s2217_s10 + $0xa0] sm:$0xff]  ;;  %v390_v11 = vld [vmem:[%s2217_s10 + $0xb0] sm:$0xff] }
  0x1b   : > { %379 = vst [vmem:[%s2222_s11 + $0x28] sm:$0xff] %v378_v5  ;;  %v392_v12 = vld [vmem:[%s2217_s10 + $0xc0] sm:$0xff]  ;;  %v394_v13 = vld [vmem:[%s2217_s10 + $0xd0] sm:$0xff] }
  0x1c   : > { %381 = vst [vmem:[%s2222_s11 + $0x30] sm:$0xff] %v380_v6  ;;  %v396_v14 = vld [vmem:[%s2217_s10 + $0xe0] sm:$0xff]  ;;  %v398_v15 = vld [vmem:[%s2217_s10 + $0xf0] sm:$0xff] }
  0x1d   : > { %383 = vst [vmem:[%s2222_s11 + $0x38] sm:$0xff] %v382_v7  ;;  %v400_v16 = vld [vmem:[%s2217_s10 + $0x100] sm:$0xff]  ;;  %v402_v17 = vld [vmem:[%s2217_s10 + $0x110] sm:$0xff] }
  0x1e   : > { %385 = vst [vmem:[%s2222_s11 + $0x40] sm:$0xff] %v384_v8  ;;  %v404_v18 = vld [vmem:[%s2217_s10 + $0x120] sm:$0xff]  ;;  %v406_v19 = vld [vmem:[%s2217_s10 + $0x130] sm:$0xff] }
  0x1f   : > { %387 = vst [vmem:[%s2222_s11 + $0x48] sm:$0xff] %v386_v9  ;;  %v408_v20 = vld [vmem:[%s2217_s10 + $0x140] sm:$0xff]  ;;  %v410_v21 = vld [vmem:[%s2217_s10 + $0x150] sm:$0xff] }
  0x20   : > { %389 = vst [vmem:[%s2222_s11 + $0x50] sm:$0xff] %v388_v10  ;;  %v412_v22 = vld [vmem:[%s2217_s10 + $0x160] sm:$0xff]  ;;  %v414_v23 = vld [vmem:[%s2217_s10 + $0x170] sm:$0xff] }
  0x21   : > { %391 = vst [vmem:[%s2222_s11 + $0x58] sm:$0xff] %v390_v11  ;;  %v416_v24 = vld [vmem:[%s2217_s10 + $0x180] sm:$0xff]  ;;  %v418_v25 = vld [vmem:[%s2217_s10 + $0x190] sm:$0xff] }
  0x22   : > { %393 = vst [vmem:[%s2222_s11 + $0x60] sm:$0xff] %v392_v12  ;;  %v420_v26 = vld [vmem:[%s2217_s10 + $0x1a0] sm:$0xff]  ;;  %v422_v27 = vld [vmem:[%s2217_s10 + $0x1b0] sm:$0xff] }
  0x23   : > { %395 = vst [vmem:[%s2222_s11 + $0x68] sm:$0xff] %v394_v13  ;;  %v424_v28 = vld [vmem:[%s2217_s10 + $0x1c0] sm:$0xff]  ;;  %v426_v29 = vld [vmem:[%s2217_s10 + $0x1d0] sm:$0xff] }
  0x24   : > { %397 = vst [vmem:[%s2222_s11 + $0x70] sm:$0xff] %v396_v14  ;;  %v428_v30 = vld [vmem:[%s2217_s10 + $0x1e0] sm:$0xff]  ;;  %v430_v31 = vld [vmem:[%s2217_s10 + $0x1f0] sm:$0xff] }
  0x25   : > { %399 = vst [vmem:[%s2222_s11 + $0x78] sm:$0xff] %v398_v15  ;;  %v432_v32 = vld [vmem:[%s2217_s10 + $0x200] sm:$0xff]  ;;  %v434_v33 = vld [vmem:[%s2217_s10 + $0x210] sm:$0xff] }
  0x26   : > { %401 = vst [vmem:[%s2222_s11 + $0x80] sm:$0xff] %v400_v16  ;;  %v436_v34 = vld [vmem:[%s2217_s10 + $0x220] sm:$0xff]  ;;  %v438_v35 = vld [vmem:[%s2217_s10 + $0x230] sm:$0xff] }
  0x27   : > { %403 = vst [vmem:[%s2222_s11 + $0x88] sm:$0xff] %v402_v17  ;;  %v440_v36 = vld [vmem:[%s2217_s10 + $0x240] sm:$0xff]  ;;  %v442_v37 = vld [vmem:[%s2217_s10 + $0x250] sm:$0xff] }
  0x28   : > { %405 = vst [vmem:[%s2222_s11 + $0x90] sm:$0xff] %v404_v18  ;;  %v444_v38 = vld [vmem:[%s2217_s10 + $0x260] sm:$0xff]  ;;  %v446_v39 = vld [vmem:[%s2217_s10 + $0x270] sm:$0xff] }
  0x29   : > { %407 = vst [vmem:[%s2222_s11 + $0x98] sm:$0xff] %v406_v19  ;;  %v448_v40 = vld [vmem:[%s2217_s10 + $0x280] sm:$0xff]  ;;  %v450_v41 = vld [vmem:[%s2217_s10 + $0x290] sm:$0xff] }
  0x2a   : > { %409 = vst [vmem:[%s2222_s11 + $0xa0] sm:$0xff] %v408_v20  ;;  %v452_v42 = vld [vmem:[%s2217_s10 + $0x2a0] sm:$0xff]  ;;  %v454_v43 = vld [vmem:[%s2217_s10 + $0x2b0] sm:$0xff] }
  0x2b   : > { %411 = vst [vmem:[%s2222_s11 + $0xa8] sm:$0xff] %v410_v21  ;;  %v456_v44 = vld [vmem:[%s2217_s10 + $0x2c0] sm:$0xff]  ;;  %v458_v45 = vld [vmem:[%s2217_s10 + $0x2d0] sm:$0xff] }
  0x2c   : > { %413 = vst [vmem:[%s2222_s11 + $0xb0] sm:$0xff] %v412_v22  ;;  %v460_v46 = vld [vmem:[%s2217_s10 + $0x2e0] sm:$0xff]  ;;  %v462_v47 = vld [vmem:[%s2217_s10 + $0x2f0] sm:$0xff] }
  0x2d   : > { %415 = vst [vmem:[%s2222_s11 + $0xb8] sm:$0xff] %v414_v23  ;;  %v464_v48 = vld [vmem:[%s2217_s10 + $0x300] sm:$0xff]  ;;  %v466_v49 = vld [vmem:[%s2217_s10 + $0x310] sm:$0xff] }
  0x2e   : > { %417 = vst [vmem:[%s2222_s11 + $0xc0] sm:$0xff] %v416_v24  ;;  %v468_v50 = vld [vmem:[%s2217_s10 + $0x320] sm:$0xff]  ;;  %v470_v51 = vld [vmem:[%s2217_s10 + $0x330] sm:$0xff] }
  0x2f   : > { %419 = vst [vmem:[%s2222_s11 + $0xc8] sm:$0xff] %v418_v25  ;;  %v472_v52 = vld [vmem:[%s2217_s10 + $0x340] sm:$0xff]  ;;  %v474_v53 = vld [vmem:[%s2217_s10 + $0x350] sm:$0xff] }
  0x30   : > { %421 = vst [vmem:[%s2222_s11 + $0xd0] sm:$0xff] %v420_v26  ;;  %v476_v54 = vld [vmem:[%s2217_s10 + $0x360] sm:$0xff]  ;;  %v478_v55 = vld [vmem:[%s2217_s10 + $0x370] sm:$0xff] }
  0x31   : > { %423 = vst [vmem:[%s2222_s11 + $0xd8] sm:$0xff] %v422_v27  ;;  %v480_v56 = vld [vmem:[%s2217_s10 + $0x380] sm:$0xff]  ;;  %v482_v57 = vld [vmem:[%s2217_s10 + $0x390] sm:$0xff] }
  0x32   : > { %425 = vst [vmem:[%s2222_s11 + $0xe0] sm:$0xff] %v424_v28  ;;  %v484_v58 = vld [vmem:[%s2217_s10 + $0x3a0] sm:$0xff]  ;;  %v486_v59 = vld [vmem:[%s2217_s10 + $0x3b0] sm:$0xff] }
  0x33   : > { %427 = vst [vmem:[%s2222_s11 + $0xe8] sm:$0xff] %v426_v29  ;;  %v488_v60 = vld [vmem:[%s2217_s10 + $0x3c0] sm:$0xff]  ;;  %v490_v61 = vld [vmem:[%s2217_s10 + $0x3d0] sm:$0xff] }
  0x34   : > { %429 = vst [vmem:[%s2222_s11 + $0xf0] sm:$0xff] %v428_v30  ;;  %v492_v62 = vld [vmem:[%s2217_s10 + $0x3e0] sm:$0xff]  ;;  %v494_v63 = vld [vmem:[%s2217_s10 + $0x3f0] sm:$0xff] }
  0x35   : > { %431 = vst [vmem:[%s2222_s11 + $0xf8] sm:$0xff] %v430_v31 }
  0x36   : > { %433 = vst [vmem:[%s2222_s11 + $0x100] sm:$0xff] %v432_v32 }
  0x37   : > { %435 = vst [vmem:[%s2222_s11 + $0x108] sm:$0xff] %v434_v33 }
  0x38   : > { %437 = vst [vmem:[%s2222_s11 + $0x110] sm:$0xff] %v436_v34 }
  0x39   : > { %439 = vst [vmem:[%s2222_s11 + $0x118] sm:$0xff] %v438_v35 }
  0x3a   : > { %441 = vst [vmem:[%s2222_s11 + $0x120] sm:$0xff] %v440_v36 }
  0x3b   : > { %443 = vst [vmem:[%s2222_s11 + $0x128] sm:$0xff] %v442_v37 }
  0x3c   : > { %445 = vst [vmem:[%s2222_s11 + $0x130] sm:$0xff] %v444_v38 }
  0x3d   : > { %447 = vst [vmem:[%s2222_s11 + $0x138] sm:$0xff] %v446_v39 }
  0x3e   : > { %449 = vst [vmem:[%s2222_s11 + $0x140] sm:$0xff] %v448_v40 }
  0x3f   : > { %451 = vst [vmem:[%s2222_s11 + $0x148] sm:$0xff] %v450_v41 }
  0x40   : > { %453 = vst [vmem:[%s2222_s11 + $0x150] sm:$0xff] %v452_v42 }
  0x41   : > { %455 = vst [vmem:[%s2222_s11 + $0x158] sm:$0xff] %v454_v43 }
  0x42   : > { %457 = vst [vmem:[%s2222_s11 + $0x160] sm:$0xff] %v456_v44 }
  0x43   : > { %459 = vst [vmem:[%s2222_s11 + $0x168] sm:$0xff] %v458_v45 }
  0x44   : > { %461 = vst [vmem:[%s2222_s11 + $0x170] sm:$0xff] %v460_v46 }
  0x45   : > { %463 = vst [vmem:[%s2222_s11 + $0x178] sm:$0xff] %v462_v47 }
  0x46   : > { %465 = vst [vmem:[%s2222_s11 + $0x180] sm:$0xff] %v464_v48 }
  0x47   : > { %467 = vst [vmem:[%s2222_s11 + $0x188] sm:$0xff] %v466_v49 }
  0x48   : > { %469 = vst [vmem:[%s2222_s11 + $0x190] sm:$0xff] %v468_v50 }
  0x49   : > { %471 = vst [vmem:[%s2222_s11 + $0x198] sm:$0xff] %v470_v51 }
  0x4a   : > { %473 = vst [vmem:[%s2222_s11 + $0x1a0] sm:$0xff] %v472_v52 }
  0x4b   : > { %475 = vst [vmem:[%s2222_s11 + $0x1a8] sm:$0xff] %v474_v53 }
  0x4c   : > { %477 = vst [vmem:[%s2222_s11 + $0x1b0] sm:$0xff] %v476_v54 }
  0x4d   : > { %479 = vst [vmem:[%s2222_s11 + $0x1b8] sm:$0xff] %v478_v55 }
  0x4e   : > { %481 = vst [vmem:[%s2222_s11 + $0x1c0] sm:$0xff] %v480_v56 }
  0x4f   : > { %483 = vst [vmem:[%s2222_s11 + $0x1c8] sm:$0xff] %v482_v57 }
  0x50   : > { %485 = vst [vmem:[%s2222_s11 + $0x1d0] sm:$0xff] %v484_v58 }
  0x51   : > { %487 = vst [vmem:[%s2222_s11 + $0x1d8] sm:$0xff] %v486_v59 }
  0x52   : > { %489 = vst [vmem:[%s2222_s11 + $0x1e0] sm:$0xff] %v488_v60 }
  0x53   : > { %491 = vst [vmem:[%s2222_s11 + $0x1e8] sm:$0xff] %v490_v61 }
  0x54   : > { %493 = vst [vmem:[%s2222_s11 + $0x1f0] sm:$0xff] %v492_v62 }
  0x55   : > { %495 = vst [vmem:[%s2222_s11 + $0x1f8] sm:$0xff] %v494_v63 }
  0x56 PF: > { %p1639_p7 = scmp.ge.s32.totalorder %s2127_s24, 1  ;;  %p508_p8 = scmp.lt.s32.totalorder %s2127_s24, 5 }
  0x58   : > { %p509_p9 = pnand %p1639_p7, %p508_p8 }
  0x59   : > { %s515_s12 = sand.u32 (!%p509_p9), 1, %s2103_s18   ;;  %p555_p10 = scmp.lt.s32.totalorder (!%p509_p9), %s2115_s21, 1 }
  0x5a   : > { %512 = sbr.rel (%p509_p9) target bundleno = 404 (0x194), region = 74  ;;  %s1640_s13 = sshll.u32 (!%p509_p9), %s515_s12, 9 }
  0x5b   : > { %s1643_s14 = sshll.u32 (!%p509_p9), %s2111_s20, 1  ;;  %s2372_s12 = scalar_lea.vmem (!%p509_p9), [#allocation3], %s1640_s13 }
  0x5c   : > { %p562_p11 = scmp.lt.s32.totalorder (!%p509_p9), %s1643_s14, 3  ;;  %p1647_p12 = scmp.ne.s32.totalorder (!%p509_p9), %s2111_s20, 0 }
  0x5f   : > { %s2794_s21 = smov (!%p555_p10, %s2115_s21), 1  ;;  %s2796_s14 = smov (!%p562_p11, %s1643_s14), 3 }
  0x60   : > { %s1951_s15 = sshll.u32 %s2794_s21, 5  ;;  %s1645_s16 = sshll.u32 %s2794_s21, 2 }
  0x61   : > { %s2360_s28 = scalar_lea.vmem %s2770_s0, %s1951_s15  ;;  %s564_s18 = scalar_lea.vmem %s2774_s4, %s2796_s14 }
  0x62   : > { %s572_s7 = sadd.s32 %s1645_s16, %s2796_s14  ;;  %579 = sbr.rel (%p1647_p12) target bundleno = 195 (0xc3), region = 82 }
  0x63   : > { %s1646_s8 = sshll.u32 %s572_s7, 2 }
  0x64   : > { %s2370_s11 = scalar_lea.vmem %s2775_s5, %s1646_s8 }
  0x67   : > { %v2376_v0 = vld [vmem:[%s2360_s28] sm:$0x55]  ;;  %v2379_v1 = vld [vmem:[%s2360_s28 + $0x8] sm:$0x55]  ;;  %vm594_vm0 = vcmask 1043456   ;;  %v2406_v12 = vld [vmem:[%s2360_s28 + $0x10] sm:$0xff] }
  0x68   : > { %v2382_v2 = vld [vmem:[%s2360_s28] sm:$0xff]  ;;  %v582_v3 = vunpack.c.l.bf16 %v2376_v0  ;;  %v2391_v5 = vld [vmem:[%s2360_s28 + $0x8] sm:$0xff]  ;;  %v584_v7 = vunpack.c.l.bf16 %v2379_v1  ;;  %v2425_v22 = vld [vmem:[%s2360_s28 + $0x10] sm:$0x55]  ;;  %v681_v23 = vunpack.c.l.bf16 %v2406_v12 }
  0x69   : > { %v2388_v4 = vld [vmem:[%s2771_s1] ss:$8 sm:$0xf]  ;;  %v2394_v6 = vld [vmem:[%s2360_s28] sm:$0xaa]  ;;  %v605_v10 = vunpack.c.l.bf16 %v2382_v2  ;;  %v607_v13 = vunpack.c.l.bf16 %v2391_v5  ;;  %v658_v38 = vunpack.c.l.bf16 %v2425_v22 }
  0x6a   : > { %v588_v8 = vperm.slane %v2388_v4, 0  ;;  %v589_v9 = vperm.slane %v2388_v4, 1  ;;  %v2403_v11 = vld [vmem:[%s2771_s1 + $0x1] ss:$8 sm:$0xf]  ;;  %v630_v20 = vunpack.c.l.bf16 %v2394_v6 }
  0x6b   : > { %v612_v14 = vperm.slane %v2403_v11, 0  ;;  %v613_v15 = vperm.slane %v2403_v11, 1  ;;  %v2412_v16 = vld [vmem:[%s2360_s28 + $0x8] sm:$0xaa]  ;;  %v2415_v17 = vld [vmem:[%s2360_s28 + $0x8] sm:$0x55] }
  0x6c   : > { %v592_v19 = vrot.slane %v589_v9, 4  ;;  %v2422_v21 = vld [vmem:[%s2771_s1 + $0x2] ss:$8 sm:$0xf]  ;;  %v632_v26 = vunpack.c.l.bf16 %v2412_v16  ;;  %v656_v31 = vunpack.c.l.bf16 %v2415_v17  ;;  %v2451_v39 = vld [vmem:[%s2360_s28 + $0x8] sm:$0xaa] }
  0x6d   : > { %v616_v25 = vrot.slane %v613_v15, 4  ;;  %v637_v27 = vperm.slane %v2422_v21, 0  ;;  %v638_v28 = vperm.slane %v2422_v21, 1  ;;  %v2435_v29 = vld [vmem:[%s2771_s1 + $0x3] ss:$8 sm:$0xf]  ;;  %v704_v48 = vunpack.c.l.bf16 %v2451_v39 }
  0x6e   : > { %v595_v30 = vsel %vm594_vm0, %v588_v8, %v592_v19  ;;  %v663_v32 = vperm.slane %v2435_v29, 0  ;;  %v664_v33 = vperm.slane %v2435_v29, 1  ;;  %v2444_v34 = vld [vmem:[%s2771_s1 + $0x4] ss:$8 sm:$0xf] }
  0x6f   : > { %v2446_v35 = vmul.f32 %v595_v30, %v582_v3  ;;  %v618_v36 = vsel %vm594_vm0, %v612_v14, %v616_v25  ;;  %v641_v37 = vrot.slane %v638_v28, 4  ;;  %v2454_v40 = vld [vmem:[%s2360_s28 + $0x10] sm:$0xaa]  ;;  %v2456_v41 = vmul.f32 %v595_v30, %v584_v7  ;;  %v2460_v45 = vld [vmem:[%s2360_s28 + $0x10] sm:$0x55]  ;;  %v2484_v61 = vld [vmem:[%s2360_s28 + $0x18] sm:$0xff] }
  0x70   : > { %v620_v42 = vrot.slane %v618_v36, 7  ;;  %v667_v43 = vrot.slane %v664_v33, 4  ;;  %v687_v44 = vperm.slane %v2444_v34, 1  ;;  %v686_v47 = vperm.slane %v2444_v34, 0  ;;  %v2473_v54 = vld [vmem:[%s2360_s28 + $0x18] sm:$0x55] }
  0x71   : > { %v643_v46 = vsel %vm594_vm0, %v637_v27, %v641_v37  ;;  %v706_v49 = vunpack.c.l.bf16 %v2454_v40  ;;  %v2469_v50 = vld [vmem:[%s2771_s1 + $0x5] ss:$8 sm:$0xf]  ;;  %v730_v55 = vunpack.c.l.bf16 %v2460_v45  ;;  %v2479_v56 = vld [vmem:[%s2771_s1 + $0x6] ss:$8 sm:$0xf]  ;;  %v732_v15 = vunpack.c.l.bf16 %v2473_v54 }
  0x72   : > { %v624_v51 = vmul.f32 %v620_v42, %v605_v10  ;;  %v645_v52 = vrot.slane %v643_v46, 6  ;;  %v669_v53 = vsel %vm594_vm0, %v663_v32, %v667_v43  ;;  %v626_v57 = vmul.f32 %v620_v42, %v607_v13  ;;  %v2489_v62 = vld [vmem:[%s2771_s1 + $0x7] ss:$8 sm:$0xf] }
  0x73   : > { %v673_v58 = vmul.f32 %v669_v53, %v656_v31  ;;  %v675_v59 = vmul.f32 %v669_v53, %v658_v38  ;;  %v690_v60 = vrot.slane %v687_v44, 4  ;;  %v711_v7 = vperm.slane %v2469_v50, 0  ;;  %v2494_v9 = vld [vmem:[%s2360_s28 + $0x10] sm:$0xaa]  ;;  %v2497_v10 = vld [vmem:[%s2360_s28 + $0x18] sm:$0xaa] }
  0x74   : > { %v649_v63 = vmul.f32 %v645_v52, %v630_v20  ;;  %v651_v3 = vmul.f32 %v645_v52, %v632_v26  ;;  %v712_v8 = vperm.slane %v2469_v50, 1  ;;  %2777 = vst [vmem:[#allocation4_spill] sm:$0xff] %v2497_v10  ;;  %v737_v19 = vperm.slane %v2479_v56, 0  ;;  %v2506_v20 = vld [vmem:[%s2771_s1 + $0x20] ss:$8 sm:$0xf] }
  0x75   : > { %v692_v14 = vsel %vm594_vm0, %v686_v47, %v690_v60  ;;  %v738_v25 = vperm.slane %v2479_v56, 1  ;;  %v760_v28 = vperm.slane %v2489_v62, 0  ;;  %v761_v30 = vperm.slane %v2489_v62, 1 }
  0x76   : > { %v694_v26 = vrot.slane %v692_v14, 7  ;;  %v715_v27 = vrot.slane %v712_v8, 4  ;;  %v755_v32 = vunpack.c.l.bf16 %v2484_v61  ;;  %v778_v33 = vunpack.c.l.bf16 %v2494_v9 }
  0x77   : > { %v741_v31 = vrot.slane %v738_v25, 4  ;;  %v780_v36 = vunpack.c.l.bf16 %v2497_v10  ;;  %v764_v42 = vrot.slane %v761_v30, 4  ;;  %v785_v43 = vperm.slane %v2506_v20, 0 }
  0x78   : > { %v698_v37 = vmul.f32 %v694_v26, %v607_v13  ;;  %v717_v38 = vsel %vm594_vm0, %v711_v7, %v715_v27  ;;  %v786_v47 = vperm.slane %v2506_v20, 1  ;;  %v1668_v52 = vrot.slane %v624_v51, 9 }
  0x79   : > { %v719_v44 = vrot.slane %v717_v38, 6  ;;  %v743_v46 = vsel %vm594_vm0, %v737_v19, %v741_v31  ;;  %v700_v53 = vmul.f32 %v694_v26, %v681_v23  ;;  %v766_v8 = vsel %vm594_vm0, %v760_v28, %v764_v42 }
  0x7a   : > { %v747_v60 = vmul.f32 %v743_v46, %v730_v55  ;;  %v1670_v14 = vrot.slane %v626_v57, 9  ;;  %v768_v24 = vrot.slane %v766_v8, 7  ;;  %v789_v7 = vrot.slane %v786_v47, 4 }
  0x7b   : > { %v723_v25 = vmul.f32 %v719_v44, %v704_v48  ;;  %v725_v13 = vmul.f32 %v719_v44, %v706_v49  ;;  %v749_v27 = vmul.f32 %v743_v46, %v732_v15  ;;  %v817_v30 = vadd.f32 %v1668_v52, %v2446_v35  ;;  %v2529_v48 = vld [vmem:[%s2772_s2] sm:$0xf] }
  0x7c   : > { %v825_v38 = vrot.slane %v673_v58, 6  ;;  %v827_v18 = vrot.slane %v675_v59, 6  ;;  %v772_v19 = vmul.f32 %v768_v24, %v681_v23  ;;  %v774_v51 = vmul.f32 %v768_v24, %v755_v32 }
  0x7d   : > { %v791_v31 = vsel %vm594_vm0, %v785_v43, %v789_v7  ;;  %v1672_v26 = vrot.slane %v723_v25, 9  ;;  %v1674_v57 = vrot.slane %v725_v13, 9  ;;  %v819_v35 = vadd.f32 %v1670_v14, %v2456_v41 }
  0x7e   : > { %v793_v55 = vrot.slane %v791_v31, 6  ;;  %v833_v10 = vadd.f32 %v825_v38, %v649_v63  ;;  %v835_v28 = vadd.f32 %v827_v18, %v651_v3  ;;  %v1676_v58 = vrot.slane %v772_v19, 9 }
  0x7f   : > { %v853_v49 = vadd.f32 %v1672_v26, %v698_v37  ;;  %v1678_v59 = vrot.slane %v774_v51, 9  ;;  %v855_v24 = vadd.f32 %v1674_v57, %v700_v53  ;;  %v956_v18 = vperm.slane %v2529_v48, 1 }
  0x80   : > { %v797_v15 = vmul.f32 %v793_v55, %v778_v33  ;;  %v799_v23 = vmul.f32 %v793_v55, %v780_v36  ;;  %v1680_v32 = vrot.slane %v833_v10, 10  ;;  %v873_v42 = vadd.f32 %v1676_v58, %v747_v60 }
  0x81   : > { %v875_v43 = vadd.f32 %v1678_v59, %v749_v27  ;;  %v1682_v44 = vrot.slane %v835_v28, 10  ;;  %v955_v3 = vperm.slane %v2529_v48, 0  ;;  %v606_v46 = vunpack.c.h.bf16 %v2382_v2 }
  0x82   : > { %v893_v63 = vadd.f32 %v1680_v32, %v817_v30  ;;  %v608_v47 = vunpack.c.h.bf16 %v2391_v5  ;;  %v901_v41 = vrot.slane %v873_v42, 7  ;;  %v1688_v52 = vrot.slane %v797_v15, 10 }
  0x83   : > { %v903_v37 = vrot.slane %v875_v43, 7  ;;  %v959_v8 = vrot.slane %v956_v18, 4  ;;  %v590_v33 = vperm.slane %v2388_v4, 2  ;;  %v591_v10 = vperm.slane %v2388_v4, 3 }
  0x84   : > { %v614_v36 = vperm.slane %v2403_v11, 2  ;;  %v615_v53 = vperm.slane %v2403_v11, 3  ;;  %v895_v60 = vadd.f32 %v1682_v44, %v819_v35  ;;  %v909_v14 = vadd.f32 %v901_v41, %v853_v49 }
  0x85   : > { %v911_v25 = vadd.f32 %v903_v37, %v855_v24  ;;  %v1690_v13 = vrot.slane %v799_v23, 10  ;;  %v593_v7 = vrot.slane %v591_v10, 4  ;;  %v639_v27 = vperm.slane %v2422_v21, 2 }
  0x86   : > { %v617_v2 = vrot.slane %v615_v53, 4  ;;  %v640_v30 = vperm.slane %v2422_v21, 3  ;;  %v1684_v38 = vrot.slane %v909_v14, 9  ;;  %v961_v51 = vsel %vm594_vm0, %v955_v3, %v959_v8 }
  0x87   : > { %v1686_v19 = vrot.slane %v911_v25, 9  ;;  %v631_v4 = vunpack.c.h.bf16 %v2394_v6  ;;  %v596_v31 = vsel %vm594_vm0, %v590_v33, %v593_v7  ;;  %v633_v26 = vunpack.c.h.bf16 %v2412_v16 }
  0x88   : > { %v619_v11 = vsel %vm594_vm0, %v614_v36, %v617_v2  ;;  %v642_v55 = vrot.slane %v640_v30, 4  ;;  %v929_v28 = vadd.f32 %v1684_v38, %v893_v63  ;;  %v657_v35 = vunpack.c.h.bf16 %v2415_v17 }
  0x89   : > { %v931_v57 = vadd.f32 %v1686_v19, %v895_v60  ;;  %v659_v49 = vunpack.c.h.bf16 %v2425_v22  ;;  %v621_v21 = vrot.slane %v619_v11, 7  ;;  %v665_v59 = vperm.slane %v2435_v29, 2 }
  0x8a   : > { %v644_v58 = vsel %vm594_vm0, %v639_v27, %v642_v55  ;;  %v666_v6 = vperm.slane %v2435_v29, 3  ;;  %v949_v15 = vadd.f32 %v1688_v52, %v929_v28  ;;  %v2778_v24 = vunpack.c.h.bf16 %v2376_v0 }
  0x8b   : > { %v951_v23 = vadd.f32 %v1690_v13, %v931_v57  ;;  %v646_v16 = vrot.slane %v644_v58, 6  ;;  %v2779_v42 = vunpack.c.h.bf16 %v2379_v1  ;;  %v688_v22 = vperm.slane %v2444_v34, 2 }
  0x8c   : > { %v2554_v32 = vmul.f32 %v596_v31, %v2778_v24  ;;  %v668_v17 = vrot.slane %v666_v6, 4  ;;  %v689_v44 = vperm.slane %v2444_v34, 3  ;;  %v965_v18 = vadd.f32 %v961_v51, %v949_v15 }
  0x8d   : > { %v2558_v43 = vmul.f32 %v596_v31, %v2779_v42  ;;  %v967_v63 = vadd.f32 %v961_v51, %v951_v23  ;;  %v2562_v3 = vmul.f32 %v621_v21, %v606_v46  ;;  %v682_v29 = vunpack.c.h.bf16 %v2406_v12 }
  0x8e   : > { %v2567_v0 = vmul.f32 %v621_v21, %v608_v47  ;;  %v650_v41 = vmul.f32 %v646_v16, %v631_v4  ;;  %v670_v1 = vsel %vm594_vm0, %v665_v59, %v668_v17  ;;  %v691_v37 = vrot.slane %v689_v44, 4 }
  0x8f   : > { %v969_v52 = vmax.f32 %v965_v18, 0.0  ;;  %v652_v8 = vmul.f32 %v646_v16, %v633_v26  ;;  %v705_v33 = vunpack.c.h.bf16 %v2451_v39  ;;  %v707_v34 = vunpack.c.h.bf16 %v2454_v40 }
  0x90   : > { %v971_v10 = vmax.f32 %v967_v63, 0.0  ;;  %v693_v46 = vsel %vm594_vm0, %v688_v22, %v691_v37  ;;  %v713_v36 = vperm.slane %v2469_v50, 2  ;;  %v714_v12 = vperm.slane %v2469_v50, 3 }
  0x91   : > { %975 = vst [vmem:[#allocation1] ss:$2 sm:$0xff] %v969_v52  ;;  %v674_v53 = vmul.f32 %v670_v1, %v657_v35  ;;  %v695_v60 = vrot.slane %v693_v46, 7  ;;  %v739_v14 = vperm.slane %v2479_v56, 2  ;;  %v740_v25 = vperm.slane %v2479_v56, 3  ;;  %v2780_v52 = vld [vmem:[#allocation4_spill] sm:$0xff] }
  0x92   : > { %v716_v13 = vrot.slane %v714_v12, 4  ;;  %v731_v7 = vunpack.c.h.bf16 %v2460_v45  ;;  %v762_v39 = vperm.slane %v2489_v62, 2  ;;  %v763_v40 = vperm.slane %v2489_v62, 3 }
  0x93   : > { %v676_v2 = vmul.f32 %v670_v1, %v659_v49  ;;  %v733_v27 = vunpack.c.h.bf16 %v2473_v54  ;;  %v742_v30 = vrot.slane %v740_v25, 4  ;;  %v756_v50 = vunpack.c.h.bf16 %v2484_v61 }
  0x94   : > { %v699_v38 = vmul.f32 %v695_v60, %v608_v47  ;;  %v701_v19 = vmul.f32 %v695_v60, %v682_v29  ;;  %v718_v51 = vsel %vm594_vm0, %v713_v36, %v716_v13  ;;  %v765_v56 = vrot.slane %v763_v40, 4 }
  0x95   : > { %v720_v4 = vrot.slane %v718_v51, 6  ;;  %v744_v45 = vsel %vm594_vm0, %v739_v14, %v742_v30  ;;  %v787_v31 = vperm.slane %v2506_v20, 2  ;;  %v788_v62 = vperm.slane %v2506_v20, 3 }
  0x96   : > { %v748_v11 = vmul.f32 %v744_v45, %v731_v7  ;;  %v767_v54 = vsel %vm594_vm0, %v762_v39, %v765_v56  ;;  %v779_v26 = vunpack.c.h.bf16 %v2494_v9  ;;  %v1669_v61 = vrot.slane %v2562_v3, 9 }
  0x97   : > { %v724_v5 = vmul.f32 %v720_v4, %v705_v33  ;;  %v726_v47 = vmul.f32 %v720_v4, %v707_v34  ;;  %v769_v55 = vrot.slane %v767_v54, 7  ;;  %v790_v28 = vrot.slane %v788_v62, 4 }
  0x98   : > { %v750_v57 = vmul.f32 %v744_v45, %v733_v27  ;;  %v1671_v35 = vrot.slane %v2567_v0, 9  ;;  %v826_v49 = vrot.slane %v674_v53, 6  ;;  %v828_v21 = vrot.slane %v676_v2, 6  ;;  %v978_v58 = vld.sshfl [vmem:[#allocation1] sm:$0xff pattern:$0x75316420] }
  0x99   : > { %v773_v59 = vmul.f32 %v769_v55, %v682_v29  ;;  %v775_v6 = vmul.f32 %v769_v55, %v756_v50  ;;  %v792_v20 = vsel %vm594_vm0, %v787_v31, %v790_v28  ;;  %v1673_v15 = vrot.slane %v724_v5, 9  ;;  %986 = vst [vmem:[#allocation2 + $0x10] sm:$0x3] %v978_v58  ;;  %v979_v23 = vld.sshfl [vmem:[#allocation1 + $0x8] sm:$0xff pattern:$0x75316420] }
  0x9a   : > { %v794_v9 = vrot.slane %v792_v20, 6  ;;  %v834_v24 = vadd.f32 %v826_v49, %v650_v41  ;;  %v836_v16 = vadd.f32 %v828_v21, %v652_v8  ;;  %v1675_v42 = vrot.slane %v726_v47, 9  ;;  %987 = vst [vmem:[#allocation2] sm:$0x3] %v979_v23 }
  0x9b   : > { %v1677_v17 = vrot.slane %v773_v59, 9  ;;  %v1679_v22 = vrot.slane %v775_v6, 9  ;;  %992 = vst [vmem:[#allocation1] ss:$2 sm:$0xff] %v971_v10  ;;  %v818_v18 = vadd.f32 %v1669_v61, %v2554_v32  ;;  %v854_v63 = vadd.f32 %v1673_v15, %v699_v38 }
  0x9c   : > { %v798_v44 = vmul.f32 %v794_v9, %v779_v26  ;;  %v1681_v3 = vrot.slane %v834_v24, 10  ;;  %v856_v29 = vadd.f32 %v1675_v42, %v701_v19  ;;  %v958_v37 = vperm.slane %v2529_v48, 3 }
  0x9d   : > { %v874_v0 = vadd.f32 %v1677_v17, %v748_v11  ;;  %v876_v1 = vadd.f32 %v1679_v22, %v750_v57  ;;  %v781_v33 = vunpack.c.h.bf16 %v2780_v52  ;;  %v820_v41 = vadd.f32 %v1671_v35, %v2558_v43 }
  0x9e   : > { %v1683_v8 = vrot.slane %v836_v16, 10  ;;  %v894_v36 = vadd.f32 %v1681_v3, %v818_v18  ;;  %v1689_v12 = vrot.slane %v798_v44, 10  ;;  %v957_v10 = vperm.slane %v2529_v48, 2 }
  0x9f   : > { %v902_v34 = vrot.slane %v874_v0, 7  ;;  %v904_v46 = vrot.slane %v876_v1, 7  ;;  %v960_v60 = vrot.slane %v958_v37, 4  ;;  %v800_v14 = vmul.f32 %v794_v9, %v781_v33 }
  0xa0   : > { %v896_v25 = vadd.f32 %v1683_v8, %v820_v41  ;;  %v2129_v30 = vmov 0.0  }
  0xa1   : > { %v910_v53 = vadd.f32 %v902_v34, %v854_v63  ;;  %v912_v32 = vadd.f32 %v904_v46, %v856_v29  ;;  %1011 = vst [vmem:[#allocation2 + $0x10] sm:$0xf0] %v2129_v30  ;;  %v962_v50 = vsel %vm594_vm0, %v957_v10, %v960_v60  ;;  %v1691_v38 = vrot.slane %v800_v14, 10 }
  0xa2   : > { %v995_v13 = vld.sshfl [vmem:[#allocation1] sm:$0xff pattern:$0x75316420]  ;;  %v996_v7 = vld.sshfl [vmem:[#allocation1 + $0x8] sm:$0xff pattern:$0x75316420] }
  0xa3   : > { %v1685_v39 = vrot.slane %v910_v53, 9  ;;  %v1687_v40 = vrot.slane %v912_v32, 9  ;;  %v999_v2 = vrot.slane %v995_v13, 6  ;;  %v1000_v27 = vrot.slane %v996_v7, 6  ;;  %1012 = vst [vmem:[#allocation2] sm:$0xf0] %v2129_v30 }
  0xa4   : > { %1013 = vst [vmem:[#allocation2 + $0x18] sm:$0xf0] %v2129_v30 }
  0xa5   : > { %v930_v43 = vadd.f32 %v1685_v39, %v894_v36  ;;  %1007 = vst [vmem:[#allocation2 + $0x10] sm:$0xc] %v999_v2  ;;  %v932_v48 = vadd.f32 %v1687_v40, %v896_v25 }
  0xa6   : > { %1008 = vst [vmem:[#allocation2] sm:$0xc] %v1000_v27 }
  0xa7   : > { %v950_v19 = vadd.f32 %v1689_v12, %v930_v43  ;;  %1014 = vst [vmem:[#allocation2 + $0x8] sm:$0xf0] %v2129_v30  ;;  %v952_v56 = vadd.f32 %v1691_v38, %v932_v48 }
  0xa9   : > { %v966_v51 = vadd.f32 %v962_v50, %v950_v19  ;;  %v968_v45 = vadd.f32 %v962_v50, %v952_v56 }
  0xab   : > { %v970_v4 = vmax.f32 %v966_v51, 0.0  ;;  %v972_v31 = vmax.f32 %v968_v45, 0.0 }
  0xad   : > { %977 = vst [vmem:[#allocation1 + $0x10] ss:$2 sm:$0xff] %v970_v4 }
  0xb4   : > { %v980_v62 = vld.sshfl [vmem:[#allocation1 + $0x10] sm:$0xff pattern:$0x75316420]  ;;  %v981_v11 = vld.sshfl [vmem:[#allocation1 + $0x18] sm:$0xff pattern:$0x75316420] }
  0xb5   : > { %988 = vst [vmem:[#allocation2 + $0x18] sm:$0x3] %v980_v62 }
  0xb6   : > { %989 = vst [vmem:[#allocation2 + $0x8] sm:$0x3] %v981_v11 }
  0xb7   : > { %994 = vst [vmem:[#allocation1 + $0x10] ss:$2 sm:$0xff] %v972_v31 }
  0xbe   : > { %v997_v54 = vld.sshfl [vmem:[#allocation1 + $0x10] sm:$0xff pattern:$0x75316420]  ;;  %v998_v26 = vld.sshfl [vmem:[#allocation1 + $0x18] sm:$0xff pattern:$0x75316420] }
  0xbf   : > { %v1001_v61 = vrot.slane %v997_v54, 6  ;;  %v1002_v5 = vrot.slane %v998_v26, 6 }
  0xc1   : > { %1009 = vst [vmem:[#allocation2 + $0x18] sm:$0xc] %v1001_v61 }
  0xc2   : > { %1010 = vst [vmem:[#allocation2 + $0x8] sm:$0xc] %v1002_v5 }
  0xc3 PF: > { %v1750_v47 = vld [vmem:[%s2372_s12 + $0x70] sm:$0xf]  ;;  %v1967_v55 = vld [vmem:[%s2372_s12 + $0x74] sm:$0xf0]  ;;  %v1742_v15 = vld [vmem:[%s2372_s12 + $0x60] sm:$0xf] }
  0xc4   : > { %v1814_v28 = vld [vmem:[%s2372_s12 + $0xf0] sm:$0xf]  ;;  %v1751_v57 = vor.u32 %v1967_v55, %v1750_v47  ;;  %v1983_v35 = vld [vmem:[%s2372_s12 + $0xf4] sm:$0xf0]  ;;  %v1965_v9 = vld [vmem:[%s2372_s12 + $0x64] sm:$0xf0] }
  0xc5   : > { %v1878_v49 = vld [vmem:[%s2372_s12 + $0x170] sm:$0xf]  ;;  %v1999_v21 = vld [vmem:[%s2372_s12 + $0x174] sm:$0xf0]  ;;  %v1815_v58 = vor.u32 %v1983_v35, %v1814_v28  ;;  %v1806_v24 = vld [vmem:[%s2372_s12 + $0xe0] sm:$0xf]  ;;  %v1743_v42 = vor.u32 %v1965_v9, %v1742_v15 }
  0xc6   : > { %v1879_v59 = vor.u32 %v1999_v21, %v1878_v49  ;;  %v1942_v6 = vld [vmem:[%s2372_s12 + $0x1f0] sm:$0xf]  ;;  %v2015_v20 = vld [vmem:[%s2372_s12 + $0x1f4] sm:$0xf0]  ;;  %1413 = vmatpush.bf16.msra.mxu0 %v1751_v57  ;;  %v1981_v16 = vld [vmem:[%s2372_s12 + $0xe4] sm:$0xf0] }
  0xc7   : > { %v1943_v23 = vor.u32 %v2015_v20, %v1942_v6  ;;  %1426 = vmatpush.bf16.msra.mxu1 %v1815_v58  ;;  %v1807_v17 = vor.u32 %v1981_v16, %v1806_v24  ;;  %v1870_v22 = vld [vmem:[%s2372_s12 + $0x160] sm:$0xf]  ;;  %v1997_v44 = vld [vmem:[%s2372_s12 + $0x164] sm:$0xf0]  ;;  %v1734_v29 = vld [vmem:[%s2372_s12 + $0x50] sm:$0xf] }
  0xc8   : > { %1439 = vmatpush.bf16.msra.mxu2 %v1879_v59  ;;  %v1934_v18 = vld [vmem:[%s2372_s12 + $0x1e0] sm:$0xf]  ;;  %v1871_v63 = vor.u32 %v1997_v44, %v1870_v22  ;;  %v2013_v3 = vld [vmem:[%s2372_s12 + $0x1e4] sm:$0xf0]  ;;  %v1963_v0 = vld [vmem:[%s2372_s12 + $0x54] sm:$0xf0] }
  0xc9   : > { %1452 = vmatpush.bf16.msra.mxu3 %v1943_v23  ;;  %v1935_v1 = vor.u32 %v2013_v3, %v1934_v18  ;;  %v1798_v37 = vld [vmem:[%s2372_s12 + $0xd0] sm:$0xf]  ;;  %v1979_v52 = vld [vmem:[%s2372_s12 + $0xd4] sm:$0xf0]  ;;  %v1735_v41 = vor.u32 %v1963_v0, %v1734_v29  ;;  %v1726_v10 = vld [vmem:[%s2372_s12 + $0x40] sm:$0xf] }
  0xca   : > { %v1862_v33 = vld [vmem:[%s2372_s12 + $0x150] sm:$0xf]  ;;  %1414 = vmatpush.bf16.msra.mxu0 %v1743_v42  ;;  %v1995_v8 = vld [vmem:[%s2372_s12 + $0x154] sm:$0xf0]  ;;  %v1799_v36 = vor.u32 %v1979_v52, %v1798_v37  ;;  %v1961_v53 = vld [vmem:[%s2372_s12 + $0x44] sm:$0xf0] }
  0xcb   : > { %v1926_v34 = vld [vmem:[%s2372_s12 + $0x1d0] sm:$0xf]  ;;  %v2011_v46 = vld [vmem:[%s2372_s12 + $0x1d4] sm:$0xf0]  ;;  %1427 = vmatpush.bf16.msra.mxu1 %v1807_v17  ;;  %v1863_v12 = vor.u32 %v1995_v8, %v1862_v33  ;;  %v1790_v32 = vld [vmem:[%s2372_s12 + $0xc0] sm:$0xf]  ;;  %v1727_v40 = vor.u32 %v1961_v53, %v1726_v10 }
  0xcc   : > { %1440 = vmatpush.bf16.msra.mxu2 %v1871_v63  ;;  %v1927_v60 = vor.u32 %v2011_v46, %v1926_v34  ;;  %v1977_v14 = vld [vmem:[%s2372_s12 + $0xc4] sm:$0xf0]  ;;  %v1854_v25 = vld [vmem:[%s2372_s12 + $0x140] sm:$0xf]  ;;  %v1718_v30 = vld [vmem:[%s2372_s12 + $0x30] sm:$0xf] }
  0xcd   : > { %1453 = vmatpush.bf16.msra.mxu3 %v1935_v1  ;;  %v1993_v13 = vld [vmem:[%s2372_s12 + $0x144] sm:$0xf0]  ;;  %v1918_v7 = vld [vmem:[%s2372_s12 + $0x1c0] sm:$0xf]  ;;  %v1791_v2 = vor.u32 %v1977_v14, %v1790_v32  ;;  %v1959_v43 = vld [vmem:[%s2372_s12 + $0x34] sm:$0xf0] }
  0xce   : > { %v2009_v39 = vld [vmem:[%s2372_s12 + $0x1c4] sm:$0xf0]  ;;  %1415 = vmatpush.bf16.msra.mxu0 %v1735_v41  ;;  %v1855_v27 = vor.u32 %v1993_v13, %v1854_v25  ;;  %v1782_v50 = vld [vmem:[%s2372_s12 + $0xb0] sm:$0xf]  ;;  %v1975_v38 = vld [vmem:[%s2372_s12 + $0xb4] sm:$0xf0]  ;;  %v1719_v45 = vor.u32 %v1959_v43, %v1718_v30 }
  0xcf   : > { %1428 = vmatpush.bf16.msra.mxu1 %v1799_v36  ;;  %v1919_v48 = vor.u32 %v2009_v39, %v1918_v7  ;;  %v1846_v19 = vld [vmem:[%s2372_s12 + $0x130] sm:$0xf]  ;;  %v1991_v51 = vld [vmem:[%s2372_s12 + $0x134] sm:$0xf0]  ;;  %v1783_v31 = vor.u32 %v1975_v38, %v1782_v50  ;;  %v1710_v11 = vld [vmem:[%s2372_s12 + $0x20] sm:$0xf] }
  0xd0   : > { %1441 = vmatpush.bf16.msra.mxu2 %v1863_v12  ;;  %v1910_v56 = vld [vmem:[%s2372_s12 + $0x1b0] sm:$0xf]  ;;  %v2007_v4 = vld [vmem:[%s2372_s12 + $0x1b4] sm:$0xf0]  ;;  %v1847_v62 = vor.u32 %v1991_v51, %v1846_v19  ;;  %v1957_v54 = vld [vmem:[%s2372_s12 + $0x24] sm:$0xf0] }
  0xd1   : > { %1454 = vmatpush.bf16.msra.mxu3 %v1927_v60  ;;  %v1774_v26 = vld [vmem:[%s2372_s12 + $0xa0] sm:$0xf]  ;;  %v1911_v61 = vor.u32 %v2007_v4, %v1910_v56  ;;  %v1973_v5 = vld [vmem:[%s2372_s12 + $0xa4] sm:$0xf0]  ;;  %v1711_v35 = vor.u32 %v1957_v54, %v1710_v11  ;;  %v1702_v58 = vld [vmem:[%s2372_s12 + $0x10] sm:$0xf] }
  0xd2   : > { %1416 = vmatpush.bf16.msra.mxu0 %v1727_v40  ;;  %v1838_v47 = vld [vmem:[%s2372_s12 + $0x120] sm:$0xf]  ;;  %v1989_v55 = vld [vmem:[%s2372_s12 + $0x124] sm:$0xf0]  ;;  %v1775_v49 = vor.u32 %v1973_v5, %v1774_v26  ;;  %v1955_v59 = vld [vmem:[%s2372_s12 + $0x14] sm:$0xf0] }
  0xd3   : > { %1429 = vmatpush.bf16.msra.mxu1 %v1791_v2  ;;  %v1902_v28 = vld [vmem:[%s2372_s12 + $0x1a0] sm:$0xf]  ;;  %v2005_v57 = vld [vmem:[%s2372_s12 + $0x1a4] sm:$0xf0]  ;;  %v1839_v21 = vor.u32 %v1989_v55, %v1838_v47  ;;  %v1766_v6 = vld [vmem:[%s2372_s12 + $0x90] sm:$0xf]  ;;  %v1703_v42 = vor.u32 %v1955_v59, %v1702_v58 }
  0xd4   : > { %1442 = vmatpush.bf16.msra.mxu2 %v1855_v27  ;;  %v1903_v20 = vor.u32 %v2005_v57, %v1902_v28  ;;  %v1971_v15 = vld [vmem:[%s2372_s12 + $0x94] sm:$0xf0]  ;;  %v1830_v23 = vld [vmem:[%s2372_s12 + $0x110] sm:$0xf]  ;;  %v1694_v17 = vld [vmem:[%s2372_s12] sm:$0xf] }
  0xd5   : > { %1455 = vmatpush.bf16.msra.mxu3 %v1919_v48  ;;  %v1987_v9 = vld [vmem:[%s2372_s12 + $0x114] sm:$0xf0]  ;;  %v1894_v24 = vld [vmem:[%s2372_s12 + $0x190] sm:$0xf]  ;;  %v1953_v22 = vld [vmem:[%s2372_s12 + $0x4] sm:$0xf0]  ;;  %v1767_v44 = vor.u32 %v1971_v15, %v1766_v6 }
  0xd6   : > { %1417 = vmatpush.bf16.msra.mxu0 %v1719_v45  ;;  %v2003_v16 = vld [vmem:[%s2372_s12 + $0x194] sm:$0xf0]  ;;  %v1831_v18 = vor.u32 %v1987_v9, %v1830_v23  ;;  %v1758_v63 = vld [vmem:[%s2372_s12 + $0x80] sm:$0xf]  ;;  %v1969_v3 = vld [vmem:[%s2372_s12 + $0x84] sm:$0xf0]  ;;  %v1695_v34 = vor.u32 %v1953_v22, %v1694_v17 }
  0xd7   : > { %1430 = vmatpush.bf16.msra.mxu1 %v1783_v31  ;;  %v1822_v29 = vld [vmem:[%s2372_s12 + $0x100] sm:$0xf]  ;;  %v1895_v0 = vor.u32 %v2003_v16, %v1894_v24  ;;  %v1985_v1 = vld [vmem:[%s2372_s12 + $0x104] sm:$0xf0]  ;;  %v1966_v33 = vld [vmem:[%s2372_s12 + $0x74] sm:$0xf]  ;;  %v1759_v10 = vor.u32 %v1969_v3, %v1758_v63 }
  0xd8   : > { %1443 = vmatpush.bf16.msra.mxu2 %v1847_v62  ;;  %v1886_v37 = vld [vmem:[%s2372_s12 + $0x180] sm:$0xf]  ;;  %v2001_v52 = vld [vmem:[%s2372_s12 + $0x184] sm:$0xf0]  ;;  %v1752_v41 = vld [vmem:[%s2372_s12 + $0x78] sm:$0xf0]  ;;  %v1823_v53 = vor.u32 %v1985_v1, %v1822_v29 }
  0xd9   : > { %1456 = vmatpush.bf16.msra.mxu3 %v1911_v61  ;;  %v1982_v8 = vld [vmem:[%s2372_s12 + $0xf4] sm:$0xf]  ;;  %v1816_v46 = vld [vmem:[%s2372_s12 + $0xf8] sm:$0xf0]  ;;  %v1887_v25 = vor.u32 %v2001_v52, %v1886_v37  ;;  %v1755_v13 = vor.u32 %v1966_v33, %v1752_v41  ;;  %v1964_v7 = vld [vmem:[%s2372_s12 + $0x64] sm:$0xf] }
  0xda   : > { %1418 = vmatpush.bf16.msra.mxu0 %v1711_v35  ;;  %v1998_v36 = vld [vmem:[%s2372_s12 + $0x174] sm:$0xf]  ;;  %v1880_v12 = vld [vmem:[%s2372_s12 + $0x178] sm:$0xf0]  ;;  %v1744_v39 = vld [vmem:[%s2372_s12 + $0x68] sm:$0xf0]  ;;  %v1819_v2 = vor.u32 %v1982_v8, %v1816_v46 }
  0xdb   : > { %1431 = vmatpush.bf16.msra.mxu1 %v1775_v49  ;;  %v2014_v32 = vld [vmem:[%s2372_s12 + $0x1f4] sm:$0xf]  ;;  %v1944_v60 = vld [vmem:[%s2372_s12 + $0x1f8] sm:$0xf0]  ;;  %v1018_v40 = vld [vmem:[#allocation2 + $0x8] sm:$0xff]  ;;  %v1883_v27 = vor.u32 %v1998_v36, %v1880_v12  ;;  %v1747_v11 = vor.u32 %v1964_v7, %v1744_v39 }
  0xdc   : > { %1444 = vmatpush.bf16.msra.mxu2 %v1839_v21  ;;  %v1017_v14 = vld [vmem:[#allocation2 + $0x18] sm:$0xff]  ;;  %v1980_v30 = vld [vmem:[%s2372_s12 + $0xe4] sm:$0xf]  ;;  %v1015_v43 = vld [vmem:[#allocation2 + $0x10] sm:$0xff]  ;;  %v1947_v48 = vor.u32 %v2014_v32, %v1944_v60  ;;  %v2681_v31 = vpack.c.bf16 %v1018_v40, %v1018_v40 }
  0xdd   : > { %1457 = vmatpush.bf16.msra.mxu3 %v1903_v20  ;;  %v1016_v50 = vld [vmem:[#allocation2] sm:$0xff]  ;;  %v1808_v38 = vld [vmem:[%s2372_s12 + $0xe8] sm:$0xf0]  ;;  %v2677_v56 = vpack.c.bf16 %v1017_v14, %v1017_v14  ;;  %v2683_v62 = vpack.c.bf16 %v1015_v43, %v1015_v43  ;;  %v1962_v5 = vld [vmem:[%s2372_s12 + $0x54] sm:$0xf] }
  0xde   : > { %1419 = vmatpush.bf16.msra.mxu0 %v1703_v42  ;;  %v1996_v19 = vld [vmem:[%s2372_s12 + $0x164] sm:$0xf]  ;;  %v1872_v51 = vld [vmem:[%s2372_s12 + $0x168] sm:$0xf0]  ;;  %v2685_v54 = vpack.c.bf16 %v1016_v50, %v1016_v50  ;;  %v1811_v26 = vor.u32 %v1980_v30, %v1808_v38  ;;  %v1736_v47 = vld [vmem:[%s2372_s12 + $0x58] sm:$0xf0] }
  0xdf   : > { %1432 = vmatpush.bf16.msra.mxu1 %v1767_v44  ;;  %v2012_v4 = vld [vmem:[%s2372_s12 + $0x1e4] sm:$0xf]  ;;  %v1936_v45 = vld [vmem:[%s2372_s12 + $0x1e8] sm:$0xf0]  ;;  %v1875_v61 = vor.u32 %v1996_v19, %v1872_v51  ;;  %v1978_v55 = vld [vmem:[%s2372_s12 + $0xd4] sm:$0xf]  ;;  %v1739_v59 = vor.u32 %v1962_v5, %v1736_v47 }
  0xe0   : > { %1445 = vmatpush.bf16.msra.mxu2 %v1831_v18  ;;  %v1939_v28 = vor.u32 %v2012_v4, %v1936_v45  ;;  %v1800_v57 = vld [vmem:[%s2372_s12 + $0xd8] sm:$0xf0]  ;;  %v1994_v35 = vld [vmem:[%s2372_s12 + $0x154] sm:$0xf]  ;;  %v1960_v15 = vld [vmem:[%s2372_s12 + $0x44] sm:$0xf] }
  0xe1   : > { %1458 = vmatpush.bf16.msra.mxu3 %v1895_v0  ;;  %v1864_v49 = vld [vmem:[%s2372_s12 + $0x158] sm:$0xf0]  ;;  %v2010_v21 = vld [vmem:[%s2372_s12 + $0x1d4] sm:$0xf]  ;;  %v1803_v6 = vor.u32 %v1978_v55, %v1800_v57  ;;  %v1728_v23 = vld [vmem:[%s2372_s12 + $0x48] sm:$0xf0] }
  0xe2   : > { %1420 = vmatpush.bf16.msra.mxu0 %v1695_v34  ;;  %v1928_v58 = vld [vmem:[%s2372_s12 + $0x1d8] sm:$0xf0]  ;;  %v1867_v20 = vor.u32 %v1994_v35, %v1864_v49  ;;  %v1976_v9 = vld [vmem:[%s2372_s12 + $0xc4] sm:$0xf]  ;;  %v1792_v16 = vld [vmem:[%s2372_s12 + $0xc8] sm:$0xf0]  ;;  %v1731_v18 = vor.u32 %v1960_v15, %v1728_v23 }
  0xe3   : > { %1433 = vmatpush.bf16.msra.mxu1 %v1759_v10  ;;  %v1931_v24 = vor.u32 %v2010_v21, %v1928_v58  ;;  %v1992_v42 = vld [vmem:[%s2372_s12 + $0x144] sm:$0xf]  ;;  %v1856_v17 = vld [vmem:[%s2372_s12 + $0x148] sm:$0xf0]  ;;  %v1795_v63 = vor.u32 %v1976_v9, %v1792_v16  ;;  %v1958_v29 = vld [vmem:[%s2372_s12 + $0x34] sm:$0xf] }
  0xe4   : > { %1446 = vmatpush.bf16.msra.mxu2 %v1823_v53  ;;  %v2008_v22 = vld [vmem:[%s2372_s12 + $0x1c4] sm:$0xf]  ;;  %v1920_v44 = vld [vmem:[%s2372_s12 + $0x1c8] sm:$0xf0]  ;;  %v1859_v3 = vor.u32 %v1992_v42, %v1856_v17  ;;  %v1720_v0 = vld [vmem:[%s2372_s12 + $0x38] sm:$0xf0] }
  0xe5   : > { %1459 = vmatpush.bf16.msra.mxu3 %v1887_v25  ;;  %1421 = vmatmul.bf16.vlgmr.msra.gmra.mxu0 %v2683_v62  ;;  %v1974_v1 = vld [vmem:[%s2372_s12 + $0xb4] sm:$0xf]  ;;  %v1923_v37 = vor.u32 %v2008_v22, %v1920_v44  ;;  %v1784_v52 = vld [vmem:[%s2372_s12 + $0xb8] sm:$0xf0]  ;;  %v1723_v46 = vor.u32 %v1958_v29, %v1720_v0  ;;  %v1956_v10 = vld [vmem:[%s2372_s12 + $0x24] sm:$0xf] }
  0xe6   : > { %1465 = vmatpush.bf16.msrb.mxu0 %v1755_v13  ;;  %1434 = vmatmul.bf16.vlgmr.msra.gmra.mxu1 %v2685_v54  ;;  %v1990_v33 = vld [vmem:[%s2372_s12 + $0x134] sm:$0xf]  ;;  %v1848_v41 = vld [vmem:[%s2372_s12 + $0x138] sm:$0xf0]  ;;  %v1787_v36 = vor.u32 %v1974_v1, %v1784_v52  ;;  %v1712_v53 = vld [vmem:[%s2372_s12 + $0x28] sm:$0xf0] }
  0xe7   : > { %1478 = vmatpush.bf16.msrb.mxu1 %v1819_v2  ;;  %1447 = vmatmul.bf16.vlgmr.msra.gmra.mxu2 %v2677_v56  ;;  %v2006_v8 = vld [vmem:[%s2372_s12 + $0x1b4] sm:$0xf]  ;;  %v1912_v34 = vld [vmem:[%s2372_s12 + $0x1b8] sm:$0xf0]  ;;  %v1851_v12 = vor.u32 %v1990_v33, %v1848_v41  ;;  %v1972_v32 = vld [vmem:[%s2372_s12 + $0xa4] sm:$0xf]  ;;  %v1715_v40 = vor.u32 %v1956_v10, %v1712_v53 }
  0xe8   : > { %1491 = vmatpush.bf16.msrb.mxu2 %v1883_v27  ;;  %1460 = vmatmul.bf16.vlgmr.msra.gmra.mxu3 %v2681_v31  ;;  %v1915_v60 = vor.u32 %v2006_v8, %v1912_v34  ;;  %v1776_v14 = vld [vmem:[%s2372_s12 + $0xa8] sm:$0xf0]  ;;  %v1988_v25 = vld [vmem:[%s2372_s12 + $0x124] sm:$0xf]  ;;  %v1954_v30 = vld [vmem:[%s2372_s12 + $0x14] sm:$0xf] }
  0xe9   : > { %1504 = vmatpush.bf16.msrb.mxu3 %v1947_v48  ;;  %v1840_v13 = vld [vmem:[%s2372_s12 + $0x128] sm:$0xf0]  ;;  %v2004_v7 = vld [vmem:[%s2372_s12 + $0x1a4] sm:$0xf]  ;;  %v1779_v2 = vor.u32 %v1972_v32, %v1776_v14  ;;  %v1704_v43 = vld [vmem:[%s2372_s12 + $0x18] sm:$0xf0] }
  0xea   : > { %1466 = vmatpush.bf16.msrb.mxu0 %v1747_v11  ;;  %v1904_v39 = vld [vmem:[%s2372_s12 + $0x1a8] sm:$0xf0]  ;;  %v1843_v27 = vor.u32 %v1988_v25, %v1840_v13  ;;  %v1970_v50 = vld [vmem:[%s2372_s12 + $0x94] sm:$0xf]  ;;  %v1768_v38 = vld [vmem:[%s2372_s12 + $0x98] sm:$0xf0]  ;;  %v1707_v11 = vor.u32 %v1954_v30, %v1704_v43 }
  0xeb   : > { %1479 = vmatpush.bf16.msrb.mxu1 %v1811_v26  ;;  %v1907_v48 = vor.u32 %v2004_v7, %v1904_v39  ;;  %v1986_v19 = vld [vmem:[%s2372_s12 + $0x114] sm:$0xf]  ;;  %v1832_v51 = vld [vmem:[%s2372_s12 + $0x118] sm:$0xf0]  ;;  %v1771_v26 = vor.u32 %v1970_v50, %v1768_v38  ;;  %v1952_v5 = vld [vmem:[%s2372_s12 + $0x4] sm:$0xf] }
  0xec   : > { %1492 = vmatpush.bf16.msrb.mxu2 %v1875_v61  ;;  %v2002_v4 = vld [vmem:[%s2372_s12 + $0x194] sm:$0xf]  ;;  %v1896_v45 = vld [vmem:[%s2372_s12 + $0x198] sm:$0xf0]  ;;  %v1835_v61 = vor.u32 %v1986_v19, %v1832_v51  ;;  %v1696_v47 = vld [vmem:[%s2372_s12 + $0x8] sm:$0xf0] }
  0xed   : > { %1505 = vmatpush.bf16.msrb.mxu3 %v1939_v28  ;;  %v1968_v55 = vld [vmem:[%s2372_s12 + $0x84] sm:$0xf]  ;;  %v1899_v28 = vor.u32 %v2002_v4, %v1896_v45  ;;  %v1760_v57 = vld [vmem:[%s2372_s12 + $0x88] sm:$0xf0] }
  0xee   : > { %1467 = vmatpush.bf16.msrb.mxu0 %v1739_v59  ;;  %v1984_v35 = vld [vmem:[%s2372_s12 + $0x104] sm:$0xf]  ;;  %v1824_v49 = vld [vmem:[%s2372_s12 + $0x108] sm:$0xf0]  ;;  %v1699_v59 = vor.u32 %v1952_v5, %v1696_v47 }
  0xef   : > { %1480 = vmatpush.bf16.msrb.mxu1 %v1803_v6  ;;  %v2000_v21 = vld [vmem:[%s2372_s12 + $0x184] sm:$0xf]  ;;  %v1888_v58 = vld [vmem:[%s2372_s12 + $0x188] sm:$0xf0]  ;;  %v1763_v6 = vor.u32 %v1968_v55, %v1760_v57 }
  0xf0   : > { %1493 = vmatpush.bf16.msrb.mxu2 %v1867_v20  ;;  %v1827_v20 = vor.u32 %v1984_v35, %v1824_v49  ;;  %v1891_v15 = vor.u32 %v2000_v21, %v1888_v58 }
  0xf1   : > { %1506 = vmatpush.bf16.msrb.mxu3 %v1931_v24 }
  0xf2   : > { %1468 = vmatpush.bf16.msrb.mxu0 %v1731_v18  ;;  %v1087_v18 = vld [vmem:[%s564_s18] sm:$0x3] }
  0xf3   : > { %1481 = vmatpush.bf16.msrb.mxu1 %v1795_v63 }
  0xf4   : > { %1494 = vmatpush.bf16.msrb.mxu2 %v1859_v3 }
  0xf5   : > { %1507 = vmatpush.bf16.msrb.mxu3 %v1923_v37 }
  0xf6   : > { %1469 = vmatpush.bf16.msrb.mxu0 %v1723_v46 }
  0xf7   : > { %1482 = vmatpush.bf16.msrb.mxu1 %v1787_v36 }
  0xf8   : > { %1495 = vmatpush.bf16.msrb.mxu2 %v1851_v12 }
  0xf9   : > { %1508 = vmatpush.bf16.msrb.mxu3 %v1915_v60 }
  0xfa   : > { %1470 = vmatpush.bf16.msrb.mxu0 %v1715_v40 }
  0xfb   : > { %1483 = vmatpush.bf16.msrb.mxu1 %v1779_v2 }
  0xfc   : > { %1496 = vmatpush.bf16.msrb.mxu2 %v1843_v27 }
  0xfd   : > { %1509 = vmatpush.bf16.msrb.mxu3 %v1907_v48 }
  0xfe   : > { %1471 = vmatpush.bf16.msrb.mxu0 %v1707_v11 }
  0xff   : > { %1484 = vmatpush.bf16.msrb.mxu1 %v1771_v26 }
 0x100   : > { %1497 = vmatpush.bf16.msrb.mxu2 %v1835_v61 }
 0x101   : > { %1510 = vmatpush.bf16.msrb.mxu3 %v1899_v28 }
 0x102   : > { %1472 = vmatpush.bf16.msrb.mxu0 %v1699_v59 }
 0x103   : > { %1485 = vmatpush.bf16.msrb.mxu1 %v1763_v6 }
 0x104   : > { %1498 = vmatpush.bf16.msrb.mxu2 %v1827_v20 }
 0x105   : > { %1511 = vmatpush.bf16.msrb.mxu3 %v1891_v15  ;;  %1473 = vmatmul.bf16.vlgmr.msrb.gmra.mxu0 %v2683_v62  ;;  %v1089_v62 = vperm.slane %v1087_v18, 0 }
 0x106   : > { %1486 = vmatmul.bf16.vlgmr.msrb.gmra.mxu1 %v2685_v54  ;;  %v1090_v54 = vperm.slane %v1087_v18, 1 }
 0x107   : > { %1499 = vmatmul.bf16.vlgmr.msrb.gmra.mxu2 %v2677_v56 }
 0x108   : > { %1512 = vmatmul.bf16.vlgmr.msrb.gmra.mxu3 %v2681_v31 }
 0x162   : > { %v1422_v23 = vpop.f32.mrf.mxu0 }
 0x163   : > { %v1435_v9 = vpop.f32.mrf.mxu1  ;;  %v1423_v63 = vadd.f32 %v1422_v23, %v1089_v62 }
 0x165   : > { %v1436_v3 = vadd.f32 %v1435_v9, %v1423_v63 }
 0x16a   : > { %v1448_v24 = vpop.f32.mrf.mxu2  ;;  %v1424_v42 = vpop.f32.mrf.mxu0 }
 0x16b   : > { %v1461_v16 = vpop.f32.mrf.mxu3  ;;  %v1437_v17 = vpop.f32.mrf.mxu1  ;;  %v1449_v0 = vadd.f32 %v1448_v24, %v1436_v3 }
 0x16d   : > { %v1462_v52 = vadd.f32 %v1461_v16, %v1449_v0 }
 0x16f   : > { %v1517_v36 = vmax.f32 %v1462_v52, 0.0 }
 0x172   : > { %v1450_v22 = vpop.f32.mrf.mxu2 }
 0x173   : > { %v1463_v44 = vpop.f32.mrf.mxu3 }
 0x182   : > { %v1474_v56 = vpop.f32.mrf.mxu0 }
 0x183   : > { %v1475_v31 = vadd.f32 %v1474_v56, %v1090_v54  ;;  %v1487_v29 = vpop.f32.mrf.mxu1 }
 0x185   : > { %v1488_v1 = vadd.f32 %v1487_v29, %v1475_v31 }
 0x18a   : > { %v1500_v37 = vpop.f32.mrf.mxu2  ;;  %v1476_v8 = vpop.f32.mrf.mxu0 }
 0x18b   : > { %v1501_v33 = vadd.f32 %v1500_v37, %v1488_v1  ;;  %v1513_v41 = vpop.f32.mrf.mxu3  ;;  %v1489_v34 = vpop.f32.mrf.mxu1 }
 0x18d   : > { %v1514_v46 = vadd.f32 %v1513_v41, %v1501_v33 }
 0x18f   : > { %v1518_v12 = vmax.f32 %v1514_v46, 0.0 }
 0x191   : > { %v1519_v10 = vpack.c.bf16 %v1518_v12, %v1517_v36 }
 0x192   : > { %v1502_v53 = vpop.f32.mrf.mxu2 }
 0x193   : > { %1520 = vst [vmem:[%s2370_s11] sm:$0xff] %v1519_v10  ;;  %v1515_v32 = vpop.f32.mrf.mxu3 }
 0x194 PF: > { %s15_s24 = sadd.s32 1, %s2127_s24   ;;  %s2781_s18 = smov %s2107_s19 }
 0x195   : > { %p12_p13 = scmp.ge.s32.totalorder %s15_s24, 6   ;;  %s2782_s19 = smov %s2209_s29 }
 0x196   : > { %s2783_s20 = smov %s2119_s22  ;;  %s2784_s21 = smov %s2123_s23 }
 0x197   : > { %s2785_s22 = smov %s2788_s25  ;;  %s2786_s23 = smov %s2792_s26 }
 0x198   :  { %14 = sbr.rel (!%p12_p13) target bundleno = 4 (0x4), region = 135 }

</bundles_post_ra>
